<compile_context>
chip_gen: v5e
topology: v5e:2x2
jax: 0.10.0
libtpu: 0.0.40
codegen_flags: <defaults>
</compile_context>

<pallas_src>
import functools
import math

import jax
import jax.numpy as jnp
from jax.experimental import pallas as pl
from jax.experimental.pallas import tpu as pltpu


# ------------------------------------------------------------------ fused kernel

def _fused_forward_kernel(
    # per-batch activations, channels-first (C, L)
    p1_ref, pos_ref, p4_ref,
    # weights: embedding matrices + packed slabs
    w_pp_ref, w_p4_ref, wslab_ref, w2slab_ref, bias_ref,
    # outputs, channels-first (C, L)
    p1_out_ref, p4_out_ref,
    *, num_heads, depth, c4_norm, eps, w_off, b_off, w2_off):

    E = w_pp_ref.shape[0]
    H = num_heads
    Dh = E // H
    scale = 1.0 / math.sqrt(Dh)
    bf16 = jnp.bfloat16

    def wsl(name):                       # bf16 (rows, E) weight slab slice
        off, rows = w_off[name]
        return wslab_ref[off:off + rows, :]

    def w2sl(name):                      # bf16 (rows, 2E) MLP-out slab slice
        off, rows = w2_off[name]
        return w2slab_ref[off:off + rows, :]

    def bsl(name):                       # f32 (rows, 1) bias column slice
        off, rows = b_off[name]
        return bias_ref[off:off + rows, :]

    def mm(w_bf, x):
        # (out, in) @ (in, L) -> (out, L); bf16 operands, f32 accumulation.
        return jax.lax.dot_general(
            w_bf, x.astype(bf16), (((1,), (0,)), ((), ())),
            preferred_element_type=jnp.float32)

    def attn_heads(q, k, v):
        # Channels-first q:(E,Lq), k,v:(E,Lk).  Per-head softmax attention:
        # scores contract the head dim of BOTH operands (no explicit .T);
        # per-head contexts (Dh,Lq) stack along sublanes (no lane concat).
        qs = q * scale                                    # f32
        ctxs = []
        for h in range(H):
            sl = slice(h * Dh, (h + 1) * Dh)
            qh = qs[sl].astype(bf16)                      # (Dh, Lq)
            kh = k[sl].astype(bf16)                       # (Dh, Lk)
            vh = v[sl].astype(bf16)                       # (Dh, Lk)
            s = jax.lax.dot_general(qh, kh, (((0,), (0,)), ((), ())),
                                    preferred_element_type=jnp.float32)   # (Lq, Lk)
            s = s - jnp.max(s, axis=-1, keepdims=True)    # softmax kept in f32 (v5e)
            p = jnp.exp(s)
            p = p * pl.reciprocal(jnp.sum(p, axis=-1, keepdims=True),
                                  approx=True)            # EUP; approx=False for bit parity
            ctx = jax.lax.dot_general(vh, p.astype(bf16), (((1,), (1,)), ((), ())),
                                      preferred_element_type=jnp.float32)  # (Dh, Lq)
            ctxs.append(ctx)
        return jnp.concatenate(ctxs, axis=0)              # (E, Lq) f32, sublane-aligned

    def mha(x_q, x_kv, w_in, b_in, w_out, b_out, fused_qkv):
        # nn.MultiheadAttention(batch_first=True), eval; key == value input.
        if fused_qkv:                                     # self-attn: one (3E,E) matmul
            qkv = mm(w_in, x_q) + b_in                    # (3E, L)
            q, k, v = qkv[:E], qkv[E:2 * E], qkv[2 * E:]
        else:                                             # cross-attn: Q + fused K|V
            q = mm(w_in[:E], x_q) + b_in[:E]              # (E, Lq)
            kv = mm(w_in[E:], x_kv) + b_in[E:]            # (2E, Lk)
            k, v = kv[:E], kv[E:]
        return mm(w_out, attn_heads(q, k, v)) + b_out     # (E, Lq)

    def rmsnorm(x):
        # SimpleRMSNorm(c4): per-token (column) L2 norm scaled by c4**-0.5.
        # TODO(synk): confirm exact SimpleRMSNorm definition / eps.
        nrm = jnp.sqrt(jnp.sum(x * x, axis=0, keepdims=True)) * (c4_norm ** -0.5)
        return x * pl.reciprocal(nrm + eps, approx=True)   # divide on the EUP

    # ----- embeddings: pos-embed add fused, channels-first, no transposes -----
    x1 = p1_ref[0] + pos_ref[0]                            # (c1, L1)
    x4 = p4_ref[0]                                         # (c4, L4)
    p1_emb = mm(w_pp_ref[...], x1) + bsl("b_pp")           # (E, L1)
    p4_emb = mm(w_p4_ref[...], x4) + bsl("b_p4")           # (E, L4)

    # hoist loop-invariant weight loads out of the depth loop
    sa_wi, sa_wo, sa_bi, sa_bo = wsl("sa_in"), wsl("sa_out"), bsl("sa_in"), bsl("sa_out")
    c41_wi, c41_wo, c41_bi, c41_bo = (wsl("c41_in"), wsl("c41_out"),
                                      bsl("c41_in"), bsl("c41_out"))
    c14_wi, c14_wo, c14_bi, c14_bo = (wsl("c14_in"), wsl("c14_out"),
                                      bsl("c14_in"), bsl("c14_out"))

    def layer(carry):
        p1_e, p4_e = carry
        p1_n = rmsnorm(p1_e)
        p1_self = mha(p1_n, p1_n, sa_wi, sa_bi, sa_wo, sa_bo, fused_qkv=True) + p1_e
        p1_to_p4 = mha(p1_self, p4_e, c41_wi, c41_bi, c41_wo, c41_bo, fused_qkv=False)
        p4_to_p1 = mha(p4_e, p1_to_p4, c14_wi, c14_bi, c14_wo, c14_bo, fused_qkv=False)
        return (p1_to_p4, p4_to_p1)

    carry = (p1_emb, p4_emb)
    if depth <= 4:                       # small depth: unroll for LLO scheduling
        for _ in range(depth):
            carry = layer(carry)
    else:                                # deep: bound vreg live ranges
        carry = jax.lax.fori_loop(0, depth, lambda _, c: layer(c), carry)
    p1_emb, p4_emb = carry

    # ----- output MLPs: Linear -> Linear -> LeakyReLU (Dropout = identity) -----
    y1 = mm(w2sl("m1_w2"), mm(wsl("m1_w1"), p1_emb) + bsl("m1_b1")) + bsl("m1_b2")  # (c1, L1)
    y1 = jnp.where(y1 >= 0, y1, 0.01 * y1)
    y4 = mm(w2sl("m4_w2"), mm(wsl("m4_w1"), p4_emb) + bsl("m4_b1")) + bsl("m4_b2")  # (c4, L4)
    y4 = jnp.where(y4 >= 0, y4, 0.01 * y4)

    # Channels-first stores (L lane-dense); wrapper reshape to NCHW is pure.
    p1_out_ref[0] = y1.astype(p1_out_ref.dtype)
    p4_out_ref[0] = y4.astype(p4_out_ref.dtype)


# ------------------------------------------------------------------ wrapper

def bidirectional_attention_forward(P1, P4, pos_embed, params, *,
                                    num_heads, depth, c4_norm, eps=1e-6):
    b, c1, h1, w1 = P1.shape
    _, c4, h4, w4 = P4.shape
    L1, L4 = h1 * w1, h4 * w4
    bf16 = jnp.bfloat16

    # Pure reshapes only (NCHW -> (B, C, L)); activations stay channels-first.
    p1_flat = P1.reshape(b, c1, L1)
    pos_flat = jnp.broadcast_to(pos_embed.reshape(-1, c1, L1), (b, c1, L1))
    p4_flat = P4.reshape(b, c4, L4)

    sa, c41, c14 = params["self_attn"], params["cross_p4_to_p1"], params["cross_p1_to_p4"]
    m1, m4 = params["mlp1"], params["mlp4"]

    # Embedding matrices (PyTorch layout (out, in)), cast to bf16 once.
    w_pp = params["patch_pos_embed"]["w"].astype(bf16)     # (E, c1)
    w_p4 = params["p4_embed"]["w"].astype(bf16)            # (E, c4)

    def pack_rows(parts, dtype):
        offs, mats, off = {}, [], 0
        for name, m in parts:
            offs[name] = (off, int(m.shape[0]))
            off += int(m.shape[0])
            mats.append(m)
        return offs, jnp.concatenate(mats, axis=0).astype(dtype)

    # Slab of all weight matrices whose input dim is E (rows stacked).
    w_off, wslab = pack_rows(
        [("sa_in", sa["w_in"]), ("sa_out", sa["w_out"]),
         ("c41_in", c41["w_in"]), ("c41_out", c41["w_out"]),
         ("c14_in", c14["w_in"]), ("c14_out", c14["w_out"]),
         ("m1_w1", m1["w1"]), ("m4_w1", m4["w1"])], bf16)   # (16E, E) bf16

    # Slab of the two MLP output matrices (input dim 2E).
    w2_off, w2slab = pack_rows(
        [("m1_w2", m1["w2"]), ("m4_w2", m4["w2"])], bf16)   # (c1+c4, 2E) bf16

    # All biases packed into one f32 column slab (out_features, 1).
    def col(v):
        return v.reshape(-1, 1)
    b_off, bias = pack_rows(
        [("b_pp", col(params["patch_pos_embed"]["b"])), ("b_p4", col(params["p4_embed"]["b"])),
         ("sa_in", col(sa["b_in"])), ("sa_out", col(sa["b_out"])),
         ("c41_in", col(c41["b_in"])), ("c41_out", col(c41["b_out"])),
         ("c14_in", col(c14["b_in"])), ("c14_out", col(c14["b_out"])),
         ("m1_b1", col(m1["b1"])), ("m4_b1", col(m4["b1"])),
         ("m1_b2", col(m1["b2"])), ("m4_b2", col(m4["b2"]))], jnp.float32)

    kern = functools.partial(_fused_forward_kernel, num_heads=num_heads, depth=depth,
                             c4_norm=float(c4_norm), eps=eps,
                             w_off=w_off, b_off=b_off, w2_off=w2_off)

    act_spec = lambda C, L: pl.BlockSpec((1, C, L), lambda i: (i, 0, 0))
    full = lambda a: pl.BlockSpec(a.shape, lambda i, nd=a.ndim: (0,) * nd)

    p1_out, p4_out = pl.pallas_call(
        kern,
        out_shape=(jax.ShapeDtypeStruct((b, c1, L1), jnp.float32),
                   jax.ShapeDtypeStruct((b, c4, L4), jnp.float32)),
        grid=(b,),
        in_specs=[act_spec(c1, L1), act_spec(c1, L1), act_spec(c4, L4),
                  full(w_pp), full(w_p4), full(wslab), full(w2slab), full(bias)],
        out_specs=(pl.BlockSpec((1, c1, L1), lambda i: (i, 0, 0)),
                   pl.BlockSpec((1, c4, L4), lambda i: (i, 0, 0))),
        compiler_params=pltpu.CompilerParams(
            dimension_semantics=("parallel",),
            # Explicit budget (safe on v5e/v6e/v7x at these shapes).  Re-derive
            # and token-tile the attention (emit_pipeline) for production E/L.
            vmem_limit_bytes=48 * 1024 * 1024),
    )(p1_flat, pos_flat, p4_flat, w_pp, w_p4, wslab, w2slab, bias)

    return (p1_out.reshape(b, c1, h1, w1), p4_out.reshape(b, c4, h4, w4))


# ------------------------------------------------------------------ deterministic params
# Weights stored in PyTorch layout: Linear.weight = (out_features, in_features);
# MHA in_proj_weight = (3E, E) with row order [Wq; Wk; Wv] — no transposes needed
# when importing a real checkpoint.

def init_params(key, c1, c4, embed_dim):
    E = embed_dim
    keys = iter(jax.random.split(key, 32))

    def w(shape, scale=0.05):
        return scale * jax.random.normal(next(keys), shape, jnp.float32)

    def mha_params():
        return dict(w_in=w((3 * E, E)), b_in=w((3 * E,)),
                    w_out=w((E, E)), b_out=w((E,)))

    return dict(
        patch_pos_embed=dict(w=w((E, c1)), b=w((E,))),
        p4_embed=dict(w=w((E, c4)), b=w((E,))),
        self_attn=mha_params(),
        cross_p4_to_p1=mha_params(),
        cross_p1_to_p4=mha_params(),
        mlp1=dict(w1=w((2 * E, E)), b1=w((2 * E,)), w2=w((c1, 2 * E)), b2=w((c1,))),
        mlp4=dict(w1=w((2 * E, E)), b1=w((2 * E,)), w2=w((c4, 2 * E)), b2=w((c4,))),
    )


# ------------------------------------------------------------------ main

if __name__ == "__main__":
    # Small deterministic configuration.
    b, c1, c4 = 2, 8, 16
    h1 = w1 = 8          # L1 = 64
    h4 = w4 = 4          # L4 = 16
    embed_dim, num_heads, depth = 32, 4, 2

    root = jax.random.PRNGKey(0)
    k_p1, k_p4, k_pos, k_par = jax.random.split(root, 4)

    P1 = jax.random.normal(k_p1, (b, c1, h1, w1), jnp.float32)
    P4 = jax.random.normal(k_p4, (b, c4, h4, w4), jnp.float32)
    pos_embed = jax.random.normal(k_pos, (b, c1, h1, w1), jnp.float32)

    params = init_params(k_par, c1, c4, embed_dim)

    fwd = jax.jit(functools.partial(bidirectional_attention_forward,
                                    num_heads=num_heads, depth=depth, c4_norm=c4))
    P1_out, P4_out = fwd(P1, P4, pos_embed, params)
    jax.block_until_ready((P1_out, P4_out))

    assert P1_out.shape == (b, c1, h1, w1), P1_out.shape
    assert P4_out.shape == (b, c4, h4, w4), P4_out.shape
    assert bool(jnp.isfinite(P1_out).all()) and bool(jnp.isfinite(P4_out).all())
    print("KERNEL_OK")
</pallas_src>

<mosaic_0001>
module attributes {stable_mosaic.version = 11 : i64} {
  func.func @_fused_forward_kernel(%arg0: i32, %arg1: memref<1x8x64xf32, #tpu.memory_space<vmem>>, %arg2: memref<1x8x64xf32, #tpu.memory_space<vmem>>, %arg3: memref<1x16x16xf32, #tpu.memory_space<vmem>>, %arg4: memref<32x8xbf16, #tpu.memory_space<vmem>>, %arg5: memref<32x16xbf16, #tpu.memory_space<vmem>>, %arg6: memref<512x32xbf16, #tpu.memory_space<vmem>>, %arg7: memref<24x64xbf16, #tpu.memory_space<vmem>>, %arg8: memref<600x1xf32, #tpu.memory_space<vmem>>, %arg9: memref<1x8x64xf32, #tpu.memory_space<vmem>>, %arg10: memref<1x16x16xf32, #tpu.memory_space<vmem>>) attributes {dimension_semantics = [#tpu.dimension_semantics<parallel>], iteration_bounds = array<i64: 2>, scalar_prefetch = 0 : i64, scratch_operands = 0 : i64, tpu.core_type = #tpu.core_type<tc>, window_params = [{transform_indices = @transform_0, window_bounds = array<i64: 1, 8, 64>}, {transform_indices = @transform_1, window_bounds = array<i64: 1, 8, 64>}, {transform_indices = @transform_2, window_bounds = array<i64: 1, 16, 16>}, {pipeline_mode = #tpu.pipeline_mode<synchronous>, transform_indices = @transform_3, window_bounds = array<i64: 32, 8>}, {pipeline_mode = #tpu.pipeline_mode<synchronous>, transform_indices = @transform_4, window_bounds = array<i64: 32, 16>}, {pipeline_mode = #tpu.pipeline_mode<synchronous>, transform_indices = @transform_5, window_bounds = array<i64: 512, 32>}, {pipeline_mode = #tpu.pipeline_mode<synchronous>, transform_indices = @transform_6, window_bounds = array<i64: 24, 64>}, {pipeline_mode = #tpu.pipeline_mode<synchronous>, transform_indices = @transform_7, window_bounds = array<i64: 600, 1>}, {transform_indices = @transform_8, window_bounds = array<i64: 1, 8, 64>}, {transform_indices = @transform_9, window_bounds = array<i64: 1, 16, 16>}]} {
    %c0 = arith.constant 0 : index
    %c0_0 = arith.constant 0 : index
    %c0_1 = arith.constant 0 : index
    %0 = vector.load %arg1[%c0, %c0_0, %c0_1] : memref<1x8x64xf32, #tpu.memory_space<vmem>>, vector<1x8x64xf32>
    %1 = vector.shape_cast %0 : vector<1x8x64xf32> to vector<8x64xf32>
    %c0_2 = arith.constant 0 : index
    %c0_3 = arith.constant 0 : index
    %c0_4 = arith.constant 0 : index
    %2 = vector.load %arg2[%c0_2, %c0_3, %c0_4] : memref<1x8x64xf32, #tpu.memory_space<vmem>>, vector<1x8x64xf32>
    %3 = vector.shape_cast %2 : vector<1x8x64xf32> to vector<8x64xf32>
    %4 = arith.addf %1, %3 : vector<8x64xf32>
    %c0_5 = arith.constant 0 : index
    %c0_6 = arith.constant 0 : index
    %c0_7 = arith.constant 0 : index
    %5 = vector.load %arg3[%c0_5, %c0_6, %c0_7] : memref<1x16x16xf32, #tpu.memory_space<vmem>>, vector<1x16x16xf32>
    %6 = vector.shape_cast %5 : vector<1x16x16xf32> to vector<16x16xf32>
    %c0_8 = arith.constant 0 : index
    %c0_9 = arith.constant 0 : index
    %7 = vector.load %arg4[%c0_8, %c0_9] : memref<32x8xbf16, #tpu.memory_space<vmem>>, vector<32x8xbf16>
    %8 = arith.truncf %4 : vector<8x64xf32> to vector<8x64xbf16>
    %cst = arith.constant dense<0.000000e+00> : vector<32x64xf32>
    %9 = tpu.matmul %7, %8, %cst {dimension_numbers = #tpu.dot_dimension_numbers<[1], [0], [0], [1], [0, 0, 1, 1], [], []>} : vector<32x8xbf16>, vector<8x64xbf16>, vector<32x64xf32> -> vector<32x64xf32>
    %c0_10 = arith.constant 0 : index
    %c0_11 = arith.constant 0 : index
    %10 = vector.load %arg8[%c0_10, %c0_11] : memref<600x1xf32, #tpu.memory_space<vmem>>, vector<32x1xf32>
    %11 = vector.broadcast %10 : vector<32x1xf32> to vector<32x64xf32>
    %12 = arith.addf %9, %11 : vector<32x64xf32>
    %c0_12 = arith.constant 0 : index
    %c0_13 = arith.constant 0 : index
    %13 = vector.load %arg5[%c0_12, %c0_13] : memref<32x16xbf16, #tpu.memory_space<vmem>>, vector<32x16xbf16>
    %14 = arith.truncf %6 : vector<16x16xf32> to vector<16x16xbf16>
    %cst_14 = arith.constant dense<0.000000e+00> : vector<32x16xf32>
    %15 = tpu.matmul %13, %14, %cst_14 {dimension_numbers = #tpu.dot_dimension_numbers<[1], [0], [0], [1], [0, 0, 1, 1], [], []>} : vector<32x16xbf16>, vector<16x16xbf16>, vector<32x16xf32> -> vector<32x16xf32>
    %c32 = arith.constant 32 : index
    %c0_15 = arith.constant 0 : index
    %16 = vector.load %arg8[%c32, %c0_15] : memref<600x1xf32, #tpu.memory_space<vmem>>, vector<32x1xf32>
    %17 = vector.broadcast %16 : vector<32x1xf32> to vector<32x16xf32>
    %18 = arith.addf %15, %17 : vector<32x16xf32>
    %c0_16 = arith.constant 0 : index
    %c0_17 = arith.constant 0 : index
    %19 = vector.load %arg6[%c0_16, %c0_17] : memref<512x32xbf16, #tpu.memory_space<vmem>>, vector<96x32xbf16>
    %c96 = arith.constant 96 : index
    %c0_18 = arith.constant 0 : index
    %20 = vector.load %arg6[%c96, %c0_18] : memref<512x32xbf16, #tpu.memory_space<vmem>>, vector<32x32xbf16>
    %c64 = arith.constant 64 : index
    %c0_19 = arith.constant 0 : index
    %21 = vector.load %arg8[%c64, %c0_19] : memref<600x1xf32, #tpu.memory_space<vmem>>, vector<96x1xf32>
    %c160 = arith.constant 160 : index
    %c0_20 = arith.constant 0 : index
    %22 = vector.load %arg8[%c160, %c0_20] : memref<600x1xf32, #tpu.memory_space<vmem>>, vector<32x1xf32>
    %c128 = arith.constant 128 : index
    %c0_21 = arith.constant 0 : index
    %23 = vector.load %arg6[%c128, %c0_21] : memref<512x32xbf16, #tpu.memory_space<vmem>>, vector<96x32xbf16>
    %c224 = arith.constant 224 : index
    %c0_22 = arith.constant 0 : index
    %24 = vector.load %arg6[%c224, %c0_22] : memref<512x32xbf16, #tpu.memory_space<vmem>>, vector<32x32xbf16>
    %c192 = arith.constant 192 : index
    %c0_23 = arith.constant 0 : index
    %25 = vector.load %arg8[%c192, %c0_23] : memref<600x1xf32, #tpu.memory_space<vmem>>, vector<96x1xf32>
    %c288 = arith.constant 288 : index
    %c0_24 = arith.constant 0 : index
    %26 = vector.load %arg8[%c288, %c0_24] : memref<600x1xf32, #tpu.memory_space<vmem>>, vector<32x1xf32>
    %c256 = arith.constant 256 : index
    %c0_25 = arith.constant 0 : index
    %27 = vector.load %arg6[%c256, %c0_25] : memref<512x32xbf16, #tpu.memory_space<vmem>>, vector<96x32xbf16>
    %c352 = arith.constant 352 : index
    %c0_26 = arith.constant 0 : index
    %28 = vector.load %arg6[%c352, %c0_26] : memref<512x32xbf16, #tpu.memory_space<vmem>>, vector<32x32xbf16>
    %c320 = arith.constant 320 : index
    %c0_27 = arith.constant 0 : index
    %29 = vector.load %arg8[%c320, %c0_27] : memref<600x1xf32, #tpu.memory_space<vmem>>, vector<96x1xf32>
    %c416 = arith.constant 416 : index
    %c0_28 = arith.constant 0 : index
    %30 = vector.load %arg8[%c416, %c0_28] : memref<600x1xf32, #tpu.memory_space<vmem>>, vector<32x1xf32>
    %31 = arith.mulf %12, %12 : vector<32x64xf32>
    %cst_29 = arith.constant dense<0.000000e+00> : vector<64xf32>
    %32 = vector.multi_reduction <add>, %31, %cst_29 [0] : vector<32x64xf32> to vector<64xf32>
    %33 = vector.shape_cast %32 : vector<64xf32> to vector<1x64xf32>
    %34 = math.sqrt %33 : vector<1x64xf32>
    %cst_30 = arith.constant 2.500000e-01 : f32
    %35 = vector.broadcast %cst_30 : f32 to vector<1x64xf32>
    %36 = arith.mulf %34, %35 : vector<1x64xf32>
    %cst_31 = arith.constant 9.99999997E-7 : f32
    %37 = vector.broadcast %cst_31 : f32 to vector<1x64xf32>
    %38 = arith.addf %36, %37 : vector<1x64xf32>
    %39 = tpu.reciprocal %38 {approx = true} : vector<1x64xf32> -> vector<1x64xf32>
    %40 = vector.broadcast %39 : vector<1x64xf32> to vector<32x64xf32>
    %41 = arith.mulf %12, %40 : vector<32x64xf32>
    %42 = arith.truncf %41 : vector<32x64xf32> to vector<32x64xbf16>
    %cst_32 = arith.constant dense<0.000000e+00> : vector<96x64xf32>
    %43 = tpu.matmul %19, %42, %cst_32 {dimension_numbers = #tpu.dot_dimension_numbers<[1], [0], [0], [1], [0, 0, 1, 1], [], []>} : vector<96x32xbf16>, vector<32x64xbf16>, vector<96x64xf32> -> vector<96x64xf32>
    %44 = vector.broadcast %21 : vector<96x1xf32> to vector<96x64xf32>
    %45 = arith.addf %43, %44 : vector<96x64xf32>
    %46 = vector.extract_strided_slice %45 {offsets = [0, 0], sizes = [32, 64], strides = [1, 1]} : vector<96x64xf32> to vector<32x64xf32>
    %47 = vector.extract_strided_slice %45 {offsets = [32, 0], sizes = [32, 64], strides = [1, 1]} : vector<96x64xf32> to vector<32x64xf32>
    %48 = vector.extract_strided_slice %45 {offsets = [64, 0], sizes = [32, 64], strides = [1, 1]} : vector<96x64xf32> to vector<32x64xf32>
    %cst_33 = arith.constant 0.353553385 : f32
    %49 = vector.broadcast %cst_33 : f32 to vector<32x64xf32>
    %50 = arith.mulf %46, %49 : vector<32x64xf32>
    %51 = vector.extract_strided_slice %50 {offsets = [0, 0], sizes = [8, 64], strides = [1, 1]} : vector<32x64xf32> to vector<8x64xf32>
    %52 = arith.truncf %51 : vector<8x64xf32> to vector<8x64xbf16>
    %53 = vector.extract_strided_slice %47 {offsets = [0, 0], sizes = [8, 64], strides = [1, 1]} : vector<32x64xf32> to vector<8x64xf32>
    %54 = arith.truncf %53 : vector<8x64xf32> to vector<8x64xbf16>
    %55 = vector.extract_strided_slice %48 {offsets = [0, 0], sizes = [8, 64], strides = [1, 1]} : vector<32x64xf32> to vector<8x64xf32>
    %56 = arith.truncf %55 : vector<8x64xf32> to vector<8x64xbf16>
    %cst_34 = arith.constant dense<0.000000e+00> : vector<64x64xf32>
    %57 = tpu.matmul %52, %54, %cst_34 {dimension_numbers = #tpu.dot_dimension_numbers<[0], [0], [1], [1], [0, 1, 1, 1], [], []>} : vector<8x64xbf16>, vector<8x64xbf16>, vector<64x64xf32> -> vector<64x64xf32>
    %cst_35 = arith.constant dense<0xFF800000> : vector<64xf32>
    %58 = vector.multi_reduction <maximumf>, %57, %cst_35 [1] : vector<64x64xf32> to vector<64xf32>
    %59 = vector.shape_cast %58 : vector<64xf32> to vector<64x1xf32>
    %60 = vector.broadcast %59 : vector<64x1xf32> to vector<64x64xf32>
    %61 = arith.subf %57, %60 : vector<64x64xf32>
    %62 = math.exp %61 : vector<64x64xf32>
    %cst_36 = arith.constant dense<0.000000e+00> : vector<64xf32>
    %63 = vector.multi_reduction <add>, %62, %cst_36 [1] : vector<64x64xf32> to vector<64xf32>
    %64 = vector.shape_cast %63 : vector<64xf32> to vector<64x1xf32>
    %65 = tpu.reciprocal %64 {approx = true} : vector<64x1xf32> -> vector<64x1xf32>
    %66 = vector.broadcast %65 : vector<64x1xf32> to vector<64x64xf32>
    %67 = arith.mulf %62, %66 : vector<64x64xf32>
    %68 = arith.truncf %67 : vector<64x64xf32> to vector<64x64xbf16>
    %cst_37 = arith.constant dense<0.000000e+00> : vector<8x64xf32>
    %69 = tpu.matmul %56, %68, %cst_37 {dimension_numbers = #tpu.dot_dimension_numbers<[1], [1], [0], [0], [0, 0, 1, 0], [], []>} : vector<8x64xbf16>, vector<64x64xbf16>, vector<8x64xf32> -> vector<8x64xf32>
    %70 = vector.extract_strided_slice %50 {offsets = [8, 0], sizes = [8, 64], strides = [1, 1]} : vector<32x64xf32> to vector<8x64xf32>
    %71 = arith.truncf %70 : vector<8x64xf32> to vector<8x64xbf16>
    %72 = vector.extract_strided_slice %47 {offsets = [8, 0], sizes = [8, 64], strides = [1, 1]} : vector<32x64xf32> to vector<8x64xf32>
    %73 = arith.truncf %72 : vector<8x64xf32> to vector<8x64xbf16>
    %74 = vector.extract_strided_slice %48 {offsets = [8, 0], sizes = [8, 64], strides = [1, 1]} : vector<32x64xf32> to vector<8x64xf32>
    %75 = arith.truncf %74 : vector<8x64xf32> to vector<8x64xbf16>
    %cst_38 = arith.constant dense<0.000000e+00> : vector<64x64xf32>
    %76 = tpu.matmul %71, %73, %cst_38 {dimension_numbers = #tpu.dot_dimension_numbers<[0], [0], [1], [1], [0, 1, 1, 1], [], []>} : vector<8x64xbf16>, vector<8x64xbf16>, vector<64x64xf32> -> vector<64x64xf32>
    %cst_39 = arith.constant dense<0xFF800000> : vector<64xf32>
    %77 = vector.multi_reduction <maximumf>, %76, %cst_39 [1] : vector<64x64xf32> to vector<64xf32>
    %78 = vector.shape_cast %77 : vector<64xf32> to vector<64x1xf32>
    %79 = vector.broadcast %78 : vector<64x1xf32> to vector<64x64xf32>
    %80 = arith.subf %76, %79 : vector<64x64xf32>
    %81 = math.exp %80 : vector<64x64xf32>
    %cst_40 = arith.constant dense<0.000000e+00> : vector<64xf32>
    %82 = vector.multi_reduction <add>, %81, %cst_40 [1] : vector<64x64xf32> to vector<64xf32>
    %83 = vector.shape_cast %82 : vector<64xf32> to vector<64x1xf32>
    %84 = tpu.reciprocal %83 {approx = true} : vector<64x1xf32> -> vector<64x1xf32>
    %85 = vector.broadcast %84 : vector<64x1xf32> to vector<64x64xf32>
    %86 = arith.mulf %81, %85 : vector<64x64xf32>
    %87 = arith.truncf %86 : vector<64x64xf32> to vector<64x64xbf16>
    %cst_41 = arith.constant dense<0.000000e+00> : vector<8x64xf32>
    %88 = tpu.matmul %75, %87, %cst_41 {dimension_numbers = #tpu.dot_dimension_numbers<[1], [1], [0], [0], [0, 0, 1, 0], [], []>} : vector<8x64xbf16>, vector<64x64xbf16>, vector<8x64xf32> -> vector<8x64xf32>
    %89 = vector.extract_strided_slice %50 {offsets = [16, 0], sizes = [8, 64], strides = [1, 1]} : vector<32x64xf32> to vector<8x64xf32>
    %90 = arith.truncf %89 : vector<8x64xf32> to vector<8x64xbf16>
    %91 = vector.extract_strided_slice %47 {offsets = [16, 0], sizes = [8, 64], strides = [1, 1]} : vector<32x64xf32> to vector<8x64xf32>
    %92 = arith.truncf %91 : vector<8x64xf32> to vector<8x64xbf16>
    %93 = vector.extract_strided_slice %48 {offsets = [16, 0], sizes = [8, 64], strides = [1, 1]} : vector<32x64xf32> to vector<8x64xf32>
    %94 = arith.truncf %93 : vector<8x64xf32> to vector<8x64xbf16>
    %cst_42 = arith.constant dense<0.000000e+00> : vector<64x64xf32>
    %95 = tpu.matmul %90, %92, %cst_42 {dimension_numbers = #tpu.dot_dimension_numbers<[0], [0], [1], [1], [0, 1, 1, 1], [], []>} : vector<8x64xbf16>, vector<8x64xbf16>, vector<64x64xf32> -> vector<64x64xf32>
    %cst_43 = arith.constant dense<0xFF800000> : vector<64xf32>
    %96 = vector.multi_reduction <maximumf>, %95, %cst_43 [1] : vector<64x64xf32> to vector<64xf32>
    %97 = vector.shape_cast %96 : vector<64xf32> to vector<64x1xf32>
    %98 = vector.broadcast %97 : vector<64x1xf32> to vector<64x64xf32>
    %99 = arith.subf %95, %98 : vector<64x64xf32>
    %100 = math.exp %99 : vector<64x64xf32>
    %cst_44 = arith.constant dense<0.000000e+00> : vector<64xf32>
    %101 = vector.multi_reduction <add>, %100, %cst_44 [1] : vector<64x64xf32> to vector<64xf32>
    %102 = vector.shape_cast %101 : vector<64xf32> to vector<64x1xf32>
    %103 = tpu.reciprocal %102 {approx = true} : vector<64x1xf32> -> vector<64x1xf32>
    %104 = vector.broadcast %103 : vector<64x1xf32> to vector<64x64xf32>
    %105 = arith.mulf %100, %104 : vector<64x64xf32>
    %106 = arith.truncf %105 : vector<64x64xf32> to vector<64x64xbf16>
    %cst_45 = arith.constant dense<0.000000e+00> : vector<8x64xf32>
    %107 = tpu.matmul %94, %106, %cst_45 {dimension_numbers = #tpu.dot_dimension_numbers<[1], [1], [0], [0], [0, 0, 1, 0], [], []>} : vector<8x64xbf16>, vector<64x64xbf16>, vector<8x64xf32> -> vector<8x64xf32>
    %108 = vector.extract_strided_slice %50 {offsets = [24, 0], sizes = [8, 64], strides = [1, 1]} : vector<32x64xf32> to vector<8x64xf32>
    %109 = arith.truncf %108 : vector<8x64xf32> to vector<8x64xbf16>
    %110 = vector.extract_strided_slice %47 {offsets = [24, 0], sizes = [8, 64], strides = [1, 1]} : vector<32x64xf32> to vector<8x64xf32>
    %111 = arith.truncf %110 : vector<8x64xf32> to vector<8x64xbf16>
    %112 = vector.extract_strided_slice %48 {offsets = [24, 0], sizes = [8, 64], strides = [1, 1]} : vector<32x64xf32> to vector<8x64xf32>
    %113 = arith.truncf %112 : vector<8x64xf32> to vector<8x64xbf16>
    %cst_46 = arith.constant dense<0.000000e+00> : vector<64x64xf32>
    %114 = tpu.matmul %109, %111, %cst_46 {dimension_numbers = #tpu.dot_dimension_numbers<[0], [0], [1], [1], [0, 1, 1, 1], [], []>} : vector<8x64xbf16>, vector<8x64xbf16>, vector<64x64xf32> -> vector<64x64xf32>
    %cst_47 = arith.constant dense<0xFF800000> : vector<64xf32>
    %115 = vector.multi_reduction <maximumf>, %114, %cst_47 [1] : vector<64x64xf32> to vector<64xf32>
    %116 = vector.shape_cast %115 : vector<64xf32> to vector<64x1xf32>
    %117 = vector.broadcast %116 : vector<64x1xf32> to vector<64x64xf32>
    %118 = arith.subf %114, %117 : vector<64x64xf32>
    %119 = math.exp %118 : vector<64x64xf32>
    %cst_48 = arith.constant dense<0.000000e+00> : vector<64xf32>
    %120 = vector.multi_reduction <add>, %119, %cst_48 [1] : vector<64x64xf32> to vector<64xf32>
    %121 = vector.shape_cast %120 : vector<64xf32> to vector<64x1xf32>
    %122 = tpu.reciprocal %121 {approx = true} : vector<64x1xf32> -> vector<64x1xf32>
    %123 = vector.broadcast %122 : vector<64x1xf32> to vector<64x64xf32>
    %124 = arith.mulf %119, %123 : vector<64x64xf32>
    %125 = arith.truncf %124 : vector<64x64xf32> to vector<64x64xbf16>
    %cst_49 = arith.constant dense<0.000000e+00> : vector<8x64xf32>
    %126 = tpu.matmul %113, %125, %cst_49 {dimension_numbers = #tpu.dot_dimension_numbers<[1], [1], [0], [0], [0, 0, 1, 0], [], []>} : vector<8x64xbf16>, vector<64x64xbf16>, vector<8x64xf32> -> vector<8x64xf32>
    %127 = tpu.concatenate %69, %88, %107, %126 in 0 : vector<8x64xf32>, vector<8x64xf32>, vector<8x64xf32>, vector<8x64xf32> -> vector<32x64xf32>
    %128 = arith.truncf %127 : vector<32x64xf32> to vector<32x64xbf16>
    %cst_50 = arith.constant dense<0.000000e+00> : vector<32x64xf32>
    %129 = tpu.matmul %20, %128, %cst_50 {dimension_numbers = #tpu.dot_dimension_numbers<[1], [0], [0], [1], [0, 0, 1, 1], [], []>} : vector<32x32xbf16>, vector<32x64xbf16>, vector<32x64xf32> -> vector<32x64xf32>
    %130 = vector.broadcast %22 : vector<32x1xf32> to vector<32x64xf32>
    %131 = arith.addf %129, %130 : vector<32x64xf32>
    %132 = arith.addf %131, %12 : vector<32x64xf32>
    %133 = vector.extract_strided_slice %23 {offsets = [0, 0], sizes = [32, 32], strides = [1, 1]} : vector<96x32xbf16> to vector<32x32xbf16>
    %134 = arith.truncf %132 : vector<32x64xf32> to vector<32x64xbf16>
    %cst_51 = arith.constant dense<0.000000e+00> : vector<32x64xf32>
    %135 = tpu.matmul %133, %134, %cst_51 {dimension_numbers = #tpu.dot_dimension_numbers<[1], [0], [0], [1], [0, 0, 1, 1], [], []>} : vector<32x32xbf16>, vector<32x64xbf16>, vector<32x64xf32> -> vector<32x64xf32>
    %136 = vector.extract_strided_slice %25 {offsets = [0, 0], sizes = [32, 1], strides = [1, 1]} : vector<96x1xf32> to vector<32x1xf32>
    %137 = vector.broadcast %136 : vector<32x1xf32> to vector<32x64xf32>
    %138 = arith.addf %135, %137 : vector<32x64xf32>
    %139 = vector.extract_strided_slice %23 {offsets = [32, 0], sizes = [64, 32], strides = [1, 1]} : vector<96x32xbf16> to vector<64x32xbf16>
    %140 = arith.truncf %18 : vector<32x16xf32> to vector<32x16xbf16>
    %cst_52 = arith.constant dense<0.000000e+00> : vector<64x16xf32>
    %141 = tpu.matmul %139, %140, %cst_52 {dimension_numbers = #tpu.dot_dimension_numbers<[1], [0], [0], [1], [0, 0, 1, 1], [], []>} : vector<64x32xbf16>, vector<32x16xbf16>, vector<64x16xf32> -> vector<64x16xf32>
    %142 = vector.extract_strided_slice %25 {offsets = [32, 0], sizes = [64, 1], strides = [1, 1]} : vector<96x1xf32> to vector<64x1xf32>
    %143 = vector.broadcast %142 : vector<64x1xf32> to vector<64x16xf32>
    %144 = arith.addf %141, %143 : vector<64x16xf32>
    %145 = vector.extract_strided_slice %144 {offsets = [0, 0], sizes = [32, 16], strides = [1, 1]} : vector<64x16xf32> to vector<32x16xf32>
    %146 = vector.extract_strided_slice %144 {offsets = [32, 0], sizes = [32, 16], strides = [1, 1]} : vector<64x16xf32> to vector<32x16xf32>
    %cst_53 = arith.constant 0.353553385 : f32
    %147 = vector.broadcast %cst_53 : f32 to vector<32x64xf32>
    %148 = arith.mulf %138, %147 : vector<32x64xf32>
    %149 = vector.extract_strided_slice %148 {offsets = [0, 0], sizes = [8, 64], strides = [1, 1]} : vector<32x64xf32> to vector<8x64xf32>
    %150 = arith.truncf %149 : vector<8x64xf32> to vector<8x64xbf16>
    %151 = vector.extract_strided_slice %145 {offsets = [0, 0], sizes = [8, 16], strides = [1, 1]} : vector<32x16xf32> to vector<8x16xf32>
    %152 = arith.truncf %151 : vector<8x16xf32> to vector<8x16xbf16>
    %153 = vector.extract_strided_slice %146 {offsets = [0, 0], sizes = [8, 16], strides = [1, 1]} : vector<32x16xf32> to vector<8x16xf32>
    %154 = arith.truncf %153 : vector<8x16xf32> to vector<8x16xbf16>
    %cst_54 = arith.constant dense<0.000000e+00> : vector<64x16xf32>
    %155 = tpu.matmul %150, %152, %cst_54 {dimension_numbers = #tpu.dot_dimension_numbers<[0], [0], [1], [1], [0, 1, 1, 1], [], []>} : vector<8x64xbf16>, vector<8x16xbf16>, vector<64x16xf32> -> vector<64x16xf32>
    %cst_55 = arith.constant dense<0xFF800000> : vector<64xf32>
    %156 = vector.multi_reduction <maximumf>, %155, %cst_55 [1] : vector<64x16xf32> to vector<64xf32>
    %157 = vector.shape_cast %156 : vector<64xf32> to vector<64x1xf32>
    %158 = vector.broadcast %157 : vector<64x1xf32> to vector<64x16xf32>
    %159 = arith.subf %155, %158 : vector<64x16xf32>
    %160 = math.exp %159 : vector<64x16xf32>
    %cst_56 = arith.constant dense<0.000000e+00> : vector<64xf32>
    %161 = vector.multi_reduction <add>, %160, %cst_56 [1] : vector<64x16xf32> to vector<64xf32>
    %162 = vector.shape_cast %161 : vector<64xf32> to vector<64x1xf32>
    %163 = tpu.reciprocal %162 {approx = true} : vector<64x1xf32> -> vector<64x1xf32>
    %164 = vector.broadcast %163 : vector<64x1xf32> to vector<64x16xf32>
    %165 = arith.mulf %160, %164 : vector<64x16xf32>
    %166 = arith.truncf %165 : vector<64x16xf32> to vector<64x16xbf16>
    %cst_57 = arith.constant dense<0.000000e+00> : vector<8x64xf32>
    %167 = tpu.matmul %154, %166, %cst_57 {dimension_numbers = #tpu.dot_dimension_numbers<[1], [1], [0], [0], [0, 0, 1, 0], [], []>} : vector<8x16xbf16>, vector<64x16xbf16>, vector<8x64xf32> -> vector<8x64xf32>
    %168 = vector.extract_strided_slice %148 {offsets = [8, 0], sizes = [8, 64], strides = [1, 1]} : vector<32x64xf32> to vector<8x64xf32>
    %169 = arith.truncf %168 : vector<8x64xf32> to vector<8x64xbf16>
    %170 = vector.extract_strided_slice %145 {offsets = [8, 0], sizes = [8, 16], strides = [1, 1]} : vector<32x16xf32> to vector<8x16xf32>
    %171 = arith.truncf %170 : vector<8x16xf32> to vector<8x16xbf16>
    %172 = vector.extract_strided_slice %146 {offsets = [8, 0], sizes = [8, 16], strides = [1, 1]} : vector<32x16xf32> to vector<8x16xf32>
    %173 = arith.truncf %172 : vector<8x16xf32> to vector<8x16xbf16>
    %cst_58 = arith.constant dense<0.000000e+00> : vector<64x16xf32>
    %174 = tpu.matmul %169, %171, %cst_58 {dimension_numbers = #tpu.dot_dimension_numbers<[0], [0], [1], [1], [0, 1, 1, 1], [], []>} : vector<8x64xbf16>, vector<8x16xbf16>, vector<64x16xf32> -> vector<64x16xf32>
    %cst_59 = arith.constant dense<0xFF800000> : vector<64xf32>
    %175 = vector.multi_reduction <maximumf>, %174, %cst_59 [1] : vector<64x16xf32> to vector<64xf32>
    %176 = vector.shape_cast %175 : vector<64xf32> to vector<64x1xf32>
    %177 = vector.broadcast %176 : vector<64x1xf32> to vector<64x16xf32>
    %178 = arith.subf %174, %177 : vector<64x16xf32>
    %179 = math.exp %178 : vector<64x16xf32>
    %cst_60 = arith.constant dense<0.000000e+00> : vector<64xf32>
    %180 = vector.multi_reduction <add>, %179, %cst_60 [1] : vector<64x16xf32> to vector<64xf32>
    %181 = vector.shape_cast %180 : vector<64xf32> to vector<64x1xf32>
    %182 = tpu.reciprocal %181 {approx = true} : vector<64x1xf32> -> vector<64x1xf32>
    %183 = vector.broadcast %182 : vector<64x1xf32> to vector<64x16xf32>
    %184 = arith.mulf %179, %183 : vector<64x16xf32>
    %185 = arith.truncf %184 : vector<64x16xf32> to vector<64x16xbf16>
    %cst_61 = arith.constant dense<0.000000e+00> : vector<8x64xf32>
    %186 = tpu.matmul %173, %185, %cst_61 {dimension_numbers = #tpu.dot_dimension_numbers<[1], [1], [0], [0], [0, 0, 1, 0], [], []>} : vector<8x16xbf16>, vector<64x16xbf16>, vector<8x64xf32> -> vector<8x64xf32>
    %187 = vector.extract_strided_slice %148 {offsets = [16, 0], sizes = [8, 64], strides = [1, 1]} : vector<32x64xf32> to vector<8x64xf32>
    %188 = arith.truncf %187 : vector<8x64xf32> to vector<8x64xbf16>
    %189 = vector.extract_strided_slice %145 {offsets = [16, 0], sizes = [8, 16], strides = [1, 1]} : vector<32x16xf32> to vector<8x16xf32>
    %190 = arith.truncf %189 : vector<8x16xf32> to vector<8x16xbf16>
    %191 = vector.extract_strided_slice %146 {offsets = [16, 0], sizes = [8, 16], strides = [1, 1]} : vector<32x16xf32> to vector<8x16xf32>
    %192 = arith.truncf %191 : vector<8x16xf32> to vector<8x16xbf16>
    %cst_62 = arith.constant dense<0.000000e+00> : vector<64x16xf32>
    %193 = tpu.matmul %188, %190, %cst_62 {dimension_numbers = #tpu.dot_dimension_numbers<[0], [0], [1], [1], [0, 1, 1, 1], [], []>} : vector<8x64xbf16>, vector<8x16xbf16>, vector<64x16xf32> -> vector<64x16xf32>
    %cst_63 = arith.constant dense<0xFF800000> : vector<64xf32>
    %194 = vector.multi_reduction <maximumf>, %193, %cst_63 [1] : vector<64x16xf32> to vector<64xf32>
    %195 = vector.shape_cast %194 : vector<64xf32> to vector<64x1xf32>
    %196 = vector.broadcast %195 : vector<64x1xf32> to vector<64x16xf32>
    %197 = arith.subf %193, %196 : vector<64x16xf32>
    %198 = math.exp %197 : vector<64x16xf32>
    %cst_64 = arith.constant dense<0.000000e+00> : vector<64xf32>
    %199 = vector.multi_reduction <add>, %198, %cst_64 [1] : vector<64x16xf32> to vector<64xf32>
    %200 = vector.shape_cast %199 : vector<64xf32> to vector<64x1xf32>
    %201 = tpu.reciprocal %200 {approx = true} : vector<64x1xf32> -> vector<64x1xf32>
    %202 = vector.broadcast %201 : vector<64x1xf32> to vector<64x16xf32>
    %203 = arith.mulf %198, %202 : vector<64x16xf32>
    %204 = arith.truncf %203 : vector<64x16xf32> to vector<64x16xbf16>
    %cst_65 = arith.constant dense<0.000000e+00> : vector<8x64xf32>
    %205 = tpu.matmul %192, %204, %cst_65 {dimension_numbers = #tpu.dot_dimension_numbers<[1], [1], [0], [0], [0, 0, 1, 0], [], []>} : vector<8x16xbf16>, vector<64x16xbf16>, vector<8x64xf32> -> vector<8x64xf32>
    %206 = vector.extract_strided_slice %148 {offsets = [24, 0], sizes = [8, 64], strides = [1, 1]} : vector<32x64xf32> to vector<8x64xf32>
    %207 = arith.truncf %206 : vector<8x64xf32> to vector<8x64xbf16>
    %208 = vector.extract_strided_slice %145 {offsets = [24, 0], sizes = [8, 16], strides = [1, 1]} : vector<32x16xf32> to vector<8x16xf32>
    %209 = arith.truncf %208 : vector<8x16xf32> to vector<8x16xbf16>
    %210 = vector.extract_strided_slice %146 {offsets = [24, 0], sizes = [8, 16], strides = [1, 1]} : vector<32x16xf32> to vector<8x16xf32>
    %211 = arith.truncf %210 : vector<8x16xf32> to vector<8x16xbf16>
    %cst_66 = arith.constant dense<0.000000e+00> : vector<64x16xf32>
    %212 = tpu.matmul %207, %209, %cst_66 {dimension_numbers = #tpu.dot_dimension_numbers<[0], [0], [1], [1], [0, 1, 1, 1], [], []>} : vector<8x64xbf16>, vector<8x16xbf16>, vector<64x16xf32> -> vector<64x16xf32>
    %cst_67 = arith.constant dense<0xFF800000> : vector<64xf32>
    %213 = vector.multi_reduction <maximumf>, %212, %cst_67 [1] : vector<64x16xf32> to vector<64xf32>
    %214 = vector.shape_cast %213 : vector<64xf32> to vector<64x1xf32>
    %215 = vector.broadcast %214 : vector<64x1xf32> to vector<64x16xf32>
    %216 = arith.subf %212, %215 : vector<64x16xf32>
    %217 = math.exp %216 : vector<64x16xf32>
    %cst_68 = arith.constant dense<0.000000e+00> : vector<64xf32>
    %218 = vector.multi_reduction <add>, %217, %cst_68 [1] : vector<64x16xf32> to vector<64xf32>
    %219 = vector.shape_cast %218 : vector<64xf32> to vector<64x1xf32>
    %220 = tpu.reciprocal %219 {approx = true} : vector<64x1xf32> -> vector<64x1xf32>
    %221 = vector.broadcast %220 : vector<64x1xf32> to vector<64x16xf32>
    %222 = arith.mulf %217, %221 : vector<64x16xf32>
    %223 = arith.truncf %222 : vector<64x16xf32> to vector<64x16xbf16>
    %cst_69 = arith.constant dense<0.000000e+00> : vector<8x64xf32>
    %224 = tpu.matmul %211, %223, %cst_69 {dimension_numbers = #tpu.dot_dimension_numbers<[1], [1], [0], [0], [0, 0, 1, 0], [], []>} : vector<8x16xbf16>, vector<64x16xbf16>, vector<8x64xf32> -> vector<8x64xf32>
    %225 = tpu.concatenate %167, %186, %205, %224 in 0 : vector<8x64xf32>, vector<8x64xf32>, vector<8x64xf32>, vector<8x64xf32> -> vector<32x64xf32>
    %226 = arith.truncf %225 : vector<32x64xf32> to vector<32x64xbf16>
    %cst_70 = arith.constant dense<0.000000e+00> : vector<32x64xf32>
    %227 = tpu.matmul %24, %226, %cst_70 {dimension_numbers = #tpu.dot_dimension_numbers<[1], [0], [0], [1], [0, 0, 1, 1], [], []>} : vector<32x32xbf16>, vector<32x64xbf16>, vector<32x64xf32> -> vector<32x64xf32>
    %228 = vector.broadcast %26 : vector<32x1xf32> to vector<32x64xf32>
    %229 = arith.addf %227, %228 : vector<32x64xf32>
    %230 = vector.extract_strided_slice %27 {offsets = [0, 0], sizes = [32, 32], strides = [1, 1]} : vector<96x32xbf16> to vector<32x32xbf16>
    %231 = arith.truncf %18 : vector<32x16xf32> to vector<32x16xbf16>
    %cst_71 = arith.constant dense<0.000000e+00> : vector<32x16xf32>
    %232 = tpu.matmul %230, %231, %cst_71 {dimension_numbers = #tpu.dot_dimension_numbers<[1], [0], [0], [1], [0, 0, 1, 1], [], []>} : vector<32x32xbf16>, vector<32x16xbf16>, vector<32x16xf32> -> vector<32x16xf32>
    %233 = vector.extract_strided_slice %29 {offsets = [0, 0], sizes = [32, 1], strides = [1, 1]} : vector<96x1xf32> to vector<32x1xf32>
    %234 = vector.broadcast %233 : vector<32x1xf32> to vector<32x16xf32>
    %235 = arith.addf %232, %234 : vector<32x16xf32>
    %236 = vector.extract_strided_slice %27 {offsets = [32, 0], sizes = [64, 32], strides = [1, 1]} : vector<96x32xbf16> to vector<64x32xbf16>
    %237 = arith.truncf %229 : vector<32x64xf32> to vector<32x64xbf16>
    %cst_72 = arith.constant dense<0.000000e+00> : vector<64x64xf32>
    %238 = tpu.matmul %236, %237, %cst_72 {dimension_numbers = #tpu.dot_dimension_numbers<[1], [0], [0], [1], [0, 0, 1, 1], [], []>} : vector<64x32xbf16>, vector<32x64xbf16>, vector<64x64xf32> -> vector<64x64xf32>
    %239 = vector.extract_strided_slice %29 {offsets = [32, 0], sizes = [64, 1], strides = [1, 1]} : vector<96x1xf32> to vector<64x1xf32>
    %240 = vector.broadcast %239 : vector<64x1xf32> to vector<64x64xf32>
    %241 = arith.addf %238, %240 : vector<64x64xf32>
    %242 = vector.extract_strided_slice %241 {offsets = [0, 0], sizes = [32, 64], strides = [1, 1]} : vector<64x64xf32> to vector<32x64xf32>
    %243 = vector.extract_strided_slice %241 {offsets = [32, 0], sizes = [32, 64], strides = [1, 1]} : vector<64x64xf32> to vector<32x64xf32>
    %cst_73 = arith.constant 0.353553385 : f32
    %244 = vector.broadcast %cst_73 : f32 to vector<32x16xf32>
    %245 = arith.mulf %235, %244 : vector<32x16xf32>
    %246 = vector.extract_strided_slice %245 {offsets = [0, 0], sizes = [8, 16], strides = [1, 1]} : vector<32x16xf32> to vector<8x16xf32>
    %247 = arith.truncf %246 : vector<8x16xf32> to vector<8x16xbf16>
    %248 = vector.extract_strided_slice %242 {offsets = [0, 0], sizes = [8, 64], strides = [1, 1]} : vector<32x64xf32> to vector<8x64xf32>
    %249 = arith.truncf %248 : vector<8x64xf32> to vector<8x64xbf16>
    %250 = vector.extract_strided_slice %243 {offsets = [0, 0], sizes = [8, 64], strides = [1, 1]} : vector<32x64xf32> to vector<8x64xf32>
    %251 = arith.truncf %250 : vector<8x64xf32> to vector<8x64xbf16>
    %cst_74 = arith.constant dense<0.000000e+00> : vector<16x64xf32>
    %252 = tpu.matmul %247, %249, %cst_74 {dimension_numbers = #tpu.dot_dimension_numbers<[0], [0], [1], [1], [0, 1, 1, 1], [], []>} : vector<8x16xbf16>, vector<8x64xbf16>, vector<16x64xf32> -> vector<16x64xf32>
    %cst_75 = arith.constant dense<0xFF800000> : vector<16xf32>
    %253 = vector.multi_reduction <maximumf>, %252, %cst_75 [1] : vector<16x64xf32> to vector<16xf32>
    %254 = vector.shape_cast %253 : vector<16xf32> to vector<16x1xf32>
    %255 = vector.broadcast %254 : vector<16x1xf32> to vector<16x64xf32>
    %256 = arith.subf %252, %255 : vector<16x64xf32>
    %257 = math.exp %256 : vector<16x64xf32>
    %cst_76 = arith.constant dense<0.000000e+00> : vector<16xf32>
    %258 = vector.multi_reduction <add>, %257, %cst_76 [1] : vector<16x64xf32> to vector<16xf32>
    %259 = vector.shape_cast %258 : vector<16xf32> to vector<16x1xf32>
    %260 = tpu.reciprocal %259 {approx = true} : vector<16x1xf32> -> vector<16x1xf32>
    %261 = vector.broadcast %260 : vector<16x1xf32> to vector<16x64xf32>
    %262 = arith.mulf %257, %261 : vector<16x64xf32>
    %263 = arith.truncf %262 : vector<16x64xf32> to vector<16x64xbf16>
    %cst_77 = arith.constant dense<0.000000e+00> : vector<8x16xf32>
    %264 = tpu.matmul %251, %263, %cst_77 {dimension_numbers = #tpu.dot_dimension_numbers<[1], [1], [0], [0], [0, 0, 1, 0], [], []>} : vector<8x64xbf16>, vector<16x64xbf16>, vector<8x16xf32> -> vector<8x16xf32>
    %265 = vector.extract_strided_slice %245 {offsets = [8, 0], sizes = [8, 16], strides = [1, 1]} : vector<32x16xf32> to vector<8x16xf32>
    %266 = arith.truncf %265 : vector<8x16xf32> to vector<8x16xbf16>
    %267 = vector.extract_strided_slice %242 {offsets = [8, 0], sizes = [8, 64], strides = [1, 1]} : vector<32x64xf32> to vector<8x64xf32>
    %268 = arith.truncf %267 : vector<8x64xf32> to vector<8x64xbf16>
    %269 = vector.extract_strided_slice %243 {offsets = [8, 0], sizes = [8, 64], strides = [1, 1]} : vector<32x64xf32> to vector<8x64xf32>
    %270 = arith.truncf %269 : vector<8x64xf32> to vector<8x64xbf16>
    %cst_78 = arith.constant dense<0.000000e+00> : vector<16x64xf32>
    %271 = tpu.matmul %266, %268, %cst_78 {dimension_numbers = #tpu.dot_dimension_numbers<[0], [0], [1], [1], [0, 1, 1, 1], [], []>} : vector<8x16xbf16>, vector<8x64xbf16>, vector<16x64xf32> -> vector<16x64xf32>
    %cst_79 = arith.constant dense<0xFF800000> : vector<16xf32>
    %272 = vector.multi_reduction <maximumf>, %271, %cst_79 [1] : vector<16x64xf32> to vector<16xf32>
    %273 = vector.shape_cast %272 : vector<16xf32> to vector<16x1xf32>
    %274 = vector.broadcast %273 : vector<16x1xf32> to vector<16x64xf32>
    %275 = arith.subf %271, %274 : vector<16x64xf32>
    %276 = math.exp %275 : vector<16x64xf32>
    %cst_80 = arith.constant dense<0.000000e+00> : vector<16xf32>
    %277 = vector.multi_reduction <add>, %276, %cst_80 [1] : vector<16x64xf32> to vector<16xf32>
    %278 = vector.shape_cast %277 : vector<16xf32> to vector<16x1xf32>
    %279 = tpu.reciprocal %278 {approx = true} : vector<16x1xf32> -> vector<16x1xf32>
    %280 = vector.broadcast %279 : vector<16x1xf32> to vector<16x64xf32>
    %281 = arith.mulf %276, %280 : vector<16x64xf32>
    %282 = arith.truncf %281 : vector<16x64xf32> to vector<16x64xbf16>
    %cst_81 = arith.constant dense<0.000000e+00> : vector<8x16xf32>
    %283 = tpu.matmul %270, %282, %cst_81 {dimension_numbers = #tpu.dot_dimension_numbers<[1], [1], [0], [0], [0, 0, 1, 0], [], []>} : vector<8x64xbf16>, vector<16x64xbf16>, vector<8x16xf32> -> vector<8x16xf32>
    %284 = vector.extract_strided_slice %245 {offsets = [16, 0], sizes = [8, 16], strides = [1, 1]} : vector<32x16xf32> to vector<8x16xf32>
    %285 = arith.truncf %284 : vector<8x16xf32> to vector<8x16xbf16>
    %286 = vector.extract_strided_slice %242 {offsets = [16, 0], sizes = [8, 64], strides = [1, 1]} : vector<32x64xf32> to vector<8x64xf32>
    %287 = arith.truncf %286 : vector<8x64xf32> to vector<8x64xbf16>
    %288 = vector.extract_strided_slice %243 {offsets = [16, 0], sizes = [8, 64], strides = [1, 1]} : vector<32x64xf32> to vector<8x64xf32>
    %289 = arith.truncf %288 : vector<8x64xf32> to vector<8x64xbf16>
    %cst_82 = arith.constant dense<0.000000e+00> : vector<16x64xf32>
    %290 = tpu.matmul %285, %287, %cst_82 {dimension_numbers = #tpu.dot_dimension_numbers<[0], [0], [1], [1], [0, 1, 1, 1], [], []>} : vector<8x16xbf16>, vector<8x64xbf16>, vector<16x64xf32> -> vector<16x64xf32>
    %cst_83 = arith.constant dense<0xFF800000> : vector<16xf32>
    %291 = vector.multi_reduction <maximumf>, %290, %cst_83 [1] : vector<16x64xf32> to vector<16xf32>
    %292 = vector.shape_cast %291 : vector<16xf32> to vector<16x1xf32>
    %293 = vector.broadcast %292 : vector<16x1xf32> to vector<16x64xf32>
    %294 = arith.subf %290, %293 : vector<16x64xf32>
    %295 = math.exp %294 : vector<16x64xf32>
    %cst_84 = arith.constant dense<0.000000e+00> : vector<16xf32>
    %296 = vector.multi_reduction <add>, %295, %cst_84 [1] : vector<16x64xf32> to vector<16xf32>
    %297 = vector.shape_cast %296 : vector<16xf32> to vector<16x1xf32>
    %298 = tpu.reciprocal %297 {approx = true} : vector<16x1xf32> -> vector<16x1xf32>
    %299 = vector.broadcast %298 : vector<16x1xf32> to vector<16x64xf32>
    %300 = arith.mulf %295, %299 : vector<16x64xf32>
    %301 = arith.truncf %300 : vector<16x64xf32> to vector<16x64xbf16>
    %cst_85 = arith.constant dense<0.000000e+00> : vector<8x16xf32>
    %302 = tpu.matmul %289, %301, %cst_85 {dimension_numbers = #tpu.dot_dimension_numbers<[1], [1], [0], [0], [0, 0, 1, 0], [], []>} : vector<8x64xbf16>, vector<16x64xbf16>, vector<8x16xf32> -> vector<8x16xf32>
    %303 = vector.extract_strided_slice %245 {offsets = [24, 0], sizes = [8, 16], strides = [1, 1]} : vector<32x16xf32> to vector<8x16xf32>
    %304 = arith.truncf %303 : vector<8x16xf32> to vector<8x16xbf16>
    %305 = vector.extract_strided_slice %242 {offsets = [24, 0], sizes = [8, 64], strides = [1, 1]} : vector<32x64xf32> to vector<8x64xf32>
    %306 = arith.truncf %305 : vector<8x64xf32> to vector<8x64xbf16>
    %307 = vector.extract_strided_slice %243 {offsets = [24, 0], sizes = [8, 64], strides = [1, 1]} : vector<32x64xf32> to vector<8x64xf32>
    %308 = arith.truncf %307 : vector<8x64xf32> to vector<8x64xbf16>
    %cst_86 = arith.constant dense<0.000000e+00> : vector<16x64xf32>
    %309 = tpu.matmul %304, %306, %cst_86 {dimension_numbers = #tpu.dot_dimension_numbers<[0], [0], [1], [1], [0, 1, 1, 1], [], []>} : vector<8x16xbf16>, vector<8x64xbf16>, vector<16x64xf32> -> vector<16x64xf32>
    %cst_87 = arith.constant dense<0xFF800000> : vector<16xf32>
    %310 = vector.multi_reduction <maximumf>, %309, %cst_87 [1] : vector<16x64xf32> to vector<16xf32>
    %311 = vector.shape_cast %310 : vector<16xf32> to vector<16x1xf32>
    %312 = vector.broadcast %311 : vector<16x1xf32> to vector<16x64xf32>
    %313 = arith.subf %309, %312 : vector<16x64xf32>
    %314 = math.exp %313 : vector<16x64xf32>
    %cst_88 = arith.constant dense<0.000000e+00> : vector<16xf32>
    %315 = vector.multi_reduction <add>, %314, %cst_88 [1] : vector<16x64xf32> to vector<16xf32>
    %316 = vector.shape_cast %315 : vector<16xf32> to vector<16x1xf32>
    %317 = tpu.reciprocal %316 {approx = true} : vector<16x1xf32> -> vector<16x1xf32>
    %318 = vector.broadcast %317 : vector<16x1xf32> to vector<16x64xf32>
    %319 = arith.mulf %314, %318 : vector<16x64xf32>
    %320 = arith.truncf %319 : vector<16x64xf32> to vector<16x64xbf16>
    %cst_89 = arith.constant dense<0.000000e+00> : vector<8x16xf32>
    %321 = tpu.matmul %308, %320, %cst_89 {dimension_numbers = #tpu.dot_dimension_numbers<[1], [1], [0], [0], [0, 0, 1, 0], [], []>} : vector<8x64xbf16>, vector<16x64xbf16>, vector<8x16xf32> -> vector<8x16xf32>
    %322 = tpu.concatenate %264, %283, %302, %321 in 0 : vector<8x16xf32>, vector<8x16xf32>, vector<8x16xf32>, vector<8x16xf32> -> vector<32x16xf32>
    %323 = arith.truncf %322 : vector<32x16xf32> to vector<32x16xbf16>
    %cst_90 = arith.constant dense<0.000000e+00> : vector<32x16xf32>
    %324 = tpu.matmul %28, %323, %cst_90 {dimension_numbers = #tpu.dot_dimension_numbers<[1], [0], [0], [1], [0, 0, 1, 1], [], []>} : vector<32x32xbf16>, vector<32x16xbf16>, vector<32x16xf32> -> vector<32x16xf32>
    %325 = vector.broadcast %30 : vector<32x1xf32> to vector<32x16xf32>
    %326 = arith.addf %324, %325 : vector<32x16xf32>
    %327 = arith.mulf %229, %229 : vector<32x64xf32>
    %cst_91 = arith.constant dense<0.000000e+00> : vector<64xf32>
    %328 = vector.multi_reduction <add>, %327, %cst_91 [0] : vector<32x64xf32> to vector<64xf32>
    %329 = vector.shape_cast %328 : vector<64xf32> to vector<1x64xf32>
    %330 = math.sqrt %329 : vector<1x64xf32>
    %cst_92 = arith.constant 2.500000e-01 : f32
    %331 = vector.broadcast %cst_92 : f32 to vector<1x64xf32>
    %332 = arith.mulf %330, %331 : vector<1x64xf32>
    %cst_93 = arith.constant 9.99999997E-7 : f32
    %333 = vector.broadcast %cst_93 : f32 to vector<1x64xf32>
    %334 = arith.addf %332, %333 : vector<1x64xf32>
    %335 = tpu.reciprocal %334 {approx = true} : vector<1x64xf32> -> vector<1x64xf32>
    %336 = vector.broadcast %335 : vector<1x64xf32> to vector<32x64xf32>
    %337 = arith.mulf %229, %336 : vector<32x64xf32>
    %338 = arith.truncf %337 : vector<32x64xf32> to vector<32x64xbf16>
    %cst_94 = arith.constant dense<0.000000e+00> : vector<96x64xf32>
    %339 = tpu.matmul %19, %338, %cst_94 {dimension_numbers = #tpu.dot_dimension_numbers<[1], [0], [0], [1], [0, 0, 1, 1], [], []>} : vector<96x32xbf16>, vector<32x64xbf16>, vector<96x64xf32> -> vector<96x64xf32>
    %340 = vector.broadcast %21 : vector<96x1xf32> to vector<96x64xf32>
    %341 = arith.addf %339, %340 : vector<96x64xf32>
    %342 = vector.extract_strided_slice %341 {offsets = [0, 0], sizes = [32, 64], strides = [1, 1]} : vector<96x64xf32> to vector<32x64xf32>
    %343 = vector.extract_strided_slice %341 {offsets = [32, 0], sizes = [32, 64], strides = [1, 1]} : vector<96x64xf32> to vector<32x64xf32>
    %344 = vector.extract_strided_slice %341 {offsets = [64, 0], sizes = [32, 64], strides = [1, 1]} : vector<96x64xf32> to vector<32x64xf32>
    %cst_95 = arith.constant 0.353553385 : f32
    %345 = vector.broadcast %cst_95 : f32 to vector<32x64xf32>
    %346 = arith.mulf %342, %345 : vector<32x64xf32>
    %347 = vector.extract_strided_slice %346 {offsets = [0, 0], sizes = [8, 64], strides = [1, 1]} : vector<32x64xf32> to vector<8x64xf32>
    %348 = arith.truncf %347 : vector<8x64xf32> to vector<8x64xbf16>
    %349 = vector.extract_strided_slice %343 {offsets = [0, 0], sizes = [8, 64], strides = [1, 1]} : vector<32x64xf32> to vector<8x64xf32>
    %350 = arith.truncf %349 : vector<8x64xf32> to vector<8x64xbf16>
    %351 = vector.extract_strided_slice %344 {offsets = [0, 0], sizes = [8, 64], strides = [1, 1]} : vector<32x64xf32> to vector<8x64xf32>
    %352 = arith.truncf %351 : vector<8x64xf32> to vector<8x64xbf16>
    %cst_96 = arith.constant dense<0.000000e+00> : vector<64x64xf32>
    %353 = tpu.matmul %348, %350, %cst_96 {dimension_numbers = #tpu.dot_dimension_numbers<[0], [0], [1], [1], [0, 1, 1, 1], [], []>} : vector<8x64xbf16>, vector<8x64xbf16>, vector<64x64xf32> -> vector<64x64xf32>
    %cst_97 = arith.constant dense<0xFF800000> : vector<64xf32>
    %354 = vector.multi_reduction <maximumf>, %353, %cst_97 [1] : vector<64x64xf32> to vector<64xf32>
    %355 = vector.shape_cast %354 : vector<64xf32> to vector<64x1xf32>
    %356 = vector.broadcast %355 : vector<64x1xf32> to vector<64x64xf32>
    %357 = arith.subf %353, %356 : vector<64x64xf32>
    %358 = math.exp %357 : vector<64x64xf32>
    %cst_98 = arith.constant dense<0.000000e+00> : vector<64xf32>
    %359 = vector.multi_reduction <add>, %358, %cst_98 [1] : vector<64x64xf32> to vector<64xf32>
    %360 = vector.shape_cast %359 : vector<64xf32> to vector<64x1xf32>
    %361 = tpu.reciprocal %360 {approx = true} : vector<64x1xf32> -> vector<64x1xf32>
    %362 = vector.broadcast %361 : vector<64x1xf32> to vector<64x64xf32>
    %363 = arith.mulf %358, %362 : vector<64x64xf32>
    %364 = arith.truncf %363 : vector<64x64xf32> to vector<64x64xbf16>
    %cst_99 = arith.constant dense<0.000000e+00> : vector<8x64xf32>
    %365 = tpu.matmul %352, %364, %cst_99 {dimension_numbers = #tpu.dot_dimension_numbers<[1], [1], [0], [0], [0, 0, 1, 0], [], []>} : vector<8x64xbf16>, vector<64x64xbf16>, vector<8x64xf32> -> vector<8x64xf32>
    %366 = vector.extract_strided_slice %346 {offsets = [8, 0], sizes = [8, 64], strides = [1, 1]} : vector<32x64xf32> to vector<8x64xf32>
    %367 = arith.truncf %366 : vector<8x64xf32> to vector<8x64xbf16>
    %368 = vector.extract_strided_slice %343 {offsets = [8, 0], sizes = [8, 64], strides = [1, 1]} : vector<32x64xf32> to vector<8x64xf32>
    %369 = arith.truncf %368 : vector<8x64xf32> to vector<8x64xbf16>
    %370 = vector.extract_strided_slice %344 {offsets = [8, 0], sizes = [8, 64], strides = [1, 1]} : vector<32x64xf32> to vector<8x64xf32>
    %371 = arith.truncf %370 : vector<8x64xf32> to vector<8x64xbf16>
    %cst_100 = arith.constant dense<0.000000e+00> : vector<64x64xf32>
    %372 = tpu.matmul %367, %369, %cst_100 {dimension_numbers = #tpu.dot_dimension_numbers<[0], [0], [1], [1], [0, 1, 1, 1], [], []>} : vector<8x64xbf16>, vector<8x64xbf16>, vector<64x64xf32> -> vector<64x64xf32>
    %cst_101 = arith.constant dense<0xFF800000> : vector<64xf32>
    %373 = vector.multi_reduction <maximumf>, %372, %cst_101 [1] : vector<64x64xf32> to vector<64xf32>
    %374 = vector.shape_cast %373 : vector<64xf32> to vector<64x1xf32>
    %375 = vector.broadcast %374 : vector<64x1xf32> to vector<64x64xf32>
    %376 = arith.subf %372, %375 : vector<64x64xf32>
    %377 = math.exp %376 : vector<64x64xf32>
    %cst_102 = arith.constant dense<0.000000e+00> : vector<64xf32>
    %378 = vector.multi_reduction <add>, %377, %cst_102 [1] : vector<64x64xf32> to vector<64xf32>
    %379 = vector.shape_cast %378 : vector<64xf32> to vector<64x1xf32>
    %380 = tpu.reciprocal %379 {approx = true} : vector<64x1xf32> -> vector<64x1xf32>
    %381 = vector.broadcast %380 : vector<64x1xf32> to vector<64x64xf32>
    %382 = arith.mulf %377, %381 : vector<64x64xf32>
    %383 = arith.truncf %382 : vector<64x64xf32> to vector<64x64xbf16>
    %cst_103 = arith.constant dense<0.000000e+00> : vector<8x64xf32>
    %384 = tpu.matmul %371, %383, %cst_103 {dimension_numbers = #tpu.dot_dimension_numbers<[1], [1], [0], [0], [0, 0, 1, 0], [], []>} : vector<8x64xbf16>, vector<64x64xbf16>, vector<8x64xf32> -> vector<8x64xf32>
    %385 = vector.extract_strided_slice %346 {offsets = [16, 0], sizes = [8, 64], strides = [1, 1]} : vector<32x64xf32> to vector<8x64xf32>
    %386 = arith.truncf %385 : vector<8x64xf32> to vector<8x64xbf16>
    %387 = vector.extract_strided_slice %343 {offsets = [16, 0], sizes = [8, 64], strides = [1, 1]} : vector<32x64xf32> to vector<8x64xf32>
    %388 = arith.truncf %387 : vector<8x64xf32> to vector<8x64xbf16>
    %389 = vector.extract_strided_slice %344 {offsets = [16, 0], sizes = [8, 64], strides = [1, 1]} : vector<32x64xf32> to vector<8x64xf32>
    %390 = arith.truncf %389 : vector<8x64xf32> to vector<8x64xbf16>
    %cst_104 = arith.constant dense<0.000000e+00> : vector<64x64xf32>
    %391 = tpu.matmul %386, %388, %cst_104 {dimension_numbers = #tpu.dot_dimension_numbers<[0], [0], [1], [1], [0, 1, 1, 1], [], []>} : vector<8x64xbf16>, vector<8x64xbf16>, vector<64x64xf32> -> vector<64x64xf32>
    %cst_105 = arith.constant dense<0xFF800000> : vector<64xf32>
    %392 = vector.multi_reduction <maximumf>, %391, %cst_105 [1] : vector<64x64xf32> to vector<64xf32>
    %393 = vector.shape_cast %392 : vector<64xf32> to vector<64x1xf32>
    %394 = vector.broadcast %393 : vector<64x1xf32> to vector<64x64xf32>
    %395 = arith.subf %391, %394 : vector<64x64xf32>
    %396 = math.exp %395 : vector<64x64xf32>
    %cst_106 = arith.constant dense<0.000000e+00> : vector<64xf32>
    %397 = vector.multi_reduction <add>, %396, %cst_106 [1] : vector<64x64xf32> to vector<64xf32>
    %398 = vector.shape_cast %397 : vector<64xf32> to vector<64x1xf32>
    %399 = tpu.reciprocal %398 {approx = true} : vector<64x1xf32> -> vector<64x1xf32>
    %400 = vector.broadcast %399 : vector<64x1xf32> to vector<64x64xf32>
    %401 = arith.mulf %396, %400 : vector<64x64xf32>
    %402 = arith.truncf %401 : vector<64x64xf32> to vector<64x64xbf16>
    %cst_107 = arith.constant dense<0.000000e+00> : vector<8x64xf32>
    %403 = tpu.matmul %390, %402, %cst_107 {dimension_numbers = #tpu.dot_dimension_numbers<[1], [1], [0], [0], [0, 0, 1, 0], [], []>} : vector<8x64xbf16>, vector<64x64xbf16>, vector<8x64xf32> -> vector<8x64xf32>
    %404 = vector.extract_strided_slice %346 {offsets = [24, 0], sizes = [8, 64], strides = [1, 1]} : vector<32x64xf32> to vector<8x64xf32>
    %405 = arith.truncf %404 : vector<8x64xf32> to vector<8x64xbf16>
    %406 = vector.extract_strided_slice %343 {offsets = [24, 0], sizes = [8, 64], strides = [1, 1]} : vector<32x64xf32> to vector<8x64xf32>
    %407 = arith.truncf %406 : vector<8x64xf32> to vector<8x64xbf16>
    %408 = vector.extract_strided_slice %344 {offsets = [24, 0], sizes = [8, 64], strides = [1, 1]} : vector<32x64xf32> to vector<8x64xf32>
    %409 = arith.truncf %408 : vector<8x64xf32> to vector<8x64xbf16>
    %cst_108 = arith.constant dense<0.000000e+00> : vector<64x64xf32>
    %410 = tpu.matmul %405, %407, %cst_108 {dimension_numbers = #tpu.dot_dimension_numbers<[0], [0], [1], [1], [0, 1, 1, 1], [], []>} : vector<8x64xbf16>, vector<8x64xbf16>, vector<64x64xf32> -> vector<64x64xf32>
    %cst_109 = arith.constant dense<0xFF800000> : vector<64xf32>
    %411 = vector.multi_reduction <maximumf>, %410, %cst_109 [1] : vector<64x64xf32> to vector<64xf32>
    %412 = vector.shape_cast %411 : vector<64xf32> to vector<64x1xf32>
    %413 = vector.broadcast %412 : vector<64x1xf32> to vector<64x64xf32>
    %414 = arith.subf %410, %413 : vector<64x64xf32>
    %415 = math.exp %414 : vector<64x64xf32>
    %cst_110 = arith.constant dense<0.000000e+00> : vector<64xf32>
    %416 = vector.multi_reduction <add>, %415, %cst_110 [1] : vector<64x64xf32> to vector<64xf32>
    %417 = vector.shape_cast %416 : vector<64xf32> to vector<64x1xf32>
    %418 = tpu.reciprocal %417 {approx = true} : vector<64x1xf32> -> vector<64x1xf32>
    %419 = vector.broadcast %418 : vector<64x1xf32> to vector<64x64xf32>
    %420 = arith.mulf %415, %419 : vector<64x64xf32>
    %421 = arith.truncf %420 : vector<64x64xf32> to vector<64x64xbf16>
    %cst_111 = arith.constant dense<0.000000e+00> : vector<8x64xf32>
    %422 = tpu.matmul %409, %421, %cst_111 {dimension_numbers = #tpu.dot_dimension_numbers<[1], [1], [0], [0], [0, 0, 1, 0], [], []>} : vector<8x64xbf16>, vector<64x64xbf16>, vector<8x64xf32> -> vector<8x64xf32>
    %423 = tpu.concatenate %365, %384, %403, %422 in 0 : vector<8x64xf32>, vector<8x64xf32>, vector<8x64xf32>, vector<8x64xf32> -> vector<32x64xf32>
    %424 = arith.truncf %423 : vector<32x64xf32> to vector<32x64xbf16>
    %cst_112 = arith.constant dense<0.000000e+00> : vector<32x64xf32>
    %425 = tpu.matmul %20, %424, %cst_112 {dimension_numbers = #tpu.dot_dimension_numbers<[1], [0], [0], [1], [0, 0, 1, 1], [], []>} : vector<32x32xbf16>, vector<32x64xbf16>, vector<32x64xf32> -> vector<32x64xf32>
    %426 = vector.broadcast %22 : vector<32x1xf32> to vector<32x64xf32>
    %427 = arith.addf %425, %426 : vector<32x64xf32>
    %428 = arith.addf %427, %229 : vector<32x64xf32>
    %429 = vector.extract_strided_slice %23 {offsets = [0, 0], sizes = [32, 32], strides = [1, 1]} : vector<96x32xbf16> to vector<32x32xbf16>
    %430 = arith.truncf %428 : vector<32x64xf32> to vector<32x64xbf16>
    %cst_113 = arith.constant dense<0.000000e+00> : vector<32x64xf32>
    %431 = tpu.matmul %429, %430, %cst_113 {dimension_numbers = #tpu.dot_dimension_numbers<[1], [0], [0], [1], [0, 0, 1, 1], [], []>} : vector<32x32xbf16>, vector<32x64xbf16>, vector<32x64xf32> -> vector<32x64xf32>
    %432 = vector.extract_strided_slice %25 {offsets = [0, 0], sizes = [32, 1], strides = [1, 1]} : vector<96x1xf32> to vector<32x1xf32>
    %433 = vector.broadcast %432 : vector<32x1xf32> to vector<32x64xf32>
    %434 = arith.addf %431, %433 : vector<32x64xf32>
    %435 = vector.extract_strided_slice %23 {offsets = [32, 0], sizes = [64, 32], strides = [1, 1]} : vector<96x32xbf16> to vector<64x32xbf16>
    %436 = arith.truncf %326 : vector<32x16xf32> to vector<32x16xbf16>
    %cst_114 = arith.constant dense<0.000000e+00> : vector<64x16xf32>
    %437 = tpu.matmul %435, %436, %cst_114 {dimension_numbers = #tpu.dot_dimension_numbers<[1], [0], [0], [1], [0, 0, 1, 1], [], []>} : vector<64x32xbf16>, vector<32x16xbf16>, vector<64x16xf32> -> vector<64x16xf32>
    %438 = vector.extract_strided_slice %25 {offsets = [32, 0], sizes = [64, 1], strides = [1, 1]} : vector<96x1xf32> to vector<64x1xf32>
    %439 = vector.broadcast %438 : vector<64x1xf32> to vector<64x16xf32>
    %440 = arith.addf %437, %439 : vector<64x16xf32>
    %441 = vector.extract_strided_slice %440 {offsets = [0, 0], sizes = [32, 16], strides = [1, 1]} : vector<64x16xf32> to vector<32x16xf32>
    %442 = vector.extract_strided_slice %440 {offsets = [32, 0], sizes = [32, 16], strides = [1, 1]} : vector<64x16xf32> to vector<32x16xf32>
    %cst_115 = arith.constant 0.353553385 : f32
    %443 = vector.broadcast %cst_115 : f32 to vector<32x64xf32>
    %444 = arith.mulf %434, %443 : vector<32x64xf32>
    %445 = vector.extract_strided_slice %444 {offsets = [0, 0], sizes = [8, 64], strides = [1, 1]} : vector<32x64xf32> to vector<8x64xf32>
    %446 = arith.truncf %445 : vector<8x64xf32> to vector<8x64xbf16>
    %447 = vector.extract_strided_slice %441 {offsets = [0, 0], sizes = [8, 16], strides = [1, 1]} : vector<32x16xf32> to vector<8x16xf32>
    %448 = arith.truncf %447 : vector<8x16xf32> to vector<8x16xbf16>
    %449 = vector.extract_strided_slice %442 {offsets = [0, 0], sizes = [8, 16], strides = [1, 1]} : vector<32x16xf32> to vector<8x16xf32>
    %450 = arith.truncf %449 : vector<8x16xf32> to vector<8x16xbf16>
    %cst_116 = arith.constant dense<0.000000e+00> : vector<64x16xf32>
    %451 = tpu.matmul %446, %448, %cst_116 {dimension_numbers = #tpu.dot_dimension_numbers<[0], [0], [1], [1], [0, 1, 1, 1], [], []>} : vector<8x64xbf16>, vector<8x16xbf16>, vector<64x16xf32> -> vector<64x16xf32>
    %cst_117 = arith.constant dense<0xFF800000> : vector<64xf32>
    %452 = vector.multi_reduction <maximumf>, %451, %cst_117 [1] : vector<64x16xf32> to vector<64xf32>
    %453 = vector.shape_cast %452 : vector<64xf32> to vector<64x1xf32>
    %454 = vector.broadcast %453 : vector<64x1xf32> to vector<64x16xf32>
    %455 = arith.subf %451, %454 : vector<64x16xf32>
    %456 = math.exp %455 : vector<64x16xf32>
    %cst_118 = arith.constant dense<0.000000e+00> : vector<64xf32>
    %457 = vector.multi_reduction <add>, %456, %cst_118 [1] : vector<64x16xf32> to vector<64xf32>
    %458 = vector.shape_cast %457 : vector<64xf32> to vector<64x1xf32>
    %459 = tpu.reciprocal %458 {approx = true} : vector<64x1xf32> -> vector<64x1xf32>
    %460 = vector.broadcast %459 : vector<64x1xf32> to vector<64x16xf32>
    %461 = arith.mulf %456, %460 : vector<64x16xf32>
    %462 = arith.truncf %461 : vector<64x16xf32> to vector<64x16xbf16>
    %cst_119 = arith.constant dense<0.000000e+00> : vector<8x64xf32>
    %463 = tpu.matmul %450, %462, %cst_119 {dimension_numbers = #tpu.dot_dimension_numbers<[1], [1], [0], [0], [0, 0, 1, 0], [], []>} : vector<8x16xbf16>, vector<64x16xbf16>, vector<8x64xf32> -> vector<8x64xf32>
    %464 = vector.extract_strided_slice %444 {offsets = [8, 0], sizes = [8, 64], strides = [1, 1]} : vector<32x64xf32> to vector<8x64xf32>
    %465 = arith.truncf %464 : vector<8x64xf32> to vector<8x64xbf16>
    %466 = vector.extract_strided_slice %441 {offsets = [8, 0], sizes = [8, 16], strides = [1, 1]} : vector<32x16xf32> to vector<8x16xf32>
    %467 = arith.truncf %466 : vector<8x16xf32> to vector<8x16xbf16>
    %468 = vector.extract_strided_slice %442 {offsets = [8, 0], sizes = [8, 16], strides = [1, 1]} : vector<32x16xf32> to vector<8x16xf32>
    %469 = arith.truncf %468 : vector<8x16xf32> to vector<8x16xbf16>
    %cst_120 = arith.constant dense<0.000000e+00> : vector<64x16xf32>
    %470 = tpu.matmul %465, %467, %cst_120 {dimension_numbers = #tpu.dot_dimension_numbers<[0], [0], [1], [1], [0, 1, 1, 1], [], []>} : vector<8x64xbf16>, vector<8x16xbf16>, vector<64x16xf32> -> vector<64x16xf32>
    %cst_121 = arith.constant dense<0xFF800000> : vector<64xf32>
    %471 = vector.multi_reduction <maximumf>, %470, %cst_121 [1] : vector<64x16xf32> to vector<64xf32>
    %472 = vector.shape_cast %471 : vector<64xf32> to vector<64x1xf32>
    %473 = vector.broadcast %472 : vector<64x1xf32> to vector<64x16xf32>
    %474 = arith.subf %470, %473 : vector<64x16xf32>
    %475 = math.exp %474 : vector<64x16xf32>
    %cst_122 = arith.constant dense<0.000000e+00> : vector<64xf32>
    %476 = vector.multi_reduction <add>, %475, %cst_122 [1] : vector<64x16xf32> to vector<64xf32>
    %477 = vector.shape_cast %476 : vector<64xf32> to vector<64x1xf32>
    %478 = tpu.reciprocal %477 {approx = true} : vector<64x1xf32> -> vector<64x1xf32>
    %479 = vector.broadcast %478 : vector<64x1xf32> to vector<64x16xf32>
    %480 = arith.mulf %475, %479 : vector<64x16xf32>
    %481 = arith.truncf %480 : vector<64x16xf32> to vector<64x16xbf16>
    %cst_123 = arith.constant dense<0.000000e+00> : vector<8x64xf32>
    %482 = tpu.matmul %469, %481, %cst_123 {dimension_numbers = #tpu.dot_dimension_numbers<[1], [1], [0], [0], [0, 0, 1, 0], [], []>} : vector<8x16xbf16>, vector<64x16xbf16>, vector<8x64xf32> -> vector<8x64xf32>
    %483 = vector.extract_strided_slice %444 {offsets = [16, 0], sizes = [8, 64], strides = [1, 1]} : vector<32x64xf32> to vector<8x64xf32>
    %484 = arith.truncf %483 : vector<8x64xf32> to vector<8x64xbf16>
    %485 = vector.extract_strided_slice %441 {offsets = [16, 0], sizes = [8, 16], strides = [1, 1]} : vector<32x16xf32> to vector<8x16xf32>
    %486 = arith.truncf %485 : vector<8x16xf32> to vector<8x16xbf16>
    %487 = vector.extract_strided_slice %442 {offsets = [16, 0], sizes = [8, 16], strides = [1, 1]} : vector<32x16xf32> to vector<8x16xf32>
    %488 = arith.truncf %487 : vector<8x16xf32> to vector<8x16xbf16>
    %cst_124 = arith.constant dense<0.000000e+00> : vector<64x16xf32>
    %489 = tpu.matmul %484, %486, %cst_124 {dimension_numbers = #tpu.dot_dimension_numbers<[0], [0], [1], [1], [0, 1, 1, 1], [], []>} : vector<8x64xbf16>, vector<8x16xbf16>, vector<64x16xf32> -> vector<64x16xf32>
    %cst_125 = arith.constant dense<0xFF800000> : vector<64xf32>
    %490 = vector.multi_reduction <maximumf>, %489, %cst_125 [1] : vector<64x16xf32> to vector<64xf32>
    %491 = vector.shape_cast %490 : vector<64xf32> to vector<64x1xf32>
    %492 = vector.broadcast %491 : vector<64x1xf32> to vector<64x16xf32>
    %493 = arith.subf %489, %492 : vector<64x16xf32>
    %494 = math.exp %493 : vector<64x16xf32>
    %cst_126 = arith.constant dense<0.000000e+00> : vector<64xf32>
    %495 = vector.multi_reduction <add>, %494, %cst_126 [1] : vector<64x16xf32> to vector<64xf32>
    %496 = vector.shape_cast %495 : vector<64xf32> to vector<64x1xf32>
    %497 = tpu.reciprocal %496 {approx = true} : vector<64x1xf32> -> vector<64x1xf32>
    %498 = vector.broadcast %497 : vector<64x1xf32> to vector<64x16xf32>
    %499 = arith.mulf %494, %498 : vector<64x16xf32>
    %500 = arith.truncf %499 : vector<64x16xf32> to vector<64x16xbf16>
    %cst_127 = arith.constant dense<0.000000e+00> : vector<8x64xf32>
    %501 = tpu.matmul %488, %500, %cst_127 {dimension_numbers = #tpu.dot_dimension_numbers<[1], [1], [0], [0], [0, 0, 1, 0], [], []>} : vector<8x16xbf16>, vector<64x16xbf16>, vector<8x64xf32> -> vector<8x64xf32>
    %502 = vector.extract_strided_slice %444 {offsets = [24, 0], sizes = [8, 64], strides = [1, 1]} : vector<32x64xf32> to vector<8x64xf32>
    %503 = arith.truncf %502 : vector<8x64xf32> to vector<8x64xbf16>
    %504 = vector.extract_strided_slice %441 {offsets = [24, 0], sizes = [8, 16], strides = [1, 1]} : vector<32x16xf32> to vector<8x16xf32>
    %505 = arith.truncf %504 : vector<8x16xf32> to vector<8x16xbf16>
    %506 = vector.extract_strided_slice %442 {offsets = [24, 0], sizes = [8, 16], strides = [1, 1]} : vector<32x16xf32> to vector<8x16xf32>
    %507 = arith.truncf %506 : vector<8x16xf32> to vector<8x16xbf16>
    %cst_128 = arith.constant dense<0.000000e+00> : vector<64x16xf32>
    %508 = tpu.matmul %503, %505, %cst_128 {dimension_numbers = #tpu.dot_dimension_numbers<[0], [0], [1], [1], [0, 1, 1, 1], [], []>} : vector<8x64xbf16>, vector<8x16xbf16>, vector<64x16xf32> -> vector<64x16xf32>
    %cst_129 = arith.constant dense<0xFF800000> : vector<64xf32>
    %509 = vector.multi_reduction <maximumf>, %508, %cst_129 [1] : vector<64x16xf32> to vector<64xf32>
    %510 = vector.shape_cast %509 : vector<64xf32> to vector<64x1xf32>
    %511 = vector.broadcast %510 : vector<64x1xf32> to vector<64x16xf32>
    %512 = arith.subf %508, %511 : vector<64x16xf32>
    %513 = math.exp %512 : vector<64x16xf32>
    %cst_130 = arith.constant dense<0.000000e+00> : vector<64xf32>
    %514 = vector.multi_reduction <add>, %513, %cst_130 [1] : vector<64x16xf32> to vector<64xf32>
    %515 = vector.shape_cast %514 : vector<64xf32> to vector<64x1xf32>
    %516 = tpu.reciprocal %515 {approx = true} : vector<64x1xf32> -> vector<64x1xf32>
    %517 = vector.broadcast %516 : vector<64x1xf32> to vector<64x16xf32>
    %518 = arith.mulf %513, %517 : vector<64x16xf32>
    %519 = arith.truncf %518 : vector<64x16xf32> to vector<64x16xbf16>
    %cst_131 = arith.constant dense<0.000000e+00> : vector<8x64xf32>
    %520 = tpu.matmul %507, %519, %cst_131 {dimension_numbers = #tpu.dot_dimension_numbers<[1], [1], [0], [0], [0, 0, 1, 0], [], []>} : vector<8x16xbf16>, vector<64x16xbf16>, vector<8x64xf32> -> vector<8x64xf32>
    %521 = tpu.concatenate %463, %482, %501, %520 in 0 : vector<8x64xf32>, vector<8x64xf32>, vector<8x64xf32>, vector<8x64xf32> -> vector<32x64xf32>
    %522 = arith.truncf %521 : vector<32x64xf32> to vector<32x64xbf16>
    %cst_132 = arith.constant dense<0.000000e+00> : vector<32x64xf32>
    %523 = tpu.matmul %24, %522, %cst_132 {dimension_numbers = #tpu.dot_dimension_numbers<[1], [0], [0], [1], [0, 0, 1, 1], [], []>} : vector<32x32xbf16>, vector<32x64xbf16>, vector<32x64xf32> -> vector<32x64xf32>
    %524 = vector.broadcast %26 : vector<32x1xf32> to vector<32x64xf32>
    %525 = arith.addf %523, %524 : vector<32x64xf32>
    %526 = vector.extract_strided_slice %27 {offsets = [0, 0], sizes = [32, 32], strides = [1, 1]} : vector<96x32xbf16> to vector<32x32xbf16>
    %527 = arith.truncf %326 : vector<32x16xf32> to vector<32x16xbf16>
    %cst_133 = arith.constant dense<0.000000e+00> : vector<32x16xf32>
    %528 = tpu.matmul %526, %527, %cst_133 {dimension_numbers = #tpu.dot_dimension_numbers<[1], [0], [0], [1], [0, 0, 1, 1], [], []>} : vector<32x32xbf16>, vector<32x16xbf16>, vector<32x16xf32> -> vector<32x16xf32>
    %529 = vector.extract_strided_slice %29 {offsets = [0, 0], sizes = [32, 1], strides = [1, 1]} : vector<96x1xf32> to vector<32x1xf32>
    %530 = vector.broadcast %529 : vector<32x1xf32> to vector<32x16xf32>
    %531 = arith.addf %528, %530 : vector<32x16xf32>
    %532 = vector.extract_strided_slice %27 {offsets = [32, 0], sizes = [64, 32], strides = [1, 1]} : vector<96x32xbf16> to vector<64x32xbf16>
    %533 = arith.truncf %525 : vector<32x64xf32> to vector<32x64xbf16>
    %cst_134 = arith.constant dense<0.000000e+00> : vector<64x64xf32>
    %534 = tpu.matmul %532, %533, %cst_134 {dimension_numbers = #tpu.dot_dimension_numbers<[1], [0], [0], [1], [0, 0, 1, 1], [], []>} : vector<64x32xbf16>, vector<32x64xbf16>, vector<64x64xf32> -> vector<64x64xf32>
    %535 = vector.extract_strided_slice %29 {offsets = [32, 0], sizes = [64, 1], strides = [1, 1]} : vector<96x1xf32> to vector<64x1xf32>
    %536 = vector.broadcast %535 : vector<64x1xf32> to vector<64x64xf32>
    %537 = arith.addf %534, %536 : vector<64x64xf32>
    %538 = vector.extract_strided_slice %537 {offsets = [0, 0], sizes = [32, 64], strides = [1, 1]} : vector<64x64xf32> to vector<32x64xf32>
    %539 = vector.extract_strided_slice %537 {offsets = [32, 0], sizes = [32, 64], strides = [1, 1]} : vector<64x64xf32> to vector<32x64xf32>
    %cst_135 = arith.constant 0.353553385 : f32
    %540 = vector.broadcast %cst_135 : f32 to vector<32x16xf32>
    %541 = arith.mulf %531, %540 : vector<32x16xf32>
    %542 = vector.extract_strided_slice %541 {offsets = [0, 0], sizes = [8, 16], strides = [1, 1]} : vector<32x16xf32> to vector<8x16xf32>
    %543 = arith.truncf %542 : vector<8x16xf32> to vector<8x16xbf16>
    %544 = vector.extract_strided_slice %538 {offsets = [0, 0], sizes = [8, 64], strides = [1, 1]} : vector<32x64xf32> to vector<8x64xf32>
    %545 = arith.truncf %544 : vector<8x64xf32> to vector<8x64xbf16>
    %546 = vector.extract_strided_slice %539 {offsets = [0, 0], sizes = [8, 64], strides = [1, 1]} : vector<32x64xf32> to vector<8x64xf32>
    %547 = arith.truncf %546 : vector<8x64xf32> to vector<8x64xbf16>
    %cst_136 = arith.constant dense<0.000000e+00> : vector<16x64xf32>
    %548 = tpu.matmul %543, %545, %cst_136 {dimension_numbers = #tpu.dot_dimension_numbers<[0], [0], [1], [1], [0, 1, 1, 1], [], []>} : vector<8x16xbf16>, vector<8x64xbf16>, vector<16x64xf32> -> vector<16x64xf32>
    %cst_137 = arith.constant dense<0xFF800000> : vector<16xf32>
    %549 = vector.multi_reduction <maximumf>, %548, %cst_137 [1] : vector<16x64xf32> to vector<16xf32>
    %550 = vector.shape_cast %549 : vector<16xf32> to vector<16x1xf32>
    %551 = vector.broadcast %550 : vector<16x1xf32> to vector<16x64xf32>
    %552 = arith.subf %548, %551 : vector<16x64xf32>
    %553 = math.exp %552 : vector<16x64xf32>
    %cst_138 = arith.constant dense<0.000000e+00> : vector<16xf32>
    %554 = vector.multi_reduction <add>, %553, %cst_138 [1] : vector<16x64xf32> to vector<16xf32>
    %555 = vector.shape_cast %554 : vector<16xf32> to vector<16x1xf32>
    %556 = tpu.reciprocal %555 {approx = true} : vector<16x1xf32> -> vector<16x1xf32>
    %557 = vector.broadcast %556 : vector<16x1xf32> to vector<16x64xf32>
    %558 = arith.mulf %553, %557 : vector<16x64xf32>
    %559 = arith.truncf %558 : vector<16x64xf32> to vector<16x64xbf16>
    %cst_139 = arith.constant dense<0.000000e+00> : vector<8x16xf32>
    %560 = tpu.matmul %547, %559, %cst_139 {dimension_numbers = #tpu.dot_dimension_numbers<[1], [1], [0], [0], [0, 0, 1, 0], [], []>} : vector<8x64xbf16>, vector<16x64xbf16>, vector<8x16xf32> -> vector<8x16xf32>
    %561 = vector.extract_strided_slice %541 {offsets = [8, 0], sizes = [8, 16], strides = [1, 1]} : vector<32x16xf32> to vector<8x16xf32>
    %562 = arith.truncf %561 : vector<8x16xf32> to vector<8x16xbf16>
    %563 = vector.extract_strided_slice %538 {offsets = [8, 0], sizes = [8, 64], strides = [1, 1]} : vector<32x64xf32> to vector<8x64xf32>
    %564 = arith.truncf %563 : vector<8x64xf32> to vector<8x64xbf16>
    %565 = vector.extract_strided_slice %539 {offsets = [8, 0], sizes = [8, 64], strides = [1, 1]} : vector<32x64xf32> to vector<8x64xf32>
    %566 = arith.truncf %565 : vector<8x64xf32> to vector<8x64xbf16>
    %cst_140 = arith.constant dense<0.000000e+00> : vector<16x64xf32>
    %567 = tpu.matmul %562, %564, %cst_140 {dimension_numbers = #tpu.dot_dimension_numbers<[0], [0], [1], [1], [0, 1, 1, 1], [], []>} : vector<8x16xbf16>, vector<8x64xbf16>, vector<16x64xf32> -> vector<16x64xf32>
    %cst_141 = arith.constant dense<0xFF800000> : vector<16xf32>
    %568 = vector.multi_reduction <maximumf>, %567, %cst_141 [1] : vector<16x64xf32> to vector<16xf32>
    %569 = vector.shape_cast %568 : vector<16xf32> to vector<16x1xf32>
    %570 = vector.broadcast %569 : vector<16x1xf32> to vector<16x64xf32>
    %571 = arith.subf %567, %570 : vector<16x64xf32>
    %572 = math.exp %571 : vector<16x64xf32>
    %cst_142 = arith.constant dense<0.000000e+00> : vector<16xf32>
    %573 = vector.multi_reduction <add>, %572, %cst_142 [1] : vector<16x64xf32> to vector<16xf32>
    %574 = vector.shape_cast %573 : vector<16xf32> to vector<16x1xf32>
    %575 = tpu.reciprocal %574 {approx = true} : vector<16x1xf32> -> vector<16x1xf32>
    %576 = vector.broadcast %575 : vector<16x1xf32> to vector<16x64xf32>
    %577 = arith.mulf %572, %576 : vector<16x64xf32>
    %578 = arith.truncf %577 : vector<16x64xf32> to vector<16x64xbf16>
    %cst_143 = arith.constant dense<0.000000e+00> : vector<8x16xf32>
    %579 = tpu.matmul %566, %578, %cst_143 {dimension_numbers = #tpu.dot_dimension_numbers<[1], [1], [0], [0], [0, 0, 1, 0], [], []>} : vector<8x64xbf16>, vector<16x64xbf16>, vector<8x16xf32> -> vector<8x16xf32>
    %580 = vector.extract_strided_slice %541 {offsets = [16, 0], sizes = [8, 16], strides = [1, 1]} : vector<32x16xf32> to vector<8x16xf32>
    %581 = arith.truncf %580 : vector<8x16xf32> to vector<8x16xbf16>
    %582 = vector.extract_strided_slice %538 {offsets = [16, 0], sizes = [8, 64], strides = [1, 1]} : vector<32x64xf32> to vector<8x64xf32>
    %583 = arith.truncf %582 : vector<8x64xf32> to vector<8x64xbf16>
    %584 = vector.extract_strided_slice %539 {offsets = [16, 0], sizes = [8, 64], strides = [1, 1]} : vector<32x64xf32> to vector<8x64xf32>
    %585 = arith.truncf %584 : vector<8x64xf32> to vector<8x64xbf16>
    %cst_144 = arith.constant dense<0.000000e+00> : vector<16x64xf32>
    %586 = tpu.matmul %581, %583, %cst_144 {dimension_numbers = #tpu.dot_dimension_numbers<[0], [0], [1], [1], [0, 1, 1, 1], [], []>} : vector<8x16xbf16>, vector<8x64xbf16>, vector<16x64xf32> -> vector<16x64xf32>
    %cst_145 = arith.constant dense<0xFF800000> : vector<16xf32>
    %587 = vector.multi_reduction <maximumf>, %586, %cst_145 [1] : vector<16x64xf32> to vector<16xf32>
    %588 = vector.shape_cast %587 : vector<16xf32> to vector<16x1xf32>
    %589 = vector.broadcast %588 : vector<16x1xf32> to vector<16x64xf32>
    %590 = arith.subf %586, %589 : vector<16x64xf32>
    %591 = math.exp %590 : vector<16x64xf32>
    %cst_146 = arith.constant dense<0.000000e+00> : vector<16xf32>
    %592 = vector.multi_reduction <add>, %591, %cst_146 [1] : vector<16x64xf32> to vector<16xf32>
    %593 = vector.shape_cast %592 : vector<16xf32> to vector<16x1xf32>
    %594 = tpu.reciprocal %593 {approx = true} : vector<16x1xf32> -> vector<16x1xf32>
    %595 = vector.broadcast %594 : vector<16x1xf32> to vector<16x64xf32>
    %596 = arith.mulf %591, %595 : vector<16x64xf32>
    %597 = arith.truncf %596 : vector<16x64xf32> to vector<16x64xbf16>
    %cst_147 = arith.constant dense<0.000000e+00> : vector<8x16xf32>
    %598 = tpu.matmul %585, %597, %cst_147 {dimension_numbers = #tpu.dot_dimension_numbers<[1], [1], [0], [0], [0, 0, 1, 0], [], []>} : vector<8x64xbf16>, vector<16x64xbf16>, vector<8x16xf32> -> vector<8x16xf32>
    %599 = vector.extract_strided_slice %541 {offsets = [24, 0], sizes = [8, 16], strides = [1, 1]} : vector<32x16xf32> to vector<8x16xf32>
    %600 = arith.truncf %599 : vector<8x16xf32> to vector<8x16xbf16>
    %601 = vector.extract_strided_slice %538 {offsets = [24, 0], sizes = [8, 64], strides = [1, 1]} : vector<32x64xf32> to vector<8x64xf32>
    %602 = arith.truncf %601 : vector<8x64xf32> to vector<8x64xbf16>
    %603 = vector.extract_strided_slice %539 {offsets = [24, 0], sizes = [8, 64], strides = [1, 1]} : vector<32x64xf32> to vector<8x64xf32>
    %604 = arith.truncf %603 : vector<8x64xf32> to vector<8x64xbf16>
    %cst_148 = arith.constant dense<0.000000e+00> : vector<16x64xf32>
    %605 = tpu.matmul %600, %602, %cst_148 {dimension_numbers = #tpu.dot_dimension_numbers<[0], [0], [1], [1], [0, 1, 1, 1], [], []>} : vector<8x16xbf16>, vector<8x64xbf16>, vector<16x64xf32> -> vector<16x64xf32>
    %cst_149 = arith.constant dense<0xFF800000> : vector<16xf32>
    %606 = vector.multi_reduction <maximumf>, %605, %cst_149 [1] : vector<16x64xf32> to vector<16xf32>
    %607 = vector.shape_cast %606 : vector<16xf32> to vector<16x1xf32>
    %608 = vector.broadcast %607 : vector<16x1xf32> to vector<16x64xf32>
    %609 = arith.subf %605, %608 : vector<16x64xf32>
    %610 = math.exp %609 : vector<16x64xf32>
    %cst_150 = arith.constant dense<0.000000e+00> : vector<16xf32>
    %611 = vector.multi_reduction <add>, %610, %cst_150 [1] : vector<16x64xf32> to vector<16xf32>
    %612 = vector.shape_cast %611 : vector<16xf32> to vector<16x1xf32>
    %613 = tpu.reciprocal %612 {approx = true} : vector<16x1xf32> -> vector<16x1xf32>
    %614 = vector.broadcast %613 : vector<16x1xf32> to vector<16x64xf32>
    %615 = arith.mulf %610, %614 : vector<16x64xf32>
    %616 = arith.truncf %615 : vector<16x64xf32> to vector<16x64xbf16>
    %cst_151 = arith.constant dense<0.000000e+00> : vector<8x16xf32>
    %617 = tpu.matmul %604, %616, %cst_151 {dimension_numbers = #tpu.dot_dimension_numbers<[1], [1], [0], [0], [0, 0, 1, 0], [], []>} : vector<8x64xbf16>, vector<16x64xbf16>, vector<8x16xf32> -> vector<8x16xf32>
    %618 = tpu.concatenate %560, %579, %598, %617 in 0 : vector<8x16xf32>, vector<8x16xf32>, vector<8x16xf32>, vector<8x16xf32> -> vector<32x16xf32>
    %619 = arith.truncf %618 : vector<32x16xf32> to vector<32x16xbf16>
    %cst_152 = arith.constant dense<0.000000e+00> : vector<32x16xf32>
    %620 = tpu.matmul %28, %619, %cst_152 {dimension_numbers = #tpu.dot_dimension_numbers<[1], [0], [0], [1], [0, 0, 1, 1], [], []>} : vector<32x32xbf16>, vector<32x16xbf16>, vector<32x16xf32> -> vector<32x16xf32>
    %621 = vector.broadcast %30 : vector<32x1xf32> to vector<32x16xf32>
    %622 = arith.addf %620, %621 : vector<32x16xf32>
    %c0_153 = arith.constant 0 : index
    %c0_154 = arith.constant 0 : index
    %623 = vector.load %arg7[%c0_153, %c0_154] : memref<24x64xbf16, #tpu.memory_space<vmem>>, vector<8x64xbf16>
    %c384 = arith.constant 384 : index
    %c0_155 = arith.constant 0 : index
    %624 = vector.load %arg6[%c384, %c0_155] : memref<512x32xbf16, #tpu.memory_space<vmem>>, vector<64x32xbf16>
    %625 = arith.truncf %525 : vector<32x64xf32> to vector<32x64xbf16>
    %cst_156 = arith.constant dense<0.000000e+00> : vector<64x64xf32>
    %626 = tpu.matmul %624, %625, %cst_156 {dimension_numbers = #tpu.dot_dimension_numbers<[1], [0], [0], [1], [0, 0, 1, 1], [], []>} : vector<64x32xbf16>, vector<32x64xbf16>, vector<64x64xf32> -> vector<64x64xf32>
    %c448 = arith.constant 448 : index
    %c0_157 = arith.constant 0 : index
    %627 = vector.load %arg8[%c448, %c0_157] : memref<600x1xf32, #tpu.memory_space<vmem>>, vector<64x1xf32>
    %628 = vector.broadcast %627 : vector<64x1xf32> to vector<64x64xf32>
    %629 = arith.addf %626, %628 : vector<64x64xf32>
    %630 = arith.truncf %629 : vector<64x64xf32> to vector<64x64xbf16>
    %cst_158 = arith.constant dense<0.000000e+00> : vector<8x64xf32>
    %631 = tpu.matmul %623, %630, %cst_158 {dimension_numbers = #tpu.dot_dimension_numbers<[1], [0], [0], [1], [0, 0, 1, 1], [], []>} : vector<8x64xbf16>, vector<64x64xbf16>, vector<8x64xf32> -> vector<8x64xf32>
    %c576 = arith.constant 576 : index
    %c0_159 = arith.constant 0 : index
    %632 = vector.load %arg8[%c576, %c0_159] : memref<600x1xf32, #tpu.memory_space<vmem>>, vector<8x1xf32>
    %633 = vector.broadcast %632 : vector<8x1xf32> to vector<8x64xf32>
    %634 = arith.addf %631, %633 : vector<8x64xf32>
    %cst_160 = arith.constant 0.000000e+00 : f32
    %635 = vector.broadcast %cst_160 : f32 to vector<8x64xf32>
    %636 = arith.cmpf oge, %634, %635 : vector<8x64xf32>
    %cst_161 = arith.constant 0.00999999977 : f32
    %637 = vector.broadcast %cst_161 : f32 to vector<8x64xf32>
    %638 = arith.mulf %637, %634 : vector<8x64xf32>
    %639 = arith.select %636, %634, %638 : vector<8x64xi1>, vector<8x64xf32>
    %c8 = arith.constant 8 : index
    %c0_162 = arith.constant 0 : index
    %640 = vector.load %arg7[%c8, %c0_162] : memref<24x64xbf16, #tpu.memory_space<vmem>>, vector<16x64xbf16>
    %c448_163 = arith.constant 448 : index
    %c0_164 = arith.constant 0 : index
    %641 = vector.load %arg6[%c448_163, %c0_164] : memref<512x32xbf16, #tpu.memory_space<vmem>>, vector<64x32xbf16>
    %642 = arith.truncf %622 : vector<32x16xf32> to vector<32x16xbf16>
    %cst_165 = arith.constant dense<0.000000e+00> : vector<64x16xf32>
    %643 = tpu.matmul %641, %642, %cst_165 {dimension_numbers = #tpu.dot_dimension_numbers<[1], [0], [0], [1], [0, 0, 1, 1], [], []>} : vector<64x32xbf16>, vector<32x16xbf16>, vector<64x16xf32> -> vector<64x16xf32>
    %c512 = arith.constant 512 : index
    %c0_166 = arith.constant 0 : index
    %644 = vector.load %arg8[%c512, %c0_166] : memref<600x1xf32, #tpu.memory_space<vmem>>, vector<64x1xf32>
    %645 = vector.broadcast %644 : vector<64x1xf32> to vector<64x16xf32>
    %646 = arith.addf %643, %645 : vector<64x16xf32>
    %647 = arith.truncf %646 : vector<64x16xf32> to vector<64x16xbf16>
    %cst_167 = arith.constant dense<0.000000e+00> : vector<16x16xf32>
    %648 = tpu.matmul %640, %647, %cst_167 {dimension_numbers = #tpu.dot_dimension_numbers<[1], [0], [0], [1], [0, 0, 1, 1], [], []>} : vector<16x64xbf16>, vector<64x16xbf16>, vector<16x16xf32> -> vector<16x16xf32>
    %c584 = arith.constant 584 : index
    %c0_168 = arith.constant 0 : index
    %649 = vector.load %arg8[%c584, %c0_168] : memref<600x1xf32, #tpu.memory_space<vmem>>, vector<16x1xf32>
    %650 = vector.broadcast %649 : vector<16x1xf32> to vector<16x16xf32>
    %651 = arith.addf %648, %650 : vector<16x16xf32>
    %cst_169 = arith.constant 0.000000e+00 : f32
    %652 = vector.broadcast %cst_169 : f32 to vector<16x16xf32>
    %653 = arith.cmpf oge, %651, %652 : vector<16x16xf32>
    %cst_170 = arith.constant 0.00999999977 : f32
    %654 = vector.broadcast %cst_170 : f32 to vector<16x16xf32>
    %655 = arith.mulf %654, %651 : vector<16x16xf32>
    %656 = arith.select %653, %651, %655 : vector<16x16xi1>, vector<16x16xf32>
    %c0_171 = arith.constant 0 : index
    %c0_172 = arith.constant 0 : index
    %c0_173 = arith.constant 0 : index
    %657 = vector.load %arg9[%c0_171, %c0_172, %c0_173] : memref<1x8x64xf32, #tpu.memory_space<vmem>>, vector<1x8x64xf32>
    %658 = vector.shape_cast %657 : vector<1x8x64xf32> to vector<8x64xf32>
    %659 = vector.shape_cast %639 : vector<8x64xf32> to vector<1x8x64xf32>
    tpu.vector_store %arg9[%c0_171, %c0_172, %c0_173], %659 {strides = array<i32>} : memref<1x8x64xf32, #tpu.memory_space<vmem>>, vector<1x8x64xf32>,
    %c0_174 = arith.constant 0 : index
    %c0_175 = arith.constant 0 : index
    %c0_176 = arith.constant 0 : index
    %660 = vector.load %arg10[%c0_174, %c0_175, %c0_176] : memref<1x16x16xf32, #tpu.memory_space<vmem>>, vector<1x16x16xf32>
    %661 = vector.shape_cast %660 : vector<1x16x16xf32> to vector<16x16xf32>
    %662 = vector.shape_cast %656 : vector<16x16xf32> to vector<1x16x16xf32>
    tpu.vector_store %arg10[%c0_174, %c0_175, %c0_176], %662 {strides = array<i32>} : memref<1x16x16xf32, #tpu.memory_space<vmem>>, vector<1x16x16xf32>,
    return
  }
  func.func @transform_0(%arg0: i32) -> (i32, i32, i32) {
    %c0_i32 = arith.constant 0 : i32
    %c0_i32_0 = arith.constant 0 : i32
    %c0_i32_1 = arith.constant 0 : i32
    return %arg0, %c0_i32, %c0_i32_0 : i32, i32, i32
  }
  func.func @transform_1(%arg0: i32) -> (i32, i32, i32) {
    %c0_i32 = arith.constant 0 : i32
    %c0_i32_0 = arith.constant 0 : i32
    %c0_i32_1 = arith.constant 0 : i32
    return %arg0, %c0_i32, %c0_i32_0 : i32, i32, i32
  }
  func.func @transform_2(%arg0: i32) -> (i32, i32, i32) {
    %c0_i32 = arith.constant 0 : i32
    %c0_i32_0 = arith.constant 0 : i32
    %c0_i32_1 = arith.constant 0 : i32
    return %arg0, %c0_i32, %c0_i32_0 : i32, i32, i32
  }
  func.func @transform_3(%arg0: i32) -> (i32, i32) {
    %c0_i32 = arith.constant 0 : i32
    %c0_i32_0 = arith.constant 0 : i32
    %c0_i32_1 = arith.constant 0 : i32
    return %c0_i32, %c0_i32_0 : i32, i32
  }
  func.func @transform_4(%arg0: i32) -> (i32, i32) {
    %c0_i32 = arith.constant 0 : i32
    %c0_i32_0 = arith.constant 0 : i32
    %c0_i32_1 = arith.constant 0 : i32
    return %c0_i32, %c0_i32_0 : i32, i32
  }
  func.func @transform_5(%arg0: i32) -> (i32, i32) {
    %c0_i32 = arith.constant 0 : i32
    %c0_i32_0 = arith.constant 0 : i32
    %c0_i32_1 = arith.constant 0 : i32
    return %c0_i32, %c0_i32_0 : i32, i32
  }
  func.func @transform_6(%arg0: i32) -> (i32, i32) {
    %c0_i32 = arith.constant 0 : i32
    %c0_i32_0 = arith.constant 0 : i32
    %c0_i32_1 = arith.constant 0 : i32
    return %c0_i32, %c0_i32_0 : i32, i32
  }
  func.func @transform_7(%arg0: i32) -> (i32, i32) {
    %c0_i32 = arith.constant 0 : i32
    %c0_i32_0 = arith.constant 0 : i32
    %c0_i32_1 = arith.constant 0 : i32
    return %c0_i32, %c0_i32_0 : i32, i32
  }
  func.func @transform_8(%arg0: i32) -> (i32, i32, i32) {
    %c0_i32 = arith.constant 0 : i32
    %c0_i32_0 = arith.constant 0 : i32
    %c0_i32_1 = arith.constant 0 : i32
    return %arg0, %c0_i32, %c0_i32_0 : i32, i32, i32
  }
  func.func @transform_9(%arg0: i32) -> (i32, i32, i32) {
    %c0_i32 = arith.constant 0 : i32
    %c0_i32_0 = arith.constant 0 : i32
    %c0_i32_1 = arith.constant 0 : i32
    return %arg0, %c0_i32, %c0_i32_0 : i32, i32, i32
  }
}

</mosaic_0001>

<bundles_post_ra>
// kernel: bidirectional_attention_forward.1
= control target key start
LH: loop header
LB: loop body
LE: loop exit
PB: predicated region body
PF: predicated region fallthrough
CT: control target
= control target key end

     0   :  { %s6654_s30 = smov 0   ;;  %s8801_s0 = inlined_call_operand.vmem [shape: f32[2,8,64], index: 0, kind: input, shape index: {}]   ;;  %s8802_s1 = inlined_call_operand.vmem [shape: f32[2,8,64], index: 1, kind: input, shape index: {}]   ;;  %s8803_s2 = inlined_call_operand.vmem [shape: f32[2,16,16], index: 2, kind: input, shape index: {}]   ;;  %s8804_s3 = inlined_call_operand.vmem [shape: bf16[32,8], index: 3, kind: input, shape index: {}]   ;;  %s8805_s4 = inlined_call_operand.vmem [shape: bf16[32,16], index: 4, kind: input, shape index: {}]   ;;  %s8806_s5 = inlined_call_operand.vmem [shape: bf16[512,32], index: 5, kind: input, shape index: {}]   ;;  %s8807_s6 = inlined_call_operand.vmem [shape: bf16[24,64], index: 6, kind: input, shape index: {}]   ;;  %s8808_s7 = inlined_call_operand.vmem [shape: f32[600,1], index: 7, kind: input, shape index: {}]   ;;  %s8809_s8 = inlined_call_operand.vmem [shape: f32[2,8,64], index: 8, kind: output, shape index: {0}]   ;;  %s8810_s9 = inlined_call_operand.vmem [shape: f32[2,16,16], index: 9, kind: output, shape index: {1}]  }
   0x1 LB: > { %s5565_s10 = sadd.s32 4294967295, %s6601_s30   ;;  %p5569_p0 = scmp.ge.s32.totalorder %s6601_s30, 1  ;;  %s6601_s30 = sphi %s6654_s30, %s20_s30  }
   0x2   : > { %p308_p1 = scmp.lt.s32.totalorder %s6601_s30, 3 }
   0x4   : > { %p309_p2 = pnand %p5569_p0, %p308_p1 }
   0x6   : > { %312 = sbr.rel (%p309_p2) target bundleno = 11047 (0x2b27), region = 52 }
   0xb   : > { %v389_v0 = vld [vmem:[%s8808_s7] sm:$0xff]  ;;  %v391_v1 = vld [vmem:[%s8808_s7 + $0x10] sm:$0xff]  ;;  %p356_p3 = scmp.lt.s32.totalorder %s5565_s10, 1  ;;  %v6603_v2 = vmov 0   ;;  %v390_v6 = vld [vmem:[%s8808_s7 + $0x8] sm:$0xff]  ;;  %vm430_vm0 = vcmask 1043456  }
   0xc   : > { %5936 = vset.pattern.permute.xlu0 %v6603_v2  ;;  %5937 = vset.pattern.permute.xlu1 %v6603_v2  ;;  %v392_v7 = vld [vmem:[%s8808_s7 + $0x18] sm:$0xff]  ;;  %v5887_v10 = vld [vmem:[%s8804_s3] sm:$0xff]  ;;  %vm423_vm1 = vcmask 64512   ;;  %v539_v12 = vld [vmem:[%s8808_s7 + $0x68] sm:$0xff]  ;;  %vm618_vm2 = vcmask 523264   ;;  %vm743_vm5 = vcmask 261120  }
   0xd   : > { %395 = vperm.xlu0 %5936, %v389_v0   ;;  %405 = vperm.xlu1 %5937, %v391_v1   ;;  %s8851_s10 = smov (!%p356_p3, %s5565_s10), 1  ;;  %v538_v11 = vld [vmem:[%s8808_s7 + $0x60] sm:$0xff]  ;;  %v536_v13 = vld [vmem:[%s8808_s7 + $0x50] sm:$0xff]  ;;  %v537_v14 = vld [vmem:[%s8808_s7 + $0x58] sm:$0xff]  ;;  %vm492_vm6 = vcmask 130048  }
   0xe   : > { %5938 = vset.pattern.permute.xlu2 %v6603_v2  ;;  %s6671_s15 = sshll.u32 %s8851_s10, 3  ;;  %v5888_v15 = vld [vmem:[%s8804_s3 + $0x8] sm:$0xff]  ;;  %v540_v16 = vld [vmem:[%s8808_s7 + $0x70] sm:$0xff]  ;;  %v541_v17 = vld [vmem:[%s8808_s7 + $0x78] sm:$0xff] }
   0xf   : > { %s359_s18 = scalar_lea.vmem %s8801_s0, %s6671_s15  ;;  %s363_s21 = scalar_lea.vmem %s8802_s1, %s6671_s15  ;;  %v5891_v2 = vld [vmem:[%s8806_s5] sm:$0xff] }
  0x10   : > { %v379_v3 = vld [vmem:[%s359_s18] sm:$0xff]  ;;  %s5885_s18 = sshll.u32 %s8851_s10, 4  ;;  %s372_s12 = scalar_lea.vmem %s8809_s8, %s6671_s15 }
  0x11   : > { %v380_v4 = vld [vmem:[%s363_s21] sm:$0xff]  ;;  %s368_s21 = scalar_lea.vmem %s8803_s2, %s5885_s18  ;;  %s377_s26 = scalar_lea.vmem %s8810_s9, %s5885_s18 }
  0x12   : > { %v381_v5 = vadd.f32 %v380_v4, %v379_v3  ;;  %v534_v3 = vld [vmem:[%s8808_s7 + $0x40] sm:$0xff]  ;;  %v535_v4 = vld [vmem:[%s8808_s7 + $0x48] sm:$0xff] }
  0x13   : > { %655 = vperm.xlu2 %5938, %v534_v3  }
  0x14   : > { %v388_v8 = vpack.c.bf16 %v381_v5, %v381_v5  ;;  %v5892_v5 = vld [vmem:[%s8806_s5 + $0x8] sm:$0xff] }
  0x15   : > { %400 = vperm.xlu0 %5936, %v390_v6   ;;  %410 = vperm.xlu1 %5937, %v392_v7   ;;  %v5893_v6 = vld [vmem:[%s8806_s5 + $0x10] sm:$0xff]  ;;  %v5894_v7 = vld [vmem:[%s8806_s5 + $0x18] sm:$0xff] }
  0x16   : > { %v432_v9 = vsel %vm430_vm0, %v388_v8, 0 }
  0x17   : > { %441 = vmatpush.bf16.msra.mxu0 %v432_v9 }
  0x1a   : > { %5585 = vmatmul.msk.bf16.vlgmr.msra.gmra.mxu0 %vm423_vm1, %v5887_v10  ;;  %v382_v10 = vld [vmem:[%s368_s21] sm:$0xff] }
  0x1b   : > { %660 = vperm.xlu2 %5938, %v535_v4  }
  0x1d   : > { %675 = vperm.xlu0 %5936, %v538_v11   ;;  %680 = vperm.xlu1 %5937, %v539_v12   ;;  %v383_v11 = vld [vmem:[%s368_s21 + $0x8] sm:$0xff] }
  0x1e   : > { %v457_v12 = vpack.c.bf16 %v383_v11, %v382_v10 }
  0x20   : > { %506 = vmatpush.bf16.msra.mxu3 %v457_v12 }
  0x25   : > { %665 = vperm.xlu0 %5936, %v536_v13   ;;  %670 = vperm.xlu1 %5937, %v537_v14  }
  0x2a   : > { %5586 = vmatmul.msk.bf16.gmra.mxu0 %vm423_vm1, %v5888_v15 }
  0x2d   : > { %685 = vperm.xlu0 %5936, %v540_v16   ;;  %690 = vperm.xlu1 %5937, %v541_v17  }
  0x6d   : > { %v6761_v8 = vpop.permute.xlu2 %655 }
  0x75   : > { %v6769_v14 = vpop.permute.xlu2 %660 }
  0x76   : > { %8824 = vst [vmem:[#allocation2_spill] sm:$0xff] %v6769_v14 }
  0x7f   : > { %v396_v19 = vpop.permute.xlu0 %395  ;;  %v406_v21 = vpop.permute.xlu1 %405 }
  0x87   : > { %v401_v22 = vpop.permute.xlu0 %400  ;;  %v411_v31 = vpop.permute.xlu1 %410 }
  0x97   : > { %v443_v18 = vpop.f32.mrf.mxu0 }
  0x98   : > { %v6716_v25 = vadd.f32 %v443_v18, %v396_v19  ;;  %v6772_v18 = vpop.permute.xlu0 %675 }
  0x9a   : > { %v614_v28 = vmul.f32 %v6716_v25, %v6716_v25 }
  0x9c   : > { %v619_v33 = vsel %vm618_vm2, %v614_v28, 0.0  ;;  %v5889_v28 = vld [vmem:[%s8805_s4] sm:$0xff] }
  0x9d   : > { %5595 = vmatmul.msk.bf16.vlgmr.msra.gmra.mxu3 %vm492_vm6, %v5889_v28 }
  0x9f   : > { %v445_v20 = vpop.f32.mrf.mxu0 }
  0xa0   : > { %v6714_v23 = vadd.f32 %v445_v20, %v401_v22  ;;  %v6774_v22 = vpop.permute.xlu1 %680 }
  0xa1   : > { %8825 = vst [vmem:[#allocation3_spill] sm:$0xff] %v6774_v22 }
  0xa2   : > { %v615_v27 = vmul.f32 %v6714_v23, %v6714_v23 }
  0xa4   : > { %v620_v30 = vsel %vm618_vm2, %v615_v27, 0.0  ;;  %v6776_v27 = vpop.permute.xlu0 %665 }
  0xa5   : > { %v621_v36 = vadd.f32 %v620_v30, %v619_v33  ;;  %8826 = vst [vmem:[#allocation4_spill] sm:$0xff] %v6776_v27 }
  0xa7   : > { %v448_v24 = vpop.f32.mrf.mxu0 }
  0xa8   : > { %v6718_v26 = vadd.f32 %v448_v24, %v406_v21  ;;  %v6783_v30 = vpop.permute.xlu1 %670 }
  0xa9   : > { %8827 = vst [vmem:[#allocation5_spill] sm:$0xff] %v6783_v30 }
  0xaa   : > { %v616_v29 = vmul.f32 %v6718_v26, %v6718_v26 }
  0xac   : > { %v622_v34 = vsel %vm618_vm2, %v616_v29, 0.0 }
  0xad   : > { %v623_v38 = vadd.f32 %v622_v34, %v621_v36 }
  0xaf   : > { %v450_v32 = vpop.f32.mrf.mxu0 }
  0xb0   : > { %v6729_v35 = vadd.f32 %v450_v32, %v411_v31 }
  0xb2   : > { %v617_v37 = vmul.f32 %v6729_v35, %v6729_v35 }
  0xb4   : > { %v624_v39 = vsel %vm618_vm2, %v617_v37, 0.0 }
  0xb5   : > { %v625_v40 = vadd.f32 %v624_v39, %v623_v38 }
  0xb7   : > { %v626_v41 = vrot.slane %v625_v40, 4 }
  0xb9   : > { %v627_v42 = vadd.f32 %v626_v41, %v625_v40  ;;  %v5890_v41 = vld [vmem:[%s8805_s4 + $0x8] sm:$0xff] }
  0xba   : > { %5596 = vmatmul.msk.bf16.gmra.mxu3 %vm492_vm6, %v5890_v41 }
  0xbb   : > { %v628_v43 = vrot.slane %v627_v42, 2 }
  0xbd   : > { %v629_v44 = vadd.f32 %v628_v43, %v627_v42 }
  0xbf   : > { %v630_v45 = vrot.slane %v629_v44, 1 }
  0xc1   : > { %v631_v46 = vadd.f32 %v630_v45, %v629_v44 }
  0xc3   : > { %5987 = vrsqrt.f32 %v631_v46  ;;  %vm639_vm3 = vcmp.eq.f32.partialorder %v631_v46, inf  ;;  %v642_v54 = vand.u32 2147483648, %v631_v46  ;;  %vm641_vm4 = vcmp.eq.f32.partialorder %v631_v46, 0.0 }
  0xc9   : > { %v5988_v47 = vpop.eup %5987 }
  0xca   : > { %v633_v48 = vmul.f32 %v5988_v47, %v631_v46 }
  0xcc   : > { %v634_v49 = vmul.f32 %v5988_v47, %v633_v48 }
  0xce   : > { %v635_v50 = vmul.f32 0.5, %v634_v49 }
  0xd0   : > { %v636_v51 = vsub.f32 1.5, %v635_v50 }
  0xd2   : > { %v637_v52 = vmul.f32 %v5988_v47, %v636_v51  ;;  %v6794_v47 = vpop.permute.xlu0 %685 }
  0xd3   : > { %8828 = vst [vmem:[#allocation6_spill] sm:$0xff] %v6794_v47 }
  0xd4   : > { %v638_v53 = vmul.f32 %v637_v52, %v631_v46  ;;  %v6798_v52 = vpop.permute.xlu1 %690 }
  0xd5   : > { %8829 = vst [vmem:[#allocation7_spill] sm:$0xff] %v6798_v52 }
  0xd6   : > { %v640_v55 = vsel %vm639_vm3, %v631_v46, %v638_v53 }
  0xd7   : > { %v643_v56 = vsel %vm641_vm4, %v642_v54, %v640_v55 }
  0xd8   : > { %v644_v57 = vmul.f32 0.25, %v643_v56 }
  0xda   : > { %v645_v58 = vadd.f32 1e-06, %v644_v57 }
  0xdc   : > { %5989 = vrcp.f32 %v645_v58 }
  0xe2   : > { %v5990_v59 = vpop.eup %5989 }
  0xe3   : > { %v649_v60 = vmul.f32 %v5990_v59, %v6718_v26  ;;  %v650_v61 = vmul.f32 %v5990_v59, %v6729_v35  ;;  %v647_v63 = vmul.f32 %v5990_v59, %v6716_v25  ;;  %v648_v0 = vmul.f32 %v5990_v59, %v6714_v23 }
  0xe5   : > { %v652_v62 = vpack.c.bf16 %v650_v61, %v649_v60  ;;  %v651_v1 = vpack.c.bf16 %v648_v0, %v647_v63 }
  0xe7   : > { %768 = vmatpush.bf16.msra.mxu2 %v652_v62 }
  0xeb   : > { %769 = vmatpush.bf16.msra.mxu2 %v651_v1 }
  0xee   : > { %5621 = vmatmul.msk.bf16.vlgmr.msra.gmra.mxu2 %vm743_vm5, %v5891_v2 }
  0xfe   : > { %5622 = vmatmul.msk.bf16.gmra.mxu2 %vm743_vm5, %v5892_v5 }
 0x10e   : > { %5623 = vmatmul.msk.bf16.gmra.mxu2 %vm743_vm5, %v5893_v6 }
 0x11e   : > { %5624 = vmatmul.msk.bf16.gmra.mxu2 %vm743_vm5, %v5894_v7 }
 0x120   : > { %v6814_v5 = vpop.f32.mrf.mxu3 }
 0x171   : > { %v771_v9 = vpop.f32.mrf.mxu2 }
 0x172   : > { %v772_v13 = vadd.f32 %v771_v9, %v6761_v8  ;;  %v6817_v9 = vpop.f32.mrf.mxu3 }
 0x174   : > { %v801_v16 = vmul.f32 0.35355338, %v772_v13 }
 0x176   : > { %v805_v20 = vpack.c.bf16 %v801_v16, %v801_v16 }
 0x179   : > { %v773_v15 = vpop.f32.mrf.mxu2 }
 0x17a   : > { %v774_v17 = vadd.f32 %v773_v15, %v6769_v14  ;;  %v6821_v11 = vpop.f32.mrf.mxu3 }
 0x17c   : > { %v802_v19 = vmul.f32 0.35355338, %v774_v17 }
 0x17e   : > { %v988_v21 = vpack.c.bf16 %v802_v19, %v802_v19 }
 0x180   : > { %5939 = vxpose.binary.xlu2.c.b16.start.end [1/2] (short) (narrow) %v988_v21, %v805_v20, 64 }
 0x181   : > { %v776_v24 = vpop.f32.mrf.mxu2 }
 0x182   : > { %v777_v29 = vadd.f32 %v776_v24, %v6776_v27  ;;  %v6824_v13 = vpop.f32.mrf.mxu3 }
 0x184   : > { %v803_v32 = vmul.f32 0.35355338, %v777_v29 }
 0x186   : > { %v1171_v36 = vpack.c.bf16 %v803_v32, %v803_v32 }
 0x189   : > { %v778_v31 = vpop.f32.mrf.mxu2 }
 0x18a   : > { %v779_v33 = vadd.f32 %v778_v31, %v6783_v30 }
 0x18c   : > { %v804_v34 = vmul.f32 0.35355338, %v779_v33 }
 0x18e   : > { %v1354_v37 = vpack.c.bf16 %v804_v34, %v804_v34 }
 0x190   : > { %5948 = vxpose.binary.xlu0.c.b16.start.end [1/2] (short) (narrow) %v1354_v37, %v1171_v36, 64 }
 0x191   : > { %v781_v38 = vpop.f32.mrf.mxu2 }
 0x192   : > { %v782_v39 = vadd.f32 %v781_v38, %v6772_v18 }
 0x194   : > { %v806_v40 = vpack.c.bf16 %v782_v39, %v782_v39 }
 0x196   : > { %v837_v42 = vsel %vm430_vm0, %v806_v40, 0 }
 0x197   : > { %846 = vmatpush.bf16.msrb.mxu3 %v837_v42 }
 0x199   : > { %v783_v43 = vpop.f32.mrf.mxu2 }
 0x19a   : > { %v784_v44 = vadd.f32 %v783_v43, %v6774_v22 }
 0x19c   : > { %v989_v45 = vpack.c.bf16 %v784_v44, %v784_v44 }
 0x19e   : > { %v1020_v46 = vsel %vm430_vm0, %v989_v45, 0 }
 0x19f   : > { %1029 = vmatpush.bf16.msra.mxu1 %v1020_v46 }
 0x1a1   : > { %v786_v48 = vpop.f32.mrf.mxu2 }
 0x1a2   : > { %v787_v49 = vadd.f32 %v786_v48, %v6794_v47 }
 0x1a4   : > { %v1172_v50 = vpack.c.bf16 %v787_v49, %v787_v49 }
 0x1a6   : > { %v1203_v51 = vsel %vm430_vm0, %v1172_v50, 0 }
 0x1a7   : > { %1212 = vmatpush.bf16.msra.mxu3 %v1203_v51 }
 0x1a9   : > { %v788_v53 = vpop.f32.mrf.mxu2 }
 0x1aa   : > { %v789_v54 = vadd.f32 %v788_v53, %v6798_v52 }
 0x1ac   : > { %v1355_v55 = vpack.c.bf16 %v789_v54, %v789_v54 }
 0x1ae   : > { %v1386_v56 = vsel %vm430_vm0, %v1355_v55, 0 }
 0x1af   : > { %1395 = vmatpush.bf16.msrb.mxu1 %v1386_v56 }
 0x221   : > { %v5940_v57 = vpop.trf.xlu2 }
 0x222   : > { %5627 = vmatmul.msk.bf16.vlgmr.msrb.gmra.mxu3 %vm423_vm1, %v5940_v57 }
 0x229   : > { %v5941_v58 = vpop.trf.xlu2 }
 0x22a   : > { %5632 = vmatmul.msk.bf16.vlgmr.msra.gmra.mxu1 %vm423_vm1, %v5941_v58 }
 0x231   : > { %v5942_v59 = vpop.trf.xlu2 }
 0x232   : > { %5628 = vmatmul.msk.bf16.gmra.mxu3 %vm423_vm1, %v5942_v59 }
 0x239   : > { %v5943_v60 = vpop.trf.xlu2 }
 0x23a   : > { %5633 = vmatmul.msk.bf16.gmra.mxu1 %vm423_vm1, %v5943_v60 }
 0x23c   : > { %v5949_v1 = vpop.trf.xlu0 }
 0x241   : > { %v5944_v61 = vpop.trf.xlu2 }
 0x242   : > { %5629 = vmatmul.msk.bf16.gmra.mxu3 %vm423_vm1, %v5944_v61 }
 0x244   : > { %v5950_v2 = vpop.trf.xlu0 }
 0x249   : > { %v5945_v62 = vpop.trf.xlu2 }
 0x24a   : > { %5634 = vmatmul.msk.bf16.gmra.mxu1 %vm423_vm1, %v5945_v62 }
 0x24c   : > { %v5951_v3 = vpop.trf.xlu0 }
 0x251   : > { %v5946_v63 = vpop.trf.xlu2 }
 0x252   : > { %5630 = vmatmul.msk.bf16.gmra.mxu3 %vm423_vm1, %v5946_v63 }
 0x254   : > { %v5952_v4 = vpop.trf.xlu0 }
 0x259   : > { %v5947_v0 = vpop.trf.xlu2 }
 0x25a   : > { %5635 = vmatmul.msk.bf16.gmra.mxu1 %vm423_vm1, %v5947_v0 }
 0x25c   : > { %v5953_v6 = vpop.trf.xlu0 }
 0x262   : > { %5637 = vmatmul.msk.bf16.vlgmr.msra.gmra.mxu3 %vm423_vm1, %v5949_v1 }
 0x264   : > { %v5954_v7 = vpop.trf.xlu0 }
 0x26a   : > { %5642 = vmatmul.msk.bf16.vlgmr.msrb.gmra.mxu1 %vm423_vm1, %v5950_v2 }
 0x26c   : > { %v5955_v10 = vpop.trf.xlu0 }
 0x272   : > { %5638 = vmatmul.msk.bf16.gmra.mxu3 %vm423_vm1, %v5951_v3 }
 0x274   : > { %v5956_v12 = vpop.trf.xlu0 }
 0x27a   : > { %5643 = vmatmul.msk.bf16.gmra.mxu1 %vm423_vm1, %v5952_v4 }
 0x282   : > { %5639 = vmatmul.msk.bf16.gmra.mxu3 %vm423_vm1, %v5953_v6 }
 0x28a   : > { %5644 = vmatmul.msk.bf16.gmra.mxu1 %vm423_vm1, %v5954_v7 }
 0x292   : > { %5640 = vmatmul.msk.bf16.gmra.mxu3 %vm423_vm1, %v5955_v10 }
 0x29a   : > { %5645 = vmatmul.msk.bf16.gmra.mxu1 %vm423_vm1, %v5956_v12 }
 0x2a5   : > { %v6826_v15 = vpop.f32.mrf.mxu3 }
 0x2a6   : > { %v868_v16 = vsel %vm618_vm2, %v6826_v15, -inf }
 0x2a7   : > { %869 = vmax.xlane.f32.xlu1 %v868_v16  ;;  %v6830_v17 = vpop.f32.mrf.mxu1 }
 0x2a8   : > { %v1051_v19 = vsel %vm618_vm2, %v6830_v17, -inf }
 0x2a9   : > { %1052 = vmax.xlane.f32.xlu2 %v1051_v19 }
 0x2ad   : > { %v6834_v20 = vpop.f32.mrf.mxu3 }
 0x2ae   : > { %v871_v21 = vsel %vm618_vm2, %v6834_v20, -inf }
 0x2af   : > { %872 = vmax.xlane.f32.xlu1 %v871_v21  ;;  %v6838_v24 = vpop.f32.mrf.mxu1 }
 0x2b0   : > { %v1054_v29 = vsel %vm618_vm2, %v6838_v24, -inf }
 0x2b5   : > { %v6840_v28 = vpop.f32.mrf.mxu3 }
 0x2b6   : > { %v874_v32 = vsel %vm618_vm2, %v6840_v28, -inf }
 0x2b7   : > { %1055 = vmax.xlane.f32.xlu1 %v1054_v29  ;;  %v6844_v31 = vpop.f32.mrf.mxu1 }
 0x2b8   : > { %v1057_v36 = vsel %vm618_vm2, %v6844_v31, -inf }
 0x2bd   : > { %v6848_v33 = vpop.f32.mrf.mxu3 }
 0x2be   : > { %v877_v41 = vsel %vm618_vm2, %v6848_v33, -inf }
 0x2bf   : > { %875 = vmax.xlane.f32.xlu1 %v874_v32  ;;  %v6850_v34 = vpop.f32.mrf.mxu1 }
 0x2c0   : > { %v1060_v44 = vsel %vm618_vm2, %v6850_v34, -inf }
 0x2c5   : > { %v6854_v37 = vpop.f32.mrf.mxu3 }
 0x2c6   : > { %v880_v38 = vsel %vm618_vm2, %v6854_v37, -inf }
 0x2c7   : > { %1058 = vmax.xlane.f32.xlu1 %v1057_v36  ;;  %881 = vmax.xlane.f32.xlu0 %v880_v38  ;;  %v6858_v39 = vpop.f32.mrf.mxu1 }
 0x2c8   : > { %v1063_v46 = vsel %vm618_vm2, %v6858_v39, -inf }
 0x2cd   : > { %v6860_v40 = vpop.f32.mrf.mxu3 }
 0x2ce   : > { %v883_v53 = vsel %vm618_vm2, %v6860_v40, -inf }
 0x2cf   : > { %878 = vmax.xlane.f32.xlu1 %v877_v41  ;;  %v6864_v42 = vpop.f32.mrf.mxu1 }
 0x2d0   : > { %v1066_v57 = vsel %vm618_vm2, %v6864_v42, -inf }
 0x2d5   : > { %v6866_v43 = vpop.f32.mrf.mxu3 }
 0x2d6   : > { %v886_v62 = vsel %vm618_vm2, %v6866_v43, -inf }
 0x2d7   : > { %1061 = vmax.xlane.f32.xlu1 %v1060_v44  ;;  %v6870_v45 = vpop.f32.mrf.mxu1 }
 0x2d8   : > { %v1069_v3 = vsel %vm618_vm2, %v6870_v45, -inf }
 0x2dd   : > { %v6874_v48 = vpop.f32.mrf.mxu3 }
 0x2de   : > { %v889_v49 = vsel %vm618_vm2, %v6874_v48, -inf }
 0x2df   : > { %1064 = vmax.xlane.f32.xlu1 %v1063_v46  ;;  %890 = vmax.xlane.f32.xlu2 %v889_v49  ;;  %v6878_v50 = vpop.f32.mrf.mxu1 }
 0x2e0   : > { %v1072_v7 = vsel %vm618_vm2, %v6878_v50, -inf }
 0x2e5   : > { %v6880_v51 = vpop.f32.mrf.mxu3 }
 0x2e6   : > { %v1234_v54 = vsel %vm618_vm2, %v6880_v51, -inf }
 0x2e7   : > { %884 = vmax.xlane.f32.xlu1 %v883_v53  ;;  %1235 = vmax.xlane.f32.xlu0 %v1234_v54  ;;  %v6886_v55 = vpop.f32.mrf.mxu1 }
 0x2e8   : > { %v1417_v12 = vsel %vm618_vm2, %v6886_v55, -inf }
 0x2ed   : > { %v6888_v56 = vpop.f32.mrf.mxu3 }
 0x2ee   : > { %v1237_v58 = vsel %vm618_vm2, %v6888_v56, -inf }
 0x2ef   : > { %1067 = vmax.xlane.f32.xlu1 %v1066_v57  ;;  %1238 = vmax.xlane.f32.xlu2 %v1237_v58  ;;  %v6894_v59 = vpop.f32.mrf.mxu1 }
 0x2f0   : > { %v1420_v60 = vsel %vm618_vm2, %v6894_v59, -inf }
 0x2f1   : > { %1421 = vmax.xlane.f32.xlu0 %v1420_v60 }
 0x2f5   : > { %v6898_v61 = vpop.f32.mrf.mxu3 }
 0x2f6   : > { %v1240_v63 = vsel %vm618_vm2, %v6898_v61, -inf }
 0x2f7   : > { %887 = vmax.xlane.f32.xlu1 %v886_v62  ;;  %v6904_v0 = vpop.f32.mrf.mxu1 }
 0x2f8   : > { %v1423_v1 = vsel %vm618_vm2, %v6904_v0, -inf }
 0x2f9   : > { %1241 = vmax.xlane.f32.xlu0 %v1240_v63  ;;  %1424 = vmax.xlane.f32.xlu2 %v1423_v1 }
 0x2fd   : > { %v6908_v2 = vpop.f32.mrf.mxu3 }
 0x2fe   : > { %v1243_v4 = vsel %vm618_vm2, %v6908_v2, -inf }
 0x2ff   : > { %1070 = vmax.xlane.f32.xlu1 %v1069_v3  ;;  %v6922_v16 = vpop.f32.mrf.mxu1 }
 0x300   : > { %v1426_v19 = vsel %vm618_vm2, %v6922_v16, -inf }
 0x301   : > { %1244 = vmax.xlane.f32.xlu2 %v1243_v4 }
 0x305   : > { %v6914_v6 = vpop.f32.mrf.mxu3 }
 0x306   : > { %v1246_v10 = vsel %vm618_vm2, %v6914_v6, -inf }
 0x307   : > { %1073 = vmax.xlane.f32.xlu1 %v1072_v7  ;;  %v6926_v29 = vpop.f32.mrf.mxu1 }
 0x308   : > { %v1429_v32 = vsel %vm618_vm2, %v6926_v29, -inf }
 0x309   : > { %1247 = vmax.xlane.f32.xlu2 %v1246_v10 }
 0x30d   : > { %v6930_v38 = vpop.f32.mrf.mxu3 }
 0x30e   : > { %v1249_v46 = vsel %vm618_vm2, %v6930_v38, -inf }
 0x30f   : > { %1418 = vmax.xlane.f32.xlu1 %v1417_v12  ;;  %v6937_v53 = vpop.f32.mrf.mxu1 }
 0x310   : > { %v1432_v58 = vsel %vm618_vm2, %v6937_v53, -inf }
 0x315   : > { %v6945_v60 = vpop.f32.mrf.mxu3 }
 0x316   : > { %v1252_v63 = vsel %vm618_vm2, %v6945_v60, -inf }
 0x317   : > { %1427 = vmax.xlane.f32.xlu1 %v1426_v19  ;;  %v6950_v4 = vpop.f32.mrf.mxu1 }
 0x318   : > { %v1435_v7 = vsel %vm618_vm2, %v6950_v4, -inf }
 0x31a   : > { %v870_v21 = vpop.xlane.xlu1 %869 }
 0x31d   : > { %v6958_v19 = vpop.f32.mrf.mxu3 }
 0x31f   : > { %1430 = vmax.xlane.f32.xlu1 %v1429_v32  ;;  %v892_v32 = vsub.f32 %v6826_v15, %v870_v21 }
 0x322   : > { %v873_v36 = vpop.xlane.xlu1 %872 }
 0x323   : > { %v893_v41 = vsub.f32 %v6834_v20, %v873_v36  ;;  %v1255_v36 = vsel %vm618_vm2, %v6958_v19, -inf }
 0x325   : > { %v902_v44 = vmul.f32 1.442695, %v893_v41  ;;  %v900_v41 = vmul.f32 1.442695, %v892_v32 }
 0x327   : > { %5991 = vpow2.f32 %v902_v44  ;;  %1250 = vmax.xlane.f32.xlu1 %v1249_v46  ;;  %v6963_v46 = vpop.f32.mrf.mxu1 }
 0x32a   : > { %v6935_v49 = vpop.xlane.xlu1 %1055 }
 0x32d   : > { %v6939_v54 = vpop.eup %5991 }
 0x32e   : > { %v919_v57 = vsel %vm618_vm2, %v6939_v54, 0.0 }
 0x32f   : > { %920 = vadd.xlane.f32.xlu0 %v919_v57  ;;  %1433 = vmax.xlane.f32.xlu1 %v1432_v58 }
 0x332   : > { %v876_v20 = vpop.xlane.xlu1 %875 }
 0x333   : > { %v894_v62 = vsub.f32 %v6840_v28, %v876_v20 }
 0x335   : > { %v904_v1 = vmul.f32 1.442695, %v894_v62  ;;  %v1438_v62 = vsel %vm618_vm2, %v6963_v46, -inf }
 0x337   : > { %5993 = vpow2.f32 %v904_v1  ;;  %1253 = vmax.xlane.f32.xlu1 %v1252_v63 }
 0x338   : > { %5995 = vpow2.f32 %v900_v41 }
 0x33a   : > { %v1059_v3 = vpop.xlane.xlu1 %1058 }
 0x33b   : > { %v1077_v58 = vsub.f32 %v6844_v31, %v1059_v3 }
 0x33d   : > { %v6954_v10 = vpop.eup %5993  ;;  %v1087_v15 = vmul.f32 1.442695, %v1077_v58 }
 0x33e   : > { %v922_v12 = vsel %vm618_vm2, %v6954_v10, 0.0  ;;  %v6969_v63 = vpop.eup %5995 }
 0x33f   : > { %923 = vadd.xlane.f32.xlu2 %v922_v12  ;;  %1436 = vmax.xlane.f32.xlu1 %v1435_v7  ;;  %v916_v3 = vsel %vm618_vm2, %v6969_v63, 0.0 }
 0x342   : > { %v879_v28 = vpop.xlane.xlu1 %878 }
 0x347   : > { %1256 = vmax.xlane.f32.xlu1 %v1255_v36  ;;  %v882_v36 = vpop.xlane.xlu0 %881 }
 0x34a   : > { %v1062_v44 = vpop.xlane.xlu1 %1061 }
 0x34b   : > { %v1078_v57 = vsub.f32 %v6850_v34, %v1062_v44  ;;  %v895_v34 = vsub.f32 %v6848_v33, %v879_v28  ;;  %v896_v33 = vsub.f32 %v6854_v37, %v882_v36 }
 0x34d   : > { %v1089_v20 = vmul.f32 1.442695, %v1078_v57  ;;  %v906_v32 = vmul.f32 1.442695, %v895_v34 }
 0x34f   : > { %5997 = vpow2.f32 %v1089_v20  ;;  %1439 = vmax.xlane.f32.xlu1 %v1438_v62  ;;  %v908_v62 = vmul.f32 1.442695, %v896_v33 }
 0x350   : > { %5999 = vpow2.f32 %v1087_v15  ;;  %v6989_v15 = vpop.xlane.xlu2 %1052 }
 0x352   : > { %v1065_v21 = vpop.xlane.xlu1 %1064 }
 0x353   : > { %v1079_v1 = vsub.f32 %v6858_v39, %v1065_v21 }
 0x355   : > { %v6972_v7 = vpop.eup %5997  ;;  %v1091_v12 = vmul.f32 1.442695, %v1079_v1 }
 0x356   : > { %v1108_v31 = vsel %vm618_vm2, %v6972_v7, 0.0  ;;  %v6979_v44 = vpop.eup %5999 }
 0x357   : > { %6001 = vpow2.f32 %v1091_v12  ;;  %1109 = vadd.xlane.f32.xlu0 %v1108_v31  ;;  %917 = vadd.xlane.f32.xlu1 %v916_v3  ;;  %v1105_v20 = vsel %vm618_vm2, %v6979_v44, 0.0 }
 0x358   : > { %6003 = vpow2.f32 %v906_v32  ;;  %v891_v3 = vpop.xlane.xlu2 %890 }
 0x35a   : > { %v885_v41 = vpop.xlane.xlu1 %884 }
 0x35b   : > { %v897_v39 = vsub.f32 %v6860_v40, %v885_v41 }
 0x35d   : > { %v6982_v57 = vpop.eup %6001  ;;  %v910_v28 = vmul.f32 1.442695, %v897_v39  ;;  %v899_v39 = vsub.f32 %v6874_v48, %v891_v3 }
 0x35e   : > { %v1111_v58 = vsel %vm618_vm2, %v6982_v57, 0.0  ;;  %v6991_v40 = vpop.eup %6003 }
 0x35f   : > { %6005 = vpow2.f32 %v910_v28  ;;  %1112 = vadd.xlane.f32.xlu2 %v1111_v58  ;;  %1106 = vadd.xlane.f32.xlu1 %v1105_v20  ;;  %v925_v12 = vsel %vm618_vm2, %v6991_v40, 0.0  ;;  %v914_v28 = vmul.f32 1.442695, %v899_v39 }
 0x360   : > { %6007 = vpow2.f32 %v908_v62 }
 0x362   : > { %v1068_v21 = vpop.xlane.xlu1 %1067 }
 0x363   : > { %v1080_v37 = vsub.f32 %v6864_v42, %v1068_v21 }
 0x365   : > { %v6993_v1 = vpop.eup %6005  ;;  %v1093_v31 = vmul.f32 1.442695, %v1080_v37 }
 0x366   : > { %v931_v34 = vsel %vm618_vm2, %v6993_v1, 0.0  ;;  %v7000_v36 = vpop.eup %6007 }
 0x367   : > { %932 = vadd.xlane.f32.xlu0 %v931_v34  ;;  %926 = vadd.xlane.f32.xlu1 %v925_v12  ;;  %6009 = vpow2.f32 %v1093_v31  ;;  %v928_v42 = vsel %vm618_vm2, %v7000_v36, 0.0 }
 0x36a   : > { %v888_v32 = vpop.xlane.xlu1 %887 }
 0x36b   : > { %v898_v41 = vsub.f32 %v6866_v43, %v888_v32 }
 0x36d   : > { %v912_v33 = vmul.f32 1.442695, %v898_v41  ;;  %v7006_v20 = vpop.eup %6009 }
 0x36e   : > { %v1114_v48 = vsel %vm618_vm2, %v7006_v20, 0.0 }
 0x36f   : > { %6011 = vpow2.f32 %v912_v33  ;;  %929 = vadd.xlane.f32.xlu1 %v928_v42 }
 0x370   : > { %6013 = vpow2.f32 %v914_v28 }
 0x372   : > { %v1071_v58 = vpop.xlane.xlu1 %1070 }
 0x373   : > { %v1081_v62 = vsub.f32 %v6870_v45, %v1071_v58 }
 0x375   : > { %v7009_v21 = vpop.eup %6011  ;;  %v1095_v37 = vmul.f32 1.442695, %v1081_v62 }
 0x376   : > { %v934_v43 = vsel %vm618_vm2, %v7009_v21, 0.0  ;;  %v7015_v12 = vpop.eup %6013 }
 0x377   : > { %6015 = vpow2.f32 %v1095_v37  ;;  %935 = vadd.xlane.f32.xlu2 %v934_v43  ;;  %1115 = vadd.xlane.f32.xlu1 %v1114_v48  ;;  %v937_v41 = vsel %vm618_vm2, %v7015_v12, 0.0  ;;  %v7033_v48 = vpop.xlane.xlu2 %1238 }
 0x37a   : > { %v1074_v34 = vpop.xlane.xlu1 %1073 }
 0x37b   : > { %v1082_v31 = vsub.f32 %v6878_v50, %v1074_v34 }
 0x37d   : > { %v7018_v3 = vpop.eup %6015  ;;  %v1097_v45 = vmul.f32 1.442695, %v1082_v31 }
 0x37e   : > { %v1117_v32 = vsel %vm618_vm2, %v7018_v3, 0.0 }
 0x37f   : > { %6017 = vpow2.f32 %v1097_v45  ;;  %1118 = vadd.xlane.f32.xlu0 %v1117_v32  ;;  %938 = vadd.xlane.f32.xlu1 %v937_v41  ;;  %v1425_v32 = vpop.xlane.xlu2 %1424 }
 0x382   : > { %v7024_v39 = vpop.xlane.xlu1 %1418 }
 0x385   : > { %v7026_v33 = vpop.eup %6017 }
 0x386   : > { %v1120_v42 = vsel %vm618_vm2, %v7026_v33, 0.0 }
 0x387   : > { %1121 = vadd.xlane.f32.xlu2 %v1120_v42 }
 0x38a   : > { %v1428_v50 = vpop.xlane.xlu1 %1427 }
 0x392   : > { %v1431_v28 = vpop.xlane.xlu1 %1430 }
 0x393   : > { %v1445_v58 = vsub.f32 %v6926_v29, %v1431_v28  ;;  %v5895_v28 = vld [vmem:[%s8806_s5 + $0x20] sm:$0xff] }
 0x394   : > { %5625 = vmatmul.msk.bf16.gmra.mxu2 %vm743_vm5, %v5895_v28  ;;  %v7059_v28 = vpop.xlane.xlu0 %1235 }
 0x395   : > { %v1457_v62 = vmul.f32 1.442695, %v1445_v58 }
 0x397   : > { %6019 = vpow2.f32 %v1457_v62  ;;  %v1076_v62 = vsub.f32 %v6838_v24, %v6935_v49 }
 0x39a   : > { %v1251_v37 = vpop.xlane.xlu1 %1250 }
 0x39b   : > { %v1263_v24 = vsub.f32 %v6930_v38, %v1251_v37  ;;  %v5896_v38 = vld [vmem:[%s8806_s5 + $0x28] sm:$0xff] }
 0x39d   : > { %v7031_v43 = vpop.eup %6019 }
 0x39e   : > { %v1477_v34 = vsel %vm618_vm2, %v7031_v43, 0.0 }
 0x39f   : > { %1478 = vadd.xlane.f32.xlu0 %v1477_v34 }
 0x3a2   : > { %v1434_v31 = vpop.xlane.xlu1 %1433 }
 0x3a3   : > { %v1446_v45 = vsub.f32 %v6937_v53, %v1434_v31  ;;  %v7049_v53 = vpop.xlane.xlu2 %1244 }
 0x3a4   : > { %5626 = vmatmul.msk.bf16.gmra.mxu2 %vm743_vm5, %v5896_v38 }
 0x3a5   : > { %v1459_v41 = vmul.f32 1.442695, %v1446_v45 }
 0x3a7   : > { %6021 = vpow2.f32 %v1459_v41  ;;  %v1075_v41 = vsub.f32 %v6830_v17, %v6989_v15 }
 0x3aa   : > { %v1254_v42 = vpop.xlane.xlu1 %1253 }
 0x3ab   : > { %v1264_v29 = vsub.f32 %v6945_v60, %v1254_v42  ;;  %v1085_v60 = vmul.f32 1.442695, %v1076_v62  ;;  %v1248_v62 = vpop.xlane.xlu2 %1247 }
 0x3ac   : > { %v1262_v15 = vsub.f32 %v6914_v6, %v1248_v62 }
 0x3ad   : > { %v7042_v58 = vpop.eup %6021  ;;  %v1278_v52 = vmul.f32 1.442695, %v1264_v29 }
 0x3ae   : > { %v1480_v34 = vsel %vm618_vm2, %v7042_v58, 0.0  ;;  %v1274_v6 = vmul.f32 1.442695, %v1262_v15 }
 0x3af   : > { %6023 = vpow2.f32 %v1278_v52  ;;  %1481 = vadd.xlane.f32.xlu2 %v1480_v34  ;;  %v1083_v52 = vmul.f32 1.442695, %v1075_v41  ;;  %v1276_v34 = vmul.f32 1.442695, %v1263_v24 }
 0x3b0   : > { %6025 = vpow2.f32 %v1085_v60  ;;  %v1444_v60 = vsub.f32 %v6922_v16, %v1428_v50  ;;  %v1443_v50 = vsub.f32 %v6904_v0, %v1425_v32 }
 0x3b2   : > { %v1437_v31 = vpop.xlane.xlu1 %1436  ;;  %v1453_v38 = vmul.f32 1.442695, %v1443_v50 }
 0x3b3   : > { %v1447_v45 = vsub.f32 %v6950_v4, %v1437_v31 }
 0x3b5   : > { %v7054_v42 = vpop.eup %6023  ;;  %v1461_v49 = vmul.f32 1.442695, %v1447_v45 }
 0x3b6   : > { %v1300_v29 = vsel %vm618_vm2, %v7054_v42, 0.0  ;;  %v7061_v31 = vpop.eup %6025 }
 0x3b7   : > { %6027 = vpow2.f32 %v1461_v49  ;;  %1301 = vadd.xlane.f32.xlu2 %v1300_v29  ;;  %v1102_v41 = vsel %vm618_vm2, %v7061_v31, 0.0  ;;  %v1455_v49 = vmul.f32 1.442695, %v1444_v60 }
 0x3b8   : > { %6029 = vpow2.f32 %v1083_v52 }
 0x3b9   : > { %6031 = vpow2.f32 %v1276_v34  ;;  %v1441_v34 = vsub.f32 %v6886_v55, %v7024_v39 }
 0x3ba   : > { %v1257_v4 = vpop.xlane.xlu1 %1256 }
 0x3bb   : > { %v1265_v17 = vsub.f32 %v6958_v19, %v1257_v4  ;;  %v1422_v19 = vpop.xlane.xlu0 %1421  ;;  %v1449_v32 = vmul.f32 1.442695, %v1441_v34 }
 0x3bd   : > { %v7068_v37 = vpop.eup %6027  ;;  %v1280_v45 = vmul.f32 1.442695, %v1265_v17 }
 0x3be   : > { %v1483_v24 = vsel %vm618_vm2, %v7068_v37, 0.0  ;;  %v7076_v29 = vpop.eup %6029 }
 0x3bf   : > { %6033 = vpow2.f32 %v1280_v45  ;;  %1103 = vadd.xlane.f32.xlu2 %v1102_v41  ;;  %1484 = vadd.xlane.f32.xlu0 %v1483_v24  ;;  %v7078_v16 = vpop.eup %6031  ;;  %v1099_v17 = vsel %vm618_vm2, %v7076_v29, 0.0 }
 0x3c0   : > { %6035 = vpow2.f32 %v1274_v6  ;;  %v1297_v4 = vsel %vm618_vm2, %v7078_v16, 0.0 }
 0x3c1   : > { %6037 = vpow2.f32 %v1455_v49 }
 0x3c2   : > { %v1440_v52 = vpop.xlane.xlu1 %1439  ;;  %6039 = vpow2.f32 %v1453_v38 }
 0x3c3   : > { %v1242_v0 = vpop.xlane.xlu0 %1241  ;;  %6041 = vpow2.f32 %v1449_v32  ;;  %v1448_v41 = vsub.f32 %v6963_v46, %v1440_v52 }
 0x3c4   : > { %v1260_v39 = vsub.f32 %v6898_v61, %v1242_v0  ;;  %v1442_v61 = vsub.f32 %v6894_v59, %v1422_v19 }
 0x3c5   : > { %v7081_v62 = vpop.eup %6033  ;;  %v1463_v50 = vmul.f32 1.442695, %v1448_v41  ;;  %v542_v41 = vld [vmem:[%s8808_s7 + $0x80] sm:$0xff] }
 0x3c6   : > { %v1303_v15 = vsel %vm618_vm2, %v7081_v62, 0.0  ;;  %v7091_v60 = vpop.eup %6035  ;;  %v1270_v49 = vmul.f32 1.442695, %v1260_v39  ;;  %v1258_v39 = vsub.f32 %v6880_v51, %v7059_v28  ;;  %v1259_v51 = vsub.f32 %v6888_v56, %v7033_v48 }
 0x3c7   : > { %1298 = vadd.xlane.f32.xlu2 %v1297_v4  ;;  %1100 = vadd.xlane.f32.xlu0 %v1099_v17  ;;  %v7095_v55 = vpop.eup %6037  ;;  %v1294_v6 = vsel %vm618_vm2, %v7091_v60, 0.0 }
 0x3c8   : > { %1304 = vadd.xlane.f32.xlu1 %v1303_v15  ;;  %v1474_v24 = vsel %vm618_vm2, %v7095_v55, 0.0  ;;  %v7103_v34 = vpop.eup %6039  ;;  %6043 = vpow2.f32 %v1270_v49  ;;  %v1451_v15 = vmul.f32 1.442695, %v1442_v61 }
 0x3c9   : > { %v7107_v17 = vpop.eup %6041  ;;  %6045 = vpow2.f32 %v1463_v50  ;;  %v1471_v52 = vsel %vm618_vm2, %v7103_v34, 0.0 }
 0x3ca   : > { %v7093_v45 = vpop.xlane.xlu1 %917  ;;  %v1465_v46 = vsel %vm618_vm2, %v7107_v17, 0.0  ;;  %6047 = vpow2.f32 %v1451_v15 }
 0x3cb   : > { %v921_v28 = vpop.xlane.xlu0 %920 }
 0x3ce   : > { %v7114_v38 = vpop.eup %6043 }
 0x3cf   : > { %1475 = vadd.xlane.f32.xlu2 %v1474_v24  ;;  %1295 = vadd.xlane.f32.xlu0 %v1294_v6  ;;  %v7116_v32 = vpop.eup %6045  ;;  %v1288_v19 = vsel %vm618_vm2, %v7114_v38, 0.0  ;;  %v924_v24 = vpop.xlane.xlu2 %923  ;;  %v1266_v6 = vmul.f32 1.442695, %v1258_v39 }
 0x3d0   : > { %v1486_v59 = vsel %vm618_vm2, %v7116_v32, 0.0  ;;  %v7127_v50 = vpop.eup %6047 }
 0x3d1   : > { %6049 = vpow2.f32 %v1266_v6  ;;  %v1468_v61 = vsel %vm618_vm2, %v7127_v50, 0.0  ;;  %v543_v6 = vld [vmem:[%s8808_s7 + $0x88] sm:$0xff] }
 0x3d2   : > { %v7105_v4 = vpop.xlane.xlu1 %1106 }
 0x3d3   : > { %v7137_v39 = vpop.xlane.xlu0 %1109 }
 0x3d7   : > { %1466 = vadd.xlane.f32.xlu2 %v1465_v46  ;;  %1472 = vadd.xlane.f32.xlu0 %v1471_v52  ;;  %v7133_v46 = vpop.xlane.xlu2 %1112  ;;  %v1268_v52 = vmul.f32 1.442695, %v1259_v51 }
 0x3d9   : > { %6051 = vpow2.f32 %v1268_v52 }
 0x3da   : > { %v927_v0 = vpop.xlane.xlu1 %926 }
 0x3db   : > { %v933_v51 = vpop.xlane.xlu0 %932 }
 0x3df   : > { %1487 = vadd.xlane.f32.xlu2 %v1486_v59  ;;  %1289 = vadd.xlane.f32.xlu0 %v1288_v19  ;;  %v7135_v59 = vpop.eup %6049 }
 0x3e0   : > { %v1282_v19 = vsel %vm618_vm2, %v7135_v59, 0.0  ;;  %v7141_v48 = vpop.eup %6051 }
 0x3e1   : > { %695 = vperm.xlu1 %5937, %v542_v41  }
 0x3e2   : > { %v930_v49 = vpop.xlane.xlu1 %929 }
 0x3e7   : > { %1469 = vadd.xlane.f32.xlu0 %v1468_v61  ;;  %v1285_v61 = vsel %vm618_vm2, %v7141_v48, 0.0 }
 0x3ea   : > { %v1116_v15 = vpop.xlane.xlu1 %1115  ;;  %v936_v41 = vpop.xlane.xlu2 %935 }
 0x3eb   : > { %6053 = vrcp.f32 %v936_v41 }
 0x3ef   : > { %1283 = vadd.xlane.f32.xlu0 %v1282_v19  ;;  %v1261_v19 = vsub.f32 %v6908_v2, %v7049_v53 }
 0x3f1   : > { %v6054_v52 = vpop.eup %6053  ;;  %v1272_v27 = vmul.f32 1.442695, %v1261_v19 }
 0x3f2   : > { %v939_v56 = vpop.xlane.xlu1 %938  ;;  %v954_v30 = vmul.f32 %v6054_v52, %v7009_v21 }
 0x3f3   : > { %6055 = vrcp.f32 %v939_v56 }
 0x3f4   : > { %6057 = vrcp.f32 %v930_v49  ;;  %v544_v49 = vld [vmem:[%s8808_s7 + $0x90] sm:$0xff] }
 0x3f5   : > { %6059 = vrcp.f32 %v933_v51 }
 0x3f6   : > { %6061 = vrcp.f32 %v927_v0  ;;  %v1119_v0 = vpop.xlane.xlu0 %1118 }
 0x3f7   : > { %700 = vperm.xlu2 %5938, %v543_v6   ;;  %1286 = vadd.xlane.f32.xlu0 %v1285_v61  ;;  %6063 = vrcp.f32 %v924_v24  ;;  %v549_v61 = vld [vmem:[%s8808_s7 + $0xb8] sm:$0xff] }
 0x3f8   : > { %6065 = vpow2.f32 %v1272_v27 }
 0x3f9   : > { %v6056_v41 = vpop.eup %6055  ;;  %6067 = vrcp.f32 %v7093_v45 }
 0x3fa   : > { %v955_v56 = vmul.f32 %v6056_v41, %v7015_v12  ;;  %v6058_v47 = vpop.eup %6057  ;;  %v1122_v53 = vpop.xlane.xlu2 %1121 }
 0x3fb   : > { %v6060_v14 = vpop.eup %6059  ;;  %v952_v51 = vmul.f32 %v6058_v47, %v7000_v36  ;;  %6069 = vrcp.f32 %v1122_v53 }
 0x3fc   : > { %v959_v22 = vpack.c.bf16 %v955_v56, %v954_v30  ;;  %v953_v2 = vmul.f32 %v6060_v14, %v6993_v1  ;;  %v6062_v12 = vpop.eup %6061  ;;  %6071 = vrcp.f32 %v921_v28  ;;  %v545_v14 = vld [vmem:[%s8808_s7 + $0x98] sm:$0xff]  ;;  %v546_v56 = vld [vmem:[%s8808_s7 + $0xa0] sm:$0xff] }
 0x3fd   : > { %v6064_v30 = vpop.eup %6063  ;;  %v951_v27 = vmul.f32 %v6062_v12, %v6991_v40  ;;  %6073 = vrcp.f32 %v1119_v0  ;;  %v547_v40 = vld [vmem:[%s8808_s7 + $0xa8] sm:$0xff] }
 0x3fe   : > { %v973_v6 = vsel %vm618_vm2, %v959_v22, 0  ;;  %v958_v21 = vpack.c.bf16 %v953_v2, %v952_v51  ;;  %v7162_v52 = vpop.eup %6065  ;;  %v950_v47 = vmul.f32 %v6064_v30, %v6954_v10  ;;  %6075 = vrcp.f32 %v1116_v15  ;;  %v461_v2 = vld [vmem:[%s8808_s7 + $0x38] sm:$0xff] }
 0x3ff   : > { %705 = vperm.xlu2 %5938, %v544_v49   ;;  %979 = vmatpush.bf16.xpose.msrb.mxu0 %v973_v6  ;;  %v1291_v1 = vsel %vm618_vm2, %v7162_v52, 0.0  ;;  %v6068_v45 = vpop.eup %6067  ;;  %6077 = vrcp.f32 %v7133_v46 }
 0x400   : > { %v970_v22 = vsel %vm618_vm2, %v958_v21, 0  ;;  %v957_v36 = vpack.c.bf16 %v951_v27, %v950_v47  ;;  %v948_v10 = vmul.f32 %v6068_v45, %v6969_v63  ;;  %6079 = vrcp.f32 %v7105_v4  ;;  %v566_v4 = vld [vmem:[%s8808_s7 + $0xc0] sm:$0xff]  ;;  %v571_v47 = vld [vmem:[%s8808_s7 + $0xe8] sm:$0xff] }
 0x401   : > { %v6070_v24 = vpop.eup %6069  ;;  %6081 = vrcp.f32 %v7137_v39  ;;  %v458_v45 = vld [vmem:[%s8808_s7 + $0x20] sm:$0xff] }
 0x402   : > { %v6072_v28 = vpop.eup %6071  ;;  %v967_v41 = vsel %vm618_vm2, %v957_v36, 0  ;;  %v1138_v49 = vmul.f32 %v6070_v24, %v7026_v33  ;;  %v567_v24 = vld [vmem:[%s8808_s7 + $0xc8] sm:$0xff] }
 0x403   : > { %v6074_v19 = vpop.eup %6073  ;;  %v949_v6 = vmul.f32 %v6072_v28, %v6939_v54  ;;  %v460_v54 = vld [vmem:[%s8808_s7 + $0x30] sm:$0xff] }
 0x404   : > { %v1137_v51 = vmul.f32 %v6074_v19, %v7018_v3  ;;  %v6076_v21 = vpop.eup %6075 }
 0x405   : > { %v956_v15 = vpack.c.bf16 %v949_v6, %v948_v10  ;;  %v6078_v12 = vpop.eup %6077  ;;  %v1136_v3 = vmul.f32 %v6076_v21, %v7006_v20  ;;  %v459_v20 = vld [vmem:[%s8808_s7 + $0x28] sm:$0xff] }
 0x406   : > { %v1142_v63 = vpack.c.bf16 %v1138_v49, %v1137_v51  ;;  %v1135_v53 = vmul.f32 %v6078_v12, %v6982_v57  ;;  %v6080_v30 = vpop.eup %6079  ;;  %v548_v57 = vld [vmem:[%s8808_s7 + $0xb0] sm:$0xff] }
 0x407   : > { %1556 = vperm.xlu2 %5938, %v549_v61   ;;  %980 = vmatpush.bf16.xpose.msrb.mxu0 %v970_v22  ;;  %v964_v33 = vsel %vm618_vm2, %v956_v15, 0  ;;  %v6082_v0 = vpop.eup %6081  ;;  %v1133_v39 = vmul.f32 %v6080_v30, %v6979_v44  ;;  %v570_v44 = vld [vmem:[%s8808_s7 + $0xe0] sm:$0xff] }
 0x408   : > { %v1156_v46 = vsel %vm618_vm2, %v1142_v63, 0  ;;  %v1141_v61 = vpack.c.bf16 %v1136_v3, %v1135_v53 }
 0x40a   : > { %v1153_v22 = vsel %vm618_vm2, %v1141_v61, 0 }
 0x40b   : > { %1292 = vadd.xlane.f32.xlu1 %v1291_v1  ;;  %710 = vperm.xlu0 %5936, %v545_v14   ;;  %v1134_v14 = vmul.f32 %v6082_v0, %v6972_v7 }
 0x40d   : > { %v1140_v1 = vpack.c.bf16 %v1134_v14, %v1133_v39 }
 0x40f   : > { %1546 = vperm.xlu2 %5938, %v547_v40   ;;  %981 = vmatpush.bf16.xpose.msrb.mxu0 %v967_v41  ;;  %v1150_v36 = vsel %vm618_vm2, %v1140_v1, 0 }
 0x412   : > { %v1479_v7 = vpop.xlane.xlu0 %1478 }
 0x413   : > { %1541 = vperm.xlu0 %5936, %v546_v56  }
 0x417   : > { %479 = vperm.xlu2 %5938, %v461_v2   ;;  %982 = vmatpush.bf16.xpose.msrb.mxu0 %v964_v33 }
 0x41b   : > { %474 = vperm.xlu0 %5936, %v460_v54  }
 0x41f   : > { %1162 = vmatpush.bf16.xpose.msra.mxu0 %v1156_v46  ;;  %1602 = vperm.xlu2 %5938, %v566_v4   ;;  %v791_v4 = vpop.f32.mrf.mxu2 }
 0x422   : > { %v1482_v27 = vpop.xlane.xlu2 %1481 }
 0x423   : > { %469 = vperm.xlu0 %5936, %v459_v20  }
 0x424   : > { %1551 = vperm.xlu1 %5937, %v548_v57  }
 0x427   : > { %1163 = vmatpush.bf16.xpose.msra.mxu0 %v1153_v22  ;;  %1664 = vperm.xlu2 %5938, %v571_v47  }
 0x42a   : > { %v1302_v40 = vpop.xlane.xlu2 %1301 }
 0x42b   : > { %1659 = vperm.xlu0 %5936, %v570_v44  }
 0x42c   : > { %464 = vperm.xlu1 %5937, %v458_v45  }
 0x42f   : > { %1164 = vmatpush.bf16.xpose.msra.mxu0 %v1150_v36 }
 0x432   : > { %v1485_v28 = vpop.xlane.xlu0 %1484  ;;  %v1104_v19 = vpop.xlane.xlu2 %1103 }
 0x433   : > { %6083 = vrcp.f32 %v1104_v19 }
 0x434   : > { %1607 = vperm.xlu1 %5937, %v567_v24  }
 0x439   : > { %v6084_v56 = vpop.eup %6083 }
 0x43a   : > { %v1101_v41 = vpop.xlane.xlu0 %1100  ;;  %v1299_v10 = vpop.xlane.xlu2 %1298  ;;  %v1132_v15 = vmul.f32 %v6084_v56, %v7061_v31 }
 0x43b   : > { %6085 = vrcp.f32 %v1101_v41  ;;  %v1305_v63 = vpop.xlane.xlu1 %1304 }
 0x43c   : > { %6087 = vrcp.f32 %v1305_v63 }
 0x43d   : > { %6089 = vrcp.f32 %v1302_v40 }
 0x441   : > { %v6086_v49 = vpop.eup %6085 }
 0x442   : > { %v1476_v6 = vpop.xlane.xlu2 %1475  ;;  %v1131_v51 = vmul.f32 %v6086_v49, %v7076_v29  ;;  %v1296_v2 = vpop.xlane.xlu0 %1295 }
 0x443   : > { %v6088_v46 = vpop.eup %6087  ;;  %6091 = vrcp.f32 %v1296_v2 }
 0x444   : > { %v1139_v21 = vpack.c.bf16 %v1132_v15, %v1131_v51  ;;  %v6090_v3 = vpop.eup %6089  ;;  %v1321_v53 = vmul.f32 %v6088_v46, %v7081_v62  ;;  %6093 = vrcp.f32 %v1299_v10 }
 0x445   : > { %6095 = vrcp.f32 %v1485_v28  ;;  %v1320_v31 = vmul.f32 %v6090_v3, %v7054_v42 }
 0x446   : > { %v1147_v12 = vsel %vm618_vm2, %v1139_v21, 0 }
 0x447   : > { %1165 = vmatpush.bf16.xpose.msra.mxu0 %v1147_v12  ;;  %v1325_v0 = vpack.c.bf16 %v1321_v53, %v1320_v31 }
 0x449   : > { %v6092_v22 = vpop.eup %6091  ;;  %v1339_v62 = vsel %vm618_vm2, %v1325_v0, 0 }
 0x44a   : > { %v1467_v33 = vpop.xlane.xlu2 %1466  ;;  %v1473_v54 = vpop.xlane.xlu0 %1472  ;;  %v1318_v47 = vmul.f32 %v6092_v22, %v7091_v60 }
 0x44b   : > { %v6094_v39 = vpop.eup %6093 }
 0x44c   : > { %v6096_v14 = vpop.eup %6095  ;;  %v1319_v1 = vmul.f32 %v6094_v39, %v7078_v16 }
 0x44d   : > { %v1503_v36 = vmul.f32 %v6096_v14, %v7068_v37 }
 0x44e   : > { %v1324_v45 = vpack.c.bf16 %v1319_v1, %v1318_v47 }
 0x450   : > { %v1336_v41 = vsel %vm618_vm2, %v1324_v45, 0 }
 0x452   : > { %v1488_v29 = vpop.xlane.xlu2 %1487  ;;  %v1290_v57 = vpop.xlane.xlu0 %1289 }
 0x453   : > { %v7226_v61 = vpop.permute.xlu1 %695  ;;  %6097 = vrcp.f32 %v1488_v29 }
 0x454   : > { %v792_v30 = vadd.f32 %v791_v4, %v7226_v61  ;;  %6099 = vrcp.f32 %v1482_v27 }
 0x455   : > { %6101 = vrcp.f32 %v1479_v7  ;;  %v793_v7 = vpop.f32.mrf.mxu2 }
 0x456   : > { %v807_v20 = vpack.c.bf16 %v792_v30, %v792_v30  ;;  %6103 = vrcp.f32 %v1473_v54 }
 0x457   : > { %6105 = vrcp.f32 %v1476_v6 }
 0x458   : > { %5631 = vmatmul.msk.bf16.vlgmr.msrb.gmra.mxu0 %vm618_vm2, %v807_v20 }
 0x459   : > { %1345 = vmatpush.bf16.xpose.msrb.mxu0 %v1339_v62  ;;  %v6098_v42 = vpop.eup %6097 }
 0x45a   : > { %v1504_v44 = vmul.f32 %v6098_v42, %v7116_v32  ;;  %v6100_v27 = vpop.eup %6099  ;;  %v7235_v28 = vpop.permute.xlu2 %700 }
 0x45b   : > { %v6102_v24 = vpop.eup %6101  ;;  %v1502_v60 = vmul.f32 %v6100_v27, %v7042_v58  ;;  %v1470_v16 = vpop.xlane.xlu0 %1469  ;;  %v794_v32 = vadd.f32 %v793_v7, %v7235_v28 }
 0x45c   : > { %v1508_v40 = vpack.c.bf16 %v1504_v44, %v1503_v36  ;;  %v1501_v37 = vmul.f32 %v6102_v24, %v7031_v43  ;;  %v6104_v56 = vpop.eup %6103  ;;  %6107 = vrcp.f32 %v1470_v16 }
 0x45d   : > { %v6106_v49 = vpop.eup %6105  ;;  %v990_v51 = vpack.c.bf16 %v794_v32, %v794_v32  ;;  %v1499_v2 = vmul.f32 %v6104_v56, %v7103_v34  ;;  %6109 = vrcp.f32 %v1467_v33  ;;  %v796_v34 = vpop.f32.mrf.mxu2 }
 0x45e   : > { %v1522_v19 = vsel %vm618_vm2, %v1508_v40, 0  ;;  %v1507_v10 = vpack.c.bf16 %v1502_v60, %v1501_v37  ;;  %v1500_v58 = vmul.f32 %v6106_v49, %v7095_v55  ;;  %6111 = vrcp.f32 %v1290_v57  ;;  %v5901_v37 = vld [vmem:[%s8806_s5 + $0x50] sm:$0xff] }
 0x45f   : > { %1528 = vmatpush.bf16.xpose.msrb.mxu2 %v1522_v19 }
 0x460   : > { %v1519_v15 = vsel %vm618_vm2, %v1507_v10, 0  ;;  %v1506_v63 = vpack.c.bf16 %v1500_v58, %v1499_v2  ;;  %v5897_v58 = vld [vmem:[%s8806_s5 + $0x30] sm:$0xff] }
 0x461   : > { %1346 = vmatpush.bf16.xpose.msrb.mxu0 %v1336_v41 }
 0x462   : > { %v6108_v43 = vpop.eup %6107  ;;  %v7246_v21 = vpop.permute.xlu2 %705  ;;  %v1516_v46 = vsel %vm618_vm2, %v1506_v63, 0 }
 0x463   : > { %v1284_v6 = vpop.xlane.xlu0 %1283  ;;  %v6110_v12 = vpop.eup %6109  ;;  %v1498_v54 = vmul.f32 %v6108_v43, %v7127_v50  ;;  %v797_v19 = vadd.f32 %v796_v34, %v7246_v21 }
 0x464   : > { %v1497_v3 = vmul.f32 %v6110_v12, %v7107_v17  ;;  %v6112_v17 = vpop.eup %6111 }
 0x465   : > { %v798_v29 = vpop.f32.mrf.mxu2  ;;  %v1316_v14 = vmul.f32 %v6112_v17, %v7114_v38  ;;  %v1173_v60 = vpack.c.bf16 %v797_v19, %v797_v19 }
 0x466   : > { %v1505_v33 = vpack.c.bf16 %v1498_v54, %v1497_v3 }
 0x467   : > { %1529 = vmatpush.bf16.xpose.msrb.mxu2 %v1519_v15 }
 0x468   : > { %5636 = vmatmul.msk.bf16.vlgmr.msra.gmra.mxu0 %vm618_vm2, %v990_v51  ;;  %v1513_v55 = vsel %vm618_vm2, %v1505_v33, 0 }
 0x46a   : > { %v7251_v4 = vpop.permute.xlu2 %1556 }
 0x46b   : > { %v1287_v53 = vpop.xlane.xlu0 %1286 }
 0x46f   : > { %1530 = vmatpush.bf16.xpose.msrb.mxu2 %v1516_v46 }
 0x472   : > { %v7257_v22 = vpop.permute.xlu2 %1546 }
 0x477   : > { %1531 = vmatpush.bf16.xpose.msrb.mxu2 %v1513_v55 }
 0x47a   : > { %v480_v44 = vpop.permute.xlu2 %479 }
 0x47b   : > { %v516_v40 = vadd.f32 %v6824_v13, %v480_v44 }
 0x47d   : > { %v7254_v31 = vpop.permute.xlu0 %710 }
 0x47e   : > { %v1293_v30 = vpop.xlane.xlu1 %1292  ;;  %v799_v0 = vadd.f32 %v798_v29, %v7254_v31 }
 0x47f   : > { %6113 = vrcp.f32 %v1293_v30 }
 0x480   : > { %v1356_v50 = vpack.c.bf16 %v799_v0, %v799_v0  ;;  %6115 = vrcp.f32 %v1287_v53 }
 0x481   : > { %6117 = vrcp.f32 %v1284_v6  ;;  %v5898_v6 = vld [vmem:[%s8806_s5 + $0x38] sm:$0xff] }
 0x482   : > { %5646 = vmatmul.msk.bf16.vlgmr.msrb.gmra.mxu2 %vm618_vm2, %v1356_v50  ;;  %v7294_v43 = vpop.permute.xlu2 %1602 }
 0x485   : > { %v6114_v20 = vpop.eup %6113  ;;  %v7260_v39 = vpop.permute.xlu0 %1541 }
 0x486   : > { %v1317_v57 = vmul.f32 %v6114_v20, %v7162_v52  ;;  %v6116_v62 = vpop.eup %6115 }
 0x487   : > { %v6118_v42 = vpop.eup %6117  ;;  %v1315_v36 = vmul.f32 %v6116_v62, %v7141_v48 }
 0x488   : > { %v1323_v47 = vpack.c.bf16 %v1317_v57, %v1316_v14  ;;  %v1314_v27 = vmul.f32 %v6118_v42, %v7135_v59 }
 0x48a   : > { %v1333_v1 = vsel %vm618_vm2, %v1323_v47, 0  ;;  %v1322_v7 = vpack.c.bf16 %v1315_v36, %v1314_v27  ;;  %v7300_v33 = vpop.permute.xlu2 %1664 }
 0x48b   : > { %1347 = vmatpush.bf16.xpose.msrb.mxu0 %v1333_v1 }
 0x48c   : > { %v1330_v52 = vsel %vm618_vm2, %v1322_v7, 0 }
 0x48d   : > { %v475_v45 = vpop.permute.xlu0 %474 }
 0x48e   : > { %v514_v24 = vadd.f32 %v6821_v11, %v475_v45 }
 0x490   : > { %v7269_v38 = vpack.c.bf16 %v516_v40, %v514_v24  ;;  %v5899_v40 = vld [vmem:[%s8806_s5 + $0x40] sm:$0xff] }
 0x492   : > { %1735 = vmatpush.bf16.msrb.mxu3 %v7269_v38 }
 0x493   : > { %1348 = vmatpush.bf16.xpose.msrb.mxu0 %v1330_v52 }
 0x495   : > { %v470_v59 = vpop.permute.xlu0 %469 }
 0x496   : > { %v7274_v48 = vpop.permute.xlu1 %1551  ;;  %v511_v13 = vadd.f32 %v6817_v9, %v470_v59 }
 0x49a   : > { %5641 = vmatmul.msk.bf16.vlgmr.msrb.gmra.mxu0 %vm618_vm2, %v1173_v60 }
 0x49d   : > { %v7296_v12 = vpop.permute.xlu0 %1659 }
 0x49e   : > { %v465_v41 = vpop.permute.xlu1 %464 }
 0x49f   : > { %v509_v11 = vadd.f32 %v6814_v5, %v465_v41 }
 0x4a1   : > { %v7279_v16 = vpack.c.bf16 %v511_v13, %v509_v11 }
 0x4a3   : > { %1736 = vmatpush.bf16.msrb.mxu3 %v7279_v16 }
 0x4a6   : > { %5683 = vmatmul.msk.bf16.vlgmr.msrb.gmra.mxu3 %vm743_vm5, %v5901_v37 }
 0x4d5   : > { %v984_v32 = vpop.f32.mrf.mxu0 }
 0x4dd   : > { %v986_v10 = vpop.f32.mrf.mxu0 }
 0x4e5   : > { %v1167_v56 = vpop.f32.mrf.mxu0 }
 0x4e6   : > { %v1537_v5 = vpack.c.bf16 %v1167_v56, %v984_v32 }
 0x4ed   : > { %v1169_v49 = vpop.f32.mrf.mxu0 }
 0x505   : > { %v1533_v51 = vpop.f32.mrf.mxu2 }
 0x50d   : > { %v1535_v15 = vpop.f32.mrf.mxu2 }
 0x517   : > { %v1350_v2 = vpop.f32.mrf.mxu0 }
 0x518   : > { %v1538_v9 = vpack.c.bf16 %v1533_v51, %v1350_v2 }
 0x51a   : > { %1581 = vmatpush.bf16.msra.mxu0 %v1538_v9  ;;  %5924 = vmatpush.bf16.msra.mxu2 %v1538_v9 }
 0x51e   : > { %1582 = vmatpush.bf16.msra.mxu0 %v1537_v5  ;;  %5925 = vmatpush.bf16.msra.mxu2 %v1537_v5 }
 0x51f   : > { %v1352_v63 = vpop.f32.mrf.mxu0 }
 0x521   : > { %5655 = vmatmul.msk.bf16.vlgmr.msra.gmra.mxu0 %vm743_vm5, %v5897_v58  ;;  %5656 = vmatmul.msk.bf16.vlgmr.msra.gmra.mxu2 %vm743_vm5, %v5898_v6 }
 0x529   : > { %v1738_v46 = vpop.f32.mrf.mxu3 }
 0x52a   : > { %v1739_v54 = vadd.f32 %v1738_v46, %v7296_v12 }
 0x52c   : > { %v1763_v3 = vpack.c.bf16 %v1739_v54, %v1739_v54 }
 0x52e   : > { %v1794_v34 = vsel %vm430_vm0, %v1763_v3, 0 }
 0x52f   : > { %1803 = vmatpush.bf16.msrb.mxu0 %v1794_v34  ;;  %v5902_v34 = vld [vmem:[%s8806_s5 + $0x58] sm:$0xff] }
 0x530   : > { %5684 = vmatmul.msk.bf16.gmra.mxu3 %vm743_vm5, %v5902_v34 }
 0x531   : > { %v1740_v53 = vpop.f32.mrf.mxu3 }
 0x532   : > { %v1741_v55 = vadd.f32 %v1740_v53, %v7300_v33 }
 0x534   : > { %v1946_v29 = vpack.c.bf16 %v1741_v55, %v1741_v55 }
 0x536   : > { %v1977_v30 = vsel %vm430_vm0, %v1946_v29, 0 }
 0x537   : > { %1986 = vmatpush.bf16.msra.mxu1 %v1977_v30 }
 0x59e   : > { %v1584_v0 = vpop.f32.mrf.mxu0 }
 0x59f   : > { %v1585_v47 = vadd.f32 %v1584_v0, %v7260_v39 }
 0x5a1   : > { %v1594_v27 = vadd.f32 %v1585_v47, %v6716_v25 }
 0x5a4   : > { %v1589_v50 = vpop.f32.mrf.mxu2 }
 0x5a5   : > { %v1590_v20 = vadd.f32 %v1589_v50, %v7274_v48 }
 0x5a6   : > { %v1586_v17 = vpop.f32.mrf.mxu0 }
 0x5a7   : > { %v1587_v57 = vadd.f32 %v1586_v17, %v7257_v22  ;;  %v1596_v42 = vadd.f32 %v1590_v20, %v6718_v26  ;;  %v7317_v26 = vpop.permute.xlu1 %1607  ;;  %v5903_v17 = vld [vmem:[%s8806_s5 + $0x60] sm:$0xff] }
 0x5a8   : > { %5685 = vmatmul.msk.bf16.gmra.mxu3 %vm743_vm5, %v5903_v17 }
 0x5a9   : > { %v1595_v36 = vadd.f32 %v1587_v57, %v6714_v23 }
 0x5ab   : > { %v1598_v45 = vpack.c.bf16 %v1595_v36, %v1594_v27 }
 0x5ac   : > { %v1591_v14 = vpop.f32.mrf.mxu2 }
 0x5ad   : > { %v1592_v62 = vadd.f32 %v1591_v14, %v7251_v4 }
 0x5af   : > { %v1597_v1 = vadd.f32 %v1592_v62, %v6729_v35 }
 0x5b1   : > { %v1599_v44 = vpack.c.bf16 %v1597_v1, %v1596_v42 }
 0x5b3   : > { %1642 = vmatpush.bf16.msrb.mxu2 %v1599_v44 }
 0x5b7   : > { %1643 = vmatpush.bf16.msrb.mxu2 %v1598_v45 }
 0x5ba   : > { %5665 = vmatmul.msk.bf16.vlgmr.msrb.gmra.mxu2 %vm743_vm5, %v5899_v40 }
 0x63d   : > { %v1645_v24 = vpop.f32.mrf.mxu2 }
 0x63e   : > { %v1646_v7 = vadd.f32 %v1645_v24, %v7294_v43 }
 0x640   : > { %v1758_v52 = vmul.f32 0.35355338, %v1646_v7 }
 0x642   : > { %v1762_v25 = vpack.c.bf16 %v1758_v52, %v1758_v52 }
 0x645   : > { %v1647_v35 = vpop.f32.mrf.mxu2 }
 0x646   : > { %v1648_v23 = vadd.f32 %v1647_v35, %v7317_v26  ;;  %v574_v35 = vld [vmem:[%s8808_s7 + $0x100] sm:$0xff] }
 0x648   : > { %v1759_v19 = vmul.f32 0.35355338, %v1648_v23 }
 0x64a   : > { %v1945_v60 = vpack.c.bf16 %v1759_v19, %v1759_v19 }
 0x64c   : > { %5957 = vxpose.binary.xlu1.c.b16.start.end [1/2] (short) (narrow) %v1945_v60, %v1762_v25, 64 }
 0x6f8   : > { %v5958_v59 = vpop.trf.xlu1 }
 0x6f9   : > { %5687 = vmatmul.msk.bf16.vlgmr.msrb.gmra.mxu0 %vm423_vm1, %v5958_v59 }
 0x700   : > { %v5959_v41 = vpop.trf.xlu1 }
 0x701   : > { %5692 = vmatmul.msk.bf16.vlgmr.msra.gmra.mxu1 %vm423_vm1, %v5959_v41 }
 0x708   : > { %v5960_v13 = vpop.trf.xlu1 }
 0x709   : > { %5688 = vmatmul.msk.bf16.gmra.mxu0 %vm423_vm1, %v5960_v13 }
 0x710   : > { %v5961_v11 = vpop.trf.xlu1 }
 0x711   : > { %5693 = vmatmul.msk.bf16.gmra.mxu1 %vm423_vm1, %v5961_v11 }
 0x718   : > { %v5962_v37 = vpop.trf.xlu1 }
 0x719   : > { %5689 = vmatmul.msk.bf16.gmra.mxu0 %vm423_vm1, %v5962_v37 }
 0x720   : > { %v5963_v32 = vpop.trf.xlu1 }
 0x721   : > { %5694 = vmatmul.msk.bf16.gmra.mxu1 %vm423_vm1, %v5963_v32 }
 0x728   : > { %v5964_v10 = vpop.trf.xlu1 }
 0x729   : > { %5690 = vmatmul.msk.bf16.gmra.mxu0 %vm423_vm1, %v5964_v10 }
 0x730   : > { %v5965_v56 = vpop.trf.xlu1 }
 0x731   : > { %5695 = vmatmul.msk.bf16.gmra.mxu1 %vm423_vm1, %v5965_v56 }
 0x776   : > { %v7328_v49 = vpop.f32.mrf.mxu0 }
 0x777   : > { %v1825_v57 = vsel %vm492_vm6, %v7328_v49, -inf }
 0x77e   : > { %v7330_v51 = vpop.f32.mrf.mxu0  ;;  %v7332_v15 = vpop.f32.mrf.mxu1 }
 0x77f   : > { %v1828_v42 = vsel %vm492_vm6, %v7330_v51, -inf  ;;  %v2008_v27 = vsel %vm492_vm6, %v7332_v15, -inf }
 0x786   : > { %v1810_v2 = vpop.f32.mrf.mxu0  ;;  %v7334_v9 = vpop.f32.mrf.mxu1 }
 0x787   : > { %v1831_v5 = vsel %vm492_vm6, %v1810_v2, -inf  ;;  %v2011_v40 = vsel %vm492_vm6, %v7334_v9, -inf }
 0x788   : > { %1832 = vmax.xlane.f32.xlu2 %v1831_v5 }
 0x78e   : > { %v7337_v58 = vpop.f32.mrf.mxu0  ;;  %v7339_v6 = vpop.f32.mrf.mxu1 }
 0x78f   : > { %v1834_v63 = vsel %vm492_vm6, %v7337_v58, -inf  ;;  %v2014_v36 = vsel %vm492_vm6, %v7339_v6, -inf }
 0x790   : > { %1835 = vmax.xlane.f32.xlu0 %v1834_v63 }
 0x796   : > { %v7343_v46 = vpop.f32.mrf.mxu0  ;;  %v7345_v54 = vpop.f32.mrf.mxu1 }
 0x797   : > { %v1837_v3 = vsel %vm492_vm6, %v7343_v46, -inf  ;;  %v2017_v45 = vsel %vm492_vm6, %v7345_v54, -inf }
 0x798   : > { %1838 = vmax.xlane.f32.xlu2 %v1837_v3 }
 0x79e   : > { %v7353_v53 = vpop.f32.mrf.mxu0  ;;  %v7355_v55 = vpop.f32.mrf.mxu1 }
 0x79f   : > { %v1840_v29 = vsel %vm492_vm6, %v7353_v53, -inf  ;;  %v2020_v1 = vsel %vm492_vm6, %v7355_v55, -inf }
 0x7a0   : > { %1841 = vmax.xlane.f32.xlu0 %v1840_v29 }
 0x7a6   : > { %v7359_v30 = vpop.f32.mrf.mxu0  ;;  %v7361_v0 = vpop.f32.mrf.mxu1 }
 0x7a7   : > { %v1843_v50 = vsel %vm492_vm6, %v7359_v30, -inf  ;;  %v2023_v44 = vsel %vm492_vm6, %v7361_v0, -inf }
 0x7a8   : > { %1844 = vmax.xlane.f32.xlu0 %v1843_v50 }
 0x7ae   : > { %v7369_v20 = vpop.f32.mrf.mxu0  ;;  %v7371_v14 = vpop.f32.mrf.mxu1 }
 0x7af   : > { %v1846_v62 = vsel %vm492_vm6, %v7369_v20, -inf  ;;  %v2026_v47 = vsel %vm492_vm6, %v7371_v14, -inf }
 0x7b0   : > { %1826 = vmax.xlane.f32.xlu0 %v1825_v57  ;;  %1847 = vmax.xlane.f32.xlu2 %v1846_v62 }
 0x7b1   : > { %2027 = vmax.xlane.f32.xlu1 %v2026_v47 }
 0x7b6   : > { %v7393_v24 = vpop.f32.mrf.mxu1 }
 0x7b7   : > { %v2029_v7 = vsel %vm492_vm6, %v7393_v24, -inf }
 0x7b8   : > { %1829 = vmax.xlane.f32.xlu2 %v1828_v42  ;;  %2021 = vmax.xlane.f32.xlu0 %v2020_v1  ;;  %v5900_v42 = vld [vmem:[%s8806_s5 + $0x48] sm:$0xff] }
 0x7b9   : > { %5666 = vmatmul.msk.bf16.gmra.mxu2 %vm743_vm5, %v5900_v42 }
 0x7c0   : > { %2015 = vmax.xlane.f32.xlu0 %v2014_v36  ;;  %2024 = vmax.xlane.f32.xlu2 %v2023_v44 }
 0x7c8   : > { %2009 = vmax.xlane.f32.xlu0 %v2008_v27  ;;  %2018 = vmax.xlane.f32.xlu2 %v2017_v45 }
 0x7d0   : > { %2012 = vmax.xlane.f32.xlu2 %v2011_v40 }
 0x7d8   : > { %2030 = vmax.xlane.f32.xlu2 %v2029_v7 }
 0x7dc   : > { %1679 = vperm.xlu0 %5936, %v574_v35  }
 0x7fb   : > { %v1833_v23 = vpop.xlane.xlu2 %1832 }
 0x7fc   : > { %v1851_v11 = vsub.f32 %v1810_v2, %v1833_v23 }
 0x7fe   : > { %v1861_v32 = vmul.f32 1.442695, %v1851_v11 }
 0x803   : > { %v1836_v52 = vpop.xlane.xlu0 %1835 }
 0x80b   : > { %v1839_v25 = vpop.xlane.xlu2 %1838 }
 0x80c   : > { %v1853_v17 = vsub.f32 %v7343_v46, %v1839_v25 }
 0x80e   : > { %v1865_v1 = vmul.f32 1.442695, %v1853_v17 }
 0x813   : > { %v7400_v19 = vpop.xlane.xlu0 %1841 }
 0x81b   : > { %v1845_v60 = vpop.xlane.xlu0 %1844 }
 0x823   : > { %v1827_v59 = vpop.xlane.xlu0 %1826  ;;  %v7402_v41 = vpop.xlane.xlu2 %1847 }
 0x824   : > { %v1849_v13 = vsub.f32 %v7328_v49, %v1827_v59  ;;  %v1852_v59 = vsub.f32 %v7337_v58, %v1836_v52 }
 0x826   : > { %v1857_v37 = vmul.f32 1.442695, %v1849_v13  ;;  %v1855_v13 = vsub.f32 %v7359_v30, %v1845_v60 }
 0x828   : > { %6119 = vpow2.f32 %v1857_v37 }
 0x829   : > { %6121 = vpow2.f32 %v1861_v32  ;;  %v1863_v32 = vmul.f32 1.442695, %v1852_v59 }
 0x82b   : > { %v2022_v10 = vpop.xlane.xlu0 %2021  ;;  %v1830_v56 = vpop.xlane.xlu2 %1829 }
 0x82c   : > { %v1850_v5 = vsub.f32 %v7330_v51, %v1830_v56  ;;  %v2036_v27 = vsub.f32 %v7355_v55, %v2022_v10  ;;  %v1869_v10 = vmul.f32 1.442695, %v1855_v13  ;;  %v569_v13 = vld [vmem:[%s8808_s7 + $0xd8] sm:$0xff] }
 0x82e   : > { %v7406_v63 = vpop.eup %6119  ;;  %v1859_v3 = vmul.f32 1.442695, %v1850_v5  ;;  %v2048_v7 = vmul.f32 1.442695, %v2036_v27 }
 0x82f   : > { %v1873_v34 = vsel %vm492_vm6, %v7406_v63, 0.0  ;;  %v7412_v49 = vpop.eup %6121 }
 0x830   : > { %1874 = vadd.xlane.f32.xlu0 %v1873_v34  ;;  %6123 = vpow2.f32 %v1859_v3  ;;  %v1879_v62 = vsel %vm492_vm6, %v7412_v49, 0.0  ;;  %v1854_v34 = vsub.f32 %v7353_v53, %v7400_v19 }
 0x833   : > { %v2016_v29 = vpop.xlane.xlu0 %2015  ;;  %v7410_v50 = vpop.xlane.xlu2 %2024 }
 0x834   : > { %v2034_v2 = vsub.f32 %v7339_v6, %v2016_v29 }
 0x836   : > { %v2044_v57 = vmul.f32 1.442695, %v2034_v2  ;;  %v7416_v51 = vpop.eup %6123  ;;  %v1867_v2 = vmul.f32 1.442695, %v1854_v34 }
 0x837   : > { %v1876_v47 = vsel %vm492_vm6, %v7416_v51, 0.0 }
 0x838   : > { %6125 = vpow2.f32 %v2044_v57  ;;  %1880 = vadd.xlane.f32.xlu0 %v1879_v62  ;;  %1877 = vadd.xlane.f32.xlu2 %v1876_v47  ;;  %v2037_v57 = vsub.f32 %v7361_v0, %v7410_v50  ;;  %v1856_v47 = vsub.f32 %v7369_v20, %v7402_v41 }
 0x839   : > { %6127 = vpow2.f32 %v1865_v1  ;;  %v568_v1 = vld [vmem:[%s8808_s7 + $0xd0] sm:$0xff] }
 0x83a   : > { %v2050_v53 = vmul.f32 1.442695, %v2037_v57  ;;  %v1871_v0 = vmul.f32 1.442695, %v1856_v47 }
 0x83b   : > { %v2010_v6 = vpop.xlane.xlu0 %2009  ;;  %v2019_v46 = vpop.xlane.xlu2 %2018 }
 0x83c   : > { %v2032_v36 = vsub.f32 %v7332_v15, %v2010_v6  ;;  %v2035_v30 = vsub.f32 %v7345_v54, %v2019_v46 }
 0x83e   : > { %v7427_v44 = vpop.eup %6125  ;;  %v2040_v45 = vmul.f32 1.442695, %v2032_v36  ;;  %v2046_v56 = vmul.f32 1.442695, %v2035_v30 }
 0x83f   : > { %v2062_v40 = vsel %vm492_vm6, %v7427_v44, 0.0  ;;  %v7432_v23 = vpop.eup %6127 }
 0x840   : > { %6129 = vpow2.f32 %v2040_v45  ;;  %2063 = vadd.xlane.f32.xlu0 %v2062_v40  ;;  %v1885_v11 = vsel %vm492_vm6, %v7432_v23, 0.0 }
 0x841   : > { %6131 = vpow2.f32 %v2048_v7  ;;  %v2028_v7 = vpop.xlane.xlu1 %2027 }
 0x843   : > { %v2013_v35 = vpop.xlane.xlu2 %2012 }
 0x844   : > { %v2033_v25 = vsub.f32 %v7334_v9, %v2013_v35  ;;  %v2038_v35 = vsub.f32 %v7371_v14, %v2028_v7  ;;  %v572_v14 = vld [vmem:[%s8808_s7 + $0xf0] sm:$0xff] }
 0x846   : > { %v7436_v15 = vpop.eup %6129  ;;  %v2042_v55 = vmul.f32 1.442695, %v2033_v25 }
 0x847   : > { %v2056_v37 = vsel %vm492_vm6, %v7436_v15, 0.0  ;;  %v7443_v9 = vpop.eup %6131 }
 0x848   : > { %6133 = vpow2.f32 %v2042_v55  ;;  %1886 = vadd.xlane.f32.xlu0 %v1885_v11  ;;  %2057 = vadd.xlane.f32.xlu2 %v2056_v37  ;;  %v2068_v52 = vsel %vm492_vm6, %v7443_v9, 0.0  ;;  %v575_v55 = vld [vmem:[%s8808_s7 + $0x108] sm:$0xff] }
 0x849   : > { %6135 = vpow2.f32 %v1863_v32 }
 0x84a   : > { %6137 = vpow2.f32 %v1869_v10  ;;  %v573_v10 = vld [vmem:[%s8808_s7 + $0xf8] sm:$0xff] }
 0x84b   : > { %6139 = vpow2.f32 %v2046_v56  ;;  %v2031_v50 = vpop.xlane.xlu2 %2030 }
 0x84c   : > { %6141 = vpow2.f32 %v1867_v2  ;;  %v2039_v46 = vsub.f32 %v7393_v24, %v2031_v50  ;;  %v2052_v24 = vmul.f32 1.442695, %v2038_v35 }
 0x84d   : > { %6143 = vpow2.f32 %v2050_v53 }
 0x84e   : > { %v7445_v58 = vpop.eup %6133  ;;  %6145 = vpow2.f32 %v1871_v0  ;;  %v2054_v41 = vmul.f32 1.442695, %v2039_v46  ;;  %v7498_v11 = vpop.permute.xlu0 %1679 }
 0x84f   : > { %v2059_v60 = vsel %vm492_vm6, %v7445_v58, 0.0  ;;  %v7452_v5 = vpop.eup %6135  ;;  %v1650_v0 = vpop.f32.mrf.mxu2 }
 0x850   : > { %2069 = vadd.xlane.f32.xlu0 %v2068_v52  ;;  %2060 = vadd.xlane.f32.xlu2 %v2059_v60  ;;  %v7454_v3 = vpop.eup %6137  ;;  %v1882_v29 = vsel %vm492_vm6, %v7452_v5, 0.0  ;;  %6147 = vpow2.f32 %v2054_v41 }
 0x851   : > { %v1891_v54 = vsel %vm492_vm6, %v7454_v3, 0.0  ;;  %v7462_v17 = vpop.eup %6139  ;;  %6149 = vpow2.f32 %v2052_v24 }
 0x852   : > { %v2065_v62 = vsel %vm492_vm6, %v7462_v17, 0.0  ;;  %v7468_v19 = vpop.eup %6141 }
 0x853   : > { %v1888_v42 = vsel %vm492_vm6, %v7468_v19, 0.0  ;;  %v7477_v6 = vpop.eup %6143 }
 0x854   : > { %v2071_v20 = vsel %vm492_vm6, %v7477_v6, 0.0  ;;  %v6146_v36 = vpop.eup %6145 }
 0x855   : > { %v1894_v27 = vsel %vm492_vm6, %v6146_v36, 0.0 }
 0x856   : > { %v7483_v45 = vpop.eup %6147 }
 0x857   : > { %v2077_v40 = vsel %vm492_vm6, %v7483_v45, 0.0  ;;  %v7488_v25 = vpop.eup %6149 }
 0x858   : > { %1892 = vadd.xlane.f32.xlu0 %v1891_v54  ;;  %1883 = vadd.xlane.f32.xlu2 %v1882_v29  ;;  %v2074_v59 = vsel %vm492_vm6, %v7488_v25, 0.0 }
 0x860   : > { %2066 = vadd.xlane.f32.xlu2 %v2065_v62 }
 0x868   : > { %1889 = vadd.xlane.f32.xlu2 %v1888_v42 }
 0x86c   : > { %1612 = vperm.xlu0 %5936, %v568_v1  }
 0x870   : > { %2072 = vadd.xlane.f32.xlu2 %v2071_v20 }
 0x878   : > { %1895 = vadd.xlane.f32.xlu2 %v1894_v27 }
 0x880   : > { %2078 = vadd.xlane.f32.xlu2 %v2077_v40 }
 0x896   : > { %2075 = vadd.xlane.f32.xlu0 %v2074_v59 }
 0x898   : > { %1617 = vperm.xlu2 %5938, %v569_v13  }
 0x8a3   : > { %v1875_v32 = vpop.xlane.xlu0 %1874 }
 0x8aa   : > { %1684 = vperm.xlu0 %5936, %v575_v55   ;;  %v7521_v55 = vpop.f32.mrf.mxu3 }
 0x8ab   : > { %v1878_v37 = vpop.xlane.xlu2 %1877  ;;  %v1881_v52 = vpop.xlane.xlu0 %1880 }
 0x8b2   : > { %1669 = vperm.xlu0 %5936, %v572_v14  }
 0x8b3   : > { %v7510_v56 = vpop.xlane.xlu0 %2063 }
 0x8ba   : > { %1674 = vperm.xlu0 %5936, %v573_v10  }
 0x8bb   : > { %v7506_v30 = vpop.xlane.xlu2 %2057  ;;  %v1887_v54 = vpop.xlane.xlu0 %1886 }
 0x8c3   : > { %v7508_v60 = vpop.xlane.xlu2 %2060  ;;  %v2070_v57 = vpop.xlane.xlu0 %2069 }
 0x8cb   : > { %v1884_v34 = vpop.xlane.xlu2 %1883  ;;  %v1893_v53 = vpop.xlane.xlu0 %1892 }
 0x8cc   : > { %6151 = vrcp.f32 %v1893_v53 }
 0x8d2   : > { %v6152_v42 = vpop.eup %6151 }
 0x8d3   : > { %v7512_v29 = vpop.xlane.xlu2 %2066  ;;  %v1911_v46 = vmul.f32 %v6152_v42, %v7454_v3  ;;  %v1652_v3 = vpop.f32.mrf.mxu2 }
 0x8db   : > { %v1890_v2 = vpop.xlane.xlu2 %1889 }
 0x8de   : > { %v7515_v27 = vpop.permute.xlu0 %1612 }
 0x8df   : > { %v1651_v59 = vadd.f32 %v1650_v0, %v7515_v27 }
 0x8e3   : > { %v2073_v62 = vpop.xlane.xlu2 %2072 }
 0x8eb   : > { %v1896_v47 = vpop.xlane.xlu2 %1895 }
 0x8ec   : > { %6153 = vrcp.f32 %v1896_v47 }
 0x8ed   : > { %6155 = vrcp.f32 %v1890_v2 }
 0x8ee   : > { %6157 = vrcp.f32 %v1887_v54  ;;  %v1760_v54 = vmul.f32 0.35355338, %v1651_v59 }
 0x8ef   : > { %6159 = vrcp.f32 %v1884_v34 }
 0x8f0   : > { %6161 = vrcp.f32 %v1881_v52  ;;  %v2128_v47 = vpack.c.bf16 %v1760_v54, %v1760_v54 }
 0x8f1   : > { %6163 = vrcp.f32 %v1878_v37 }
 0x8f2   : > { %v6154_v1 = vpop.eup %6153  ;;  %6165 = vrcp.f32 %v1875_v32 }
 0x8f3   : > { %v2079_v50 = vpop.xlane.xlu2 %2078  ;;  %v1912_v20 = vmul.f32 %v6154_v1, %v6146_v36  ;;  %v6156_v41 = vpop.eup %6155 }
 0x8f4   : > { %v6158_v7 = vpop.eup %6157  ;;  %v1910_v24 = vmul.f32 %v6156_v41, %v7468_v19  ;;  %6167 = vrcp.f32 %v2079_v50 }
 0x8f5   : > { %v1916_v40 = vpack.c.bf16 %v1912_v20, %v1911_v46  ;;  %v1909_v13 = vmul.f32 %v6158_v7, %v7432_v23  ;;  %v6160_v10 = vpop.eup %6159  ;;  %v1745_v46 = vpop.f32.mrf.mxu3 }
 0x8f6   : > { %v6162_v2 = vpop.eup %6161  ;;  %v1908_v52 = vmul.f32 %v6160_v10, %v7452_v5  ;;  %v5904_v10 = vld [vmem:[%s8806_s5 + $0x68] sm:$0xff] }
 0x8f7   : > { %v1930_v35 = vsel %vm492_vm6, %v1916_v40, 0  ;;  %v1915_v14 = vpack.c.bf16 %v1910_v24, %v1909_v13  ;;  %v1907_v42 = vmul.f32 %v6162_v2, %v7412_v49  ;;  %v6164_v0 = vpop.eup %6163  ;;  %5686 = vmatmul.msk.bf16.gmra.mxu3 %vm743_vm5, %v5904_v10 }
 0x8f8   : > { %1936 = vmatpush.bf16.xpose.msra.mxu2 %v1930_v35  ;;  %v6166_v20 = vpop.eup %6165  ;;  %v1906_v37 = vmul.f32 %v6164_v0, %v7416_v51 }
 0x8f9   : > { %v1927_v19 = vsel %vm492_vm6, %v1915_v14, 0  ;;  %v1914_v1 = vpack.c.bf16 %v1908_v52, %v1907_v42  ;;  %v1905_v5 = vmul.f32 %v6166_v20, %v7406_v63 }
 0x8fa   : > { %v6168_v7 = vpop.eup %6167 }
 0x8fb   : > { %v7523_v36 = vpop.permute.xlu2 %1617  ;;  %v1924_v41 = vsel %vm492_vm6, %v1914_v1, 0  ;;  %v1913_v32 = vpack.c.bf16 %v1906_v37, %v1905_v5  ;;  %v2095_v51 = vmul.f32 %v6168_v7, %v7483_v45 }
 0x8fc   : > { %v1653_v34 = vadd.f32 %v1652_v3, %v7523_v36 }
 0x8fd   : > { %v1748_v35 = vpop.f32.mrf.mxu3  ;;  %v1921_v49 = vsel %vm492_vm6, %v1913_v32, 0 }
 0x8fe   : > { %v1761_v53 = vmul.f32 0.35355338, %v1653_v34  ;;  %v1749_v59 = vadd.f32 %v1748_v35, %v7498_v11 }
 0x900   : > { %v2311_v23 = vpack.c.bf16 %v1761_v53, %v1761_v53  ;;  %1937 = vmatpush.bf16.xpose.msra.mxu2 %v1927_v19  ;;  %v1764_v63 = vpack.c.bf16 %v1749_v59, %v1749_v59 }
 0x902   : > { %5966 = vxpose.binary.xlu2.c.b16.start.end [1/2] (short) (narrow) %v2311_v23, %v2128_v47, 64 }
 0x908   : > { %1938 = vmatpush.bf16.xpose.msra.mxu2 %v1924_v41 }
 0x909   : > { %v2076_v40 = vpop.xlane.xlu0 %2075 }
 0x90a   : > { %6169 = vrcp.f32 %v2076_v40 }
 0x90b   : > { %6171 = vrcp.f32 %v2073_v62 }
 0x90c   : > { %6173 = vrcp.f32 %v2070_v57 }
 0x90d   : > { %6175 = vrcp.f32 %v7512_v29 }
 0x90e   : > { %6177 = vrcp.f32 %v7510_v56 }
 0x90f   : > { %6179 = vrcp.f32 %v7508_v60 }
 0x910   : > { %v6170_v24 = vpop.eup %6169  ;;  %1939 = vmatpush.bf16.xpose.msra.mxu2 %v1921_v49  ;;  %6181 = vrcp.f32 %v7506_v30 }
 0x911   : > { %v2094_v13 = vmul.f32 %v6170_v24, %v7488_v25  ;;  %v6172_v50 = vpop.eup %6171 }
 0x912   : > { %v6174_v14 = vpop.eup %6173  ;;  %v2093_v57 = vmul.f32 %v6172_v50, %v7477_v6 }
 0x913   : > { %v2099_v3 = vpack.c.bf16 %v2095_v51, %v2094_v13  ;;  %v2092_v45 = vmul.f32 %v6174_v14, %v7443_v9  ;;  %v6176_v29 = vpop.eup %6175 }
 0x914   : > { %v6178_v54 = vpop.eup %6177  ;;  %v2091_v2 = vmul.f32 %v6176_v29, %v7462_v17 }
 0x915   : > { %v2113_v62 = vsel %vm492_vm6, %v2099_v3, 0  ;;  %v2098_v25 = vpack.c.bf16 %v2093_v57, %v2092_v45  ;;  %v2090_v56 = vmul.f32 %v6178_v54, %v7427_v44  ;;  %v6180_v9 = vpop.eup %6179  ;;  %v1750_v44 = vpop.f32.mrf.mxu3 }
 0x916   : > { %v6182_v19 = vpop.eup %6181  ;;  %v2089_v23 = vmul.f32 %v6180_v9, %v7445_v58 }
 0x917   : > { %5691 = vmatmul.msk.bf16.vlgmr.msra.gmra.mxu2 %vm492_vm6, %v1764_v63  ;;  %v2110_v6 = vsel %vm492_vm6, %v2098_v25, 0  ;;  %v2097_v53 = vpack.c.bf16 %v2091_v2, %v2090_v56  ;;  %v2088_v17 = vmul.f32 %v6182_v19, %v7436_v15 }
 0x918   : > { %2119 = vmatpush.bf16.xpose.msrb.mxu2 %v2113_v62 }
 0x919   : > { %v2107_v60 = vsel %vm492_vm6, %v2097_v53, 0  ;;  %v2096_v1 = vpack.c.bf16 %v2089_v23, %v2088_v17  ;;  %v598_v17 = vld [vmem:[%s8808_s7 + $0x140] sm:$0xff] }
 0x91b   : > { %v2104_v41 = vsel %vm492_vm6, %v2096_v1, 0 }
 0x91c   : > { %v7547_v34 = vpop.permute.xlu0 %1684 }
 0x920   : > { %2120 = vmatpush.bf16.xpose.msrb.mxu2 %v2110_v6 }
 0x924   : > { %v7553_v52 = vpop.permute.xlu0 %1669 }
 0x925   : > { %v1744_v47 = vadd.f32 %v7521_v55, %v7553_v52  ;;  %v1751_v55 = vadd.f32 %v1750_v44, %v7547_v34 }
 0x927   : > { %v2129_v42 = vpack.c.bf16 %v1744_v47, %v1744_v47  ;;  %v1947_v40 = vpack.c.bf16 %v1751_v55, %v1751_v55 }
 0x928   : > { %2121 = vmatpush.bf16.xpose.msrb.mxu2 %v2107_v60 }
 0x929   : > { %v2160_v30 = vsel %vm430_vm0, %v2129_v42, 0 }
 0x92a   : > { %2169 = vmatpush.bf16.msra.mxu3 %v2160_v30 }
 0x92c   : > { %v7561_v0 = vpop.permute.xlu0 %1674 }
 0x92d   : > { %v1746_v20 = vadd.f32 %v1745_v46, %v7561_v0 }
 0x92f   : > { %v2312_v37 = vpack.c.bf16 %v1746_v20, %v1746_v20 }
 0x930   : > { %2122 = vmatpush.bf16.xpose.msrb.mxu2 %v2104_v41 }
 0x931   : > { %v2343_v58 = vsel %vm430_vm0, %v2312_v37, 0 }
 0x937   : > { %5696 = vmatmul.msk.bf16.vlgmr.msrb.gmra.mxu2 %vm492_vm6, %v1947_v40 }
 0x938   : > { %2352 = vmatpush.bf16.msra.mxu2 %v2343_v58 }
 0x97a   : > { %v7581_v3 = vpop.f32.mrf.mxu3 }
 0x982   : > { %v7583_v14 = vpop.f32.mrf.mxu3 }
 0x99a   : > { %v7568_v15 = vpop.f32.mrf.mxu2 }
 0x9a2   : > { %v1943_v5 = vpop.f32.mrf.mxu2 }
 0x9a3   : > { %v5967_v32 = vpop.trf.xlu2 }
 0x9a4   : > { %5697 = vmatmul.msk.bf16.vlgmr.msra.gmra.mxu3 %vm423_vm1, %v5967_v32 }
 0x9ab   : > { %v5968_v7 = vpop.trf.xlu2 }
 0x9ac   : > { %5702 = vmatmul.msk.bf16.vlgmr.msra.gmra.mxu2 %vm423_vm1, %v5968_v7 }
 0x9b3   : > { %v5969_v46 = vpop.trf.xlu2 }
 0x9b4   : > { %5698 = vmatmul.msk.bf16.gmra.mxu3 %vm423_vm1, %v5969_v46 }
 0x9ba   : > { %v7573_v35 = vpop.f32.mrf.mxu2 }
 0x9bb   : > { %v2494_v49 = vpack.c.bf16 %v7573_v35, %v7568_v15  ;;  %v5970_v24 = vpop.trf.xlu2 }
 0x9bc   : > { %5703 = vmatmul.msk.bf16.gmra.mxu2 %vm423_vm1, %v5970_v24 }
 0x9c2   : > { %v2126_v59 = vpop.f32.mrf.mxu2 }
 0x9c3   : > { %v5971_v13 = vpop.trf.xlu2 }
 0x9c4   : > { %5699 = vmatmul.msk.bf16.gmra.mxu3 %vm423_vm1, %v5971_v13 }
 0x9cb   : > { %v5972_v51 = vpop.trf.xlu2 }
 0x9cc   : > { %5704 = vmatmul.msk.bf16.gmra.mxu2 %vm423_vm1, %v5972_v51 }
 0x9d3   : > { %v5973_v50 = vpop.trf.xlu2 }
 0x9d4   : > { %5700 = vmatmul.msk.bf16.gmra.mxu3 %vm423_vm1, %v5973_v50 }
 0x9db   : > { %v5974_v54 = vpop.trf.xlu2 }
 0x9dc   : > { %5705 = vmatmul.msk.bf16.gmra.mxu2 %vm423_vm1, %v5974_v54 }
 0xa27   : > { %v7585_v63 = vpop.f32.mrf.mxu3 }
 0xa28   : > { %v2191_v55 = vsel %vm492_vm6, %v7585_v63, -inf }
 0xa2f   : > { %v7587_v62 = vpop.f32.mrf.mxu3  ;;  %v7589_v57 = vpop.f32.mrf.mxu2 }
 0xa30   : > { %v2194_v37 = vsel %vm492_vm6, %v7587_v62, -inf  ;;  %v2374_v58 = vsel %vm492_vm6, %v7589_v57, -inf }
 0xa37   : > { %v2176_v10 = vpop.f32.mrf.mxu3  ;;  %v7591_v45 = vpop.f32.mrf.mxu2 }
 0xa38   : > { %v2197_v1 = vsel %vm492_vm6, %v2176_v10, -inf  ;;  %v2377_v40 = vsel %vm492_vm6, %v7591_v45, -inf }
 0xa3f   : > { %v7593_v25 = vpop.f32.mrf.mxu3  ;;  %v7595_v29 = vpop.f32.mrf.mxu2 }
 0xa40   : > { %v2200_v44 = vsel %vm492_vm6, %v7593_v25, -inf  ;;  %v2380_v20 = vsel %vm492_vm6, %v7595_v29, -inf }
 0xa47   : > { %v2181_v6 = vpop.f32.mrf.mxu3  ;;  %v7598_v2 = vpop.f32.mrf.mxu2 }
 0xa48   : > { %v2203_v23 = vsel %vm492_vm6, %v2181_v6, -inf  ;;  %v2383_v41 = vsel %vm492_vm6, %v7598_v2, -inf }
 0xa4f   : > { %v7600_v56 = vpop.f32.mrf.mxu3  ;;  %v7602_v53 = vpop.f32.mrf.mxu2 }
 0xa50   : > { %v2386_v9 = vsel %vm492_vm6, %v7602_v53, -inf  ;;  %v2206_v30 = vsel %vm492_vm6, %v7600_v56, -inf }
 0xa51   : > { %2387 = vmax.xlane.f32.xlu2 %v2386_v9 }
 0xa57   : > { %v2186_v19 = vpop.f32.mrf.mxu3 }
 0xa58   : > { %v2209_v47 = vsel %vm492_vm6, %v2186_v19, -inf }
 0xa59   : > { %2210 = vmax.xlane.f32.xlu1 %v2209_v47 }
 0xa5f   : > { %v2188_v60 = vpop.f32.mrf.mxu3 }
 0xa60   : > { %v2212_v42 = vsel %vm492_vm6, %v2188_v60, -inf }
 0xa61   : > { %2204 = vmax.xlane.f32.xlu1 %v2203_v23  ;;  %2213 = vmax.xlane.f32.xlu0 %v2212_v42 }
 0xa69   : > { %2553 = vperm.xlu2 %5938, %v598_v17   ;;  %2207 = vmax.xlane.f32.xlu1 %v2206_v30 }
 0xa6a   : > { %2198 = vmax.xlane.f32.xlu0 %v2197_v1  ;;  %v7641_v1 = vpop.f32.mrf.mxu2 }
 0xa71   : > { %2201 = vmax.xlane.f32.xlu1 %v2200_v44 }
 0xa72   : > { %2381 = vmax.xlane.f32.xlu0 %v2380_v20 }
 0xa79   : > { %2384 = vmax.xlane.f32.xlu1 %v2383_v41 }
 0xa7a   : > { %2192 = vmax.xlane.f32.xlu0 %v2191_v55 }
 0xa81   : > { %2195 = vmax.xlane.f32.xlu1 %v2194_v37  ;;  %v7649_v37 = vpop.f32.mrf.mxu2 }
 0xa82   : > { %2375 = vmax.xlane.f32.xlu0 %v2374_v58 }
 0xa89   : > { %2378 = vmax.xlane.f32.xlu1 %v2377_v40 }
 0xacc   : > { %v2211_v5 = vpop.xlane.xlu1 %2210 }
 0xacd   : > { %v2221_v32 = vsub.f32 %v2186_v19, %v2211_v5  ;;  %v2392_v5 = vsel %vm492_vm6, %v7649_v37, -inf }
 0xacf   : > { %v2235_v7 = vmul.f32 1.442695, %v2221_v32 }
 0xad1   : > { %6183 = vpow2.f32 %v2235_v7 }
 0xad4   : > { %v2205_v46 = vpop.xlane.xlu1 %2204  ;;  %v2214_v24 = vpop.xlane.xlu0 %2213 }
 0xad5   : > { %v2219_v59 = vsub.f32 %v2181_v6, %v2205_v46  ;;  %v2222_v13 = vsub.f32 %v2188_v60, %v2214_v24 }
 0xad7   : > { %v7629_v51 = vpop.eup %6183  ;;  %v2231_v50 = vmul.f32 1.442695, %v2219_v59  ;;  %v2237_v54 = vmul.f32 1.442695, %v2222_v13  ;;  %v7655_v13 = vpop.f32.mrf.mxu2 }
 0xad8   : > { %v2257_v9 = vsel %vm492_vm6, %v7629_v51, 0.0 }
 0xad9   : > { %6185 = vpow2.f32 %v2231_v50  ;;  %2258 = vadd.xlane.f32.xlu0 %v2257_v9 }
 0xada   : > { %6187 = vpow2.f32 %v2237_v54 }
 0xadc   : > { %v2208_v47 = vpop.xlane.xlu1 %2207 }
 0xadd   : > { %v2199_v23 = vpop.xlane.xlu0 %2198  ;;  %v2220_v32 = vsub.f32 %v7600_v56, %v2208_v47  ;;  %v2395_v47 = vsel %vm492_vm6, %v7655_v13, -inf }
 0xade   : > { %v2217_v42 = vsub.f32 %v2176_v10, %v2199_v23  ;;  %v2389_v10 = vsel %vm492_vm6, %v7641_v1, -inf }
 0xadf   : > { %v7633_v19 = vpop.eup %6185  ;;  %v2233_v24 = vmul.f32 1.442695, %v2220_v32 }
 0xae0   : > { %v7635_v17 = vpop.eup %6187  ;;  %v2227_v30 = vmul.f32 1.442695, %v2217_v42  ;;  %v2251_v6 = vsel %vm492_vm6, %v7633_v19, 0.0 }
 0xae1   : > { %2252 = vadd.xlane.f32.xlu0 %v2251_v6  ;;  %v2260_v60 = vsel %vm492_vm6, %v7635_v17, 0.0 }
 0xae2   : > { %6189 = vpow2.f32 %v2227_v30  ;;  %2261 = vadd.xlane.f32.xlu1 %v2260_v60 }
 0xae4   : > { %v2202_v20 = vpop.xlane.xlu1 %2201 }
 0xae5   : > { %v2382_v44 = vpop.xlane.xlu0 %2381  ;;  %v2218_v54 = vsub.f32 %v7593_v25, %v2202_v20 }
 0xae7   : > { %v2229_v42 = vmul.f32 1.442695, %v2218_v54 }
 0xae8   : > { %v7643_v41 = vpop.eup %6189 }
 0xae9   : > { %v2245_v55 = vsel %vm492_vm6, %v7643_v41, 0.0 }
 0xaea   : > { %2390 = vmax.xlane.f32.xlu1 %v2389_v10  ;;  %2246 = vadd.xlane.f32.xlu0 %v2245_v55 }
 0xaec   : > { %v2385_v46 = vpop.xlane.xlu1 %2384 }
 0xaed   : > { %v2193_v58 = vpop.xlane.xlu0 %2192  ;;  %v2401_v54 = vsub.f32 %v7598_v2, %v2385_v46 }
 0xaee   : > { %v2215_v40 = vsub.f32 %v7585_v63, %v2193_v58  ;;  %v2400_v63 = vsub.f32 %v7595_v29, %v2382_v44 }
 0xaf0   : > { %v2223_v7 = vmul.f32 1.442695, %v2215_v40  ;;  %v2410_v6 = vmul.f32 1.442695, %v2400_v63 }
 0xaf2   : > { %6191 = vpow2.f32 %v2223_v7  ;;  %2393 = vmax.xlane.f32.xlu1 %v2392_v5 }
 0xaf3   : > { %6193 = vpow2.f32 %v2233_v24 }
 0xaf4   : > { %v2196_v30 = vpop.xlane.xlu1 %2195 }
 0xaf5   : > { %v2376_v59 = vpop.xlane.xlu0 %2375  ;;  %v2216_v44 = vsub.f32 %v7587_v62, %v2196_v30 }
 0xaf6   : > { %v2398_v50 = vsub.f32 %v7589_v57, %v2376_v59  ;;  %v2388_v57 = vpop.xlane.xlu2 %2387 }
 0xaf7   : > { %v2402_v60 = vsub.f32 %v7602_v53, %v2388_v57  ;;  %v2225_v58 = vmul.f32 1.442695, %v2216_v44 }
 0xaf8   : > { %v7659_v9 = vpop.eup %6191  ;;  %v2406_v23 = vmul.f32 1.442695, %v2398_v50 }
 0xaf9   : > { %v2239_v56 = vsel %vm492_vm6, %v7659_v9, 0.0  ;;  %v7666_v25 = vpop.eup %6193  ;;  %v2414_v55 = vmul.f32 1.442695, %v2402_v60 }
 0xafa   : > { %6195 = vpow2.f32 %v2406_v23  ;;  %2240 = vadd.xlane.f32.xlu0 %v2239_v56  ;;  %2396 = vmax.xlane.f32.xlu1 %v2395_v47  ;;  %v2254_v10 = vsel %vm492_vm6, %v7666_v25, 0.0  ;;  %v2412_v23 = vmul.f32 1.442695, %v2401_v54 }
 0xafb   : > { %6197 = vpow2.f32 %v2229_v42 }
 0xafc   : > { %6199 = vpow2.f32 %v2410_v6  ;;  %v2379_v5 = vpop.xlane.xlu1 %2378 }
 0xafd   : > { %6201 = vpow2.f32 %v2414_v55  ;;  %v2399_v32 = vsub.f32 %v7591_v45, %v2379_v5 }
 0xafe   : > { %6203 = vpow2.f32 %v2225_v58 }
 0xaff   : > { %v2408_v24 = vmul.f32 1.442695, %v2399_v32 }
 0xb00   : > { %v7669_v29 = vpop.eup %6195 }
 0xb01   : > { %v2422_v20 = vsel %vm492_vm6, %v7669_v29, 0.0  ;;  %v7676_v40 = vpop.eup %6197  ;;  %6205 = vpow2.f32 %v2408_v24 }
 0xb02   : > { %2423 = vadd.xlane.f32.xlu0 %v2422_v20  ;;  %2255 = vadd.xlane.f32.xlu1 %v2254_v10  ;;  %v7678_v53 = vpop.eup %6199  ;;  %v2248_v7 = vsel %vm492_vm6, %v7676_v40, 0.0  ;;  %6207 = vpow2.f32 %v2412_v23 }
 0xb03   : > { %v2428_v62 = vsel %vm492_vm6, %v7678_v53, 0.0  ;;  %v7685_v59 = vpop.eup %6201 }
 0xb04   : > { %v7687_v50 = vpop.eup %6203  ;;  %v2434_v45 = vsel %vm492_vm6, %v7685_v59, 0.0 }
 0xb05   : > { %v2242_v63 = vsel %vm492_vm6, %v7687_v50, 0.0 }
 0xb07   : > { %v7694_v56 = vpop.eup %6205 }
 0xb08   : > { %v2425_v47 = vsel %vm492_vm6, %v7694_v56, 0.0  ;;  %v7698_v42 = vpop.eup %6207 }
 0xb09   : > { %v2431_v2 = vsel %vm492_vm6, %v7698_v42, 0.0 }
 0xb0a   : > { %2429 = vadd.xlane.f32.xlu0 %v2428_v62  ;;  %2249 = vadd.xlane.f32.xlu1 %v2248_v7 }
 0xb12   : > { %2243 = vadd.xlane.f32.xlu1 %v2242_v63  ;;  %2435 = vadd.xlane.f32.xlu0 %v2434_v45 }
 0xb1a   : > { %2426 = vadd.xlane.f32.xlu1 %v2425_v47 }
 0xb22   : > { %2432 = vadd.xlane.f32.xlu1 %v2431_v2 }
 0xb4c   : > { %v2259_v46 = vpop.xlane.xlu0 %2258 }
 0xb4d   : > { %6209 = vrcp.f32 %v2259_v46 }
 0xb53   : > { %v6210_v57 = vpop.eup %6209 }
 0xb54   : > { %v2277_v44 = vmul.f32 %v6210_v57, %v7629_v51 }
 0xb55   : > { %v2262_v30 = vpop.xlane.xlu1 %2261 }
 0xb56   : > { %6211 = vrcp.f32 %v2262_v30 }
 0xb5c   : > { %v6212_v6 = vpop.eup %6211 }
 0xb5d   : > { %v2391_v60 = vpop.xlane.xlu1 %2390  ;;  %v2278_v20 = vmul.f32 %v6212_v6, %v7635_v17 }
 0xb5e   : > { %v2403_v10 = vsub.f32 %v7641_v1, %v2391_v60  ;;  %v2253_v1 = vpop.xlane.xlu0 %2252 }
 0xb5f   : > { %v2282_v55 = vpack.c.bf16 %v2278_v20, %v2277_v44 }
 0xb60   : > { %v2416_v58 = vmul.f32 1.442695, %v2403_v10 }
 0xb61   : > { %v2296_v5 = vsel %vm492_vm6, %v2282_v55, 0 }
 0xb62   : > { %6213 = vpow2.f32 %v2416_v58  ;;  %2302 = vmatpush.bf16.xpose.msra.mxu0 %v2296_v5  ;;  %v576_v58 = vld [vmem:[%s8808_s7 + $0x110] sm:$0xff] }
 0xb65   : > { %v2394_v32 = vpop.xlane.xlu1 %2393 }
 0xb66   : > { %v2404_v62 = vsub.f32 %v7649_v37, %v2394_v32  ;;  %v2247_v2 = vpop.xlane.xlu0 %2246 }
 0xb68   : > { %v7707_v7 = vpop.eup %6213  ;;  %v2418_v24 = vmul.f32 1.442695, %v2404_v62 }
 0xb69   : > { %v2437_v54 = vsel %vm492_vm6, %v7707_v7, 0.0 }
 0xb6a   : > { %6215 = vpow2.f32 %v2418_v24  ;;  %2438 = vadd.xlane.f32.xlu1 %v2437_v54 }
 0xb6d   : > { %v2397_v51 = vpop.xlane.xlu1 %2396 }
 0xb6e   : > { %v2405_v17 = vsub.f32 %v7655_v13, %v2397_v51  ;;  %v2241_v20 = vpop.xlane.xlu0 %2240  ;;  %v580_v51 = vld [vmem:[%s8808_s7 + $0x130] sm:$0xff] }
 0xb70   : > { %v7712_v63 = vpop.eup %6215  ;;  %v2420_v45 = vmul.f32 1.442695, %v2405_v17 }
 0xb71   : > { %v2440_v23 = vsel %vm492_vm6, %v7712_v63, 0.0 }
 0xb72   : > { %6217 = vpow2.f32 %v2420_v45  ;;  %2441 = vadd.xlane.f32.xlu0 %v2440_v23 }
 0xb73   : > { %6219 = vrcp.f32 %v2253_v1 }
 0xb75   : > { %v2256_v37 = vpop.xlane.xlu1 %2255 }
 0xb76   : > { %6221 = vrcp.f32 %v2256_v37  ;;  %v581_v37 = vld [vmem:[%s8808_s7 + $0x138] sm:$0xff] }
 0xb77   : > { %6223 = vrcp.f32 %v2247_v2  ;;  %v599_v2 = vld [vmem:[%s8808_s7 + $0x148] sm:$0xff] }
 0xb78   : > { %v7716_v47 = vpop.eup %6217 }
 0xb79   : > { %v2443_v46 = vsel %vm492_vm6, %v7716_v47, 0.0  ;;  %v6220_v13 = vpop.eup %6219 }
 0xb7a   : > { %2444 = vadd.xlane.f32.xlu1 %v2443_v46  ;;  %v2275_v6 = vmul.f32 %v6220_v13, %v7633_v19  ;;  %v603_v46 = vld [vmem:[%s8808_s7 + $0x168] sm:$0xff]  ;;  %v2424_v13 = vpop.xlane.xlu0 %2423 }
 0xb7c   : > { %v6222_v30 = vpop.eup %6221 }
 0xb7d   : > { %v2250_v57 = vpop.xlane.xlu1 %2249  ;;  %v2276_v60 = vmul.f32 %v6222_v30, %v7666_v25  ;;  %v6224_v55 = vpop.eup %6223 }
 0xb7e   : > { %6225 = vrcp.f32 %v2250_v57  ;;  %v2273_v19 = vmul.f32 %v6224_v55, %v7643_v41  ;;  %v577_v41 = vld [vmem:[%s8808_s7 + $0x118] sm:$0xff] }
 0xb7f   : > { %v2281_v44 = vpack.c.bf16 %v2276_v60, %v2275_v6  ;;  %6227 = vrcp.f32 %v2241_v20 }
 0xb81   : > { %v2293_v10 = vsel %vm492_vm6, %v2281_v44, 0 }
 0xb82   : > { %2303 = vmatpush.bf16.xpose.msra.mxu0 %v2293_v10  ;;  %v2430_v57 = vpop.xlane.xlu0 %2429 }
 0xb84   : > { %v6226_v5 = vpop.eup %6225 }
 0xb85   : > { %v2244_v32 = vpop.xlane.xlu1 %2243  ;;  %v2274_v25 = vmul.f32 %v6226_v5, %v7676_v40  ;;  %v6228_v24 = vpop.eup %6227 }
 0xb86   : > { %6229 = vrcp.f32 %v2244_v32  ;;  %1689 = vperm.xlu0 %5936, %v576_v58   ;;  %v2271_v1 = vmul.f32 %v6228_v24, %v7659_v9  ;;  %v578_v9 = vld [vmem:[%s8808_s7 + $0x120] sm:$0xff] }
 0xb87   : > { %v2280_v62 = vpack.c.bf16 %v2274_v25, %v2273_v19 }
 0xb89   : > { %v2290_v54 = vsel %vm492_vm6, %v2280_v62, 0 }
 0xb8a   : > { %2304 = vmatpush.bf16.xpose.msra.mxu0 %v2290_v54  ;;  %v2436_v60 = vpop.xlane.xlu0 %2435 }
 0xb8c   : > { %v6230_v17 = vpop.eup %6229 }
 0xb8d   : > { %v2272_v45 = vmul.f32 %v6230_v17, %v7687_v50  ;;  %v579_v50 = vld [vmem:[%s8808_s7 + $0x128] sm:$0xff]  ;;  %v2427_v30 = vpop.xlane.xlu1 %2426 }
 0xb8e   : > { %2508 = vperm.xlu0 %5936, %v580_v51  }
 0xb8f   : > { %v2279_v23 = vpack.c.bf16 %v2272_v45, %v2271_v1 }
 0xb91   : > { %v2287_v40 = vsel %vm492_vm6, %v2279_v23, 0 }
 0xb92   : > { %2305 = vmatpush.bf16.xpose.msra.mxu0 %v2287_v40 }
 0xb93   : > { %1694 = vperm.xlu1 %5937, %v577_v41  }
 0xb95   : > { %v2433_v6 = vpop.xlane.xlu1 %2432 }
 0xb96   : > { %2513 = vperm.xlu0 %5936, %v581_v37  }
 0xb9b   : > { %2498 = vperm.xlu1 %5937, %v578_v9  }
 0xb9e   : > { %2503 = vperm.xlu0 %5936, %v579_v50  }
 0xba3   : > { %2558 = vperm.xlu1 %5937, %v599_v2  }
 0xba6   : > { %2615 = vperm.xlu0 %5936, %v603_v46  }
 0xbdd   : > { %v2439_v44 = vpop.xlane.xlu1 %2438 }
 0xbe5   : > { %v2442_v20 = vpop.xlane.xlu0 %2441 }
 0xbe6   : > { %6231 = vrcp.f32 %v2442_v20 }
 0xbec   : > { %v6232_v55 = vpop.eup %6231 }
 0xbed   : > { %v2445_v10 = vpop.xlane.xlu1 %2444  ;;  %v2460_v5 = vmul.f32 %v6232_v55, %v7712_v63 }
 0xbee   : > { %6233 = vrcp.f32 %v2445_v10  ;;  %v5906_v10 = vld [vmem:[%s8806_s5 + $0x78] sm:$0xff] }
 0xbef   : > { %6235 = vrcp.f32 %v2439_v44 }
 0xbf0   : > { %6237 = vrcp.f32 %v2436_v60 }
 0xbf1   : > { %6239 = vrcp.f32 %v2433_v6  ;;  %v5908_v6 = vld [vmem:[%s8806_s5 + $0x88] sm:$0xff] }
 0xbf2   : > { %6241 = vrcp.f32 %v2430_v57 }
 0xbf3   : > { %6243 = vrcp.f32 %v2427_v30 }
 0xbf4   : > { %v6234_v58 = vpop.eup %6233  ;;  %6245 = vrcp.f32 %v2424_v13 }
 0xbf5   : > { %v2461_v32 = vmul.f32 %v6234_v58, %v7716_v47  ;;  %v6236_v19 = vpop.eup %6235 }
 0xbf6   : > { %v6238_v62 = vpop.eup %6237  ;;  %v2459_v17 = vmul.f32 %v6236_v19, %v7707_v7 }
 0xbf7   : > { %v2465_v25 = vpack.c.bf16 %v2461_v32, %v2460_v5  ;;  %v2458_v63 = vmul.f32 %v6238_v62, %v7685_v59  ;;  %v6240_v45 = vpop.eup %6239 }
 0xbf8   : > { %v7755_v24 = vpop.permute.xlu0 %1689  ;;  %v6242_v23 = vpop.eup %6241  ;;  %v2457_v40 = vmul.f32 %v6240_v45, %v7698_v42 }
 0xbf9   : > { %v1754_v54 = vadd.f32 %v7581_v3, %v7755_v24  ;;  %v2479_v51 = vsel %vm492_vm6, %v2465_v25, 0  ;;  %v2464_v47 = vpack.c.bf16 %v2459_v17, %v2458_v63  ;;  %v2456_v3 = vmul.f32 %v6242_v23, %v7678_v53  ;;  %v6244_v37 = vpop.eup %6243 }
 0xbfa   : > { %2485 = vmatpush.bf16.xpose.msrb.mxu1 %v2479_v51  ;;  %v6246_v9 = vpop.eup %6245  ;;  %v2455_v59 = vmul.f32 %v6244_v37, %v7694_v56 }
 0xbfb   : > { %v2130_v1 = vpack.c.bf16 %v1754_v54, %v1754_v54  ;;  %v2476_v41 = vsel %vm492_vm6, %v2464_v47, 0  ;;  %v2463_v7 = vpack.c.bf16 %v2457_v40, %v2456_v3  ;;  %v2454_v2 = vmul.f32 %v6246_v9, %v7669_v29  ;;  %v5907_v29 = vld [vmem:[%s8806_s5 + $0x80] sm:$0xff]  ;;  %v5909_v40 = vld [vmem:[%s8806_s5 + $0x90] sm:$0xff]  ;;  %v5910_v3 = vld [vmem:[%s8806_s5 + $0x98] sm:$0xff] }
 0xbfd   : > { %5701 = vmatmul.msk.bf16.vlgmr.msra.gmra.mxu0 %vm492_vm6, %v2130_v1  ;;  %v2473_v50 = vsel %vm492_vm6, %v2463_v7, 0  ;;  %v2462_v46 = vpack.c.bf16 %v2455_v59, %v2454_v2 }
 0xbff   : > { %v2470_v57 = vsel %vm492_vm6, %v2462_v46, 0 }
 0xc00   : > { %v7806_v19 = vpop.permute.xlu0 %2508 }
 0xc02   : > { %2486 = vmatpush.bf16.xpose.msrb.mxu1 %v2476_v41 }
 0xc05   : > { %v7769_v30 = vpop.permute.xlu1 %1694 }
 0xc06   : > { %v1756_v42 = vadd.f32 %v7583_v14, %v7769_v30 }
 0xc08   : > { %v2313_v53 = vpack.c.bf16 %v1756_v42, %v1756_v42  ;;  %v7808_v62 = vpop.permute.xlu0 %2513 }
 0xc0a   : > { %2487 = vmatpush.bf16.xpose.msrb.mxu1 %v2473_v50 }
 0xc0d   : > { %v7792_v44 = vpop.permute.xlu1 %2498 }
 0xc10   : > { %v7816_v63 = vpop.permute.xlu0 %2503 }
 0xc12   : > { %2488 = vmatpush.bf16.xpose.msrb.mxu1 %v2470_v57  ;;  %v5911_v57 = vld [vmem:[%s8806_s5 + $0xa0] sm:$0xff] }
 0xc15   : > { %v7799_v55 = vpop.permute.xlu1 %2558 }
 0xc18   : > { %v7836_v37 = vpop.permute.xlu0 %2615 }
 0xc19   : > { %5706 = vmatmul.msk.bf16.vlgmr.msrb.gmra.mxu1 %vm492_vm6, %v2313_v53 }
 0xc1a   : > { %2593 = vmatpush.bf16.msra.mxu1 %v7269_v38  ;;  %v5905_v38 = vld [vmem:[%s8806_s5 + $0x70] sm:$0xff] }
 0xc1e   : > { %2594 = vmatpush.bf16.msra.mxu1 %v7279_v16 }
 0xc29   : > { %5725 = vmatmul.msk.bf16.vlgmr.msra.gmra.mxu1 %vm743_vm5, %v5907_v29 }
 0xc39   : > { %5726 = vmatmul.msk.bf16.gmra.mxu1 %vm743_vm5, %v5908_v6 }
 0xc7a   : > { %v2307_v56 = vpop.f32.mrf.mxu0 }
 0xc82   : > { %v2309_v13 = vpop.f32.mrf.mxu0 }
 0xc96   : > { %v2490_v14 = vpop.f32.mrf.mxu1 }
 0xc97   : > { %v2495_v60 = vpack.c.bf16 %v2490_v14, %v2307_v56  ;;  %v607_v14 = vld [vmem:[%s8808_s7 + $0x188] sm:$0xff] }
 0xc99   : > { %2538 = vmatpush.bf16.msrb.mxu0 %v2495_v60  ;;  %v602_v60 = vld [vmem:[%s8808_s7 + $0x160] sm:$0xff] }
 0xc9d   : > { %2539 = vmatpush.bf16.msrb.mxu0 %v2494_v49  ;;  %v601_v49 = vld [vmem:[%s8808_s7 + $0x158] sm:$0xff] }
 0xc9e   : > { %v2492_v16 = vpop.f32.mrf.mxu1 }
 0xca0   : > { %5715 = vmatmul.msk.bf16.vlgmr.msrb.gmra.mxu0 %vm743_vm5, %v5905_v38  ;;  %v7855_v38 = vpop.permute.xlu2 %2553 }
 0xca6   : > { %v7794_v20 = vpop.f32.mrf.mxu1 }
 0xcae   : > { %v2598_v58 = vpop.f32.mrf.mxu1 }
 0xcaf   : > { %v2599_v5 = vadd.f32 %v2598_v58, %v7799_v55 }
 0xcb0   : > { %5716 = vmatmul.msk.bf16.gmra.mxu0 %vm743_vm5, %v5906_v10 }
 0xcb1   : > { %v2710_v15 = vmul.f32 0.35355338, %v2599_v5 }
 0xcb3   : > { %v2794_v35 = vpack.c.bf16 %v2710_v15, %v2710_v15 }
 0xcb5   : > { %2797 = vxpose.xlu1.c.b16.start.end [1/1] (short) (narrow) %v2794_v35, 16 }
 0xcb6   : > { %v7845_v42 = vpop.f32.mrf.mxu1 }
 0xcbe   : > { %v2603_v53 = vpop.f32.mrf.mxu1 }
 0xd0f   : > { %2568 = vperm.xlu1 %5937, %v601_v49  }
 0xd1d   : > { %v2541_v32 = vpop.f32.mrf.mxu0 }
 0xd1e   : > { %v7824_v23 = vadd.f32 %v2541_v32, %v7792_v44 }
 0xd25   : > { %v2543_v25 = vpop.f32.mrf.mxu0 }
 0xd26   : > { %v7819_v47 = vadd.f32 %v2543_v25, %v7816_v63 }
 0xd28   : > { %v2606_v41 = vpack.c.bf16 %v7819_v47, %v7824_v23 }
 0xd2d   : > { %v2546_v54 = vpop.f32.mrf.mxu0 }
 0xd2e   : > { %v7811_v17 = vadd.f32 %v2546_v54, %v7806_v19 }
 0xd35   : > { %v2548_v51 = vpop.f32.mrf.mxu0 }
 0xd36   : > { %v7814_v1 = vadd.f32 %v2548_v51, %v7808_v62 }
 0xd38   : > { %v2607_v45 = vpack.c.bf16 %v7814_v1, %v7811_v17 }
 0xd3a   : > { %2686 = vmatpush.bf16.msra.mxu0 %v2607_v45 }
 0xd3e   : > { %2687 = vmatpush.bf16.msra.mxu0 %v2606_v41 }
 0xd41   : > { %5743 = vmatmul.msk.bf16.vlgmr.msra.gmra.mxu0 %vm743_vm5, %v5909_v40 }
 0xd51   : > { %5744 = vmatmul.msk.bf16.gmra.mxu0 %vm743_vm5, %v5910_v3  ;;  %v605_v3 = vld [vmem:[%s8808_s7 + $0x178] sm:$0xff] }
 0xd61   : > { %v2805_v46 = vpop.trf.xlu1  ;;  %5745 = vmatmul.msk.bf16.gmra.mxu0 %vm743_vm5, %v5911_v57 }
 0xdbe   : > { %v2689_v7 = vpop.f32.mrf.mxu0 }
 0xdc6   : > { %v2691_v9 = vpop.f32.mrf.mxu0 }
 0xdc7   : > { %v2692_v50 = vadd.f32 %v2691_v9, %v7836_v37  ;;  %v2597_v9 = vadd.f32 %v7794_v20, %v7855_v38  ;;  %v3095_v20 = vmul.f32 %v7819_v47, %v7819_v47 }
 0xdc9   : > { %v2795_v59 = vpack.c.bf16 %v2692_v50, %v2692_v50  ;;  %v2709_v50 = vmul.f32 0.35355338, %v2597_v9 }
 0xdcb   : > { %v2817_v2 = vsel %vm430_vm0, %v2795_v59, 0  ;;  %v2713_v59 = vpack.c.bf16 %v2709_v50, %v2709_v50 }
 0xdcc   : > { %2826 = vmatpush.bf16.msrb.mxu1 %v2817_v2 }
 0xdcf   : > { %5749 = vmatmul.msk.bf16.vlgmr.msrb.gmra.mxu1 %vm423_vm1, %v2805_v46 }
 0xe4c   : > { %v2828_v29 = vpop.f32.mrf.mxu1 }
 0xe4d   : > { %v2833_v56 = vsel %vm618_vm2, %v2828_v29, -inf }
 0xe4e   : > { %2834 = vmax.xlane.f32.xlu0 %v2833_v56 }
 0xe54   : > { %v2830_v13 = vpop.f32.mrf.mxu1 }
 0xe55   : > { %v2836_v6 = vsel %vm618_vm2, %v2830_v13, -inf }
 0xe56   : > { %2837 = vmax.xlane.f32.xlu2 %v2836_v6 }
 0xe62   : > { %2635 = vperm.xlu0 %5936, %v607_v14  }
 0xe6e   : > { %2610 = vperm.xlu2 %5938, %v602_v60  }
 0xec1   : > { %v2835_v16 = vpop.xlane.xlu0 %2834 }
 0xec2   : > { %v2839_v10 = vsub.f32 %v2828_v29, %v2835_v16 }
 0xec4   : > { %v2841_v58 = vmul.f32 1.442695, %v2839_v10  ;;  %v3094_v10 = vmul.f32 %v7824_v23, %v7824_v23 }
 0xec6   : > { %6247 = vpow2.f32 %v2841_v58 }
 0xec9   : > { %v2838_v5 = vpop.xlane.xlu2 %2837 }
 0xeca   : > { %v2840_v15 = vsub.f32 %v2830_v13, %v2838_v5  ;;  %v3099_v5 = vsel %vm618_vm2, %v3095_v20, 0.0 }
 0xecc   : > { %v6248_v35 = vpop.eup %6247  ;;  %v2843_v49 = vmul.f32 1.442695, %v2840_v15  ;;  %v3097_v15 = vmul.f32 %v7814_v1, %v7814_v1 }
 0xecd   : > { %v2845_v32 = vsel %vm618_vm2, %v6248_v35, 0.0 }
 0xece   : > { %6249 = vpow2.f32 %v2843_v49  ;;  %2846 = vadd.xlane.f32.xlu0 %v2845_v32  ;;  %v3098_v32 = vsel %vm618_vm2, %v3094_v10, 0.0 }
 0xed1   : > { %v7858_v25 = vpop.permute.xlu2 %2610 }
 0xed2   : > { %v2690_v54 = vadd.f32 %v2689_v7, %v7858_v25  ;;  %v7868_v7 = vpop.permute.xlu1 %2568 }
 0xed3   : > { %8830 = vst [vmem:[#allocation8_spill] sm:$0xff] %v7868_v7  ;;  %v2604_v2 = vadd.f32 %v2603_v53, %v7868_v7  ;;  %v3096_v53 = vmul.f32 %v7811_v17, %v7811_v17 }
 0xed4   : > { %v6250_v51 = vpop.eup %6249  ;;  %v2714_v45 = vpack.c.bf16 %v2690_v54, %v2690_v54  ;;  %v7871_v29 = vpop.permute.xlu0 %2635 }
 0xed5   : > { %v2848_v41 = vsel %vm618_vm2, %v6250_v51, 0.0  ;;  %v2712_v46 = vmul.f32 0.35355338, %v2604_v2  ;;  %8831 = vst [vmem:[#allocation9_spill] sm:$0xff] %v7871_v29  ;;  %v3101_v54 = vsel %vm618_vm2, %v3096_v53, 0.0 }
 0xed6   : > { %2849 = vadd.xlane.f32.xlu2 %v2848_v41  ;;  %v2736_v40 = vsel %vm430_vm0, %v2714_v45, 0 }
 0xed7   : > { %2745 = vmatpush.bf16.msrb.mxu3 %v2736_v40  ;;  %v2956_v57 = vpack.c.bf16 %v2712_v46, %v2712_v46 }
 0xeee   : > { %2625 = vperm.xlu2 %5938, %v605_v3  }
 0xef7   : > { %2716 = vxpose.xlu0.c.b16.start.end [1/1] (short) (narrow) %v2713_v59, 16 }
 0xf07   : > { %2959 = vxpose.xlu0.c.b16.start.end [1/1] (short) (narrow) %v2956_v57, 16 }
 0xf41   : > { %v2847_v56 = vpop.xlane.xlu0 %2846 }
 0xf42   : > { %6251 = vrcp.f32 %v2847_v56 }
 0xf48   : > { %v6252_v6 = vpop.eup %6251 }
 0xf49   : > { %v2850_v13 = vpop.xlane.xlu2 %2849  ;;  %v2853_v60 = vmul.f32 %v6252_v6, %v6248_v35  ;;  %v3100_v35 = vadd.f32 %v3099_v5, %v3098_v32 }
 0xf4a   : > { %6253 = vrcp.f32 %v2850_v13 }
 0xf4b   : > { %v3102_v45 = vadd.f32 %v3101_v54, %v3100_v35 }
 0xf50   : > { %v6254_v14 = vpop.eup %6253 }
 0xf51   : > { %v2854_v16 = vmul.f32 %v6254_v14, %v6250_v51  ;;  %v3103_v51 = vsel %vm618_vm2, %v3097_v15, 0.0  ;;  %v7886_v14 = vpop.f32.mrf.mxu0  ;;  %v7888_v53 = vpop.permute.xlu2 %2625 }
 0xf52   : > { %v3104_v41 = vadd.f32 %v3103_v51, %v3102_v45  ;;  %8832 = vst [vmem:[#allocation10_spill] sm:$0xff] %v7888_v53 }
 0xf53   : > { %v2855_v58 = vpack.c.bf16 %v2854_v16, %v2853_v60 }
 0xf54   : > { %v3105_v40 = vrot.slane %v3104_v41, 4 }
 0xf55   : > { %v2860_v49 = vsel %vm618_vm2, %v2855_v58, 0 }
 0xf56   : > { %2869 = vmatpush.bf16.xpose.msra.mxu3 %v2860_v49  ;;  %v3106_v3 = vadd.f32 %v3105_v40, %v3104_v41 }
 0xf58   : > { %v3107_v9 = vrot.slane %v3106_v3, 2 }
 0xf59   : > { %v2696_v16 = vpop.f32.mrf.mxu0 }
 0xf5a   : > { %v3108_v50 = vadd.f32 %v3107_v9, %v3106_v3  ;;  %v2697_v15 = vadd.f32 %v2696_v16, %v7888_v53  ;;  %v6574_v16 = vld [vmem:[%s8806_s5 + $0x18] sm:$0xff] }
 0xf5c   : > { %v3109_v59 = vrot.slane %v3108_v50, 1  ;;  %v2957_v32 = vpack.c.bf16 %v2697_v15, %v2697_v15 }
 0xf5e   : > { %v3110_v2 = vadd.f32 %v3109_v59, %v3108_v50  ;;  %v2979_v45 = vsel %vm430_vm0, %v2957_v32, 0 }
 0xf60   : > { %6255 = vrsqrt.f32 %v3110_v2  ;;  %vm3118_vm7 = vcmp.eq.f32.partialorder %v3110_v2, inf  ;;  %v3121_v58 = vand.u32 2147483648, %v3110_v2  ;;  %vm3120_vm8 = vcmp.eq.f32.partialorder %v3110_v2, 0.0 }
 0xf61   : > { %v7891_v54 = vpop.f32.mrf.mxu0 }
 0xf66   : > { %v6256_v46 = vpop.eup %6255 }
 0xf67   : > { %v3112_v57 = vmul.f32 %v6256_v46, %v3110_v2 }
 0xf69   : > { %v3113_v56 = vmul.f32 %v6256_v46, %v3112_v57  ;;  %v2701_v41 = vpop.f32.mrf.mxu0 }
 0xf6a   : > { %v2702_v3 = vadd.f32 %v2701_v41, %v7871_v29  ;;  %v609_v41 = vld [vmem:[%s8808_s7 + $0x198] sm:$0xff] }
 0xf6b   : > { %v3114_v13 = vmul.f32 0.5, %v3113_v56 }
 0xf6c   : > { %v2796_v59 = vpack.c.bf16 %v2702_v3, %v2702_v3 }
 0xf6d   : > { %v3115_v6 = vsub.f32 1.5, %v3114_v13 }
 0xf6f   : > { %v3116_v20 = vmul.f32 %v6256_v46, %v3115_v6  ;;  %v6571_v6 = vld [vmem:[%s8806_s5] sm:$0xff] }
 0xf71   : > { %v3117_v60 = vmul.f32 %v3116_v20, %v3110_v2  ;;  %v6572_v20 = vld [vmem:[%s8806_s5 + $0x8] sm:$0xff] }
 0xf73   : > { %v3119_v10 = vsel %vm3118_vm7, %v3110_v2, %v3117_v60  ;;  %v6573_v60 = vld [vmem:[%s8806_s5 + $0x10] sm:$0xff] }
 0xf74   : > { %v3122_v5 = vsel %vm3120_vm8, %v3121_v58, %v3119_v10  ;;  %v5912_v10 = vld [vmem:[%s8806_s5 + $0xa8] sm:$0xff]  ;;  %v6575_v58 = vld [vmem:[%s8806_s5 + $0x20] sm:$0xff] }
 0xf75   : > { %v3123_v49 = vmul.f32 0.25, %v3122_v5  ;;  %5746 = vmatmul.msk.bf16.gmra.mxu0 %vm743_vm5, %v5912_v10  ;;  %v6576_v5 = vld [vmem:[%s8806_s5 + $0x28] sm:$0xff] }
 0xf77   : > { %v3124_v35 = vadd.f32 1e-06, %v3123_v49 }
 0xf79   : > { %6257 = vrcp.f32 %v3124_v35 }
 0xf7f   : > { %v6258_v40 = vpop.eup %6257 }
 0xf80   : > { %v3128_v9 = vmul.f32 %v6258_v40, %v7811_v17  ;;  %v3129_v50 = vmul.f32 %v6258_v40, %v7814_v1  ;;  %v3126_v46 = vmul.f32 %v6258_v40, %v7824_v23  ;;  %v3127_v57 = vmul.f32 %v6258_v40, %v7819_v47 }
 0xf82   : > { %v3131_v2 = vpack.c.bf16 %v3129_v50, %v3128_v9  ;;  %v3130_v56 = vpack.c.bf16 %v3127_v57, %v3126_v46  ;;  %v606_v9 = vld [vmem:[%s8808_s7 + $0x180] sm:$0xff] }
 0xfa3   : > { %v2724_v51 = vpop.trf.xlu0 }
 0xfa4   : > { %5747 = vmatmul.msk.bf16.vlgmr.msrb.gmra.mxu3 %vm423_vm1, %v2724_v51 }
 0xfa5   : > { %2988 = vmatpush.bf16.msrb.mxu3 %v2979_v45 }
 0xfb3   : > { %v2967_v13 = vpop.trf.xlu0 }
 0xfb4   : > { %5750 = vmatmul.msk.bf16.vlgmr.msra.gmra.mxu3 %vm618_vm2, %v2796_v59 }
 0xfb5   : > { %3138 = vmatpush.bf16.msra.mxu3 %v3131_v2 }
 0xfb9   : > { %3139 = vmatpush.bf16.msra.mxu3 %v3130_v56 }
 0xfc4   : > { %5753 = vmatmul.msk.bf16.vlgmr.msrb.gmra.mxu3 %vm423_vm1, %v2967_v13 }
 0xfd4   : > { %5765 = vmatmul.msk.bf16.vlgmr.msra.gmra.mxu3 %vm743_vm5, %v6571_v6 }
 0xfe4   : > { %5766 = vmatmul.msk.bf16.gmra.mxu3 %vm743_vm5, %v6572_v20 }
 0xff4   : > { %5767 = vmatmul.msk.bf16.gmra.mxu3 %vm743_vm5, %v6573_v60 }
0x1004   : > { %5768 = vmatmul.msk.bf16.gmra.mxu3 %vm743_vm5, %v6574_v16 }
0x1014   : > { %5769 = vmatmul.msk.bf16.gmra.mxu3 %vm743_vm5, %v6575_v58 }
0x1024   : > { %5770 = vmatmul.msk.bf16.gmra.mxu3 %vm743_vm5, %v6576_v5  ;;  %v600_v5 = vld [vmem:[%s8808_s7 + $0x150] sm:$0xff] }
0x1027   : > { %v2747_v15 = vpop.f32.mrf.mxu3 }
0x1028   : > { %v2752_v49 = vsel %vm618_vm2, %v2747_v15, -inf }
0x1029   : > { %2753 = vmax.xlane.f32.xlu2 %v2752_v49 }
0x102f   : > { %v2749_v32 = vpop.f32.mrf.mxu3 }
0x1030   : > { %v2755_v35 = vsel %vm618_vm2, %v2749_v32, -inf }
0x1031   : > { %2756 = vmax.xlane.f32.xlu0 %v2755_v35 }
0x1037   : > { %v7932_v51 = vpop.f32.mrf.mxu3 }
0x103f   : > { %v2873_v45 = vpop.f32.mrf.mxu3 }
0x1040   : > { %v604_v45 = vld [vmem:[%s8808_s7 + $0x170] sm:$0xff] }
0x1045   : > { %2645 = vperm.xlu0 %5936, %v609_v41  }
0x1047   : > { %v2990_v40 = vpop.f32.mrf.mxu3 }
0x1048   : > { %v2995_v3 = vsel %vm618_vm2, %v2990_v40, -inf }
0x1049   : > { %2996 = vmax.xlane.f32.xlu1 %v2995_v3 }
0x1062   : > { %2630 = vperm.xlu1 %5937, %v606_v9  }
0x109c   : > { %v2754_v50 = vpop.xlane.xlu2 %2753 }
0x109d   : > { %v2758_v59 = vsub.f32 %v2747_v15, %v2754_v50 }
0x109f   : > { %v2760_v2 = vmul.f32 1.442695, %v2758_v59 }
0x10a1   : > { %6259 = vpow2.f32 %v2760_v2 }
0x10a4   : > { %v2757_v46 = vpop.xlane.xlu0 %2756 }
0x10a5   : > { %v2759_v57 = vsub.f32 %v2749_v32, %v2757_v46  ;;  %v2992_v32 = vpop.f32.mrf.mxu3 }
0x10a6   : > { %v2998_v35 = vsel %vm618_vm2, %v2992_v32, -inf }
0x10a7   : > { %v6260_v56 = vpop.eup %6259  ;;  %v2762_v13 = vmul.f32 1.442695, %v2759_v57 }
0x10a8   : > { %v2764_v6 = vsel %vm618_vm2, %v6260_v56, 0.0 }
0x10a9   : > { %6261 = vpow2.f32 %v2762_v13  ;;  %2765 = vadd.xlane.f32.xlu2 %v2764_v6 }
0x10af   : > { %v6262_v20 = vpop.eup %6261 }
0x10b0   : > { %v2767_v60 = vsel %vm618_vm2, %v6262_v20, 0.0 }
0x10b1   : > { %2768 = vadd.xlane.f32.xlu2 %v2767_v60 }
0x10bc   : > { %v2997_v16 = vpop.xlane.xlu1 %2996 }
0x10bd   : > { %v3001_v10 = vsub.f32 %v2990_v40, %v2997_v16 }
0x10bf   : > { %v3003_v58 = vmul.f32 1.442695, %v3001_v10 }
0x10c1   : > { %6263 = vpow2.f32 %v3003_v58 }
0x10c7   : > { %v6264_v15 = vpop.eup %6263 }
0x10c8   : > { %v3007_v49 = vsel %vm618_vm2, %v6264_v15, 0.0 }
0x10c9   : > { %3008 = vadd.xlane.f32.xlu1 %v3007_v49  ;;  %2563 = vperm.xlu2 %5938, %v600_v5  }
0x10d4   : > { %v7955_v13 = vpop.permute.xlu1 %2630 }
0x10d5   : > { %8833 = vst [vmem:[#allocation11_spill] sm:$0xff] %v7955_v13  ;;  %v2700_v10 = vadd.f32 %v7891_v54, %v7955_v13 }
0x10d7   : > { %v2715_v58 = vpack.c.bf16 %v2700_v10, %v2700_v10  ;;  %v7977_v10 = vpop.f32.mrf.mxu0 }
0x10f2   : > { %2999 = vmax.xlane.f32.xlu2 %v2998_v35 }
0x110a   : > { %2620 = vperm.xlu2 %5938, %v604_v45  }
0x111c   : > { %v2766_v41 = vpop.xlane.xlu2 %2765 }
0x111d   : > { %6265 = vrcp.f32 %v2766_v41 }
0x1123   : > { %v6266_v3 = vpop.eup %6265 }
0x1124   : > { %v2769_v40 = vpop.xlane.xlu2 %2768  ;;  %v2772_v59 = vmul.f32 %v6266_v3, %v6260_v56 }
0x1125   : > { %6267 = vrcp.f32 %v2769_v40  ;;  %v3141_v40 = vpop.f32.mrf.mxu3 }
0x1126   : > { %v3142_v3 = vadd.f32 %v3141_v40, %v6761_v8  ;;  %v7980_v40 = vpop.permute.xlu0 %2645 }
0x1127   : > { %8835 = vst [vmem:[#allocation13_spill] sm:$0xff] %v7980_v40 }
0x112b   : > { %v6268_v9 = vpop.eup %6267 }
0x112c   : > { %v7951_v50 = vpop.permute.xlu2 %2563  ;;  %v2773_v2 = vmul.f32 %v6268_v9, %v6262_v20  ;;  %v3171_v9 = vmul.f32 0.35355338, %v3142_v3 }
0x112d   : > { %v2602_v46 = vadd.f32 %v7845_v42, %v7951_v50 }
0x112e   : > { %v2774_v57 = vpack.c.bf16 %v2773_v2, %v2772_v59 }
0x112f   : > { %v2711_v6 = vmul.f32 0.35355338, %v2602_v46  ;;  %v7970_v46 = vpop.f32.mrf.mxu3 }
0x1130   : > { %v2779_v60 = vsel %vm618_vm2, %v2774_v57, 0 }
0x1131   : > { %v2875_v16 = vpack.c.bf16 %v2711_v6, %v2711_v6  ;;  %2788 = vmatpush.bf16.xpose.msrb.mxu2 %v2779_v60 }
0x1133   : > { %2878 = vxpose.xlu1.c.b16.start.end [1/1] (short) (narrow) %v2875_v16, 16 }
0x1138   : > { %5748 = vmatmul.msk.bf16.vlgmr.msrb.gmra.mxu2 %vm618_vm2, %v2715_v58 }
0x113c   : > { %v3009_v57 = vpop.xlane.xlu1 %3008 }
0x1165   : > { %v3000_v56 = vpop.xlane.xlu2 %2999 }
0x1166   : > { %v3002_v20 = vsub.f32 %v2992_v32, %v3000_v56  ;;  %v3175_v32 = vpack.c.bf16 %v3171_v9, %v3171_v9 }
0x1168   : > { %v3005_v5 = vmul.f32 1.442695, %v3002_v20 }
0x116a   : > { %6269 = vpow2.f32 %v3005_v5 }
0x116b   : > { %6271 = vrcp.f32 %v3009_v57 }
0x116d   : > { %v7961_v42 = vpop.permute.xlu2 %2620 }
0x116e   : > { %8834 = vst [vmem:[#allocation12_spill] sm:$0xff] %v7961_v42  ;;  %v2695_v49 = vadd.f32 %v7886_v14, %v7961_v42  ;;  %v7972_v14 = vpop.f32.mrf.mxu3 }
0x1170   : > { %v6270_v35 = vpop.eup %6269  ;;  %v2876_v45 = vpack.c.bf16 %v2695_v49, %v2695_v49 }
0x1171   : > { %v3010_v41 = vsel %vm618_vm2, %v6270_v35, 0.0  ;;  %v6272_v58 = vpop.eup %6271 }
0x1172   : > { %3011 = vadd.xlane.f32.xlu2 %v3010_v41  ;;  %v2898_v54 = vsel %vm430_vm0, %v2876_v45, 0  ;;  %v3015_v5 = vmul.f32 %v6272_v58, %v6264_v15 }
0x1173   : > { %2907 = vmatpush.bf16.msra.mxu2 %v2898_v54  ;;  %v2706_v54 = vpop.f32.mrf.mxu0 }
0x1176   : > { %v7974_v6 = vpop.f32.mrf.mxu3 }
0x117e   : > { %v3151_v8 = vpop.f32.mrf.mxu3 }
0x117f   : > { %v3152_v56 = vadd.f32 %v3151_v8, %v6772_v18 }
0x1181   : > { %v3176_v45 = vpack.c.bf16 %v3152_v56, %v3152_v56 }
0x1183   : > { %v3207_v9 = vsel %vm430_vm0, %v3176_v45, 0 }
0x119b   : > { %3178 = vxpose.xlu2.c.b16.start.end [1/1] (short) (narrow) %v3175_v32, 64  ;;  %v2707_v32 = vadd.f32 %v2706_v54, %v7980_v40 }
0x11bb   : > { %v7968_v59 = vpop.f32.mrf.mxu2 }
0x11c3   : > { %v2792_v2 = vpop.f32.mrf.mxu2 }
0x11c4   : > { %v2958_v2 = vpack.c.bf16 %v2707_v32, %v2707_v32 }
0x11df   : > { %v2886_v60 = vpop.trf.xlu1 }
0x11e0   : > { %5751 = vmatmul.msk.bf16.vlgmr.msra.gmra.mxu2 %vm423_vm1, %v2886_v60 }
0x11e5   : > { %v3012_v16 = vpop.xlane.xlu2 %3011 }
0x11e6   : > { %6273 = vrcp.f32 %v3012_v16 }
0x11ec   : > { %v6274_v20 = vpop.eup %6273 }
0x11ed   : > { %v3016_v49 = vmul.f32 %v6274_v20, %v6270_v35 }
0x11ef   : > { %v3017_v41 = vpack.c.bf16 %v3016_v49, %v3015_v5 }
0x11f1   : > { %v3022_v3 = vsel %vm618_vm2, %v3017_v41, 0 }
0x11f2   : > { %3031 = vmatpush.bf16.xpose.msrb.mxu2 %v3022_v3 }
0x11f9   : > { %5754 = vmatmul.msk.bf16.vlgmr.msrb.gmra.mxu2 %vm618_vm2, %v2958_v2 }
0x11fa   : > { %3216 = vmatpush.bf16.msra.mxu2 %v3207_v9 }
0x123c   : > { %v3186_v18 = vpop.trf.xlu2 }
0x123d   : > { %5771 = vmatmul.msk.bf16.vlgmr.msra.gmra.mxu2 %vm423_vm1, %v3186_v18 }
0x124c   : > { %v3187_v15 = vpop.trf.xlu2 }
0x124d   : > { %5772 = vmatmul.msk.bf16.gmra.mxu2 %vm423_vm1, %v3187_v15 }
0x125c   : > { %v3188_v35 = vpop.trf.xlu2 }
0x125d   : > { %5773 = vmatmul.msk.bf16.gmra.mxu2 %vm423_vm1, %v3188_v35 }
0x1263   : > { %v2909_v57 = vpop.f32.mrf.mxu2 }
0x1264   : > { %v2914_v41 = vsel %vm618_vm2, %v2909_v57, -inf }
0x126b   : > { %v2911_v16 = vpop.f32.mrf.mxu2 }
0x126c   : > { %v3189_v60 = vpop.trf.xlu2  ;;  %v2917_v3 = vsel %vm618_vm2, %v2911_v16, -inf }
0x126d   : > { %5774 = vmatmul.msk.bf16.gmra.mxu2 %vm423_vm1, %v3189_v60 }
0x127c   : > { %v7990_v8 = vpop.f32.mrf.mxu2 }
0x1284   : > { %v3035_v58 = vpop.f32.mrf.mxu2 }
0x12c0   : > { %v7992_v56 = vpop.f32.mrf.mxu2 }
0x12c8   : > { %v7994_v20 = vpop.f32.mrf.mxu2 }
0x12d0   : > { %v3223_v5 = vpop.f32.mrf.mxu2 }
0x12d1   : > { %v3244_v49 = vsel %vm618_vm2, %v3223_v5, -inf }
0x12d2   : > { %3245 = vmax.xlane.f32.xlu1 %v3244_v49  ;;  %v3238_v49 = vsel %vm618_vm2, %v7992_v56, -inf }
0x12d8   : > { %v7997_v45 = vpop.f32.mrf.mxu2 }
0x12d9   : > { %v3247_v58 = vsel %vm618_vm2, %v7997_v45, -inf }
0x12da   : > { %2915 = vmax.xlane.f32.xlu1 %v2914_v41  ;;  %v3241_v41 = vsel %vm618_vm2, %v7994_v20, -inf }
0x12e0   : > { %v3228_v54 = vpop.f32.mrf.mxu2 }
0x12e1   : > { %v3250_v15 = vsel %vm618_vm2, %v3228_v54, -inf }
0x12e2   : > { %2918 = vmax.xlane.f32.xlu1 %v2917_v3 }
0x12e8   : > { %v3230_v9 = vpop.f32.mrf.mxu2 }
0x12e9   : > { %v3253_v60 = vsel %vm618_vm2, %v3230_v9, -inf }
0x12f0   : > { %v3233_v32 = vpop.f32.mrf.mxu2 }
0x12f1   : > { %v3256_v2 = vsel %vm618_vm2, %v3233_v32, -inf }
0x12f2   : > { %3257 = vmax.xlane.f32.xlu0 %v3256_v2 }
0x12f8   : > { %v3235_v18 = vpop.f32.mrf.mxu2 }
0x12f9   : > { %v3259_v35 = vsel %vm618_vm2, %v3235_v18, -inf }
0x12fa   : > { %3251 = vmax.xlane.f32.xlu0 %v3250_v15  ;;  %3260 = vmax.xlane.f32.xlu2 %v3259_v35 }
0x1302   : > { %3254 = vmax.xlane.f32.xlu0 %v3253_v60 }
0x130a   : > { %3248 = vmax.xlane.f32.xlu0 %v3247_v58 }
0x1312   : > { %3239 = vmax.xlane.f32.xlu0 %v3238_v49 }
0x131a   : > { %3242 = vmax.xlane.f32.xlu0 %v3241_v41 }
0x1345   : > { %v3246_v3 = vpop.xlane.xlu1 %3245 }
0x1346   : > { %v3264_v2 = vsub.f32 %v3223_v5, %v3246_v3 }
0x1348   : > { %v3274_v40 = vmul.f32 1.442695, %v3264_v2 }
0x134a   : > { %6275 = vpow2.f32 %v3274_v40 }
0x134d   : > { %v2916_v15 = vpop.xlane.xlu1 %2915 }
0x134e   : > { %v2920_v35 = vsub.f32 %v2909_v57, %v2916_v15 }
0x1350   : > { %v8011_v29 = vpop.eup %6275  ;;  %v2922_v60 = vmul.f32 1.442695, %v2920_v35 }
0x1351   : > { %v3292_v58 = vsel %vm618_vm2, %v8011_v29, 0.0 }
0x1352   : > { %6277 = vpow2.f32 %v2922_v60  ;;  %3293 = vadd.xlane.f32.xlu0 %v3292_v58 }
0x1355   : > { %v2919_v53 = vpop.xlane.xlu1 %2918 }
0x1356   : > { %v2921_v49 = vsub.f32 %v2911_v16, %v2919_v53 }
0x1358   : > { %v8015_v13 = vpop.eup %6277  ;;  %v2924_v42 = vmul.f32 1.442695, %v2921_v49 }
0x1359   : > { %v2926_v5 = vsel %vm618_vm2, %v8015_v13, 0.0 }
0x135a   : > { %6279 = vpow2.f32 %v2924_v42  ;;  %2927 = vadd.xlane.f32.xlu1 %v2926_v5  ;;  %v608_v42 = vld [vmem:[%s8808_s7 + $0x190] sm:$0xff] }
0x1360   : > { %v8019_v40 = vpop.eup %6279 }
0x1361   : > { %v2929_v57 = vsel %vm618_vm2, %v8019_v40, 0.0 }
0x1362   : > { %2930 = vadd.xlane.f32.xlu1 %v2929_v57 }
0x1365   : > { %v3258_v41 = vpop.xlane.xlu0 %3257 }
0x1366   : > { %v3268_v60 = vsub.f32 %v3233_v32, %v3258_v41 }
0x1368   : > { %v3282_v5 = vmul.f32 1.442695, %v3268_v60 }
0x136d   : > { %v3252_v3 = vpop.xlane.xlu0 %3251 }
0x136e   : > { %v3266_v2 = vsub.f32 %v3228_v54, %v3252_v3  ;;  %v3261_v54 = vpop.xlane.xlu2 %3260 }
0x1370   : > { %v3278_v15 = vmul.f32 1.442695, %v3266_v2 }
0x1372   : > { %6281 = vpow2.f32 %v3278_v15 }
0x1375   : > { %v3255_v53 = vpop.xlane.xlu0 %3254 }
0x1376   : > { %v3267_v16 = vsub.f32 %v3230_v9, %v3255_v53  ;;  %v3269_v9 = vsub.f32 %v3235_v18, %v3261_v54 }
0x1378   : > { %v8023_v35 = vpop.eup %6281  ;;  %v3280_v58 = vmul.f32 1.442695, %v3267_v16  ;;  %v3284_v41 = vmul.f32 1.442695, %v3269_v9 }
0x1379   : > { %v3298_v49 = vsel %vm618_vm2, %v8023_v35, 0.0 }
0x137a   : > { %6283 = vpow2.f32 %v3280_v58  ;;  %3299 = vadd.xlane.f32.xlu0 %v3298_v49 }
0x137b   : > { %2640 = vperm.xlu1 %5937, %v608_v42   ;;  %6285 = vpow2.f32 %v3282_v5 }
0x137c   : > { %6287 = vpow2.f32 %v3284_v41 }
0x137d   : > { %v3249_v3 = vpop.xlane.xlu0 %3248 }
0x137e   : > { %v3265_v15 = vsub.f32 %v7997_v45, %v3249_v3 }
0x1380   : > { %v8030_v57 = vpop.eup %6283  ;;  %v3276_v60 = vmul.f32 1.442695, %v3265_v15 }
0x1381   : > { %v3301_v32 = vsel %vm618_vm2, %v8030_v57, 0.0  ;;  %v6286_v2 = vpop.eup %6285 }
0x1382   : > { %3302 = vadd.xlane.f32.xlu0 %v3301_v32  ;;  %v3304_v53 = vsel %vm618_vm2, %v6286_v2, 0.0  ;;  %v6288_v58 = vpop.eup %6287  ;;  %6289 = vpow2.f32 %v3276_v60 }
0x1383   : > { %v3307_v18 = vsel %vm618_vm2, %v6288_v58, 0.0 }
0x1385   : > { %v3240_v16 = vpop.xlane.xlu0 %3239 }
0x1386   : > { %v3262_v42 = vsub.f32 %v7992_v56, %v3240_v16 }
0x1388   : > { %v3270_v49 = vmul.f32 1.442695, %v3262_v42  ;;  %v6290_v54 = vpop.eup %6289 }
0x1389   : > { %v3295_v45 = vsel %vm618_vm2, %v6290_v54, 0.0 }
0x138a   : > { %3305 = vadd.xlane.f32.xlu0 %v3304_v53  ;;  %6291 = vpow2.f32 %v3270_v49  ;;  %v8836_v53 = vld [vmem:[#allocation2_spill] sm:$0xff] }
0x138d   : > { %v3243_v5 = vpop.xlane.xlu0 %3242 }
0x138e   : > { %v3263_v9 = vsub.f32 %v7994_v20, %v3243_v5  ;;  %v3144_v20 = vadd.f32 %v7970_v46, %v8836_v53 }
0x1390   : > { %v3272_v3 = vmul.f32 1.442695, %v3263_v9  ;;  %v8040_v32 = vpop.eup %6291  ;;  %v3172_v16 = vmul.f32 0.35355338, %v3144_v20 }
0x1391   : > { %v3286_v41 = vsel %vm618_vm2, %v8040_v32, 0.0 }
0x1392   : > { %3308 = vadd.xlane.f32.xlu0 %v3307_v18  ;;  %6293 = vpow2.f32 %v3272_v3  ;;  %v3358_v42 = vpack.c.bf16 %v3172_v16, %v3172_v16 }
0x1398   : > { %v8044_v56 = vpop.eup %6293 }
0x1399   : > { %v3289_v15 = vsel %vm618_vm2, %v8044_v56, 0.0 }
0x139a   : > { %3296 = vadd.xlane.f32.xlu0 %v3295_v45 }
0x13a2   : > { %3287 = vadd.xlane.f32.xlu0 %v3286_v41 }
0x13aa   : > { %3290 = vadd.xlane.f32.xlu0 %v3289_v15 }
0x13c5   : > { %v3294_v15 = vpop.xlane.xlu0 %3293 }
0x13cd   : > { %v2928_v60 = vpop.xlane.xlu1 %2927 }
0x13ce   : > { %6295 = vrcp.f32 %v2928_v60 }
0x13d3   : > { %3361 = vxpose.xlu0.c.b16.start.end [1/1] (short) (narrow) %v3358_v42, 64  ;;  %v3153_v42 = vpop.f32.mrf.mxu3 }
0x13d4   : > { %v6296_v49 = vpop.eup %6295 }
0x13d5   : > { %v2931_v18 = vpop.xlane.xlu1 %2930  ;;  %v2934_v9 = vmul.f32 %v6296_v49, %v8015_v13 }
0x13d6   : > { %6297 = vrcp.f32 %v2931_v18 }
0x13dc   : > { %v6298_v5 = vpop.eup %6297 }
0x13dd   : > { %v2935_v45 = vmul.f32 %v6298_v5, %v8019_v40 }
0x13df   : > { %v2936_v3 = vpack.c.bf16 %v2935_v45, %v2934_v9 }
0x13e1   : > { %v2941_v41 = vsel %vm618_vm2, %v2936_v3, 0 }
0x13e2   : > { %2950 = vmatpush.bf16.xpose.msra.mxu1 %v2941_v41 }
0x13ed   : > { %v8053_v7 = vpop.permute.xlu1 %2640  ;;  %v3300_v46 = vpop.xlane.xlu0 %3299 }
0x13ee   : > { %8837 = vst [vmem:[#allocation2_spill] sm:$0xff] %v8053_v7  ;;  %v2705_v53 = vadd.f32 %v7977_v10, %v8053_v7 }
0x13f0   : > { %v2877_v20 = vpack.c.bf16 %v2705_v53, %v2705_v53 }
0x13f2   : > { %5752 = vmatmul.msk.bf16.vlgmr.msra.gmra.mxu1 %vm618_vm2, %v2877_v20 }
0x13f5   : > { %v3303_v16 = vpop.xlane.xlu0 %3302 }
0x13fd   : > { %v3306_v60 = vpop.xlane.xlu0 %3305 }
0x13fe   : > { %6299 = vrcp.f32 %v3306_v60 }
0x1404   : > { %v6300_v40 = vpop.eup %6299 }
0x1405   : > { %v3309_v13 = vpop.xlane.xlu0 %3308  ;;  %v3324_v5 = vmul.f32 %v6300_v40, %v6286_v2 }
0x1406   : > { %6301 = vrcp.f32 %v3309_v13 }
0x1407   : > { %6303 = vrcp.f32 %v3303_v16  ;;  %v8061_v16 = vpop.f32.mrf.mxu3 }
0x1408   : > { %6305 = vrcp.f32 %v3300_v46 }
0x140c   : > { %v6302_v18 = vpop.eup %6301 }
0x140d   : > { %v3297_v49 = vpop.xlane.xlu0 %3296  ;;  %v3325_v9 = vmul.f32 %v6302_v18, %v6288_v58  ;;  %v6304_v45 = vpop.eup %6303 }
0x140e   : > { %v6306_v41 = vpop.eup %6305  ;;  %6307 = vrcp.f32 %v3297_v49  ;;  %v3323_v53 = vmul.f32 %v6304_v45, %v8030_v57 }
0x140f   : > { %v3329_v3 = vpack.c.bf16 %v3325_v9, %v3324_v5  ;;  %6309 = vrcp.f32 %v3294_v15  ;;  %v3322_v20 = vmul.f32 %v6306_v41, %v8023_v35  ;;  %v8065_v57 = vpop.f32.mrf.mxu3  ;;  %v8838_v5 = vld [vmem:[#allocation3_spill] sm:$0xff] }
0x1410   : > { %v3154_v9 = vadd.f32 %v3153_v42, %v8838_v5 }
0x1411   : > { %v3343_v10 = vsel %vm618_vm2, %v3329_v3, 0  ;;  %v3328_v46 = vpack.c.bf16 %v3323_v53, %v3322_v20 }
0x1412   : > { %3349 = vmatpush.bf16.xpose.msrb.mxu0 %v3343_v10  ;;  %v3359_v41 = vpack.c.bf16 %v3154_v9, %v3154_v9 }
0x1413   : > { %v3340_v2 = vsel %vm618_vm2, %v3328_v46, 0 }
0x1414   : > { %v6308_v13 = vpop.eup %6307  ;;  %v3390_v53 = vsel %vm430_vm0, %v3359_v41, 0 }
0x1415   : > { %v3288_v60 = vpop.xlane.xlu0 %3287  ;;  %v6310_v7 = vpop.eup %6309  ;;  %v3321_v58 = vmul.f32 %v6308_v13, %v6290_v54 }
0x1416   : > { %v3320_v40 = vmul.f32 %v6310_v7, %v8011_v29  ;;  %6311 = vrcp.f32 %v3288_v60 }
0x1417   : > { %v3161_v7 = vpop.f32.mrf.mxu3 }
0x1418   : > { %v3327_v49 = vpack.c.bf16 %v3321_v58, %v3320_v40  ;;  %v3162_v20 = vadd.f32 %v3161_v7, %v7226_v61 }
0x141a   : > { %3350 = vmatpush.bf16.xpose.msrb.mxu0 %v3340_v2  ;;  %v3337_v35 = vsel %vm618_vm2, %v3327_v49, 0  ;;  %v3177_v60 = vpack.c.bf16 %v3162_v20, %v3162_v20 }
0x141c   : > { %v6312_v15 = vpop.eup %6311 }
0x141d   : > { %v3291_v18 = vpop.xlane.xlu0 %3290  ;;  %v3318_v3 = vmul.f32 %v6312_v15, %v8040_v32  ;;  %v3037_v32 = vpack.c.bf16 %v7932_v51, %v7968_v59 }
0x141e   : > { %6313 = vrcp.f32 %v3291_v18 }
0x1422   : > { %3351 = vmatpush.bf16.xpose.msrb.mxu0 %v3337_v35 }
0x1424   : > { %v6314_v45 = vpop.eup %6313 }
0x1425   : > { %v3319_v54 = vmul.f32 %v6314_v45, %v8044_v56 }
0x1427   : > { %v3326_v10 = vpack.c.bf16 %v3319_v54, %v3318_v3 }
0x1429   : > { %v3334_v29 = vsel %vm618_vm2, %v3326_v10, 0 }
0x142a   : > { %3352 = vmatpush.bf16.xpose.msrb.mxu0 %v3334_v29 }
0x1431   : > { %5775 = vmatmul.msk.bf16.vlgmr.msrb.gmra.mxu0 %vm618_vm2, %v3177_v60 }
0x1432   : > { %3399 = vmatpush.bf16.msra.mxu0 %v3390_v53 }
0x146f   : > { %v2952_v42 = vpop.f32.mrf.mxu1 }
0x1470   : > { %v3038_v46 = vpack.c.bf16 %v7990_v8, %v2952_v42 }
0x1472   : > { %3081 = vmatpush.bf16.msrb.mxu1 %v3038_v46 }
0x1476   : > { %3082 = vmatpush.bf16.msrb.mxu1 %v3037_v32 }
0x1477   : > { %v2954_v56 = vpop.f32.mrf.mxu1 }
0x147f   : > { %v3369_v13 = vpop.trf.xlu0 }
0x1480   : > { %5776 = vmatmul.msk.bf16.vlgmr.msra.gmra.mxu0 %vm423_vm1, %v3369_v13 }
0x148f   : > { %v3370_v2 = vpop.trf.xlu0 }
0x1490   : > { %5777 = vmatmul.msk.bf16.gmra.mxu0 %vm423_vm1, %v3370_v2 }
0x149f   : > { %v3371_v61 = vpop.trf.xlu0 }
0x14a0   : > { %5778 = vmatmul.msk.bf16.gmra.mxu0 %vm423_vm1, %v3371_v61 }
0x14ae   : > { %v8081_v58 = vpop.f32.mrf.mxu0 }
0x14af   : > { %v3372_v40 = vpop.trf.xlu0 }
0x14b0   : > { %5779 = vmatmul.msk.bf16.gmra.mxu0 %vm423_vm1, %v3372_v40 }
0x14b6   : > { %v3356_v8 = vpop.f32.mrf.mxu0 }
0x14fd   : > { %v3401_v18 = vpop.f32.mrf.mxu0 }
0x14fe   : > { %v3421_v29 = vsel %vm618_vm2, %v3401_v18, -inf }
0x1505   : > { %v8084_v49 = vpop.f32.mrf.mxu0 }
0x1506   : > { %v3424_v53 = vsel %vm618_vm2, %v8084_v49, -inf }
0x150d   : > { %v3406_v51 = vpop.f32.mrf.mxu0 }
0x150e   : > { %v3427_v3 = vsel %vm618_vm2, %v3406_v51, -inf }
0x1515   : > { %v3408_v59 = vpop.f32.mrf.mxu0 }
0x1516   : > { %v3430_v7 = vsel %vm618_vm2, %v3408_v59, -inf }
0x151d   : > { %v3411_v35 = vpop.f32.mrf.mxu0 }
0x151e   : > { %v3433_v15 = vsel %vm618_vm2, %v3411_v35, -inf }
0x151f   : > { %3434 = vmax.xlane.f32.xlu1 %v3433_v15 }
0x1525   : > { %v3413_v5 = vpop.f32.mrf.mxu0 }
0x1526   : > { %v3436_v9 = vsel %vm618_vm2, %v3413_v5, -inf }
0x1527   : > { %3437 = vmax.xlane.f32.xlu2 %v3436_v9 }
0x152d   : > { %v3416_v45 = vpop.f32.mrf.mxu0 }
0x152e   : > { %v3439_v54 = vsel %vm618_vm2, %v3416_v45, -inf }
0x152f   : > { %3428 = vmax.xlane.f32.xlu2 %v3427_v3  ;;  %3440 = vmax.xlane.f32.xlu0 %v3439_v54 }
0x1535   : > { %v3418_v41 = vpop.f32.mrf.mxu0 }
0x1536   : > { %v3442_v10 = vsel %vm618_vm2, %v3418_v41, -inf }
0x1537   : > { %3443 = vmax.xlane.f32.xlu2 %v3442_v10 }
0x153f   : > { %3431 = vmax.xlane.f32.xlu2 %v3430_v7 }
0x1547   : > { %3422 = vmax.xlane.f32.xlu2 %v3421_v29 }
0x154f   : > { %3425 = vmax.xlane.f32.xlu2 %v3424_v53 }
0x1592   : > { %v3435_v46 = vpop.xlane.xlu1 %3434 }
0x1593   : > { %v3449_v13 = vsub.f32 %v3411_v35, %v3435_v46 }
0x1595   : > { %v3461_v2 = vmul.f32 1.442695, %v3449_v13 }
0x159a   : > { %v3438_v20 = vpop.xlane.xlu2 %3437 }
0x159b   : > { %v3450_v8 = vsub.f32 %v3413_v5, %v3438_v20 }
0x159d   : > { %v3463_v10 = vmul.f32 1.442695, %v3450_v8 }
0x15a2   : > { %v3429_v60 = vpop.xlane.xlu2 %3428  ;;  %v3441_v42 = vpop.xlane.xlu0 %3440 }
0x15a3   : > { %v3451_v32 = vsub.f32 %v3416_v45, %v3441_v42  ;;  %v3447_v3 = vsub.f32 %v3406_v51, %v3429_v60 }
0x15a5   : > { %v3465_v56 = vmul.f32 1.442695, %v3451_v32  ;;  %v3457_v7 = vmul.f32 1.442695, %v3447_v3 }
0x15a7   : > { %6315 = vpow2.f32 %v3465_v56 }
0x15a8   : > { %6317 = vpow2.f32 %v3461_v2 }
0x15aa   : > { %v3444_v61 = vpop.xlane.xlu2 %3443 }
0x15ab   : > { %v3452_v40 = vsub.f32 %v3418_v41, %v3444_v61 }
0x15ad   : > { %v3467_v15 = vmul.f32 1.442695, %v3452_v40  ;;  %v6316_v9 = vpop.eup %6315 }
0x15ae   : > { %v3487_v54 = vsel %vm618_vm2, %v6316_v9, 0.0  ;;  %v6318_v53 = vpop.eup %6317 }
0x15af   : > { %6319 = vpow2.f32 %v3467_v15  ;;  %3488 = vadd.xlane.f32.xlu2 %v3487_v54  ;;  %v3481_v5 = vsel %vm618_vm2, %v6318_v53, 0.0 }
0x15b0   : > { %6321 = vpow2.f32 %v3463_v10  ;;  %v8839_v10 = vld [vmem:[#allocation4_spill] sm:$0xff] }
0x15b1   : > { %6323 = vpow2.f32 %v3457_v7  ;;  %v3147_v7 = vadd.f32 %v7972_v14, %v8839_v10 }
0x15b2   : > { %v3432_v29 = vpop.xlane.xlu2 %3431 }
0x15b3   : > { %v3448_v35 = vsub.f32 %v3408_v59, %v3432_v29  ;;  %v3173_v29 = vmul.f32 0.35355338, %v3147_v7 }
0x15b5   : > { %v6320_v45 = vpop.eup %6319  ;;  %v3459_v41 = vmul.f32 1.442695, %v3448_v35  ;;  %v3541_v35 = vpack.c.bf16 %v3173_v29, %v3173_v29 }
0x15b6   : > { %v3490_v42 = vsel %vm618_vm2, %v6320_v45, 0.0  ;;  %v6322_v20 = vpop.eup %6321 }
0x15b7   : > { %3491 = vadd.xlane.f32.xlu1 %v3490_v42  ;;  %3482 = vadd.xlane.f32.xlu2 %v3481_v5  ;;  %v6324_v46 = vpop.eup %6323  ;;  %6325 = vpow2.f32 %v3459_v41  ;;  %v3484_v56 = vsel %vm618_vm2, %v6322_v20, 0.0  ;;  %v5914_v5 = vld [vmem:[%s8806_s5 + $0xb8] sm:$0xff] }
0x15b8   : > { %v3475_v13 = vsel %vm618_vm2, %v6324_v46, 0.0 }
0x15ba   : > { %v3423_v51 = vpop.xlane.xlu2 %3422 }
0x15bb   : > { %v3445_v60 = vsub.f32 %v3401_v18, %v3423_v51 }
0x15bd   : > { %v3453_v32 = vmul.f32 1.442695, %v3445_v60  ;;  %v6326_v2 = vpop.eup %6325 }
0x15be   : > { %v3478_v15 = vsel %vm618_vm2, %v6326_v2, 0.0 }
0x15bf   : > { %6327 = vpow2.f32 %v3453_v32  ;;  %3485 = vadd.xlane.f32.xlu1 %v3484_v56  ;;  %3476 = vadd.xlane.f32.xlu2 %v3475_v13 }
0x15c2   : > { %v3426_v59 = vpop.xlane.xlu2 %3425 }
0x15c3   : > { %v3446_v61 = vsub.f32 %v8084_v49, %v3426_v59  ;;  %v5913_v49 = vld [vmem:[%s8806_s5 + $0xb0] sm:$0xff] }
0x15c4   : > { %5763 = vmatmul.msk.bf16.vlgmr.msrb.gmra.mxu1 %vm743_vm5, %v5913_v49 }
0x15c5   : > { %v6328_v40 = vpop.eup %6327  ;;  %v3455_v8 = vmul.f32 1.442695, %v3446_v61 }
0x15c6   : > { %v3469_v18 = vsel %vm618_vm2, %v6328_v40, 0.0 }
0x15c7   : > { %6329 = vpow2.f32 %v3455_v8  ;;  %3479 = vadd.xlane.f32.xlu1 %v3478_v15  ;;  %3470 = vadd.xlane.f32.xlu2 %v3469_v18 }
0x15cd   : > { %v6330_v3 = vpop.eup %6329 }
0x15ce   : > { %v3472_v54 = vsel %vm618_vm2, %v6330_v3, 0.0 }
0x15cf   : > { %3473 = vadd.xlane.f32.xlu1 %v3472_v54 }
0x15d4   : > { %5764 = vmatmul.msk.bf16.gmra.mxu1 %vm743_vm5, %v5914_v5 }
0x15f0   : > { %3544 = vxpose.xlu2.c.b16.start.end [1/1] (short) (narrow) %v3541_v35, 64 }
0x1622   : > { %v3489_v42 = vpop.xlane.xlu2 %3488 }
0x1623   : > { %6331 = vrcp.f32 %v3489_v42 }
0x1629   : > { %v6332_v51 = vpop.eup %6331 }
0x162a   : > { %v3492_v41 = vpop.xlane.xlu1 %3491  ;;  %v3483_v14 = vpop.xlane.xlu2 %3482  ;;  %v3507_v56 = vmul.f32 %v6332_v51, %v6316_v9 }
0x162b   : > { %6333 = vrcp.f32 %v3492_v41 }
0x162c   : > { %6335 = vrcp.f32 %v3483_v14 }
0x1631   : > { %v6334_v60 = vpop.eup %6333 }
0x1632   : > { %v3486_v32 = vpop.xlane.xlu1 %3485  ;;  %v3508_v13 = vmul.f32 %v6334_v60, %v6320_v45  ;;  %v3477_v59 = vpop.xlane.xlu2 %3476 }
0x1633   : > { %6337 = vrcp.f32 %v3486_v32  ;;  %v6336_v15 = vpop.eup %6335  ;;  %v8840_v32 = vld [vmem:[#allocation6_spill] sm:$0xff] }
0x1634   : > { %v3512_v61 = vpack.c.bf16 %v3508_v13, %v3507_v56  ;;  %6339 = vrcp.f32 %v3477_v59  ;;  %v3505_v10 = vmul.f32 %v6336_v15, %v6318_v53  ;;  %v3157_v53 = vadd.f32 %v8061_v16, %v8840_v32 }
0x1636   : > { %v3526_v8 = vsel %vm618_vm2, %v3512_v61, 0  ;;  %v3542_v59 = vpack.c.bf16 %v3157_v53, %v3157_v53 }
0x1637   : > { %3532 = vmatpush.bf16.xpose.msra.mxu1 %v3526_v8  ;;  %v3163_v8 = vpop.f32.mrf.mxu3 }
0x1639   : > { %v6338_v18 = vpop.eup %6337 }
0x163a   : > { %v3480_v54 = vpop.xlane.xlu1 %3479  ;;  %v3506_v7 = vmul.f32 %v6338_v18, %v6322_v20  ;;  %v3471_v35 = vpop.xlane.xlu2 %3470 }
0x163b   : > { %6341 = vrcp.f32 %v3480_v54  ;;  %v6340_v42 = vpop.eup %6339 }
0x163c   : > { %v3511_v29 = vpack.c.bf16 %v3506_v7, %v3505_v10  ;;  %6343 = vrcp.f32 %v3471_v35  ;;  %v3503_v5 = vmul.f32 %v6340_v42, %v6324_v46  ;;  %v3573_v46 = vsel %vm430_vm0, %v3542_v59, 0 }
0x163e   : > { %v3523_v49 = vsel %vm618_vm2, %v3511_v29, 0 }
0x163f   : > { %3533 = vmatpush.bf16.xpose.msra.mxu1 %v3523_v49 }
0x1641   : > { %v6342_v9 = vpop.eup %6341 }
0x1642   : > { %v3474_v45 = vpop.xlane.xlu1 %3473  ;;  %v3504_v41 = vmul.f32 %v6342_v9, %v6326_v2  ;;  %v6344_v60 = vpop.eup %6343  ;;  %v3164_v2 = vadd.f32 %v3163_v8, %v7235_v28 }
0x1643   : > { %6345 = vrcp.f32 %v3474_v45  ;;  %v3501_v56 = vmul.f32 %v6344_v60, %v6328_v40  ;;  %v8125_v40 = vpop.f32.mrf.mxu1 }
0x1644   : > { %v3510_v14 = vpack.c.bf16 %v3504_v41, %v3503_v5  ;;  %v3360_v18 = vpack.c.bf16 %v3164_v2, %v3164_v2 }
0x1646   : > { %v3520_v51 = vsel %vm618_vm2, %v3510_v14, 0 }
0x1647   : > { %3534 = vmatpush.bf16.xpose.msra.mxu1 %v3520_v51 }
0x1649   : > { %v6346_v20 = vpop.eup %6345 }
0x164a   : > { %v3502_v13 = vmul.f32 %v6346_v20, %v6330_v3 }
0x164b   : > { %v8128_v10 = vpop.f32.mrf.mxu1 }
0x164c   : > { %v3509_v61 = vpack.c.bf16 %v3502_v13, %v3501_v56 }
0x164e   : > { %v3517_v15 = vsel %vm618_vm2, %v3509_v61, 0 }
0x164f   : > { %3535 = vmatpush.bf16.xpose.msra.mxu1 %v3517_v15 }
0x1653   : > { %v8130_v7 = vpop.f32.mrf.mxu1 }
0x1656   : > { %5780 = vmatmul.msk.bf16.vlgmr.msra.gmra.mxu1 %vm618_vm2, %v3360_v18 }
0x1657   : > { %3582 = vmatpush.bf16.msrb.mxu1 %v3573_v46 }
0x165b   : > { %v8133_v29 = vpop.f32.mrf.mxu1 }
0x1691   : > { %v3552_v54 = vpop.trf.xlu2 }
0x1692   : > { %5781 = vmatmul.msk.bf16.vlgmr.msrb.gmra.mxu1 %vm423_vm1, %v3552_v54 }
0x16a1   : > { %v3553_v16 = vpop.trf.xlu2 }
0x16a2   : > { %5782 = vmatmul.msk.bf16.gmra.mxu1 %vm423_vm1, %v3553_v16 }
0x16b1   : > { %v3554_v3 = vpop.trf.xlu2 }
0x16b2   : > { %5783 = vmatmul.msk.bf16.gmra.mxu1 %vm423_vm1, %v3554_v3 }
0x16c1   : > { %v3555_v28 = vpop.trf.xlu2 }
0x16c2   : > { %5784 = vmatmul.msk.bf16.gmra.mxu1 %vm423_vm1, %v3555_v28 }
0x16d3   : > { %v8135_v35 = vpop.f32.mrf.mxu1 }
0x16db   : > { %v3539_v49 = vpop.f32.mrf.mxu1 }
0x170f   : > { %v3584_v42 = vpop.f32.mrf.mxu1 }
0x1710   : > { %v3604_v9 = vsel %vm618_vm2, %v3584_v42, -inf }
0x1711   : > { %3605 = vmax.xlane.f32.xlu2 %v3604_v9 }
0x1717   : > { %v8138_v45 = vpop.f32.mrf.mxu1 }
0x1718   : > { %v3607_v8 = vsel %vm618_vm2, %v8138_v45, -inf }
0x171f   : > { %v3589_v5 = vpop.f32.mrf.mxu1 }
0x1720   : > { %v3610_v59 = vsel %vm618_vm2, %v3589_v5, -inf }
0x1727   : > { %v3591_v41 = vpop.f32.mrf.mxu1 }
0x1728   : > { %v3613_v61 = vsel %vm618_vm2, %v3591_v41, -inf }
0x172f   : > { %v3594_v14 = vpop.f32.mrf.mxu1 }
0x1730   : > { %v3616_v51 = vsel %vm618_vm2, %v3594_v14, -inf }
0x1731   : > { %3617 = vmax.xlane.f32.xlu1 %v3616_v51 }
0x1737   : > { %v3596_v60 = vpop.f32.mrf.mxu1 }
0x1738   : > { %v3619_v32 = vsel %vm618_vm2, %v3596_v60, -inf }
0x1739   : > { %3620 = vmax.xlane.f32.xlu1 %v3619_v32 }
0x173f   : > { %v3599_v53 = vpop.f32.mrf.mxu1 }
0x1740   : > { %v3622_v20 = vsel %vm618_vm2, %v3599_v53, -inf }
0x1741   : > { %3623 = vmax.xlane.f32.xlu1 %v3622_v20 }
0x1747   : > { %v3601_v56 = vpop.f32.mrf.mxu1 }
0x1748   : > { %v3625_v13 = vsel %vm618_vm2, %v3601_v56, -inf }
0x1749   : > { %3626 = vmax.xlane.f32.xlu1 %v3625_v13 }
0x1751   : > { %3611 = vmax.xlane.f32.xlu1 %v3610_v59 }
0x1759   : > { %3614 = vmax.xlane.f32.xlu1 %v3613_v61 }
0x1761   : > { %3608 = vmax.xlane.f32.xlu1 %v3607_v8 }
0x1784   : > { %v3606_v61 = vpop.xlane.xlu2 %3605 }
0x17a4   : > { %v3618_v15 = vpop.xlane.xlu1 %3617 }
0x17a5   : > { %v3632_v46 = vsub.f32 %v3594_v14, %v3618_v15 }
0x17a7   : > { %v3644_v2 = vmul.f32 1.442695, %v3632_v46 }
0x17a9   : > { %6347 = vpow2.f32 %v3644_v2  ;;  %v3628_v2 = vsub.f32 %v3584_v42, %v3606_v61 }
0x17ac   : > { %v3621_v18 = vpop.xlane.xlu1 %3620 }
0x17ad   : > { %v3633_v20 = vsub.f32 %v3596_v60, %v3621_v18 }
0x17af   : > { %v8148_v54 = vpop.eup %6347  ;;  %v3646_v59 = vmul.f32 1.442695, %v3633_v20 }
0x17b0   : > { %v3664_v16 = vsel %vm618_vm2, %v8148_v54, 0.0 }
0x17b1   : > { %3665 = vadd.xlane.f32.xlu0 %v3664_v16 }
0x17b4   : > { %v3624_v3 = vpop.xlane.xlu1 %3623 }
0x17b5   : > { %v3634_v28 = vsub.f32 %v3599_v53, %v3624_v3 }
0x17b7   : > { %v3648_v49 = vmul.f32 1.442695, %v3634_v28 }
0x17b9   : > { %6349 = vpow2.f32 %v3648_v49 }
0x17bc   : > { %v3627_v9 = vpop.xlane.xlu1 %3626 }
0x17bd   : > { %v3635_v51 = vsub.f32 %v3601_v56, %v3627_v9  ;;  %v3636_v56 = vmul.f32 1.442695, %v3628_v2 }
0x17bf   : > { %v6350_v32 = vpop.eup %6349  ;;  %v3650_v13 = vmul.f32 1.442695, %v3635_v51 }
0x17c0   : > { %v3670_v14 = vsel %vm618_vm2, %v6350_v32, 0.0 }
0x17c1   : > { %6351 = vpow2.f32 %v3650_v13  ;;  %3671 = vadd.xlane.f32.xlu1 %v3670_v14 }
0x17c2   : > { %6353 = vpow2.f32 %v3646_v59 }
0x17c4   : > { %v3612_v8 = vpop.xlane.xlu1 %3611 }
0x17c5   : > { %v3630_v15 = vsub.f32 %v3589_v5, %v3612_v8 }
0x17c7   : > { %v6352_v46 = vpop.eup %6351  ;;  %v3640_v16 = vmul.f32 1.442695, %v3630_v15  ;;  %v8841_v15 = vld [vmem:[#allocation5_spill] sm:$0xff] }
0x17c8   : > { %v3673_v53 = vsel %vm618_vm2, %v6352_v46, 0.0  ;;  %v6354_v60 = vpop.eup %6353  ;;  %v3149_v2 = vadd.f32 %v7974_v6, %v8841_v15 }
0x17c9   : > { %6355 = vpow2.f32 %v3640_v16  ;;  %3674 = vadd.xlane.f32.xlu1 %v3673_v53  ;;  %v3667_v9 = vsel %vm618_vm2, %v6354_v60, 0.0 }
0x17ca   : > { %6357 = vpow2.f32 %v3636_v56  ;;  %v3174_v16 = vmul.f32 0.35355338, %v3149_v2 }
0x17cc   : > { %v3615_v3 = vpop.xlane.xlu1 %3614  ;;  %v3724_v53 = vpack.c.bf16 %v3174_v16, %v3174_v16 }
0x17cd   : > { %v3631_v18 = vsub.f32 %v3591_v41, %v3615_v3 }
0x17cf   : > { %v6356_v28 = vpop.eup %6355  ;;  %v3642_v49 = vmul.f32 1.442695, %v3631_v18 }
0x17d0   : > { %v3658_v51 = vsel %vm618_vm2, %v6356_v28, 0.0  ;;  %v6358_v5 = vpop.eup %6357 }
0x17d1   : > { %6359 = vpow2.f32 %v3642_v49  ;;  %3668 = vadd.xlane.f32.xlu1 %v3667_v9  ;;  %3659 = vadd.xlane.f32.xlu0 %v3658_v51  ;;  %v3652_v41 = vsel %vm618_vm2, %v6358_v5, 0.0 }
0x17d4   : > { %v3609_v42 = vpop.xlane.xlu1 %3608 }
0x17d5   : > { %v3629_v20 = vsub.f32 %v8138_v45, %v3609_v42 }
0x17d7   : > { %v6360_v13 = vpop.eup %6359  ;;  %v3638_v14 = vmul.f32 1.442695, %v3629_v20 }
0x17d8   : > { %v3661_v59 = vsel %vm618_vm2, %v6360_v13, 0.0 }
0x17d9   : > { %6361 = vpow2.f32 %v3638_v14  ;;  %3662 = vadd.xlane.f32.xlu1 %v3661_v59  ;;  %3653 = vadd.xlane.f32.xlu0 %v3652_v41 }
0x17df   : > { %v6362_v61 = vpop.eup %6361 }
0x17e0   : > { %v3655_v8 = vsel %vm618_vm2, %v6362_v61, 0.0 }
0x17e1   : > { %3656 = vadd.xlane.f32.xlu1 %v3655_v8 }
0x1802   : > { %3727 = vxpose.xlu0.c.b16.start.end [1/1] (short) (narrow) %v3724_v53, 64 }
0x1824   : > { %v3666_v3 = vpop.xlane.xlu0 %3665 }
0x1834   : > { %v3672_v45 = vpop.xlane.xlu1 %3671 }
0x1835   : > { %6363 = vrcp.f32 %v3672_v45 }
0x183b   : > { %v6364_v18 = vpop.eup %6363 }
0x183c   : > { %v3675_v56 = vpop.xlane.xlu1 %3674  ;;  %v3690_v51 = vmul.f32 %v6364_v18, %v6350_v32 }
0x183d   : > { %6365 = vrcp.f32 %v3675_v56 }
0x183e   : > { %6367 = vrcp.f32 %v3666_v3 }
0x1843   : > { %v6366_v49 = vpop.eup %6365 }
0x1844   : > { %v3669_v9 = vpop.xlane.xlu1 %3668  ;;  %v3691_v42 = vmul.f32 %v6366_v49, %v6352_v46  ;;  %v3660_v20 = vpop.xlane.xlu0 %3659 }
0x1845   : > { %6369 = vrcp.f32 %v3669_v9  ;;  %v6368_v6 = vpop.eup %6367 }
0x1846   : > { %v3695_v14 = vpack.c.bf16 %v3691_v42, %v3690_v51  ;;  %6371 = vrcp.f32 %v3660_v20  ;;  %v3688_v15 = vmul.f32 %v6368_v6, %v8148_v54  ;;  %v8842_v42 = vld [vmem:[#allocation7_spill] sm:$0xff] }
0x1847   : > { %v3159_v54 = vadd.f32 %v8065_v57, %v8842_v42 }
0x1848   : > { %v3709_v59 = vsel %vm618_vm2, %v3695_v14, 0 }
0x1849   : > { %3715 = vmatpush.bf16.xpose.msrb.mxu2 %v3709_v59  ;;  %v3725_v59 = vpack.c.bf16 %v3159_v54, %v3159_v54 }
0x184b   : > { %v6370_v41 = vpop.eup %6369 }
0x184c   : > { %v3663_v8 = vpop.xlane.xlu1 %3662  ;;  %v3689_v2 = vmul.f32 %v6370_v41, %v6354_v60  ;;  %v3654_v53 = vpop.xlane.xlu0 %3653 }
0x184d   : > { %6373 = vrcp.f32 %v3663_v8  ;;  %v6372_v45 = vpop.eup %6371  ;;  %v3166_v41 = vpop.f32.mrf.mxu3 }
0x184e   : > { %v3694_v16 = vpack.c.bf16 %v3689_v2, %v3688_v15  ;;  %6375 = vrcp.f32 %v3654_v53  ;;  %v3686_v3 = vmul.f32 %v6372_v45, %v6356_v28  ;;  %v3756_v28 = vsel %vm430_vm0, %v3725_v59, 0 }
0x1850   : > { %v3706_v32 = vsel %vm618_vm2, %v3694_v16, 0 }
0x1851   : > { %3716 = vmatpush.bf16.xpose.msrb.mxu2 %v3706_v32 }
0x1853   : > { %v6374_v46 = vpop.eup %6373 }
0x1854   : > { %v3657_v56 = vpop.xlane.xlu1 %3656  ;;  %v3687_v18 = vmul.f32 %v6374_v46, %v6360_v13  ;;  %v6376_v51 = vpop.eup %6375  ;;  %v3167_v13 = vadd.f32 %v3166_v41, %v7246_v21 }
0x1855   : > { %6377 = vrcp.f32 %v3657_v56  ;;  %v3684_v20 = vmul.f32 %v6376_v51, %v6358_v5 }
0x1856   : > { %v3693_v49 = vpack.c.bf16 %v3687_v18, %v3686_v3  ;;  %v3543_v15 = vpack.c.bf16 %v3167_v13, %v3167_v13 }
0x1858   : > { %v3703_v9 = vsel %vm618_vm2, %v3693_v49, 0 }
0x1859   : > { %3717 = vmatpush.bf16.xpose.msrb.mxu2 %v3703_v9 }
0x185b   : > { %v6378_v60 = vpop.eup %6377 }
0x185c   : > { %v3685_v14 = vmul.f32 %v6378_v60, %v6362_v61 }
0x185e   : > { %v3692_v6 = vpack.c.bf16 %v3685_v14, %v3684_v20 }
0x1860   : > { %v3700_v8 = vsel %vm618_vm2, %v3692_v6, 0 }
0x1861   : > { %3718 = vmatpush.bf16.xpose.msrb.mxu2 %v3700_v8 }
0x1868   : > { %5785 = vmatmul.msk.bf16.vlgmr.msrb.gmra.mxu2 %vm618_vm2, %v3543_v15 }
0x1869   : > { %3765 = vmatpush.bf16.msra.mxu2 %v3756_v28 }
0x18ae   : > { %v3735_v2 = vpop.trf.xlu0 }
0x18af   : > { %5786 = vmatmul.msk.bf16.vlgmr.msra.gmra.mxu2 %vm423_vm1, %v3735_v2 }
0x18be   : > { %v3736_v57 = vpop.trf.xlu0 }
0x18bf   : > { %5787 = vmatmul.msk.bf16.gmra.mxu2 %vm423_vm1, %v3736_v57 }
0x18ce   : > { %v3737_v5 = vpop.trf.xlu0 }
0x18cf   : > { %5788 = vmatmul.msk.bf16.gmra.mxu2 %vm423_vm1, %v3737_v5 }
0x18de   : > { %v3738_v61 = vpop.trf.xlu0 }
0x18df   : > { %5789 = vmatmul.msk.bf16.gmra.mxu2 %vm423_vm1, %v3738_v61 }
0x18eb   : > { %v8176_v16 = vpop.f32.mrf.mxu2 }
0x18f3   : > { %v3722_v53 = vpop.f32.mrf.mxu2 }
0x1932   : > { %v8178_v21 = vpop.f32.mrf.mxu2 }
0x1933   : > { %v3787_v14 = vsel %vm618_vm2, %v8178_v21, -inf }
0x193a   : > { %v8180_v45 = vpop.f32.mrf.mxu2 }
0x193b   : > { %v3790_v59 = vsel %vm618_vm2, %v8180_v45, -inf }
0x1942   : > { %v3772_v32 = vpop.f32.mrf.mxu2 }
0x1943   : > { %v3793_v20 = vsel %vm618_vm2, %v3772_v32, -inf }
0x194a   : > { %v3774_v46 = vpop.f32.mrf.mxu2 }
0x194b   : > { %v3796_v56 = vsel %vm618_vm2, %v3774_v46, -inf }
0x194c   : > { %3797 = vmax.xlane.f32.xlu0 %v3796_v56 }
0x1952   : > { %v3777_v3 = vpop.f32.mrf.mxu2 }
0x1953   : > { %v3799_v18 = vsel %vm618_vm2, %v3777_v3, -inf }
0x1954   : > { %3800 = vmax.xlane.f32.xlu1 %v3799_v18 }
0x195a   : > { %v3779_v49 = vpop.f32.mrf.mxu2 }
0x195b   : > { %v3802_v9 = vsel %vm618_vm2, %v3779_v49, -inf }
0x195c   : > { %3803 = vmax.xlane.f32.xlu1 %v3802_v9 }
0x1962   : > { %v3782_v51 = vpop.f32.mrf.mxu2 }
0x1963   : > { %v3805_v42 = vsel %vm618_vm2, %v3782_v51, -inf }
0x1964   : > { %3806 = vmax.xlane.f32.xlu1 %v3805_v42 }
0x196a   : > { %v3784_v54 = vpop.f32.mrf.mxu2 }
0x196b   : > { %v3808_v60 = vsel %vm618_vm2, %v3784_v54, -inf }
0x196c   : > { %3809 = vmax.xlane.f32.xlu1 %v3808_v60 }
0x1974   : > { %3794 = vmax.xlane.f32.xlu1 %v3793_v20 }
0x197c   : > { %3788 = vmax.xlane.f32.xlu1 %v3787_v14 }
0x1984   : > { %3791 = vmax.xlane.f32.xlu1 %v3790_v59 }
0x19bf   : > { %v3798_v20 = vpop.xlane.xlu0 %3797 }
0x19c7   : > { %v3801_v6 = vpop.xlane.xlu1 %3800 }
0x19c8   : > { %v3815_v41 = vsub.f32 %v3777_v3, %v3801_v6  ;;  %v3814_v6 = vsub.f32 %v3774_v46, %v3798_v20  ;;  %v611_v20 = vld [vmem:[%s8808_s7 + $0x1a8] sm:$0xff] }
0x19ca   : > { %v3827_v8 = vmul.f32 1.442695, %v3815_v41 }
0x19cc   : > { %6379 = vpow2.f32 %v3827_v8 }
0x19cf   : > { %v3804_v28 = vpop.xlane.xlu1 %3803 }
0x19d0   : > { %v3816_v13 = vsub.f32 %v3779_v49, %v3804_v28  ;;  %v3825_v28 = vmul.f32 1.442695, %v3814_v6 }
0x19d2   : > { %v8192_v15 = vpop.eup %6379  ;;  %v3829_v2 = vmul.f32 1.442695, %v3816_v13 }
0x19d3   : > { %v3847_v57 = vsel %vm618_vm2, %v8192_v15, 0.0 }
0x19d4   : > { %6381 = vpow2.f32 %v3829_v2  ;;  %3848 = vadd.xlane.f32.xlu1 %v3847_v57 }
0x19d7   : > { %v3807_v5 = vpop.xlane.xlu1 %3806 }
0x19d8   : > { %v3817_v61 = vsub.f32 %v3782_v51, %v3807_v5 }
0x19da   : > { %v8196_v53 = vpop.eup %6381  ;;  %v3831_v56 = vmul.f32 1.442695, %v3817_v61 }
0x19db   : > { %v3850_v3 = vsel %vm618_vm2, %v8196_v53, 0.0 }
0x19dc   : > { %6383 = vpow2.f32 %v3831_v56  ;;  %3851 = vadd.xlane.f32.xlu1 %v3850_v3 }
0x19df   : > { %v3810_v18 = vpop.xlane.xlu1 %3809 }
0x19e0   : > { %v3818_v49 = vsub.f32 %v3784_v54, %v3810_v18 }
0x19e2   : > { %v6384_v9 = vpop.eup %6383  ;;  %v3833_v42 = vmul.f32 1.442695, %v3818_v49 }
0x19e3   : > { %v3853_v60 = vsel %vm618_vm2, %v6384_v9, 0.0 }
0x19e4   : > { %6385 = vpow2.f32 %v3833_v42  ;;  %3854 = vadd.xlane.f32.xlu1 %v3853_v60  ;;  %v613_v60 = vld [vmem:[%s8808_s7 + $0x1b8] sm:$0xff] }
0x19e7   : > { %v3795_v14 = vpop.xlane.xlu1 %3794 }
0x19e8   : > { %v3813_v59 = vsub.f32 %v3772_v32, %v3795_v14  ;;  %v610_v14 = vld [vmem:[%s8808_s7 + $0x1a0] sm:$0xff] }
0x19ea   : > { %v6386_v51 = vpop.eup %6385  ;;  %v3823_v41 = vmul.f32 1.442695, %v3813_v59 }
0x19eb   : > { %v3856_v8 = vsel %vm618_vm2, %v6386_v51, 0.0 }
0x19ec   : > { %6387 = vpow2.f32 %v3823_v41  ;;  %3857 = vadd.xlane.f32.xlu1 %v3856_v8 }
0x19ed   : > { %6389 = vpow2.f32 %v3825_v28 }
0x19ef   : > { %v3789_v13 = vpop.xlane.xlu1 %3788 }
0x19f0   : > { %v3811_v54 = vsub.f32 %v8178_v21, %v3789_v13 }
0x19f2   : > { %v6388_v2 = vpop.eup %6387  ;;  %v3819_v5 = vmul.f32 1.442695, %v3811_v54 }
0x19f3   : > { %v3841_v57 = vsel %vm618_vm2, %v6388_v2, 0.0  ;;  %v6390_v56 = vpop.eup %6389 }
0x19f4   : > { %3842 = vadd.xlane.f32.xlu1 %v3841_v57  ;;  %6391 = vpow2.f32 %v3819_v5  ;;  %v3844_v3 = vsel %vm618_vm2, %v6390_v56, 0.0 }
0x19f7   : > { %v3792_v61 = vpop.xlane.xlu1 %3791 }
0x19f8   : > { %v3812_v32 = vsub.f32 %v8180_v45, %v3792_v61  ;;  %v612_v45 = vld [vmem:[%s8808_s7 + $0x1b0] sm:$0xff] }
0x19fa   : > { %v3821_v46 = vmul.f32 1.442695, %v3812_v32  ;;  %v6392_v18 = vpop.eup %6391 }
0x19fb   : > { %v3835_v21 = vsel %vm618_vm2, %v6392_v18, 0.0 }
0x19fc   : > { %6393 = vpow2.f32 %v3821_v46  ;;  %3845 = vadd.xlane.f32.xlu1 %v3844_v3 }
0x1a02   : > { %v6394_v49 = vpop.eup %6393 }
0x1a03   : > { %v3838_v42 = vsel %vm618_vm2, %v6394_v49, 0.0 }
0x1a04   : > { %3839 = vadd.xlane.f32.xlu2 %v3838_v42  ;;  %3836 = vadd.xlane.f32.xlu1 %v3835_v21 }
0x1a1c   : > { %3056 = vperm.xlu2 %5938, %v613_v60  }
0x1a1d   : > { %3051 = vperm.xlu1 %5937, %v612_v45  }
0x1a24   : > { %3046 = vperm.xlu2 %5938, %v611_v20  }
0x1a25   : > { %3041 = vperm.xlu1 %5937, %v610_v14  }
0x1a47   : > { %v3849_v59 = vpop.xlane.xlu1 %3848 }
0x1a4f   : > { %v3852_v6 = vpop.xlane.xlu1 %3851 }
0x1a57   : > { %v3855_v41 = vpop.xlane.xlu1 %3854 }
0x1a58   : > { %6395 = vrcp.f32 %v3855_v41 }
0x1a5e   : > { %v6396_v28 = vpop.eup %6395 }
0x1a5f   : > { %v3858_v8 = vpop.xlane.xlu1 %3857  ;;  %v3873_v57 = vmul.f32 %v6396_v28, %v6384_v9 }
0x1a60   : > { %6397 = vrcp.f32 %v3858_v8 }
0x1a61   : > { %6399 = vrcp.f32 %v3852_v6 }
0x1a62   : > { %6401 = vrcp.f32 %v3849_v59 }
0x1a66   : > { %v6398_v13 = vpop.eup %6397 }
0x1a67   : > { %v3843_v54 = vpop.xlane.xlu1 %3842  ;;  %v3874_v5 = vmul.f32 %v6398_v13, %v6386_v51  ;;  %v6400_v61 = vpop.eup %6399 }
0x1a68   : > { %v6402_v46 = vpop.eup %6401  ;;  %v3872_v42 = vmul.f32 %v6400_v61, %v8196_v53  ;;  %6403 = vrcp.f32 %v3843_v54 }
0x1a69   : > { %v3878_v32 = vpack.c.bf16 %v3874_v5, %v3873_v57  ;;  %v3871_v21 = vmul.f32 %v6402_v46, %v8192_v15  ;;  %v3168_v5 = vpop.f32.mrf.mxu3 }
0x1a6b   : > { %v3892_v3 = vsel %vm618_vm2, %v3878_v32, 0  ;;  %v3877_v45 = vpack.c.bf16 %v3872_v42, %v3871_v21  ;;  %v3169_v32 = vadd.f32 %v3168_v5, %v7254_v31 }
0x1a6c   : > { %3898 = vmatpush.bf16.xpose.msrb.mxu0 %v3892_v3 }
0x1a6d   : > { %v3889_v20 = vsel %vm618_vm2, %v3877_v45, 0  ;;  %v3726_v46 = vpack.c.bf16 %v3169_v32, %v3169_v32 }
0x1a6e   : > { %v6404_v14 = vpop.eup %6403 }
0x1a6f   : > { %v3846_v60 = vpop.xlane.xlu1 %3845  ;;  %v3869_v6 = vmul.f32 %v6404_v14, %v6388_v2 }
0x1a70   : > { %6405 = vrcp.f32 %v3846_v60 }
0x1a74   : > { %3899 = vmatpush.bf16.xpose.msrb.mxu0 %v3889_v20 }
0x1a76   : > { %v6406_v9 = vpop.eup %6405 }
0x1a77   : > { %v3840_v51 = vpop.xlane.xlu2 %3839  ;;  %v3837_v59 = vpop.xlane.xlu1 %3836  ;;  %v3870_v41 = vmul.f32 %v6406_v9, %v6390_v56  ;;  %v3907_v9 = vpack.c.bf16 %v8135_v35, %v8081_v58 }
0x1a78   : > { %6407 = vrcp.f32 %v3840_v51 }
0x1a79   : > { %6409 = vrcp.f32 %v3837_v59  ;;  %v3876_v8 = vpack.c.bf16 %v3870_v41, %v3869_v6  ;;  %v6581_v59 = vld [vmem:[%s8806_s5 + $0x30] sm:$0xff] }
0x1a7b   : > { %v3886_v53 = vsel %vm618_vm2, %v3876_v8, 0 }
0x1a7c   : > { %3900 = vmatpush.bf16.xpose.msrb.mxu0 %v3886_v53 }
0x1a7e   : > { %v6408_v15 = vpop.eup %6407 }
0x1a7f   : > { %v6410_v28 = vpop.eup %6409  ;;  %v3868_v13 = vmul.f32 %v6408_v15, %v6394_v49  ;;  %v8227_v2 = vpop.permute.xlu2 %3056 }
0x1a80   : > { %v3867_v54 = vmul.f32 %v6410_v28, %v6392_v18  ;;  %v3092_v3 = vadd.f32 %v8133_v29, %v8227_v2  ;;  %v6578_v29 = vld [vmem:[%s8806_s5 + $0x58] sm:$0xff] }
0x1a82   : > { %v3875_v57 = vpack.c.bf16 %v3868_v13, %v3867_v54 }
0x1a84   : > { %v3883_v61 = vsel %vm618_vm2, %v3875_v57, 0 }
0x1a85   : > { %3901 = vmatpush.bf16.xpose.msrb.mxu0 %v3883_v61 }
0x1a87   : > { %v8239_v42 = vpop.permute.xlu2 %3046 }
0x1a88   : > { %v3087_v21 = vadd.f32 %v8128_v10, %v8239_v42  ;;  %v6580_v10 = vld [vmem:[%s8806_s5 + $0x68] sm:$0xff] }
0x1a8c   : > { %5790 = vmatmul.msk.bf16.vlgmr.msrb.gmra.mxu0 %vm618_vm2, %v3726_v46 }
0x1a8f   : > { %v8230_v56 = vpop.permute.xlu1 %3051 }
0x1a90   : > { %v3090_v18 = vadd.f32 %v8130_v7, %v8230_v56  ;;  %v6577_v7 = vld [vmem:[%s8806_s5 + $0x50] sm:$0xff] }
0x1a92   : > { %v8236_v49 = vpack.c.bf16 %v3092_v3, %v3090_v18 }
0x1a94   : > { %3961 = vmatpush.bf16.msra.mxu1 %v8236_v49 }
0x1a97   : > { %v8241_v31 = vpop.permute.xlu1 %3041 }
0x1a98   : > { %v3085_v60 = vadd.f32 %v8125_v40, %v8241_v31  ;;  %v6579_v40 = vld [vmem:[%s8806_s5 + $0x60] sm:$0xff] }
0x1a9a   : > { %v8247_v45 = vpack.c.bf16 %v3087_v21, %v3085_v60 }
0x1a9c   : > { %3962 = vmatpush.bf16.msra.mxu1 %v8247_v45 }
0x1a9f   : > { %5795 = vmatmul.msk.bf16.vlgmr.msra.gmra.mxu1 %vm743_vm5, %v6577_v7 }
0x1aaf   : > { %5796 = vmatmul.msk.bf16.gmra.mxu1 %vm743_vm5, %v6578_v29 }
0x1abf   : > { %5797 = vmatmul.msk.bf16.gmra.mxu1 %vm743_vm5, %v6579_v40 }
0x1acf   : > { %5798 = vmatmul.msk.bf16.gmra.mxu1 %vm743_vm5, %v6580_v10 }
0x1b09   : > { %v3903_v20 = vpop.f32.mrf.mxu0 }
0x1b0a   : > { %v3908_v14 = vpack.c.bf16 %v3903_v20, %v8176_v16  ;;  %v6582_v16 = vld [vmem:[%s8806_s5 + $0x38] sm:$0xff] }
0x1b0c   : > { %3915 = vmatpush.bf16.msrb.mxu3 %v3908_v14 }
0x1b10   : > { %3916 = vmatpush.bf16.msrb.mxu3 %v3907_v9 }
0x1b11   : > { %v3905_v51 = vpop.f32.mrf.mxu0 }
0x1b13   : > { %5791 = vmatmul.msk.bf16.vlgmr.msrb.gmra.mxu3 %vm743_vm5, %v6581_v59 }
0x1b1c   : > { %v3964_v6 = vpop.f32.mrf.mxu1 }
0x1b1d   : > { %v3965_v41 = vadd.f32 %v3964_v6, %v7296_v12 }
0x1b1f   : > { %v3989_v8 = vpack.c.bf16 %v3965_v41, %v3965_v41 }
0x1b21   : > { %v4020_v53 = vsel %vm430_vm0, %v3989_v8, 0 }
0x1b22   : > { %4029 = vmatpush.bf16.msra.mxu3 %v4020_v53 }
0x1b23   : > { %5792 = vmatmul.msk.bf16.gmra.mxu3 %vm743_vm5, %v6582_v16 }
0x1b24   : > { %v3966_v58 = vpop.f32.mrf.mxu1 }
0x1b25   : > { %v3967_v35 = vadd.f32 %v3966_v58, %v7300_v33 }
0x1b27   : > { %v4172_v15 = vpack.c.bf16 %v3967_v35, %v3967_v35 }
0x1b29   : > { %v8281_v28 = vsel %vm430_vm0, %v4172_v15, 0 }
0x1b2a   : > { %5926 = vmatpush.bf16.msrb.mxu2 %v8281_v28 }
0x1b2c   : > { %v3969_v12 = vpop.f32.mrf.mxu1 }
0x1b2d   : > { %v3970_v13 = vadd.f32 %v3969_v12, %v7553_v52 }
0x1b2f   : > { %v4355_v54 = vpack.c.bf16 %v3970_v13, %v3970_v13 }
0x1b31   : > { %v4386_v57 = vsel %vm430_vm0, %v4355_v54, 0 }
0x1b32   : > { %4395 = vmatpush.bf16.msrb.mxu1 %v4386_v57 }
0x1b96   : > { %v3918_v5 = vpop.f32.mrf.mxu3 }
0x1b97   : > { %v3919_v21 = vadd.f32 %v3918_v5, %v7260_v39 }
0x1b99   : > { %v3928_v40 = vadd.f32 %v3919_v21, %v7824_v23 }
0x1b9e   : > { %v3920_v61 = vpop.f32.mrf.mxu3 }
0x1b9f   : > { %v3921_v33 = vadd.f32 %v3920_v61, %v7257_v22  ;;  %v6583_v22 = vld [vmem:[%s8806_s5 + $0x40] sm:$0xff] }
0x1ba1   : > { %v3929_v7 = vadd.f32 %v3921_v33, %v7819_v47 }
0x1ba3   : > { %v3932_v10 = vpack.c.bf16 %v3929_v7, %v3928_v40 }
0x1ba6   : > { %v3923_v32 = vpop.f32.mrf.mxu3 }
0x1ba7   : > { %v3924_v46 = vadd.f32 %v3923_v32, %v7274_v48 }
0x1ba9   : > { %v3930_v60 = vadd.f32 %v3924_v46, %v7811_v17 }
0x1bae   : > { %v3925_v3 = vpop.f32.mrf.mxu3 }
0x1baf   : > { %v3926_v18 = vadd.f32 %v3925_v3, %v7251_v4  ;;  %v6584_v4 = vld [vmem:[%s8806_s5 + $0x48] sm:$0xff] }
0x1bb1   : > { %v3931_v52 = vadd.f32 %v3926_v18, %v7814_v1 }
0x1bb3   : > { %v3933_v29 = vpack.c.bf16 %v3931_v52, %v3930_v60 }
0x1bb5   : > { %3940 = vmatpush.bf16.msra.mxu0 %v3933_v29 }
0x1bb9   : > { %3941 = vmatpush.bf16.msra.mxu0 %v3932_v10 }
0x1bbc   : > { %5793 = vmatmul.msk.bf16.vlgmr.msra.gmra.mxu0 %vm743_vm5, %v6583_v22 }
0x1bcc   : > { %5794 = vmatmul.msk.bf16.gmra.mxu0 %vm743_vm5, %v6584_v4 }
0x1c39   : > { %v3943_v39 = vpop.f32.mrf.mxu0 }
0x1c3a   : > { %v3944_v48 = vadd.f32 %v3943_v39, %v7294_v43 }
0x1c3c   : > { %v3984_v17 = vmul.f32 0.35355338, %v3944_v48 }
0x1c3e   : > { %v3988_v1 = vpack.c.bf16 %v3984_v17, %v3984_v17 }
0x1c40   : > { %3991 = vxpose.xlu1.c.b16.start.end [1/1] (short) (narrow) %v3988_v1, 64 }
0x1cec   : > { %v3999_v47 = vpop.trf.xlu1 }
0x1ced   : > { %5799 = vmatmul.msk.bf16.vlgmr.msra.gmra.mxu3 %vm423_vm1, %v3999_v47 }
0x1cfc   : > { %v4000_v23 = vpop.trf.xlu1 }
0x1cfd   : > { %5800 = vmatmul.msk.bf16.gmra.mxu3 %vm423_vm1, %v4000_v23 }
0x1d0c   : > { %v4001_v20 = vpop.trf.xlu1 }
0x1d0d   : > { %5801 = vmatmul.msk.bf16.gmra.mxu3 %vm423_vm1, %v4001_v20 }
0x1d1c   : > { %v4002_v14 = vpop.trf.xlu1 }
0x1d1d   : > { %5802 = vmatmul.msk.bf16.gmra.mxu3 %vm423_vm1, %v4002_v14 }
0x1d70   : > { %v8307_v9 = vpop.f32.mrf.mxu3 }
0x1d71   : > { %v4051_v41 = vsel %vm492_vm6, %v8307_v9, -inf }
0x1d78   : > { %v4033_v51 = vpop.f32.mrf.mxu3 }
0x1d79   : > { %v4054_v57 = vsel %vm492_vm6, %v4033_v51, -inf }
0x1d80   : > { %v4036_v59 = vpop.f32.mrf.mxu3 }
0x1d81   : > { %v4057_v43 = vsel %vm492_vm6, %v4036_v59, -inf }
0x1d82   : > { %4058 = vmax.xlane.f32.xlu0 %v4057_v43 }
0x1d88   : > { %v4038_v6 = vpop.f32.mrf.mxu3 }
0x1d89   : > { %v4060_v54 = vsel %vm492_vm6, %v4038_v6, -inf }
0x1d8a   : > { %4052 = vmax.xlane.f32.xlu0 %v4051_v41 }
0x1d90   : > { %v4041_v8 = vpop.f32.mrf.mxu3 }
0x1d91   : > { %v4063_v13 = vsel %vm492_vm6, %v4041_v8, -inf }
0x1d98   : > { %v4043_v53 = vpop.f32.mrf.mxu3 }
0x1d99   : > { %v4066_v16 = vsel %vm492_vm6, %v4043_v53, -inf }
0x1d9a   : > { %4067 = vmax.xlane.f32.xlu1 %v4066_v16 }
0x1da0   : > { %v4046_v58 = vpop.f32.mrf.mxu3 }
0x1da1   : > { %v4069_v35 = vsel %vm492_vm6, %v4046_v58, -inf }
0x1da2   : > { %4070 = vmax.xlane.f32.xlu2 %v4069_v35 }
0x1da8   : > { %v4048_v15 = vpop.f32.mrf.mxu3 }
0x1da9   : > { %v4072_v12 = vsel %vm492_vm6, %v4048_v15, -inf }
0x1daa   : > { %4073 = vmax.xlane.f32.xlu2 %v4072_v12 }
0x1db2   : > { %4064 = vmax.xlane.f32.xlu2 %v4063_v13 }
0x1dba   : > { %4061 = vmax.xlane.f32.xlu2 %v4060_v54 }
0x1dc2   : > { %4055 = vmax.xlane.f32.xlu2 %v4054_v57 }
0x1df5   : > { %v4059_v10 = vpop.xlane.xlu0 %4058 }
0x1df6   : > { %v4077_v1 = vsub.f32 %v4036_v59, %v4059_v10 }
0x1df8   : > { %v4087_v14 = vmul.f32 1.442695, %v4077_v1 }
0x1dfd   : > { %v4053_v43 = vpop.xlane.xlu0 %4052 }
0x1e0d   : > { %v4068_v61 = vpop.xlane.xlu1 %4067 }
0x1e0e   : > { %v4080_v3 = vsub.f32 %v4043_v53, %v4068_v61 }
0x1e10   : > { %v4093_v18 = vmul.f32 1.442695, %v4080_v3 }
0x1e15   : > { %v4071_v5 = vpop.xlane.xlu2 %4070 }
0x1e16   : > { %v4081_v7 = vsub.f32 %v4046_v58, %v4071_v5  ;;  %v3945_v5 = vpop.f32.mrf.mxu0 }
0x1e17   : > { %v3946_v61 = vadd.f32 %v3945_v5, %v7317_v26 }
0x1e18   : > { %v4095_v22 = vmul.f32 1.442695, %v4081_v7 }
0x1e1d   : > { %v4074_v32 = vpop.xlane.xlu2 %4073 }
0x1e1e   : > { %v4082_v46 = vsub.f32 %v4048_v15, %v4074_v32  ;;  %v3985_v32 = vmul.f32 0.35355338, %v3946_v61 }
0x1e20   : > { %v4097_v33 = vmul.f32 1.442695, %v4082_v46  ;;  %v4171_v46 = vpack.c.bf16 %v3985_v32, %v3985_v32 }
0x1e22   : > { %6411 = vpow2.f32 %v4097_v33 }
0x1e23   : > { %6413 = vpow2.f32 %v4093_v18 }
0x1e25   : > { %v4065_v21 = vpop.xlane.xlu2 %4064 }
0x1e26   : > { %v4079_v60 = vsub.f32 %v4041_v8, %v4065_v21 }
0x1e28   : > { %v8318_v52 = vpop.eup %6411  ;;  %v4091_v29 = vmul.f32 1.442695, %v4079_v60 }
0x1e29   : > { %v4120_v40 = vsel %vm492_vm6, %v8318_v52, 0.0  ;;  %v6414_v39 = vpop.eup %6413 }
0x1e2a   : > { %6415 = vpow2.f32 %v4091_v29  ;;  %4121 = vadd.xlane.f32.xlu2 %v4120_v40  ;;  %v4114_v20 = vsel %vm492_vm6, %v6414_v39, 0.0 }
0x1e2b   : > { %6417 = vpow2.f32 %v4095_v22 }
0x1e2d   : > { %v4062_v4 = vpop.xlane.xlu2 %4061 }
0x1e2e   : > { %v4078_v48 = vsub.f32 %v4038_v6, %v4062_v4  ;;  %v4075_v6 = vsub.f32 %v8307_v9, %v4053_v43 }
0x1e30   : > { %v6416_v17 = vpop.eup %6415  ;;  %v4089_v47 = vmul.f32 1.442695, %v4078_v48  ;;  %v4083_v15 = vmul.f32 1.442695, %v4075_v6 }
0x1e31   : > { %v4111_v23 = vsel %vm492_vm6, %v6416_v17, 0.0  ;;  %v6418_v8 = vpop.eup %6417 }
0x1e32   : > { %6419 = vpow2.f32 %v4089_v47  ;;  %4112 = vadd.xlane.f32.xlu0 %v4111_v23  ;;  %4115 = vadd.xlane.f32.xlu2 %v4114_v20  ;;  %v4117_v59 = vsel %vm492_vm6, %v6418_v8, 0.0 }
0x1e33   : > { %6421 = vpow2.f32 %v4087_v14 }
0x1e35   : > { %v4056_v41 = vpop.xlane.xlu2 %4055 }
0x1e36   : > { %v4076_v53 = vsub.f32 %v4033_v51, %v4056_v41 }
0x1e38   : > { %v6420_v16 = vpop.eup %6419  ;;  %v4085_v58 = vmul.f32 1.442695, %v4076_v53 }
0x1e39   : > { %v4108_v35 = vsel %vm492_vm6, %v6420_v16, 0.0  ;;  %v6422_v12 = vpop.eup %6421 }
0x1e3a   : > { %6423 = vpow2.f32 %v4085_v58  ;;  %4118 = vadd.xlane.f32.xlu0 %v4117_v59  ;;  %4109 = vadd.xlane.f32.xlu2 %v4108_v35  ;;  %v4105_v54 = vsel %vm492_vm6, %v6422_v12, 0.0  ;;  %v8334_v35 = vpop.f32.mrf.mxu1 }
0x1e3b   : > { %6425 = vpow2.f32 %v4083_v15 }
0x1e40   : > { %v6424_v13 = vpop.eup %6423 }
0x1e41   : > { %v4102_v51 = vsel %vm492_vm6, %v6424_v13, 0.0  ;;  %v6426_v57 = vpop.eup %6425 }
0x1e42   : > { %4106 = vadd.xlane.f32.xlu0 %v4105_v54  ;;  %4103 = vadd.xlane.f32.xlu2 %v4102_v51  ;;  %v4099_v9 = vsel %vm492_vm6, %v6426_v57, 0.0 }
0x1e4a   : > { %4100 = vadd.xlane.f32.xlu0 %v4099_v9  ;;  %v3974_v9 = vpop.f32.mrf.mxu1 }
0x1e73   : > { %4174 = vxpose.xlu0.c.b16.start.end [1/1] (short) (narrow) %v4171_v46, 64 }
0x1e9d   : > { %v4122_v3 = vpop.xlane.xlu2 %4121 }
0x1e9e   : > { %6427 = vrcp.f32 %v4122_v3 }
0x1ea4   : > { %v6428_v60 = vpop.eup %6427 }
0x1ea5   : > { %v4113_v33 = vpop.xlane.xlu0 %4112  ;;  %v4116_v18 = vpop.xlane.xlu2 %4115  ;;  %v4138_v4 = vmul.f32 %v6428_v60, %v8318_v52 }
0x1ead   : > { %v4119_v21 = vpop.xlane.xlu0 %4118  ;;  %v4110_v40 = vpop.xlane.xlu2 %4109 }
0x1eae   : > { %6429 = vrcp.f32 %v4119_v21 }
0x1eaf   : > { %6431 = vrcp.f32 %v4113_v33 }
0x1eb0   : > { %6433 = vrcp.f32 %v4116_v18 }
0x1eb4   : > { %v6430_v7 = vpop.eup %6429 }
0x1eb5   : > { %v6432_v29 = vpop.eup %6431  ;;  %v4107_v10 = vpop.xlane.xlu0 %4106  ;;  %v4137_v22 = vmul.f32 %v6430_v7, %v6418_v8 }
0x1eb6   : > { %v6434_v26 = vpop.eup %6433  ;;  %6435 = vrcp.f32 %v4107_v10  ;;  %v4135_v47 = vmul.f32 %v6432_v29, %v6416_v17  ;;  %v4104_v41 = vpop.xlane.xlu2 %4103 }
0x1eb7   : > { %v4142_v48 = vpack.c.bf16 %v4138_v4, %v4137_v22  ;;  %v4136_v23 = vmul.f32 %v6434_v26, %v6414_v39  ;;  %6437 = vrcp.f32 %v4110_v40 }
0x1eb9   : > { %v4156_v1 = vsel %vm492_vm6, %v4142_v48, 0  ;;  %v4141_v14 = vpack.c.bf16 %v4136_v23, %v4135_v47 }
0x1eba   : > { %4162 = vmatpush.bf16.xpose.msrb.mxu0 %v4156_v1 }
0x1ebb   : > { %v4153_v6 = vsel %vm492_vm6, %v4141_v14, 0 }
0x1ebc   : > { %v6436_v43 = vpop.eup %6435 }
0x1ebd   : > { %v4101_v20 = vpop.xlane.xlu0 %4100  ;;  %v6438_v53 = vpop.eup %6437  ;;  %v4133_v8 = vmul.f32 %v6436_v43, %v6422_v12  ;;  %v3975_v12 = vadd.f32 %v3974_v9, %v7498_v11 }
0x1ebe   : > { %6439 = vrcp.f32 %v4101_v20  ;;  %v4134_v52 = vmul.f32 %v6438_v53, %v6420_v16 }
0x1ebf   : > { %6441 = vrcp.f32 %v4104_v41  ;;  %v3990_v16 = vpack.c.bf16 %v3975_v12, %v3975_v12 }
0x1ec0   : > { %v4140_v58 = vpack.c.bf16 %v4134_v52, %v4133_v8 }
0x1ec2   : > { %4163 = vmatpush.bf16.xpose.msrb.mxu0 %v4153_v6  ;;  %v4150_v39 = vsel %vm492_vm6, %v4140_v58, 0 }
0x1ec4   : > { %v6440_v59 = vpop.eup %6439 }
0x1ec5   : > { %v6442_v17 = vpop.eup %6441  ;;  %v4131_v15 = vmul.f32 %v6440_v59, %v6426_v57 }
0x1ec6   : > { %v4132_v54 = vmul.f32 %v6442_v17, %v6424_v13  ;;  %v8344_v13 = vpop.f32.mrf.mxu0 }
0x1ec8   : > { %v4139_v51 = vpack.c.bf16 %v4132_v54, %v4131_v15 }
0x1eca   : > { %4164 = vmatpush.bf16.xpose.msrb.mxu0 %v4150_v39  ;;  %v4147_v5 = vsel %vm492_vm6, %v4139_v51, 0 }
0x1ece   : > { %v8346_v46 = vpop.f32.mrf.mxu0 }
0x1ed2   : > { %4165 = vmatpush.bf16.xpose.msrb.mxu0 %v4147_v5 }
0x1ed9   : > { %5803 = vmatmul.msk.bf16.vlgmr.msrb.gmra.mxu0 %vm492_vm6, %v3990_v16 }
0x1eda   : > { %4212 = vmatpush.bf16.msra.mxu0 %v8281_v28 }
0x1f1f   : > { %v4182_v61 = vpop.trf.xlu0 }
0x1f20   : > { %5804 = vmatmul.msk.bf16.vlgmr.msra.gmra.mxu0 %vm423_vm1, %v4182_v61 }
0x1f2f   : > { %v4183_v32 = vpop.trf.xlu0 }
0x1f30   : > { %5805 = vmatmul.msk.bf16.gmra.mxu0 %vm423_vm1, %v4183_v32 }
0x1f3f   : > { %v4184_v57 = vpop.trf.xlu0 }
0x1f40   : > { %5806 = vmatmul.msk.bf16.vlgmr.msrb.gmra.mxu2 %vm423_vm1, %v4184_v57 }
0x1f4f   : > { %v4185_v3 = vpop.trf.xlu0 }
0x1f50   : > { %5807 = vmatmul.msk.bf16.gmra.mxu2 %vm423_vm1, %v4185_v3 }
0x1f56   : > { %v8349_v11 = vpop.f32.mrf.mxu0 }
0x1f5e   : > { %v4169_v28 = vpop.f32.mrf.mxu0 }
0x1f9d   : > { %v8351_v33 = vpop.f32.mrf.mxu0 }
0x1f9e   : > { %v4234_v23 = vsel %vm492_vm6, %v8351_v33, -inf }
0x1fa5   : > { %v8353_v18 = vpop.f32.mrf.mxu0 }
0x1fa6   : > { %v4237_v20 = vsel %vm492_vm6, %v8353_v18, -inf }
0x1fad   : > { %v4219_v21 = vpop.f32.mrf.mxu0 }
0x1fae   : > { %v4240_v47 = vsel %vm492_vm6, %v4219_v21, -inf }
0x1fb5   : > { %v4221_v60 = vpop.f32.mrf.mxu0 }
0x1fb6   : > { %v4243_v7 = vsel %vm492_vm6, %v4221_v60, -inf }
0x1fb7   : > { %4244 = vmax.xlane.f32.xlu0 %v4243_v7 }
0x1fc3   : > { %v4224_v29 = vpop.f32.mrf.mxu2 }
0x1fc4   : > { %v4246_v48 = vsel %vm492_vm6, %v4224_v29, -inf }
0x1fcb   : > { %v4226_v40 = vpop.f32.mrf.mxu2 }
0x1fcc   : > { %v4249_v1 = vsel %vm492_vm6, %v4226_v40, -inf }
0x1fd3   : > { %v4229_v10 = vpop.f32.mrf.mxu2 }
0x1fd4   : > { %v4252_v22 = vsel %vm492_vm6, %v4229_v10, -inf }
0x1fd5   : > { %4253 = vmax.xlane.f32.xlu2 %v4252_v22 }
0x1fdb   : > { %v4231_v4 = vpop.f32.mrf.mxu2 }
0x1fdc   : > { %v4255_v26 = vsel %vm492_vm6, %v4231_v4, -inf }
0x1fdd   : > { %4256 = vmax.xlane.f32.xlu2 %v4255_v26 }
0x1fe5   : > { %4247 = vmax.xlane.f32.xlu2 %v4246_v48 }
0x1fed   : > { %4250 = vmax.xlane.f32.xlu2 %v4249_v1 }
0x1ff5   : > { %4241 = vmax.xlane.f32.xlu2 %v4240_v47 }
0x1ffd   : > { %4235 = vmax.xlane.f32.xlu2 %v4234_v23 }
0x2005   : > { %4238 = vmax.xlane.f32.xlu2 %v4237_v20 }
0x202a   : > { %v4245_v14 = vpop.xlane.xlu0 %4244 }
0x202b   : > { %v4261_v43 = vsub.f32 %v4221_v60, %v4245_v14 }
0x202d   : > { %v4272_v41 = vmul.f32 1.442695, %v4261_v43 }
0x202f   : > { %6443 = vpow2.f32 %v4272_v41 }
0x2035   : > { %v8365_v53 = vpop.eup %6443 }
0x2036   : > { %v4291_v6 = vsel %vm492_vm6, %v8365_v53, 0.0 }
0x2037   : > { %4292 = vadd.xlane.f32.xlu1 %v4291_v6  ;;  %v3951_v6 = vadd.f32 %v8346_v46, %v7523_v36 }
0x2048   : > { %v4254_v8 = vpop.xlane.xlu2 %4253 }
0x2049   : > { %v4264_v52 = vsub.f32 %v4229_v10, %v4254_v8 }
0x204b   : > { %v4278_v58 = vmul.f32 1.442695, %v4264_v52  ;;  %v3987_v52 = vmul.f32 0.35355338, %v3951_v6 }
0x204d   : > { %6445 = vpow2.f32 %v4278_v58 }
0x2050   : > { %v4257_v59 = vpop.xlane.xlu2 %4256 }
0x2051   : > { %v4265_v17 = vsub.f32 %v4231_v4, %v4257_v59 }
0x2053   : > { %v6446_v39 = vpop.eup %6445  ;;  %v4280_v15 = vmul.f32 1.442695, %v4265_v17 }
0x2054   : > { %v4300_v54 = vsel %vm492_vm6, %v6446_v39, 0.0 }
0x2055   : > { %6447 = vpow2.f32 %v4280_v15  ;;  %4301 = vadd.xlane.f32.xlu2 %v4300_v54 }
0x2058   : > { %v4248_v51 = vpop.xlane.xlu2 %4247 }
0x2059   : > { %v4262_v9 = vsub.f32 %v4224_v29, %v4248_v51 }
0x205b   : > { %v6448_v5 = vpop.eup %6447  ;;  %v4274_v12 = vmul.f32 1.442695, %v4262_v9 }
0x205c   : > { %v4303_v16 = vsel %vm492_vm6, %v6448_v5, 0.0 }
0x205d   : > { %6449 = vpow2.f32 %v4274_v12  ;;  %4304 = vadd.xlane.f32.xlu2 %v4303_v16 }
0x2060   : > { %v4251_v61 = vpop.xlane.xlu2 %4250 }
0x2061   : > { %v4263_v32 = vsub.f32 %v4226_v40, %v4251_v61 }
0x2063   : > { %v6450_v57 = vpop.eup %6449  ;;  %v4276_v3 = vmul.f32 1.442695, %v4263_v32 }
0x2064   : > { %v4294_v28 = vsel %vm492_vm6, %v6450_v57, 0.0 }
0x2065   : > { %6451 = vpow2.f32 %v4276_v3  ;;  %4295 = vadd.xlane.f32.xlu2 %v4294_v28 }
0x2068   : > { %v4242_v60 = vpop.xlane.xlu2 %4241 }
0x2069   : > { %v4260_v7 = vsub.f32 %v4219_v21, %v4242_v60 }
0x206b   : > { %v6452_v10 = vpop.eup %6451  ;;  %v4270_v22 = vmul.f32 1.442695, %v4260_v7 }
0x206c   : > { %v4297_v29 = vsel %vm492_vm6, %v6452_v10, 0.0 }
0x206d   : > { %6453 = vpow2.f32 %v4270_v22  ;;  %4298 = vadd.xlane.f32.xlu2 %v4297_v29 }
0x2070   : > { %v4236_v4 = vpop.xlane.xlu2 %4235 }
0x2071   : > { %v4258_v26 = vsub.f32 %v8351_v33, %v4236_v4  ;;  %v3949_v33 = vadd.f32 %v8344_v13, %v7515_v27 }
0x2073   : > { %v6454_v48 = vpop.eup %6453  ;;  %v4266_v1 = vmul.f32 1.442695, %v4258_v26  ;;  %v3986_v8 = vmul.f32 0.35355338, %v3949_v33 }
0x2074   : > { %v4288_v40 = vsel %vm492_vm6, %v6454_v48, 0.0 }
0x2075   : > { %6455 = vpow2.f32 %v4266_v1  ;;  %4289 = vadd.xlane.f32.xlu2 %v4288_v40  ;;  %v4354_v58 = vpack.c.bf16 %v3986_v8, %v3986_v8 }
0x2078   : > { %v4239_v47 = vpop.xlane.xlu2 %4238 }
0x2079   : > { %v4259_v23 = vsub.f32 %v8353_v18, %v4239_v47  ;;  %v4537_v18 = vpack.c.bf16 %v3987_v52, %v3987_v52 }
0x207b   : > { %v6456_v20 = vpop.eup %6455  ;;  %v4268_v21 = vmul.f32 1.442695, %v4259_v23 }
0x207c   : > { %v4282_v14 = vsel %vm492_vm6, %v6456_v20, 0.0 }
0x207d   : > { %6457 = vpow2.f32 %v4268_v21  ;;  %4283 = vadd.xlane.f32.xlu2 %v4282_v14 }
0x2083   : > { %v6458_v43 = vpop.eup %6457 }
0x2084   : > { %v4285_v41 = vsel %vm492_vm6, %v6458_v43, 0.0 }
0x2085   : > { %4286 = vadd.xlane.f32.xlu1 %v4285_v41 }
0x20a6   : > { %5975 = vxpose.binary.xlu2.c.b16.start.end [1/2] (short) (narrow) %v4537_v18, %v4354_v58, 64 }
0x20aa   : > { %v4293_v13 = vpop.xlane.xlu1 %4292 }
0x20c8   : > { %v4302_v59 = vpop.xlane.xlu2 %4301 }
0x20c9   : > { %6459 = vrcp.f32 %v4302_v59 }
0x20cf   : > { %v6460_v15 = vpop.eup %6459 }
0x20d0   : > { %v4305_v17 = vpop.xlane.xlu2 %4304  ;;  %v4320_v9 = vmul.f32 %v6460_v15, %v6446_v39 }
0x20d1   : > { %6461 = vrcp.f32 %v4305_v17 }
0x20d7   : > { %v6462_v54 = vpop.eup %6461 }
0x20d8   : > { %v4296_v51 = vpop.xlane.xlu2 %4295  ;;  %v4321_v12 = vmul.f32 %v6462_v54, %v6448_v5 }
0x20d9   : > { %6463 = vrcp.f32 %v4296_v51 }
0x20da   : > { %v4325_v16 = vpack.c.bf16 %v4321_v12, %v4320_v9 }
0x20dc   : > { %v4339_v27 = vsel %vm492_vm6, %v4325_v16, 0 }
0x20dd   : > { %4345 = vmatpush.bf16.xpose.msrb.mxu0 %v4339_v27 }
0x20df   : > { %v6464_v46 = vpop.eup %6463 }
0x20e0   : > { %v4299_v36 = vpop.xlane.xlu2 %4298  ;;  %v4318_v3 = vmul.f32 %v6464_v46, %v6450_v57 }
0x20e1   : > { %6465 = vrcp.f32 %v4299_v36 }
0x20e2   : > { %6467 = vrcp.f32 %v4293_v13 }
0x20e7   : > { %v6466_v61 = vpop.eup %6465 }
0x20e8   : > { %v4290_v32 = vpop.xlane.xlu2 %4289  ;;  %v4319_v28 = vmul.f32 %v6466_v61, %v6452_v10  ;;  %v6468_v39 = vpop.eup %6467  ;;  %v3972_v10 = vadd.f32 %v8334_v35, %v7561_v0 }
0x20e9   : > { %6469 = vrcp.f32 %v4290_v32  ;;  %v4317_v29 = vmul.f32 %v6468_v39, %v8365_v53 }
0x20ea   : > { %v4324_v60 = vpack.c.bf16 %v4319_v28, %v4318_v3  ;;  %v4538_v14 = vpack.c.bf16 %v3972_v10, %v3972_v10 }
0x20ec   : > { %v4336_v7 = vsel %vm492_vm6, %v4324_v60, 0  ;;  %v4569_v33 = vsel %vm430_vm0, %v4538_v14, 0 }
0x20ed   : > { %4346 = vmatpush.bf16.xpose.msrb.mxu0 %v4336_v7 }
0x20ef   : > { %v6470_v5 = vpop.eup %6469 }
0x20f0   : > { %v4316_v22 = vmul.f32 %v6470_v5, %v6454_v48  ;;  %v4284_v26 = vpop.xlane.xlu2 %4283  ;;  %v3976_v48 = vpop.f32.mrf.mxu1 }
0x20f1   : > { %6471 = vrcp.f32 %v4284_v26  ;;  %v3977_v6 = vadd.f32 %v3976_v48, %v7547_v34 }
0x20f2   : > { %v4323_v4 = vpack.c.bf16 %v4317_v29, %v4316_v22 }
0x20f3   : > { %v4173_v8 = vpack.c.bf16 %v3977_v6, %v3977_v6 }
0x20f4   : > { %v4333_v1 = vsel %vm492_vm6, %v4323_v4, 0 }
0x20f5   : > { %4347 = vmatpush.bf16.xpose.msrb.mxu0 %v4333_v1 }
0x20f7   : > { %v6472_v57 = vpop.eup %6471 }
0x20f8   : > { %v4287_v40 = vpop.xlane.xlu1 %4286  ;;  %v4314_v23 = vmul.f32 %v6472_v57, %v6456_v20  ;;  %v8402_v15 = vpop.f32.mrf.mxu1 }
0x20f9   : > { %6473 = vrcp.f32 %v4287_v40 }
0x20ff   : > { %v6474_v47 = vpop.eup %6473 }
0x2100   : > { %v4315_v21 = vmul.f32 %v6474_v47, %v6458_v43  ;;  %v8404_v54 = vpop.f32.mrf.mxu1 }
0x2102   : > { %v4322_v41 = vpack.c.bf16 %v4315_v21, %v4314_v23 }
0x2104   : > { %v4330_v53 = vsel %vm492_vm6, %v4322_v41, 0 }
0x2105   : > { %4348 = vmatpush.bf16.xpose.msrb.mxu0 %v4330_v53 }
0x210c   : > { %5808 = vmatmul.msk.bf16.vlgmr.msrb.gmra.mxu0 %vm492_vm6, %v4173_v8 }
0x210d   : > { %4578 = vmatpush.bf16.msra.mxu0 %v4569_v33 }
0x2147   : > { %v5976_v52 = vpop.trf.xlu2 }
0x2148   : > { %5809 = vmatmul.msk.bf16.vlgmr.msrb.gmra.mxu1 %vm423_vm1, %v5976_v52 }
0x214f   : > { %v5977_v0 = vpop.trf.xlu2 }
0x2150   : > { %5814 = vmatmul.msk.bf16.vlgmr.msra.gmra.mxu0 %vm423_vm1, %v5977_v0 }
0x2157   : > { %v5978_v35 = vpop.trf.xlu2 }
0x2158   : > { %5810 = vmatmul.msk.bf16.gmra.mxu1 %vm423_vm1, %v5978_v35 }
0x215f   : > { %v5979_v20 = vpop.trf.xlu2 }
0x2160   : > { %5815 = vmatmul.msk.bf16.gmra.mxu0 %vm423_vm1, %v5979_v20 }
0x2167   : > { %v5980_v43 = vpop.trf.xlu2 }
0x2168   : > { %5811 = vmatmul.msk.bf16.gmra.mxu1 %vm423_vm1, %v5980_v43 }
0x216f   : > { %v5981_v34 = vpop.trf.xlu2 }
0x2170   : > { %5816 = vmatmul.msk.bf16.gmra.mxu0 %vm423_vm1, %v5981_v34 }
0x2177   : > { %v5982_v58 = vpop.trf.xlu2 }
0x2178   : > { %5812 = vmatmul.msk.bf16.gmra.mxu1 %vm423_vm1, %v5982_v58 }
0x217f   : > { %v5983_v18 = vpop.trf.xlu2 }
0x2180   : > { %5817 = vmatmul.msk.bf16.gmra.mxu0 %vm423_vm1, %v5983_v18 }
0x2189   : > { %v8400_v59 = vpop.f32.mrf.mxu0 }
0x2191   : > { %v4352_v17 = vpop.f32.mrf.mxu0 }
0x21c5   : > { %v8406_v51 = vpop.f32.mrf.mxu1 }
0x21c6   : > { %v4417_v53 = vsel %vm492_vm6, %v8406_v51, -inf }
0x21cd   : > { %v8408_v9 = vpop.f32.mrf.mxu1  ;;  %v8410_v12 = vpop.f32.mrf.mxu0 }
0x21ce   : > { %v4420_v16 = vsel %vm492_vm6, %v8408_v9, -inf  ;;  %v4600_v33 = vsel %vm492_vm6, %v8410_v12, -inf }
0x21cf   : > { %4421 = vmax.xlane.f32.xlu0 %v4420_v16 }
0x21d5   : > { %v8414_v27 = vpop.f32.mrf.mxu1  ;;  %v8416_v36 = vpop.f32.mrf.mxu0 }
0x21d6   : > { %v4603_v13 = vsel %vm492_vm6, %v8416_v36, -inf  ;;  %v4423_v22 = vsel %vm492_vm6, %v8414_v27, -inf }
0x21d7   : > { %4604 = vmax.xlane.f32.xlu0 %v4603_v13 }
0x21dd   : > { %v8420_v46 = vpop.f32.mrf.mxu1  ;;  %v8428_v29 = vpop.f32.mrf.mxu0 }
0x21de   : > { %v4426_v4 = vsel %vm492_vm6, %v8420_v46, -inf  ;;  %v4606_v1 = vsel %vm492_vm6, %v8428_v29, -inf }
0x21e5   : > { %v4407_v61 = vpop.f32.mrf.mxu1  ;;  %v8432_v26 = vpop.f32.mrf.mxu0 }
0x21e6   : > { %v4429_v5 = vsel %vm492_vm6, %v4407_v61, -inf  ;;  %v4609_v40 = vsel %vm492_vm6, %v8432_v26, -inf }
0x21ed   : > { %v4409_v32 = vpop.f32.mrf.mxu1  ;;  %v8438_v57 = vpop.f32.mrf.mxu0 }
0x21ee   : > { %v4432_v3 = vsel %vm492_vm6, %v4409_v32, -inf  ;;  %v4612_v10 = vsel %vm492_vm6, %v8438_v57, -inf }
0x21ef   : > { %4433 = vmax.xlane.f32.xlu2 %v4432_v3 }
0x21f5   : > { %v4412_v28 = vpop.f32.mrf.mxu1  ;;  %v8442_v47 = vpop.f32.mrf.mxu0 }
0x21f6   : > { %v4435_v60 = vsel %vm492_vm6, %v4412_v28, -inf  ;;  %v4615_v23 = vsel %vm492_vm6, %v8442_v47, -inf }
0x21f7   : > { %4436 = vmax.xlane.f32.xlu1 %v4435_v60 }
0x21fd   : > { %v4414_v7 = vpop.f32.mrf.mxu1  ;;  %v8446_v21 = vpop.f32.mrf.mxu0 }
0x21fe   : > { %v4438_v39 = vsel %vm492_vm6, %v4414_v7, -inf  ;;  %v4618_v14 = vsel %vm492_vm6, %v8446_v21, -inf }
0x21ff   : > { %4439 = vmax.xlane.f32.xlu1 %v4438_v39 }
0x2205   : > { %v8450_v41 = vpop.f32.mrf.mxu0 }
0x2206   : > { %v4621_v48 = vsel %vm492_vm6, %v8450_v41, -inf }
0x2207   : > { %4430 = vmax.xlane.f32.xlu1 %v4429_v5 }
0x220f   : > { %4424 = vmax.xlane.f32.xlu1 %v4423_v22 }
0x2217   : > { %4427 = vmax.xlane.f32.xlu1 %v4426_v4 }
0x221f   : > { %4607 = vmax.xlane.f32.xlu1 %v4606_v1 }
0x2227   : > { %4610 = vmax.xlane.f32.xlu1 %v4609_v40 }
0x222f   : > { %4613 = vmax.xlane.f32.xlu1 %v4612_v10 }
0x2237   : > { %4616 = vmax.xlane.f32.xlu1 %v4615_v23 }
0x223f   : > { %4619 = vmax.xlane.f32.xlu1 %v4618_v14 }
0x2247   : > { %4622 = vmax.xlane.f32.xlu1 %v4621_v48 }
0x224f   : > { %4418 = vmax.xlane.f32.xlu1 %v4417_v53 }
0x2257   : > { %4601 = vmax.xlane.f32.xlu1 %v4600_v33 }
0x2262   : > { %v4434_v0 = vpop.xlane.xlu2 %4433 }
0x2263   : > { %v4446_v34 = vsub.f32 %v4409_v32, %v4434_v0 }
0x2265   : > { %v4459_v17 = vmul.f32 1.442695, %v4446_v34 }
0x226a   : > { %v4437_v6 = vpop.xlane.xlu1 %4436 }
0x226b   : > { %v4447_v8 = vsub.f32 %v4412_v28, %v4437_v6 }
0x226d   : > { %v4461_v52 = vmul.f32 1.442695, %v4447_v8 }
0x226f   : > { %6475 = vpow2.f32 %v4461_v52 }
0x2272   : > { %v4440_v35 = vpop.xlane.xlu1 %4439 }
0x2273   : > { %v4448_v20 = vsub.f32 %v4414_v7, %v4440_v35 }
0x2275   : > { %v8458_v43 = vpop.eup %6475  ;;  %v4463_v58 = vmul.f32 1.442695, %v4448_v20 }
0x2276   : > { %v4483_v18 = vsel %vm492_vm6, %v8458_v43, 0.0 }
0x2277   : > { %6477 = vpow2.f32 %v4463_v58  ;;  %4484 = vadd.xlane.f32.xlu1 %v4483_v18 }
0x2278   : > { %6479 = vpow2.f32 %v4459_v17 }
0x227a   : > { %v4431_v16 = vpop.xlane.xlu1 %4430 }
0x227b   : > { %v4445_v13 = vsub.f32 %v4407_v61, %v4431_v16 }
0x227d   : > { %v8462_v3 = vpop.eup %6477  ;;  %v4457_v28 = vmul.f32 1.442695, %v4445_v13 }
0x227e   : > { %v4486_v60 = vsel %vm492_vm6, %v8462_v3, 0.0  ;;  %v8466_v32 = vpop.eup %6479 }
0x227f   : > { %6481 = vpow2.f32 %v4457_v28  ;;  %4487 = vadd.xlane.f32.xlu0 %v4486_v60  ;;  %v4480_v4 = vsel %vm492_vm6, %v8466_v32, 0.0 }
0x2282   : > { %v4425_v7 = vpop.xlane.xlu1 %4424 }
0x2283   : > { %v4443_v39 = vsub.f32 %v8414_v27, %v4425_v7 }
0x2285   : > { %v8469_v5 = vpop.eup %6481  ;;  %v4453_v22 = vmul.f32 1.442695, %v4443_v39 }
0x2286   : > { %v4477_v61 = vsel %vm492_vm6, %v8469_v5, 0.0 }
0x2287   : > { %6483 = vpow2.f32 %v4453_v22  ;;  %4478 = vadd.xlane.f32.xlu1 %v4477_v61  ;;  %4481 = vadd.xlane.f32.xlu0 %v4480_v4 }
0x228a   : > { %v4428_v1 = vpop.xlane.xlu1 %4427 }
0x228b   : > { %v4444_v40 = vsub.f32 %v8420_v46, %v4428_v1 }
0x228d   : > { %v8476_v10 = vpop.eup %6483  ;;  %v4455_v23 = vmul.f32 1.442695, %v4444_v40 }
0x228e   : > { %v4471_v27 = vsel %vm492_vm6, %v8476_v10, 0.0 }
0x228f   : > { %6485 = vpow2.f32 %v4455_v23  ;;  %4472 = vadd.xlane.f32.xlu1 %v4471_v27 }
0x2292   : > { %v4608_v14 = vpop.xlane.xlu1 %4607 }
0x2295   : > { %v8480_v48 = vpop.eup %6485 }
0x2296   : > { %v4474_v53 = vsel %vm492_vm6, %v8480_v48, 0.0 }
0x2297   : > { %4475 = vadd.xlane.f32.xlu0 %v4474_v53 }
0x229a   : > { %v4611_v33 = vpop.xlane.xlu1 %4610 }
0x229b   : > { %v4627_v39 = vsub.f32 %v8432_v26, %v4611_v33 }
0x229d   : > { %v4638_v61 = vmul.f32 1.442695, %v4627_v39 }
0x22a2   : > { %v4614_v6 = vpop.xlane.xlu1 %4613 }
0x22a3   : > { %v4628_v8 = vsub.f32 %v8438_v57, %v4614_v6  ;;  %v4626_v57 = vsub.f32 %v8428_v29, %v4608_v14  ;;  %v4422_v29 = vpop.xlane.xlu0 %4421 }
0x22a5   : > { %v4640_v46 = vmul.f32 1.442695, %v4628_v8 }
0x22a7   : > { %6487 = vpow2.f32 %v4640_v46 }
0x22aa   : > { %v4617_v52 = vpop.xlane.xlu1 %4616 }
0x22ab   : > { %v4629_v0 = vsub.f32 %v8442_v47, %v4617_v52  ;;  %v4636_v47 = vmul.f32 1.442695, %v4626_v57  ;;  %v4605_v33 = vpop.xlane.xlu0 %4604 }
0x22ad   : > { %v8486_v35 = vpop.eup %6487  ;;  %v4642_v20 = vmul.f32 1.442695, %v4629_v0 }
0x22ae   : > { %v4660_v34 = vsel %vm492_vm6, %v8486_v35, 0.0 }
0x22af   : > { %6489 = vpow2.f32 %v4642_v20  ;;  %4661 = vadd.xlane.f32.xlu1 %v4660_v34 }
0x22b2   : > { %v4620_v58 = vpop.xlane.xlu1 %4619 }
0x22b3   : > { %v4630_v18 = vsub.f32 %v8446_v21, %v4620_v58 }
0x22b5   : > { %v8491_v17 = vpop.eup %6489  ;;  %v4644_v16 = vmul.f32 1.442695, %v4630_v18 }
0x22b6   : > { %v4663_v13 = vsel %vm492_vm6, %v8491_v17, 0.0 }
0x22b7   : > { %6491 = vpow2.f32 %v4644_v16  ;;  %4664 = vadd.xlane.f32.xlu0 %v4663_v13 }
0x22b8   : > { %6493 = vpow2.f32 %v4636_v47 }
0x22ba   : > { %v4623_v28 = vpop.xlane.xlu1 %4622 }
0x22bb   : > { %v4631_v60 = vsub.f32 %v8450_v41, %v4623_v28  ;;  %v4442_v41 = vsub.f32 %v8408_v9, %v4422_v29  ;;  %v4625_v9 = vsub.f32 %v8416_v36, %v4605_v33 }
0x22bd   : > { %v8497_v7 = vpop.eup %6491  ;;  %v4646_v21 = vmul.f32 1.442695, %v4631_v60  ;;  %v4451_v53 = vmul.f32 1.442695, %v4442_v41  ;;  %v4634_v34 = vmul.f32 1.442695, %v4625_v9 }
0x22be   : > { %v4666_v22 = vsel %vm492_vm6, %v8497_v7, 0.0  ;;  %v8502_v1 = vpop.eup %6493 }
0x22bf   : > { %6495 = vpow2.f32 %v4646_v21  ;;  %4667 = vadd.xlane.f32.xlu1 %v4666_v22  ;;  %v4654_v26 = vsel %vm492_vm6, %v8502_v1, 0.0 }
0x22c0   : > { %6497 = vpow2.f32 %v4638_v61 }
0x22c2   : > { %v4419_v4 = vpop.xlane.xlu1 %4418 }
0x22c3   : > { %v4441_v40 = vsub.f32 %v8406_v51, %v4419_v4 }
0x22c5   : > { %v8505_v23 = vpop.eup %6495  ;;  %v4449_v27 = vmul.f32 1.442695, %v4441_v40 }
0x22c6   : > { %v4669_v14 = vsel %vm492_vm6, %v8505_v23, 0.0  ;;  %v8512_v8 = vpop.eup %6497 }
0x22c7   : > { %6499 = vpow2.f32 %v4449_v27  ;;  %4655 = vadd.xlane.f32.xlu1 %v4654_v26  ;;  %4670 = vadd.xlane.f32.xlu0 %v4669_v14  ;;  %v4657_v20 = vsel %vm492_vm6, %v8512_v8, 0.0 }
0x22c8   : > { %6501 = vpow2.f32 %v4451_v53 }
0x22ca   : > { %v4602_v6 = vpop.xlane.xlu1 %4601 }
0x22cb   : > { %v4624_v51 = vsub.f32 %v8410_v12, %v4602_v6 }
0x22cd   : > { %v8515_v46 = vpop.eup %6499  ;;  %v4632_v52 = vmul.f32 1.442695, %v4624_v51 }
0x22ce   : > { %v4465_v0 = vsel %vm492_vm6, %v8515_v46, 0.0  ;;  %v8522_v58 = vpop.eup %6501 }
0x22cf   : > { %6503 = vpow2.f32 %v4632_v52  ;;  %4466 = vadd.xlane.f32.xlu1 %v4465_v0  ;;  %4658 = vadd.xlane.f32.xlu0 %v4657_v20  ;;  %v4468_v36 = vsel %vm492_vm6, %v8522_v58, 0.0 }
0x22d0   : > { %6505 = vpow2.f32 %v4634_v34 }
0x22d5   : > { %v8524_v18 = vpop.eup %6503 }
0x22d6   : > { %v4648_v12 = vsel %vm492_vm6, %v8524_v18, 0.0  ;;  %v8530_v57 = vpop.eup %6505 }
0x22d7   : > { %4649 = vadd.xlane.f32.xlu1 %v4648_v12  ;;  %4469 = vadd.xlane.f32.xlu0 %v4468_v36  ;;  %v4651_v16 = vsel %vm492_vm6, %v8530_v57, 0.0 }
0x22df   : > { %4652 = vadd.xlane.f32.xlu0 %v4651_v16 }
0x22ea   : > { %v4485_v13 = vpop.xlane.xlu1 %4484 }
0x22eb   : > { %6507 = vrcp.f32 %v4485_v13 }
0x22f1   : > { %v6508_v28 = vpop.eup %6507 }
0x22f2   : > { %v4488_v47 = vpop.xlane.xlu0 %4487  ;;  %v4503_v22 = vmul.f32 %v6508_v28, %v8458_v43 }
0x22f3   : > { %6509 = vrcp.f32 %v4488_v47 }
0x22f9   : > { %v6510_v60 = vpop.eup %6509 }
0x22fa   : > { %v4479_v39 = vpop.xlane.xlu1 %4478  ;;  %v4482_v21 = vpop.xlane.xlu0 %4481  ;;  %v4504_v29 = vmul.f32 %v6510_v60, %v8462_v3 }
0x22fb   : > { %6511 = vrcp.f32 %v4479_v39 }
0x22fc   : > { %6513 = vrcp.f32 %v4482_v21  ;;  %v4508_v61 = vpack.c.bf16 %v4504_v29, %v4503_v22 }
0x22fe   : > { %v4522_v4 = vsel %vm492_vm6, %v4508_v61, 0 }
0x22ff   : > { %4528 = vmatpush.bf16.xpose.msrb.mxu3 %v4522_v4 }
0x2301   : > { %v6512_v40 = vpop.eup %6511 }
0x2302   : > { %v6514_v41 = vpop.eup %6513  ;;  %v4501_v27 = vmul.f32 %v6512_v40, %v8469_v5  ;;  %v4473_v53 = vpop.xlane.xlu1 %4472 }
0x2303   : > { %v4502_v26 = vmul.f32 %v6514_v41, %v8466_v32  ;;  %6515 = vrcp.f32 %v4473_v53 }
0x2305   : > { %v4507_v14 = vpack.c.bf16 %v4502_v26, %v4501_v27 }
0x2307   : > { %v4519_v33 = vsel %vm492_vm6, %v4507_v14, 0 }
0x2308   : > { %4529 = vmatpush.bf16.xpose.msrb.mxu3 %v4519_v33 }
0x2309   : > { %v6516_v3 = vpop.eup %6515 }
0x230a   : > { %v4476_v43 = vpop.xlane.xlu0 %4475  ;;  %v4499_v51 = vmul.f32 %v6516_v3, %v8476_v10 }
0x230b   : > { %6517 = vrcp.f32 %v4476_v43 }
0x2311   : > { %v6518_v6 = vpop.eup %6517 }
0x2312   : > { %v4500_v9 = vmul.f32 %v6518_v6, %v8480_v48 }
0x2314   : > { %v4506_v52 = vpack.c.bf16 %v4500_v9, %v4499_v51 }
0x2316   : > { %v4516_v0 = vsel %vm492_vm6, %v4506_v52, 0 }
0x2317   : > { %4530 = vmatpush.bf16.xpose.msrb.mxu3 %v4516_v0 }
0x2322   : > { %v4662_v5 = vpop.xlane.xlu1 %4661 }
0x232a   : > { %v4665_v32 = vpop.xlane.xlu0 %4664 }
0x2332   : > { %v4668_v20 = vpop.xlane.xlu1 %4667 }
0x2333   : > { %6519 = vrcp.f32 %v4668_v20 }
0x2339   : > { %v6520_v36 = vpop.eup %6519 }
0x233a   : > { %v4656_v34 = vpop.xlane.xlu1 %4655  ;;  %v4671_v12 = vpop.xlane.xlu0 %4670  ;;  %v4686_v10 = vmul.f32 %v6520_v36, %v8497_v7 }
0x233b   : > { %6521 = vrcp.f32 %v4671_v12 }
0x233c   : > { %6523 = vrcp.f32 %v4665_v32  ;;  %v3982_v32 = vadd.f32 %v8404_v54, %v7769_v30 }
0x233d   : > { %6525 = vrcp.f32 %v4662_v5 }
0x233e   : > { %v4539_v20 = vpack.c.bf16 %v3982_v32, %v3982_v32 }
0x2341   : > { %v6522_v16 = vpop.eup %6521 }
0x2342   : > { %v4659_v13 = vpop.xlane.xlu0 %4658  ;;  %v4687_v48 = vmul.f32 %v6522_v16, %v8505_v23  ;;  %v6524_v47 = vpop.eup %6523 }
0x2343   : > { %v4467_v28 = vpop.xlane.xlu1 %4466  ;;  %v6526_v39 = vpop.eup %6525  ;;  %6527 = vrcp.f32 %v4659_v13  ;;  %v4685_v22 = vmul.f32 %v6524_v47, %v8491_v17 }
0x2344   : > { %v4691_v60 = vpack.c.bf16 %v4687_v48, %v4686_v10  ;;  %6529 = vrcp.f32 %v4656_v34  ;;  %v4684_v29 = vmul.f32 %v6526_v39, %v8486_v35  ;;  %v6587_v34 = vld [vmem:[%s8806_s5 + $0x70] sm:$0xff] }
0x2345   : > { %6531 = vrcp.f32 %v4467_v28 }
0x2346   : > { %v4705_v21 = vsel %vm492_vm6, %v4691_v60, 0  ;;  %v4690_v4 = vpack.c.bf16 %v4685_v22, %v4684_v29 }
0x2347   : > { %4711 = vmatpush.bf16.xpose.msra.mxu2 %v4705_v21 }
0x2348   : > { %v4702_v41 = vsel %vm492_vm6, %v4690_v4, 0 }
0x2349   : > { %v6528_v40 = vpop.eup %6527 }
0x234a   : > { %v4470_v61 = vpop.xlane.xlu0 %4469  ;;  %v6530_v7 = vpop.eup %6529  ;;  %v4683_v27 = vmul.f32 %v6528_v40, %v8512_v8  ;;  %v6589_v40 = vld [vmem:[%s8806_s5 + $0x90] sm:$0xff] }
0x234b   : > { %6533 = vrcp.f32 %v4470_v61  ;;  %v4650_v23 = vpop.xlane.xlu1 %4649  ;;  %v6532_v26 = vpop.eup %6531  ;;  %v4682_v17 = vmul.f32 %v6530_v7, %v8502_v1  ;;  %v3980_v1 = vadd.f32 %v8402_v15, %v7755_v24  ;;  %v6585_v24 = vld [vmem:[%s8806_s5 + $0x80] sm:$0xff]  ;;  %v6586_v15 = vld [vmem:[%s8806_s5 + $0x88] sm:$0xff] }
0x234c   : > { %6535 = vrcp.f32 %v4650_v23  ;;  %v4497_v35 = vmul.f32 %v6532_v26, %v8515_v46 }
0x234d   : > { %v4689_v43 = vpack.c.bf16 %v4683_v27, %v4682_v17  ;;  %v4356_v5 = vpack.c.bf16 %v3980_v1, %v3980_v1 }
0x234f   : > { %4712 = vmatpush.bf16.xpose.msra.mxu2 %v4702_v41  ;;  %v4699_v9 = vsel %vm492_vm6, %v4689_v43, 0 }
0x2351   : > { %v6534_v14 = vpop.eup %6533 }
0x2352   : > { %v4653_v53 = vpop.xlane.xlu0 %4652  ;;  %v4498_v33 = vmul.f32 %v6534_v14, %v8522_v58  ;;  %v6536_v6 = vpop.eup %6535 }
0x2353   : > { %6537 = vrcp.f32 %v4653_v53  ;;  %v4680_v52 = vmul.f32 %v6536_v6, %v8524_v18 }
0x2354   : > { %v4505_v3 = vpack.c.bf16 %v4498_v33, %v4497_v35 }
0x2356   : > { %v4513_v51 = vsel %vm492_vm6, %v4505_v3, 0 }
0x2357   : > { %4531 = vmatpush.bf16.xpose.msrb.mxu3 %v4513_v51  ;;  %4713 = vmatpush.bf16.xpose.msra.mxu2 %v4699_v9 }
0x2359   : > { %v6538_v8 = vpop.eup %6537 }
0x235a   : > { %v4681_v0 = vmul.f32 %v6538_v8, %v8530_v57 }
0x235c   : > { %v4688_v46 = vpack.c.bf16 %v4681_v0, %v4680_v52 }
0x235e   : > { %v4696_v58 = vsel %vm492_vm6, %v4688_v46, 0  ;;  %5813 = vmatmul.msk.bf16.vlgmr.msrb.gmra.mxu3 %vm492_vm6, %v4356_v5 }
0x235f   : > { %4714 = vmatpush.bf16.xpose.msra.mxu2 %v4696_v58 }
0x2366   : > { %5818 = vmatmul.msk.bf16.vlgmr.msra.gmra.mxu2 %vm492_vm6, %v4539_v20 }
0x2367   : > { %4747 = vmatpush.bf16.msrb.mxu2 %v8236_v49 }
0x236b   : > { %4748 = vmatpush.bf16.msrb.mxu2 %v8247_v45  ;;  %v4720_v45 = vpack.c.bf16 %v8400_v59, %v8349_v11  ;;  %v6588_v11 = vld [vmem:[%s8806_s5 + $0x78] sm:$0xff] }
0x2376   : > { %5821 = vmatmul.msk.bf16.vlgmr.msrb.gmra.mxu2 %vm743_vm5, %v6585_v24 }
0x2386   : > { %5822 = vmatmul.msk.bf16.gmra.mxu2 %vm743_vm5, %v6586_v15 }
0x23e1   : > { %v4533_v30 = vpop.f32.mrf.mxu3 }
0x23e9   : > { %v4535_v54 = vpop.f32.mrf.mxu3  ;;  %v4716_v49 = vpop.f32.mrf.mxu2 }
0x23ea   : > { %v4721_v18 = vpack.c.bf16 %v4716_v49, %v4533_v30 }
0x23ec   : > { %4728 = vmatpush.bf16.msra.mxu3 %v4721_v18 }
0x23f0   : > { %4729 = vmatpush.bf16.msra.mxu3 %v4720_v45 }
0x23f1   : > { %v4718_v57 = vpop.f32.mrf.mxu2 }
0x23f3   : > { %5819 = vmatmul.msk.bf16.vlgmr.msra.gmra.mxu3 %vm743_vm5, %v6587_v34 }
0x23f9   : > { %v4750_v12 = vpop.f32.mrf.mxu2 }
0x23fa   : > { %v4751_v36 = vadd.f32 %v4750_v12, %v7855_v38 }
0x23fc   : > { %v4791_v16 = vmul.f32 0.35355338, %v4751_v36 }
0x23fe   : > { %v4795_v13 = vpack.c.bf16 %v4791_v16, %v4791_v16 }
0x2400   : > { %4798 = vxpose.xlu1.c.b16.start.end [1/1] (short) (narrow) %v4795_v13, 16 }
0x2401   : > { %v4752_v10 = vpop.f32.mrf.mxu2 }
0x2402   : > { %v4753_v48 = vadd.f32 %v4752_v10, %v7799_v55 }
0x2403   : > { %5820 = vmatmul.msk.bf16.gmra.mxu3 %vm743_vm5, %v6588_v11 }
0x2404   : > { %v4792_v59 = vmul.f32 0.35355338, %v4753_v48  ;;  %v8843_v48 = vld [vmem:[#allocation8_spill] sm:$0xff] }
0x2406   : > { %v4876_v47 = vpack.c.bf16 %v4792_v59, %v4792_v59 }
0x2408   : > { %4879 = vxpose.xlu0.c.b16.start.end [1/1] (short) (narrow) %v4876_v47, 16 }
0x2409   : > { %v4755_v16 = vpop.f32.mrf.mxu2 }
0x240a   : > { %v4756_v10 = vadd.f32 %v4755_v16, %v7951_v50  ;;  %v5915_v16 = vld [vmem:[%s8806_s5 + $0xc0] sm:$0xff] }
0x240c   : > { %v4793_v59 = vmul.f32 0.35355338, %v4756_v10 }
0x2411   : > { %v4757_v13 = vpop.f32.mrf.mxu2 }
0x2412   : > { %v4758_v11 = vadd.f32 %v4757_v13, %v8843_v48  ;;  %v5916_v13 = vld [vmem:[%s8806_s5 + $0xc8] sm:$0xff] }
0x2414   : > { %v4794_v47 = vmul.f32 0.35355338, %v4758_v11 }
0x2476   : > { %v4731_v28 = vpop.f32.mrf.mxu3 }
0x2477   : > { %v4732_v61 = vadd.f32 %v4731_v28, %v7792_v44  ;;  %v6591_v44 = vld [vmem:[%s8806_s5 + $0xa0] sm:$0xff]  ;;  %v4957_v28 = vpack.c.bf16 %v4793_v59, %v4793_v59  ;;  %v5917_v59 = vld [vmem:[%s8806_s5 + $0xd0] sm:$0xff] }
0x247e   : > { %v4733_v60 = vpop.f32.mrf.mxu3 }
0x247f   : > { %v4734_v29 = vadd.f32 %v4733_v60, %v7816_v63  ;;  %v5038_v60 = vpack.c.bf16 %v4794_v47, %v4794_v47 }
0x2481   : > { %v8593_v4 = vpack.c.bf16 %v4734_v29, %v4732_v61  ;;  %v8844_v61 = vld [vmem:[#allocation12_spill] sm:$0xff] }
0x2486   : > { %v4736_v39 = vpop.f32.mrf.mxu3 }
0x2487   : > { %v4737_v38 = vadd.f32 %v4736_v39, %v7806_v19  ;;  %v6590_v19 = vld [vmem:[%s8806_s5 + $0x98] sm:$0xff] }
0x248e   : > { %v4738_v21 = vpop.f32.mrf.mxu3 }
0x248f   : > { %v4739_v22 = vadd.f32 %v4738_v21, %v7808_v62  ;;  %v6592_v62 = vld [vmem:[%s8806_s5 + $0xa8] sm:$0xff] }
0x2491   : > { %v8589_v55 = vpack.c.bf16 %v4739_v22, %v4737_v38 }
0x2493   : > { %4768 = vmatpush.bf16.msra.mxu1 %v8589_v55 }
0x2497   : > { %4769 = vmatpush.bf16.msra.mxu1 %v8593_v4 }
0x249a   : > { %5823 = vmatmul.msk.bf16.vlgmr.msra.gmra.mxu1 %vm743_vm5, %v6589_v40 }
0x24aa   : > { %5824 = vmatmul.msk.bf16.gmra.mxu1 %vm743_vm5, %v6590_v19 }
0x24ac   : > { %v4806_v27 = vpop.trf.xlu1 }
0x24b4   : > { %v4887_v35 = vpop.trf.xlu0 }
0x24ba   : > { %5825 = vmatmul.msk.bf16.gmra.mxu1 %vm743_vm5, %v6591_v44 }
0x24ca   : > { %5826 = vmatmul.msk.bf16.gmra.mxu1 %vm743_vm5, %v6592_v62 }
0x2517   : > { %v4771_v63 = vpop.f32.mrf.mxu1 }
0x2518   : > { %v4772_v7 = vadd.f32 %v4771_v63, %v7858_v25 }
0x251a   : > { %v4796_v23 = vpack.c.bf16 %v4772_v7, %v4772_v7 }
0x251c   : > { %v4818_v41 = vsel %vm430_vm0, %v4796_v23, 0 }
0x251d   : > { %4827 = vmatpush.bf16.msrb.mxu3 %v4818_v41 }
0x251f   : > { %v4773_v26 = vpop.f32.mrf.mxu1 }
0x2520   : > { %v4774_v17 = vadd.f32 %v4773_v26, %v7836_v37  ;;  %5827 = vmatmul.msk.bf16.vlgmr.msrb.gmra.mxu3 %vm423_vm1, %v4806_v27  ;;  %v8845_v26 = vld [vmem:[#allocation11_spill] sm:$0xff] }
0x2522   : > { %v4877_v14 = vpack.c.bf16 %v4774_v17, %v4774_v17 }
0x2524   : > { %v4899_v53 = vsel %vm430_vm0, %v4877_v14, 0 }
0x2525   : > { %4908 = vmatpush.bf16.msra.mxu3 %v4899_v53 }
0x2527   : > { %v4776_v39 = vpop.f32.mrf.mxu1 }
0x2528   : > { %v4777_v40 = vadd.f32 %v4776_v39, %v8844_v61  ;;  %v5918_v61 = vld [vmem:[%s8806_s5 + $0xd8] sm:$0xff] }
0x252a   : > { %v4958_v63 = vpack.c.bf16 %v4777_v40, %v4777_v40 }
0x252c   : > { %v4980_v27 = vsel %vm430_vm0, %v4958_v63, 0 }
0x252f   : > { %v4778_v22 = vpop.f32.mrf.mxu1 }
0x2530   : > { %5829 = vmatmul.msk.bf16.vlgmr.msra.gmra.mxu3 %vm423_vm1, %v4887_v35 }
0x2537   : > { %v4781_v23 = vpop.f32.mrf.mxu1 }
0x2538   : > { %v4782_v17 = vadd.f32 %v4781_v23, %v8845_v26  ;;  %v5151_v26 = vld [vmem:[%s8808_s7 + $0x1d0] sm:$0xff] }
0x253a   : > { %v4797_v53 = vpack.c.bf16 %v4782_v17, %v4782_v17  ;;  %v5150_v17 = vld [vmem:[%s8808_s7 + $0x1c8] sm:$0xff] }
0x25a3   : > { %v4829_v33 = vpop.f32.mrf.mxu3 }
0x25a4   : > { %v4834_v25 = vsel %vm618_vm2, %v4829_v33, -inf }
0x25a5   : > { %4835 = vmax.xlane.f32.xlu2 %v4834_v25 }
0x25ab   : > { %v4831_v43 = vpop.f32.mrf.mxu3 }
0x25ac   : > { %v4837_v3 = vsel %vm618_vm2, %v4831_v43, -inf }
0x25ad   : > { %4838 = vmax.xlane.f32.xlu2 %v4837_v3 }
0x25b3   : > { %v4910_v6 = vpop.f32.mrf.mxu3 }
0x25b4   : > { %v4915_v37 = vsel %vm618_vm2, %v4910_v6, -inf }
0x25b5   : > { %4916 = vmax.xlane.f32.xlu0 %v4915_v37 }
0x25bb   : > { %v4912_v51 = vpop.f32.mrf.mxu3 }
0x25bc   : > { %v4918_v9 = vsel %vm618_vm2, %v4912_v51, -inf }
0x25bd   : > { %4919 = vmax.xlane.f32.xlu2 %v4918_v9  ;;  %v4783_v9 = vpop.f32.mrf.mxu1 }
0x2618   : > { %v4836_v8 = vpop.xlane.xlu2 %4835 }
0x2619   : > { %v4840_v1 = vsub.f32 %v4829_v33, %v4836_v8  ;;  %v8846_v33 = vld [vmem:[#allocation10_spill] sm:$0xff] }
0x261a   : > { %v4779_v25 = vadd.f32 %v4778_v22, %v8846_v33  ;;  %v5155_v33 = vld [vmem:[%s8808_s7 + $0x1f0] sm:$0xff] }
0x261b   : > { %v4842_v52 = vmul.f32 1.442695, %v4840_v1 }
0x261c   : > { %v5039_v37 = vpack.c.bf16 %v4779_v25, %v4779_v25  ;;  %v5156_v25 = vld [vmem:[%s8808_s7 + $0x1f8] sm:$0xff] }
0x261d   : > { %6539 = vpow2.f32 %v4842_v52  ;;  %v8847_v52 = vld [vmem:[#allocation9_spill] sm:$0xff] }
0x261e   : > { %v5061_v1 = vsel %vm430_vm0, %v5039_v37, 0  ;;  %v5302_v37 = vld [vmem:[%s8808_s7 + $0x218] sm:$0xff] }
0x2620   : > { %v4839_v0 = vpop.xlane.xlu2 %4838 }
0x2621   : > { %v4841_v46 = vsub.f32 %v4831_v43, %v4839_v0  ;;  %v4784_v0 = vadd.f32 %v4783_v9, %v8847_v52  ;;  %v5304_v9 = vld [vmem:[%s8808_s7 + $0x228] sm:$0xff]  ;;  %v5413_v52 = vld [vmem:[%s8808_s7 + $0x250] sm:$0xff] }
0x2623   : > { %v6540_v5 = vpop.eup %6539  ;;  %v4844_v58 = vmul.f32 1.442695, %v4841_v46  ;;  %v4878_v46 = vpack.c.bf16 %v4784_v0, %v4784_v0 }
0x2624   : > { %v4846_v32 = vsel %vm618_vm2, %v6540_v5, 0.0 }
0x2625   : > { %6541 = vpow2.f32 %v4844_v58  ;;  %4847 = vadd.xlane.f32.xlu2 %v4846_v32 }
0x2628   : > { %v4917_v20 = vpop.xlane.xlu0 %4916 }
0x2629   : > { %v4921_v24 = vsub.f32 %v4910_v6, %v4917_v20 }
0x262b   : > { %v6542_v15 = vpop.eup %6541  ;;  %v4923_v30 = vmul.f32 1.442695, %v4921_v24 }
0x262c   : > { %v4849_v54 = vsel %vm618_vm2, %v6542_v15, 0.0 }
0x262d   : > { %6543 = vpow2.f32 %v4923_v30  ;;  %4850 = vadd.xlane.f32.xlu1 %v4849_v54 }
0x2630   : > { %v4920_v49 = vpop.xlane.xlu2 %4919 }
0x2631   : > { %v4922_v18 = vsub.f32 %v4912_v51, %v4920_v49 }
0x2633   : > { %v6544_v45 = vpop.eup %6543  ;;  %v4925_v57 = vmul.f32 1.442695, %v4922_v18 }
0x2634   : > { %v4927_v34 = vsel %vm618_vm2, %v6544_v45, 0.0 }
0x2635   : > { %6545 = vpow2.f32 %v4925_v57  ;;  %4928 = vadd.xlane.f32.xlu2 %v4927_v34 }
0x263b   : > { %v6546_v12 = vpop.eup %6545 }
0x263c   : > { %v4930_v36 = vsel %vm618_vm2, %v6546_v12, 0.0 }
0x263d   : > { %4931 = vadd.xlane.f32.xlu2 %v4930_v36  ;;  %v5306_v36 = vld [vmem:[%s8808_s7 + $0x238] sm:$0xff] }
0x2666   : > { %5984 = vxpose.binary.xlu2.c.b16.start.end [1/2] (short) (narrow) %v5038_v60, %v4957_v28, 16 }
0x2698   : > { %v4848_v21 = vpop.xlane.xlu2 %4847 }
0x2699   : > { %6547 = vrcp.f32 %v4848_v21 }
0x269f   : > { %v6548_v29 = vpop.eup %6547 }
0x26a0   : > { %v4851_v38 = vpop.xlane.xlu1 %4850  ;;  %v4854_v62 = vmul.f32 %v6548_v29, %v6540_v5 }
0x26a1   : > { %6549 = vrcp.f32 %v4851_v38 }
0x26a7   : > { %v6550_v19 = vpop.eup %6549 }
0x26a8   : > { %v4929_v44 = vpop.xlane.xlu2 %4928  ;;  %v4855_v50 = vmul.f32 %v6550_v19, %v6542_v15 }
0x26a9   : > { %6551 = vrcp.f32 %v4929_v44 }
0x26aa   : > { %v4856_v7 = vpack.c.bf16 %v4855_v50, %v4854_v62 }
0x26ac   : > { %v4861_v41 = vsel %vm618_vm2, %v4856_v7, 0 }
0x26ad   : > { %4870 = vmatpush.bf16.xpose.msrb.mxu0 %v4861_v41 }
0x26af   : > { %v6552_v35 = vpop.eup %6551 }
0x26b0   : > { %v4932_v14 = vpop.xlane.xlu2 %4931  ;;  %v4935_v3 = vmul.f32 %v6552_v35, %v6544_v45  ;;  %v5154_v35 = vld [vmem:[%s8808_s7 + $0x1e8] sm:$0xff] }
0x26b1   : > { %6553 = vrcp.f32 %v4932_v14  ;;  %v5152_v14 = vld [vmem:[%s8808_s7 + $0x1d8] sm:$0xff] }
0x26b4   : > { %5828 = vmatmul.msk.bf16.vlgmr.msrb.gmra.mxu0 %vm618_vm2, %v4797_v53  ;;  %v5153_v53 = vld [vmem:[%s8808_s7 + $0x1e0] sm:$0xff] }
0x26b5   : > { %4989 = vmatpush.bf16.msra.mxu0 %v4980_v27  ;;  %v5149_v27 = vld [vmem:[%s8808_s7 + $0x1c0] sm:$0xff] }
0x26b7   : > { %v6554_v43 = vpop.eup %6553 }
0x26b8   : > { %v4936_v6 = vmul.f32 %v6554_v43, %v6546_v12  ;;  %v5299_v12 = vld [vmem:[%s8808_s7 + $0x200] sm:$0xff] }
0x26b9   : > { %v5262_v43 = vld [vmem:[%s8808_s7 + $0x240] sm:$0xff] }
0x26ba   : > { %v4937_v51 = vpack.c.bf16 %v4936_v6, %v4935_v3  ;;  %v5300_v3 = vld [vmem:[%s8808_s7 + $0x208] sm:$0xff]  ;;  %v5301_v6 = vld [vmem:[%s8808_s7 + $0x210] sm:$0xff] }
0x26bc   : > { %v4942_v8 = vsel %vm618_vm2, %v4937_v51, 0  ;;  %v5303_v51 = vld [vmem:[%s8808_s7 + $0x220] sm:$0xff] }
0x26bd   : > { %4951 = vmatpush.bf16.xpose.msra.mxu2 %v4942_v8  ;;  %v5305_v8 = vld [vmem:[%s8808_s7 + $0x230] sm:$0xff] }
0x26c4   : > { %5830 = vmatmul.msk.bf16.vlgmr.msra.gmra.mxu2 %vm618_vm2, %v4878_v46 }
0x26c5   : > { %5070 = vmatpush.bf16.msrb.mxu2 %v5061_v1  ;;  %v5412_v1 = vld [vmem:[%s8808_s7 + $0x248] sm:$0xff] }
0x26c9   : > { %5235 = vmatpush.bf16.msra.mxu2 %v8589_v55 }
0x26cd   : > { %5236 = vmatpush.bf16.msra.mxu2 %v8593_v4 }
0x2707   : > { %v5985_v5 = vpop.trf.xlu2 }
0x2708   : > { %5831 = vmatmul.msk.bf16.vlgmr.msra.gmra.mxu0 %vm423_vm1, %v5985_v5 }
0x270f   : > { %v5986_v58 = vpop.trf.xlu2 }
0x2710   : > { %5833 = vmatmul.msk.bf16.vlgmr.msrb.gmra.mxu2 %vm423_vm1, %v5986_v58 }
0x2720   : > { %5853 = vmatmul.msk.bf16.vlgmr.msra.gmra.mxu2 %vm743_vm5, %v5915_v16 }
0x2730   : > { %5854 = vmatmul.msk.bf16.gmra.mxu2 %vm743_vm5, %v5916_v13 }
0x2731   : > { %v8642_v32 = vpop.f32.mrf.mxu0 }
0x2739   : > { %v4874_v20 = vpop.f32.mrf.mxu0 }
0x2740   : > { %5855 = vmatmul.msk.bf16.gmra.mxu2 %vm743_vm5, %v5917_v59 }
0x2747   : > { %v8644_v24 = vpop.f32.mrf.mxu2 }
0x2748   : > { %v5119_v15 = vpack.c.bf16 %v8644_v24, %v8642_v32 }
0x274f   : > { %v4955_v30 = vpop.f32.mrf.mxu2 }
0x2750   : > { %5856 = vmatmul.msk.bf16.gmra.mxu2 %vm743_vm5, %v5918_v61 }
0x2785   : > { %v4991_v54 = vpop.f32.mrf.mxu0 }
0x2786   : > { %v4996_v55 = vsel %vm618_vm2, %v4991_v54, -inf }
0x2787   : > { %4997 = vmax.xlane.f32.xlu2 %v4996_v55 }
0x278d   : > { %v4993_v4 = vpop.f32.mrf.mxu0 }
0x278e   : > { %v4999_v49 = vsel %vm618_vm2, %v4993_v4, -inf }
0x278f   : > { %5000 = vmax.xlane.f32.xlu1 %v4999_v49 }
0x2793   : > { %v5072_v18 = vpop.f32.mrf.mxu2 }
0x2794   : > { %v5077_v45 = vsel %vm618_vm2, %v5072_v18, -inf }
0x2795   : > { %5078 = vmax.xlane.f32.xlu0 %v5077_v45  ;;  %v4786_v45 = vpop.f32.mrf.mxu1 }
0x279b   : > { %v5074_v57 = vpop.f32.mrf.mxu2 }
0x279c   : > { %v5080_v34 = vsel %vm618_vm2, %v5074_v57, -inf }
0x279d   : > { %5081 = vmax.xlane.f32.xlu1 %v5080_v34  ;;  %v8848_v34 = vld [vmem:[#allocation2_spill] sm:$0xff] }
0x279f   : > { %5309 = vperm.xlu2 %5938, %v5299_v12   ;;  %v4787_v12 = vadd.f32 %v4786_v45, %v8848_v34 }
0x27a1   : > { %v4959_v13 = vpack.c.bf16 %v4787_v12, %v4787_v12 }
0x27a3   : > { %v5238_v0 = vpop.f32.mrf.mxu2 }
0x27a7   : > { %5344 = vperm.xlu2 %5938, %v5306_v36  }
0x27ab   : > { %v5240_v46 = vpop.f32.mrf.mxu2 }
0x27b3   : > { %v5243_v30 = vpop.f32.mrf.mxu2 }
0x27bb   : > { %v5245_v16 = vpop.f32.mrf.mxu2 }
0x27fa   : > { %v4998_v10 = vpop.xlane.xlu2 %4997 }
0x27fb   : > { %v5002_v48 = vsub.f32 %v4991_v54, %v4998_v10 }
0x27fd   : > { %v5004_v11 = vmul.f32 1.442695, %v5002_v48 }
0x27ff   : > { %6555 = vpow2.f32 %v5004_v11 }
0x2802   : > { %v5001_v47 = vpop.xlane.xlu1 %5000 }
0x2803   : > { %v5003_v28 = vsub.f32 %v4993_v4, %v5001_v47  ;;  %v4788_v47 = vpop.f32.mrf.mxu1 }
0x2805   : > { %v8670_v60 = vpop.eup %6555  ;;  %v5006_v39 = vmul.f32 1.442695, %v5003_v28 }
0x2806   : > { %v5008_v21 = vsel %vm618_vm2, %v8670_v60, 0.0 }
0x2807   : > { %6557 = vpow2.f32 %v5006_v39  ;;  %5009 = vadd.xlane.f32.xlu0 %v5008_v21  ;;  %v5248_v39 = vpop.f32.mrf.mxu2 }
0x2808   : > { %v5079_v38 = vpop.xlane.xlu0 %5078 }
0x2809   : > { %v5083_v22 = vsub.f32 %v5072_v18, %v5079_v38  ;;  %v8849_v38 = vld [vmem:[#allocation13_spill] sm:$0xff] }
0x280b   : > { %v5085_v29 = vmul.f32 1.442695, %v5083_v22  ;;  %v4789_v22 = vadd.f32 %v4788_v47, %v8849_v38 }
0x280d   : > { %v6558_v40 = vpop.eup %6557  ;;  %6559 = vpow2.f32 %v5085_v29  ;;  %v5040_v29 = vpack.c.bf16 %v4789_v22, %v4789_v22 }
0x280e   : > { %v5011_v19 = vsel %vm618_vm2, %v6558_v40, 0.0 }
0x280f   : > { %5012 = vadd.xlane.f32.xlu1 %v5011_v19 }
0x2810   : > { %v5082_v44 = vpop.xlane.xlu1 %5081 }
0x2811   : > { %v5084_v62 = vsub.f32 %v5074_v57, %v5082_v44 }
0x2813   : > { %v8679_v50 = vpop.eup %6559  ;;  %v5087_v63 = vmul.f32 1.442695, %v5084_v62 }
0x2814   : > { %v5089_v7 = vsel %vm618_vm2, %v8679_v50, 0.0 }
0x2815   : > { %6561 = vpow2.f32 %v5087_v63  ;;  %5090 = vadd.xlane.f32.xlu0 %v5089_v7 }
0x281b   : > { %v8683_v23 = vpop.eup %6561 }
0x281c   : > { %v5092_v41 = vsel %vm618_vm2, %v8683_v23, 0.0 }
0x281d   : > { %5093 = vadd.xlane.f32.xlu1 %v5092_v41 }
0x2829   : > { %5159 = vperm.xlu0 %5936, %v5149_v27  }
0x2831   : > { %5169 = vperm.xlu0 %5936, %v5151_v26  }
0x2836   : > { %5164 = vperm.xlu1 %5937, %v5150_v17  }
0x2839   : > { %5174 = vperm.xlu0 %5936, %v5152_v14  }
0x283e   : > { %5179 = vperm.xlu1 %5937, %v5153_v53  }
0x2841   : > { %5184 = vperm.xlu0 %5936, %v5154_v35  }
0x2846   : > { %5189 = vperm.xlu1 %5937, %v5155_v33  }
0x2849   : > { %5194 = vperm.xlu0 %5936, %v5156_v25  }
0x284e   : > { %5265 = vperm.xlu1 %5937, %v5262_v43  }
0x2851   : > { %5314 = vperm.xlu0 %5936, %v5300_v3  }
0x2856   : > { %5319 = vperm.xlu1 %5937, %v5301_v6  }
0x2859   : > { %5324 = vperm.xlu0 %5936, %v5302_v37  }
0x285e   : > { %5329 = vperm.xlu1 %5937, %v5303_v51   ;;  %v5140_v51 = vld [vmem:[%s8807_s6] sm:$0xf] }
0x2861   : > { %5334 = vperm.xlu0 %5936, %v5304_v9  }
0x2866   : > { %5339 = vperm.xlu1 %5937, %v5305_v8  }
0x2869   : > { %5416 = vperm.xlu0 %5936, %v5412_v1  }
0x286e   : > { %5421 = vperm.xlu1 %5937, %v5413_v52  }
0x287a   : > { %v5010_v5 = vpop.xlane.xlu0 %5009 }
0x287b   : > { %6563 = vrcp.f32 %v5010_v5  ;;  %v6594_v5 = vld [vmem:[%s8806_s5 + $0xb8] sm:$0xff] }
0x2881   : > { %v6564_v20 = vpop.eup %6563 }
0x2882   : > { %v5013_v58 = vpop.xlane.xlu1 %5012  ;;  %v5016_v55 = vmul.f32 %v6564_v20, %v8670_v60 }
0x2883   : > { %6565 = vrcp.f32 %v5013_v58 }
0x2888   : > { %v5091_v49 = vpop.xlane.xlu0 %5090 }
0x2889   : > { %v6566_v54 = vpop.eup %6565  ;;  %6567 = vrcp.f32 %v5091_v49 }
0x288a   : > { %v5017_v4 = vmul.f32 %v6566_v54, %v6558_v40  ;;  %v5250_v40 = vpop.f32.mrf.mxu2 }
0x288c   : > { %v5018_v18 = vpack.c.bf16 %v5017_v4, %v5016_v55 }
0x288e   : > { %v5023_v57 = vsel %vm618_vm2, %v5018_v18, 0 }
0x288f   : > { %5032 = vmatpush.bf16.xpose.msrb.mxu3 %v5023_v57  ;;  %v6568_v10 = vpop.eup %6567 }
0x2890   : > { %v5094_v36 = vpop.xlane.xlu1 %5093  ;;  %v5097_v11 = vmul.f32 %v6568_v10, %v8679_v50 }
0x2891   : > { %6569 = vrcp.f32 %v5094_v36 }
0x2892   : > { %v5253_v62 = vpop.f32.mrf.mxu2 }
0x2896   : > { %5832 = vmatmul.msk.bf16.vlgmr.msrb.gmra.mxu3 %vm618_vm2, %v4959_v13 }
0x2897   : > { %v6570_v48 = vpop.eup %6569 }
0x2898   : > { %v5098_v59 = vmul.f32 %v6570_v48, %v8683_v23 }
0x289a   : > { %v5099_v28 = vpack.c.bf16 %v5098_v59, %v5097_v11  ;;  %v5255_v23 = vpop.f32.mrf.mxu2 }
0x289b   : > { %v5160_v60 = vpop.permute.xlu0 %5159 }
0x289c   : > { %v5104_v21 = vsel %vm618_vm2, %v5099_v28, 0  ;;  %v5239_v6 = vadd.f32 %v5238_v0, %v5160_v60  ;;  %v5310_v60 = vpop.permute.xlu2 %5309 }
0x289d   : > { %5113 = vmatpush.bf16.xpose.msrb.mxu0 %v5104_v21 }
0x28a3   : > { %v5170_v61 = vpop.permute.xlu0 %5169 }
0x28a4   : > { %5834 = vmatmul.msk.bf16.vlgmr.msrb.gmra.mxu0 %vm618_vm2, %v5040_v29  ;;  %v5244_v25 = vadd.f32 %v5243_v30, %v5170_v61  ;;  %v5345_v22 = vpop.permute.xlu2 %5344 }
0x28a8   : > { %v5165_v19 = vpop.permute.xlu1 %5164 }
0x28a9   : > { %v5241_v43 = vadd.f32 %v5240_v46, %v5165_v19  ;;  %v6593_v46 = vld [vmem:[%s8806_s5 + $0xb0] sm:$0xff] }
0x28ab   : > { %v5175_v44 = vpop.permute.xlu0 %5174  ;;  %v5258_v37 = vpack.c.bf16 %v5241_v43, %v5239_v6 }
0x28ac   : > { %v5246_v35 = vadd.f32 %v5245_v16, %v5175_v44  ;;  %v5920_v16 = vld [vmem:[%s8806_s5 + $0xe0] sm:$0xff] }
0x28ae   : > { %v5259_v3 = vpack.c.bf16 %v5246_v35, %v5244_v25 }
0x28b0   : > { %v5180_v50 = vpop.permute.xlu1 %5179 }
0x28b1   : > { %v5249_v53 = vadd.f32 %v5248_v39, %v5180_v50 }
0x28b3   : > { %v5185_v63 = vpop.permute.xlu0 %5184 }
0x28b4   : > { %v5251_v17 = vadd.f32 %v5250_v40, %v5185_v63 }
0x28b6   : > { %v5260_v33 = vpack.c.bf16 %v5251_v17, %v5249_v53  ;;  %v5919_v53 = vld [vmem:[%s8807_s6 + $0x4] sm:$0xff] }
0x28b8   : > { %v5190_v7 = vpop.permute.xlu1 %5189 }
0x28b9   : > { %v5254_v27 = vadd.f32 %v5253_v62, %v5190_v7 }
0x28bb   : > { %v5195_v41 = vpop.permute.xlu0 %5194 }
0x28bc   : > { %v5256_v26 = vadd.f32 %v5255_v23, %v5195_v41 }
0x28be   : > { %v5261_v14 = vpack.c.bf16 %v5256_v26, %v5254_v27 }
0x28c0   : > { %5275 = vmatpush.bf16.msra.mxu0 %v5261_v14  ;;  %v5266_v58 = vpop.permute.xlu1 %5265 }
0x28c3   : > { %v5315_v47 = vpop.permute.xlu0 %5314 }
0x28c4   : > { %5276 = vmatpush.bf16.msra.mxu0 %v5260_v33 }
0x28c8   : > { %5277 = vmatpush.bf16.msra.mxu0 %v5259_v3  ;;  %v5320_v59 = vpop.permute.xlu1 %5319 }
0x28cb   : > { %v5325_v21 = vpop.permute.xlu0 %5324 }
0x28cc   : > { %5278 = vmatpush.bf16.msra.mxu0 %v5258_v37 }
0x28cf   : > { %5857 = vmatmul.msk.bf16.vlgmr.msra.gmra.mxu0 %vm618_vm2, %v5140_v51 }
0x28d0   : > { %v5330_v39 = vpop.permute.xlu1 %5329 }
0x28d3   : > { %v5335_v44 = vpop.permute.xlu0 %5334 }
0x28d8   : > { %v5340_v29 = vpop.permute.xlu1 %5339 }
0x28db   : > { %v5417_v35 = vpop.permute.xlu0 %5416 }
0x28e0   : > { %v5422_v6 = vpop.permute.xlu1 %5421 }
0x2919   : > { %v5034_v9 = vpop.f32.mrf.mxu3 }
0x2921   : > { %v5036_v8 = vpop.f32.mrf.mxu3  ;;  %v5115_v1 = vpop.f32.mrf.mxu0 }
0x2922   : > { %v5120_v52 = vpack.c.bf16 %v5115_v1, %v5034_v9 }
0x2924   : > { %5127 = vmatpush.bf16.msra.mxu3 %v5120_v52 }
0x2928   : > { %5128 = vmatpush.bf16.msra.mxu3 %v5119_v15 }
0x2929   : > { %v5117_v0 = vpop.f32.mrf.mxu0 }
0x292b   : > { %5835 = vmatmul.msk.bf16.vlgmr.msra.gmra.mxu3 %vm743_vm5, %v6593_v46 }
0x293b   : > { %5836 = vmatmul.msk.bf16.gmra.mxu3 %vm743_vm5, %v6594_v5 }
0x294c   : > { %v5280_v20 = vpop.f32.mrf.mxu0 }
0x294d   : > { %v5281_v30 = vadd.f32 %v5280_v20, %v5266_v58 }
0x294f   : > { %vm5284_vm9 = vcmp.ge.f32.partialorder %v5281_v30, 0.0  ;;  %v5285_v32 = vmul.f32 0.01, %v5281_v30 }
0x2951   : > { %v5286_v24 = vsel %vm5284_vm9, %v5281_v30, %v5285_v32 }
0x2952   : > { %5452 = vst.msk [vmem:[%s372_s12] sm:$0xff] %vm618_vm2, %v5286_v24 }
0x2954   : > { %v5282_v15 = vpop.f32.mrf.mxu0 }
0x29ae   : > { %v5130_v54 = vpop.f32.mrf.mxu3 }
0x29af   : > { %v5131_v12 = vadd.f32 %v5130_v54, %v8241_v31 }
0x29b6   : > { %v5132_v55 = vpop.f32.mrf.mxu3 }
0x29b7   : > { %v5133_v57 = vadd.f32 %v5132_v55, %v8239_v42  ;;  %v5923_v42 = vld [vmem:[%s8806_s5 + $0xf8] sm:$0xff] }
0x29b9   : > { %v5297_v36 = vpack.c.bf16 %v5133_v57, %v5131_v12 }
0x29be   : > { %v5135_v4 = vpop.f32.mrf.mxu3 }
0x29bf   : > { %v5136_v18 = vadd.f32 %v5135_v4, %v8230_v56  ;;  %v5921_v56 = vld [vmem:[%s8806_s5 + $0xe8] sm:$0xff] }
0x29c6   : > { %v5137_v49 = vpop.f32.mrf.mxu3 }
0x29c7   : > { %v5138_v45 = vadd.f32 %v5137_v49, %v8227_v2  ;;  %v5922_v2 = vld [vmem:[%s8806_s5 + $0xf0] sm:$0xff] }
0x29c9   : > { %v5298_v34 = vpack.c.bf16 %v5138_v45, %v5136_v18 }
0x29cb   : > { %5385 = vmatpush.bf16.msrb.mxu1 %v5298_v34 }
0x29cf   : > { %5386 = vmatpush.bf16.msrb.mxu1 %v5297_v36 }
0x29d2   : > { %5874 = vmatmul.msk.bf16.vlgmr.msrb.gmra.mxu1 %vm743_vm5, %v5920_v16 }
0x29e2   : > { %5875 = vmatmul.msk.bf16.gmra.mxu1 %vm743_vm5, %v5921_v56 }
0x29f2   : > { %5876 = vmatmul.msk.bf16.gmra.mxu1 %vm743_vm5, %v5922_v2 }
0x2a02   : > { %5877 = vmatmul.msk.bf16.gmra.mxu1 %vm743_vm5, %v5923_v42 }
0x2a4f   : > { %v5388_v31 = vpop.f32.mrf.mxu1 }
0x2a50   : > { %v5389_v17 = vadd.f32 %v5388_v31, %v5310_v60 }
0x2a57   : > { %v5390_v13 = vpop.f32.mrf.mxu1 }
0x2a58   : > { %v5391_v27 = vadd.f32 %v5390_v13, %v5315_v47 }
0x2a5a   : > { %v5408_v14 = vpack.c.bf16 %v5391_v27, %v5389_v17 }
0x2a5f   : > { %v5393_v10 = vpop.f32.mrf.mxu1 }
0x2a60   : > { %v5394_v41 = vadd.f32 %v5393_v10, %v5320_v59 }
0x2a67   : > { %v5395_v48 = vpop.f32.mrf.mxu1 }
0x2a68   : > { %v5396_v7 = vadd.f32 %v5395_v48, %v5325_v21 }
0x2a6a   : > { %v5409_v26 = vpack.c.bf16 %v5396_v7, %v5394_v41 }
0x2a6f   : > { %v5398_v11 = vpop.f32.mrf.mxu1 }
0x2a70   : > { %v5399_v63 = vadd.f32 %v5398_v11, %v5330_v39 }
0x2a77   : > { %v5400_v28 = vpop.f32.mrf.mxu1 }
0x2a78   : > { %v5401_v62 = vadd.f32 %v5400_v28, %v5335_v44 }
0x2a7a   : > { %v5410_v23 = vpack.c.bf16 %v5401_v62, %v5399_v63 }
0x2a7f   : > { %v5403_v38 = vpop.f32.mrf.mxu1 }
0x2a80   : > { %v5404_v40 = vadd.f32 %v5403_v38, %v5340_v29 }
0x2a87   : > { %v5405_v61 = vpop.f32.mrf.mxu1 }
0x2a88   : > { %v5406_v19 = vadd.f32 %v5405_v61, %v5345_v22 }
0x2a8a   : > { %v5411_v50 = vpack.c.bf16 %v5406_v19, %v5404_v40 }
0x2a8c   : > { %5436 = vmatpush.bf16.msrb.mxu0 %v5411_v50 }
0x2a90   : > { %5437 = vmatpush.bf16.msrb.mxu0 %v5410_v23 }
0x2a94   : > { %5438 = vmatpush.bf16.msrb.mxu0 %v5409_v26 }
0x2a98   : > { %5439 = vmatpush.bf16.msrb.mxu0 %v5408_v14 }
0x2a9b   : > { %5882 = vmatmul.msk.bf16.vlgmr.msrb.gmra.mxu0 %vm618_vm2, %v5919_v53 }
0x2b18   : > { %v5441_v33 = vpop.f32.mrf.mxu0 }
0x2b19   : > { %v5442_v25 = vadd.f32 %v5441_v33, %v5417_v35 }
0x2b1b   : > { %vm5446_vm10 = vcmp.ge.f32.partialorder %v5442_v25, 0.0  ;;  %v5448_v43 = vmul.f32 0.01, %v5442_v25 }
0x2b1d   : > { %v5450_v3 = vsel %vm5446_vm10, %v5442_v25, %v5448_v43 }
0x2b1e   : > { %5453 = vst.msk [vmem:[%s377_s26] sm:$0xff] %vm492_vm6, %v5450_v3 }
0x2b20   : > { %v5443_v37 = vpop.f32.mrf.mxu0 }
0x2b21   : > { %v5444_v51 = vadd.f32 %v5443_v37, %v5422_v6 }
0x2b23   : > { %vm5447_vm11 = vcmp.ge.f32.partialorder %v5444_v51, 0.0  ;;  %v5449_v9 = vmul.f32 0.01, %v5444_v51 }
0x2b25   : > { %v5451_v8 = vsel %vm5447_vm11, %v5444_v51, %v5449_v9 }
0x2b26   : > { %5454 = vst.msk [vmem:[%s377_s26 + $0x8] sm:$0xff] %vm492_vm6, %v5451_v8 }
0x2b27 PF: > { %s20_s30 = sadd.s32 1, %s6601_s30  }
0x2b28   : > { %p17_p4 = scmp.ge.s32.totalorder %s20_s30, 4  }
0x2b2a   :  { %19 = sbr.rel (!%p17_p4) target bundleno = 1 (0x1), region = 100 }

</bundles_post_ra>
